<compile_context>
chip_gen: v7x
topology: tpu7x:2x2x1
jax: 0.10.0
libtpu: 0.0.40
codegen_flags: <defaults>
</compile_context>

<pallas_src>
from functools import partial

import numpy as np
import jax
import jax.numpy as jnp
from jax import lax
from jax.experimental import pallas as pl
from jax.experimental.pallas import tpu as pltpu


# ---------------------------------------------------------------------------
# In-kernel helper: KxK conv with reflect padding on a single (H, W, C) image.
# Builds the reflect-padded image and an im2col slab in VMEM scratch, then issues
# ONE MXU dot with contraction dim K*K*C.
# ---------------------------------------------------------------------------
def _conv_reflect_im2col(src, w_ref, b_ref, xp_ref, slab_ref, *, H, W, C, K, relu):
    p = K // 2
    # ---- reflect pad into scratch (every element of xp_ref is overwritten) ----
    xp_ref[p:p + H, p:p + W, :] = src
    for d in range(p):  # rows
        xp_ref[d:d + 1, p:p + W, :] = xp_ref[2 * p - d:2 * p - d + 1, p:p + W, :]
        xp_ref[p + H + d:p + H + d + 1, p:p + W, :] = \
            xp_ref[p + H - 2 - d:p + H - 1 - d, p:p + W, :]
    for d in range(p):  # cols (full rows -> corners handled too, matches ReflectionPad2d)
        xp_ref[:, d:d + 1, :] = xp_ref[:, 2 * p - d:2 * p - d + 1, :]
        xp_ref[:, p + W + d:p + W + d + 1, :] = \
            xp_ref[:, p + W - 2 - d:p + W - 1 - d, :]

    # ---- im2col slab (H*W, K*K*C), then a single MXU dot ----
    for dy in range(K):
        for dx in range(K):
            c0 = (dy * K + dx) * C
            slab_ref[:, c0:c0 + C] = \
                xp_ref[dy:dy + H, dx:dx + W, :].reshape(H * W, C)
    y = jnp.dot(slab_ref[...], w_ref[...], preferred_element_type=jnp.float32)
    y = y + b_ref[...]
    if relu:
        y = jnp.maximum(y, 0.0)
    return y  # (H*W, Cout) float32


# ---------------------------------------------------------------------------
# Fused RCAB kernel: one grid step = one image.
# ---------------------------------------------------------------------------
def _rcab_kernel(x_ref, w1_ref, b1_ref, w2_ref, b2_ref,
                 wc1_ref, bc1_ref, wc2_ref, bc2_ref, band_ref,
                 o_ref, xp_ref, slab_ref, sa_ref,
                 *, H, W, C, K, K_SA):
    x = x_ref[0].astype(jnp.float32)                                  # (H, W, C) residual

    # conv1 + ReLU, then conv2 (scratch buffers reused sequentially)
    y1 = _conv_reflect_im2col(x, w1_ref, b1_ref, xp_ref, slab_ref,
                              H=H, W=W, C=C, K=K, relu=True)
    y2 = _conv_reflect_im2col(y1.reshape(H, W, C), w2_ref, b2_ref, xp_ref, slab_ref,
                              H=H, W=W, C=C, K=K, relu=False)         # (H*W, C)

    # ---- CALayer: global avg pool -> 1x1 squeeze -> ReLU -> 1x1 excite -> sigmoid
    pooled = jnp.mean(y2, axis=0, keepdims=True)                      # (1, C)
    z = jnp.maximum(
        jnp.dot(pooled, wc1_ref[...], preferred_element_type=jnp.float32)
        + bc1_ref[...], 0.0)                                          # (1, Cr)
    s = jax.nn.sigmoid(
        jnp.dot(z, wc2_ref[...], preferred_element_type=jnp.float32)
        + bc2_ref[...])                                               # (1, C)
    y_ca = y2 * s                                                     # (H*W, C)
    y_img = y_ca.reshape(H, W, C)

    # ---- SpatialAttention: channel mean/max -> 7x7 conv on the MXU -> sigmoid gate
    # Zero-padded stats planes are built in VMEM scratch; the 7x7 conv is 14 small
    # matmuls against banded (Toeplitz) weight matrices (one per stats-channel / dy).
    p = K_SA // 2
    sa_ref[...] = jnp.zeros_like(sa_ref)                              # zero padding
    sa_ref[0:1, p:p + H, p:p + W] = jnp.mean(y_img, axis=-1)[None]
    sa_ref[1:2, p:p + H, p:p + W] = jnp.max(y_img, axis=-1)[None]

    acc = jnp.zeros((H, W), jnp.float32)
    for c in range(2):
        plane = sa_ref[c]                                             # (H+K_SA-1, W+K_SA-1)
        for dy in range(K_SA):
            acc = acc + jnp.dot(plane[dy:dy + H, :],
                                band_ref[c * K_SA + dy],
                                preferred_element_type=jnp.float32)
    gate = jax.nn.sigmoid(acc)[:, :, None]                            # (H, W, 1)

    o_ref[...] = (y_img * gate + x)[None].astype(o_ref.dtype)


# ---------------------------------------------------------------------------
# Wrapper glue: banded (Toeplitz) weights for the 7x7 SpatialAttention conv.
# Band[c*K_SA + dy][j, w] = wsa[dy, j - w, c, 0] if 0 <= j - w < K_SA else 0,
# so  out[h, w] = sum_{c,dy}  (pad_c[h+dy, :] @ Band[c*K_SA+dy])[w].
# ---------------------------------------------------------------------------
def _sa_banded_weights(wsa, W):
    K_SA = wsa.shape[0]
    p = K_SA // 2
    Wp2 = W + 2 * p
    j = jnp.arange(Wp2)[:, None]                                      # (Wp2, 1)
    w = jnp.arange(W)[None, :]                                        # (1, W)
    dx = j - w                                                        # (Wp2, W)
    valid = (dx >= 0) & (dx < K_SA)
    taps = jnp.transpose(wsa[..., 0], (2, 0, 1))                      # (2, K_SA, K_SA) [c,dy,dx]
    band = jnp.where(valid[None, None],
                     taps[:, :, jnp.clip(dx, 0, K_SA - 1)], 0.0)      # (2, K_SA, Wp2, W)
    return band.reshape(2 * K_SA, Wp2, W).astype(jnp.float32)


# ---------------------------------------------------------------------------
# Wrapper: NCHW in/out, NHWC internally, single fused pallas_call.
# ---------------------------------------------------------------------------
def rcab_forward_nchw(x_nchw, params):
    x = jnp.transpose(x_nchw, (0, 2, 3, 1))                           # NCHW -> NHWC
    N, H, W, C = x.shape
    K = params["w1"].shape[0]
    K_SA = params["wsa"].shape[0]
    Cr = params["wc1"].shape[-1]
    Wp2 = W + 2 * (K_SA // 2)

    w1 = params["w1"].reshape(K * K * C, C)                           # im2col weight layout
    w2 = params["w2"].reshape(K * K * C, C)
    band = _sa_banded_weights(params["wsa"], W)                       # (2*K_SA, Wp2, W)

    def full(shape):  # grid-invariant, fully-resident VMEM operand
        return pl.BlockSpec(shape, lambda n, _s=shape: (0,) * len(_s))

    kern = partial(_rcab_kernel, H=H, W=W, C=C, K=K, K_SA=K_SA)

    out = pl.pallas_call(
        kern,
        out_shape=jax.ShapeDtypeStruct((N, H, W, C), x.dtype),
        grid=(N,),
        in_specs=[
            pl.BlockSpec((1, H, W, C), lambda n: (n, 0, 0, 0)),       # x (per-image tile)
            full((K * K * C, C)),                                     # conv1 weight
            full((1, C)),                                             # conv1 bias
            full((K * K * C, C)),                                     # conv2 weight
            full((1, C)),                                             # conv2 bias
            full((C, Cr)),                                            # CA squeeze weight
            full((1, Cr)),                                            # CA squeeze bias
            full((Cr, C)),                                            # CA excite weight
            full((1, C)),                                             # CA excite bias
            full((2 * K_SA, Wp2, W)),                                 # SA banded weights
        ],
        out_specs=pl.BlockSpec((1, H, W, C), lambda n: (n, 0, 0, 0)),
        scratch_shapes=[
            pltpu.VMEM((H + K - 1, W + K - 1, C), jnp.float32),           # reflect-padded img
            pltpu.VMEM((H * W, K * K * C), jnp.float32),                  # im2col slab
            pltpu.VMEM((2, H + K_SA - 1, W + K_SA - 1), jnp.float32),     # zero-padded SA stats
        ],
        compiler_params=pltpu.CompilerParams(
            dimension_semantics=("parallel",),                        # megacore on v7x
            vmem_limit_bytes=32 * 1024 * 1024),
    )(x,
      w1, params["b1"].reshape(1, C),
      w2, params["b2"].reshape(1, C),
      params["wc1"], params["bc1"].reshape(1, Cr),
      params["wc2"], params["bc2"].reshape(1, C),
      band)
    return jnp.transpose(out, (0, 3, 1, 2))                           # NHWC -> NCHW


# ---------------------------------------------------------------------------
# Pure-JAX reference (same math, lax.conv) for verification.
# ---------------------------------------------------------------------------
def _conv_ref(x, w, b, pad, mode):
    xp = jnp.pad(x, ((0, 0), (pad, pad), (pad, pad), (0, 0)), mode=mode)
    y = lax.conv_general_dilated(xp, w, (1, 1), "VALID",
                                 dimension_numbers=("NHWC", "HWIO", "NHWC"))
    return y + b.reshape(1, 1, 1, -1)


def rcab_ref_nchw(x_nchw, params):
    x = jnp.transpose(x_nchw, (0, 2, 3, 1))
    res = x
    o = jnp.maximum(_conv_ref(x, params["w1"], params["b1"], 1, "reflect"), 0.0)
    o = _conv_ref(o, params["w2"], params["b2"], 1, "reflect")
    pooled = jnp.mean(o, axis=(1, 2))
    z = jnp.maximum(pooled @ params["wc1"] + params["bc1"], 0.0)
    s = jax.nn.sigmoid(z @ params["wc2"] + params["bc2"])
    o = o * s[:, None, None, :]
    stats = jnp.concatenate([jnp.mean(o, axis=-1, keepdims=True),
                             jnp.max(o, axis=-1, keepdims=True)], axis=-1)
    sa = _conv_ref(stats, params["wsa"], jnp.zeros((1,), o.dtype), 3, "constant")
    o = o * jax.nn.sigmoid(sa) + res
    return jnp.transpose(o, (0, 3, 1, 2))


if __name__ == "__main__":
    # Small shapes: batch=2, channels=16 (so channels//16 >= 1), spatial=16, k=3.
    N, C, H, W = 2, 16, 16, 16
    K, K_SA = 3, 7
    Cr = max(C // 16, 1)  # CALayer(out_feat, reduction=16)

    key = jax.random.PRNGKey(0)
    ks = jax.random.split(key, 10)
    sc = lambda fan_in: 1.0 / np.sqrt(fan_in)
    params = {
        "w1":  jax.random.normal(ks[0], (K, K, C, C), jnp.float32) * sc(K * K * C),
        "b1":  jax.random.normal(ks[1], (C,), jnp.float32) * 0.1,
        "w2":  jax.random.normal(ks[2], (K, K, C, C), jnp.float32) * sc(K * K * C),
        "b2":  jax.random.normal(ks[3], (C,), jnp.float32) * 0.1,
        "wc1": jax.random.normal(ks[4], (C, Cr), jnp.float32) * sc(C),
        "bc1": jax.random.normal(ks[5], (Cr,), jnp.float32) * 0.1,
        "wc2": jax.random.normal(ks[6], (Cr, C), jnp.float32) * sc(max(Cr, 1)),
        "bc2": jax.random.normal(ks[7], (C,), jnp.float32) * 0.1,
        "wsa": jax.random.normal(ks[8], (K_SA, K_SA, 2, 1), jnp.float32) * sc(K_SA * K_SA * 2),
    }
    x = jax.random.normal(ks[9], (N, C, H, W), jnp.float32)

    out = jax.block_until_ready(rcab_forward_nchw(x, params))
    ref = jax.block_until_ready(rcab_ref_nchw(x, params))
    np.testing.assert_allclose(np.asarray(out), np.asarray(ref), rtol=2e-4, atol=2e-4)
    assert out.shape == (N, C, H, W)
    print("KERNEL_OK")
</pallas_src>

<mosaic_0001>
module attributes {stable_mosaic.version = 11 : i64} {
  func.func @_rcab_kernel(%arg0: i32, %arg1: memref<1x16x16x16xf32, #tpu.memory_space<vmem>>, %arg2: memref<144x16xf32, #tpu.memory_space<vmem>>, %arg3: memref<1x16xf32, #tpu.memory_space<vmem>>, %arg4: memref<144x16xf32, #tpu.memory_space<vmem>>, %arg5: memref<1x16xf32, #tpu.memory_space<vmem>>, %arg6: memref<16x1xf32, #tpu.memory_space<vmem>>, %arg7: memref<1x1xf32, #tpu.memory_space<vmem>>, %arg8: memref<1x16xf32, #tpu.memory_space<vmem>>, %arg9: memref<1x16xf32, #tpu.memory_space<vmem>>, %arg10: memref<14x22x16xf32, #tpu.memory_space<vmem>>, %arg11: memref<1x16x16x16xf32, #tpu.memory_space<vmem>>, %arg12: memref<18x18x16xf32, #tpu.memory_space<vmem>>, %arg13: memref<256x144xf32, #tpu.memory_space<vmem>>, %arg14: memref<2x22x22xf32, #tpu.memory_space<vmem>>) attributes {dimension_semantics = [#tpu.dimension_semantics<parallel>], iteration_bounds = array<i64: 2>, scalar_prefetch = 0 : i64, scratch_operands = 3 : i64, tpu.core_type = #tpu.core_type<tc>, window_params = [{transform_indices = @transform_0, window_bounds = array<i64: 1, 16, 16, 16>}, {pipeline_mode = #tpu.pipeline_mode<synchronous>, transform_indices = @transform_1, window_bounds = array<i64: 144, 16>}, {pipeline_mode = #tpu.pipeline_mode<synchronous>, transform_indices = @transform_2, window_bounds = array<i64: 1, 16>}, {pipeline_mode = #tpu.pipeline_mode<synchronous>, transform_indices = @transform_3, window_bounds = array<i64: 144, 16>}, {pipeline_mode = #tpu.pipeline_mode<synchronous>, transform_indices = @transform_4, window_bounds = array<i64: 1, 16>}, {pipeline_mode = #tpu.pipeline_mode<synchronous>, transform_indices = @transform_5, window_bounds = array<i64: 16, 1>}, {pipeline_mode = #tpu.pipeline_mode<synchronous>, transform_indices = @transform_6, window_bounds = array<i64: 1, 1>}, {pipeline_mode = #tpu.pipeline_mode<synchronous>, transform_indices = @transform_7, window_bounds = array<i64: 1, 16>}, {pipeline_mode = #tpu.pipeline_mode<synchronous>, transform_indices = @transform_8, window_bounds = array<i64: 1, 16>}, {pipeline_mode = #tpu.pipeline_mode<synchronous>, transform_indices = @transform_9, window_bounds = array<i64: 14, 22, 16>}, {transform_indices = @transform_10, window_bounds = array<i64: 1, 16, 16, 16>}]} {
    %c0 = arith.constant 0 : index
    %c0_0 = arith.constant 0 : index
    %c0_1 = arith.constant 0 : index
    %c0_2 = arith.constant 0 : index
    %0 = vector.load %arg1[%c0, %c0_0, %c0_1, %c0_2] : memref<1x16x16x16xf32, #tpu.memory_space<vmem>>, vector<1x16x16x16xf32>
    %1 = vector.shape_cast %0 : vector<1x16x16x16xf32> to vector<16x16x16xf32>
    %c1 = arith.constant 1 : index
    %c1_3 = arith.constant 1 : index
    %c0_4 = arith.constant 0 : index
    %2 = vector.load %arg12[%c1, %c1_3, %c0_4] : memref<18x18x16xf32, #tpu.memory_space<vmem>>, vector<16x16x16xf32>
    tpu.vector_store %arg12[%c1, %c1_3, %c0_4], %1 {strides = array<i32>} : memref<18x18x16xf32, #tpu.memory_space<vmem>>, vector<16x16x16xf32>,
    %c2 = arith.constant 2 : index
    %c1_5 = arith.constant 1 : index
    %c0_6 = arith.constant 0 : index
    %3 = vector.load %arg12[%c2, %c1_5, %c0_6] : memref<18x18x16xf32, #tpu.memory_space<vmem>>, vector<1x16x16xf32>
    %c0_7 = arith.constant 0 : index
    %c1_8 = arith.constant 1 : index
    %c0_9 = arith.constant 0 : index
    %4 = vector.load %arg12[%c0_7, %c1_8, %c0_9] : memref<18x18x16xf32, #tpu.memory_space<vmem>>, vector<1x16x16xf32>
    tpu.vector_store %arg12[%c0_7, %c1_8, %c0_9], %3 {strides = array<i32>} : memref<18x18x16xf32, #tpu.memory_space<vmem>>, vector<1x16x16xf32>,
    %c15 = arith.constant 15 : index
    %c1_10 = arith.constant 1 : index
    %c0_11 = arith.constant 0 : index
    %5 = vector.load %arg12[%c15, %c1_10, %c0_11] : memref<18x18x16xf32, #tpu.memory_space<vmem>>, vector<1x16x16xf32>
    %c17 = arith.constant 17 : index
    %c1_12 = arith.constant 1 : index
    %c0_13 = arith.constant 0 : index
    %6 = vector.load %arg12[%c17, %c1_12, %c0_13] : memref<18x18x16xf32, #tpu.memory_space<vmem>>, vector<1x16x16xf32>
    tpu.vector_store %arg12[%c17, %c1_12, %c0_13], %5 {strides = array<i32>} : memref<18x18x16xf32, #tpu.memory_space<vmem>>, vector<1x16x16xf32>,
    %c0_14 = arith.constant 0 : index
    %c2_15 = arith.constant 2 : index
    %c0_16 = arith.constant 0 : index
    %7 = vector.load %arg12[%c0_14, %c2_15, %c0_16] : memref<18x18x16xf32, #tpu.memory_space<vmem>>, vector<18x1x16xf32>
    %c0_17 = arith.constant 0 : index
    %c0_18 = arith.constant 0 : index
    %c0_19 = arith.constant 0 : index
    %8 = vector.load %arg12[%c0_17, %c0_18, %c0_19] : memref<18x18x16xf32, #tpu.memory_space<vmem>>, vector<18x1x16xf32>
    tpu.vector_store %arg12[%c0_17, %c0_18, %c0_19], %7 {strides = array<i32>} : memref<18x18x16xf32, #tpu.memory_space<vmem>>, vector<18x1x16xf32>,
    %c0_20 = arith.constant 0 : index
    %c15_21 = arith.constant 15 : index
    %c0_22 = arith.constant 0 : index
    %9 = vector.load %arg12[%c0_20, %c15_21, %c0_22] : memref<18x18x16xf32, #tpu.memory_space<vmem>>, vector<18x1x16xf32>
    %c0_23 = arith.constant 0 : index
    %c17_24 = arith.constant 17 : index
    %c0_25 = arith.constant 0 : index
    %10 = vector.load %arg12[%c0_23, %c17_24, %c0_25] : memref<18x18x16xf32, #tpu.memory_space<vmem>>, vector<18x1x16xf32>
    tpu.vector_store %arg12[%c0_23, %c17_24, %c0_25], %9 {strides = array<i32>} : memref<18x18x16xf32, #tpu.memory_space<vmem>>, vector<18x1x16xf32>,
    %c0_26 = arith.constant 0 : index
    %c0_27 = arith.constant 0 : index
    %c0_28 = arith.constant 0 : index
    %11 = vector.load %arg12[%c0_26, %c0_27, %c0_28] : memref<18x18x16xf32, #tpu.memory_space<vmem>>, vector<16x16x16xf32>
    %12 = vector.shape_cast %11 : vector<16x16x16xf32> to vector<256x16xf32>
    %c0_29 = arith.constant 0 : index
    %c0_30 = arith.constant 0 : index
    %13 = vector.load %arg13[%c0_29, %c0_30] : memref<256x144xf32, #tpu.memory_space<vmem>>, vector<256x16xf32>
    tpu.vector_store %arg13[%c0_29, %c0_30], %12 {strides = array<i32>} : memref<256x144xf32, #tpu.memory_space<vmem>>, vector<256x16xf32>,
    %c0_31 = arith.constant 0 : index
    %c1_32 = arith.constant 1 : index
    %c0_33 = arith.constant 0 : index
    %14 = vector.load %arg12[%c0_31, %c1_32, %c0_33] : memref<18x18x16xf32, #tpu.memory_space<vmem>>, vector<16x16x16xf32>
    %15 = vector.shape_cast %14 : vector<16x16x16xf32> to vector<256x16xf32>
    %c0_34 = arith.constant 0 : index
    %c16 = arith.constant 16 : index
    %16 = vector.load %arg13[%c0_34, %c16] : memref<256x144xf32, #tpu.memory_space<vmem>>, vector<256x16xf32>
    tpu.vector_store %arg13[%c0_34, %c16], %15 {strides = array<i32>} : memref<256x144xf32, #tpu.memory_space<vmem>>, vector<256x16xf32>,
    %c0_35 = arith.constant 0 : index
    %c2_36 = arith.constant 2 : index
    %c0_37 = arith.constant 0 : index
    %17 = vector.load %arg12[%c0_35, %c2_36, %c0_37] : memref<18x18x16xf32, #tpu.memory_space<vmem>>, vector<16x16x16xf32>
    %18 = vector.shape_cast %17 : vector<16x16x16xf32> to vector<256x16xf32>
    %c0_38 = arith.constant 0 : index
    %c32 = arith.constant 32 : index
    %19 = vector.load %arg13[%c0_38, %c32] : memref<256x144xf32, #tpu.memory_space<vmem>>, vector<256x16xf32>
    tpu.vector_store %arg13[%c0_38, %c32], %18 {strides = array<i32>} : memref<256x144xf32, #tpu.memory_space<vmem>>, vector<256x16xf32>,
    %c1_39 = arith.constant 1 : index
    %c0_40 = arith.constant 0 : index
    %c0_41 = arith.constant 0 : index
    %20 = vector.load %arg12[%c1_39, %c0_40, %c0_41] : memref<18x18x16xf32, #tpu.memory_space<vmem>>, vector<16x16x16xf32>
    %21 = vector.shape_cast %20 : vector<16x16x16xf32> to vector<256x16xf32>
    %c0_42 = arith.constant 0 : index
    %c48 = arith.constant 48 : index
    %22 = vector.load %arg13[%c0_42, %c48] : memref<256x144xf32, #tpu.memory_space<vmem>>, vector<256x16xf32>
    tpu.vector_store %arg13[%c0_42, %c48], %21 {strides = array<i32>} : memref<256x144xf32, #tpu.memory_space<vmem>>, vector<256x16xf32>,
    %c1_43 = arith.constant 1 : index
    %c1_44 = arith.constant 1 : index
    %c0_45 = arith.constant 0 : index
    %23 = vector.load %arg12[%c1_43, %c1_44, %c0_45] : memref<18x18x16xf32, #tpu.memory_space<vmem>>, vector<16x16x16xf32>
    %24 = vector.shape_cast %23 : vector<16x16x16xf32> to vector<256x16xf32>
    %c0_46 = arith.constant 0 : index
    %c64 = arith.constant 64 : index
    %25 = vector.load %arg13[%c0_46, %c64] : memref<256x144xf32, #tpu.memory_space<vmem>>, vector<256x16xf32>
    tpu.vector_store %arg13[%c0_46, %c64], %24 {strides = array<i32>} : memref<256x144xf32, #tpu.memory_space<vmem>>, vector<256x16xf32>,
    %c1_47 = arith.constant 1 : index
    %c2_48 = arith.constant 2 : index
    %c0_49 = arith.constant 0 : index
    %26 = vector.load %arg12[%c1_47, %c2_48, %c0_49] : memref<18x18x16xf32, #tpu.memory_space<vmem>>, vector<16x16x16xf32>
    %27 = vector.shape_cast %26 : vector<16x16x16xf32> to vector<256x16xf32>
    %c0_50 = arith.constant 0 : index
    %c80 = arith.constant 80 : index
    %28 = vector.load %arg13[%c0_50, %c80] : memref<256x144xf32, #tpu.memory_space<vmem>>, vector<256x16xf32>
    tpu.vector_store %arg13[%c0_50, %c80], %27 {strides = array<i32>} : memref<256x144xf32, #tpu.memory_space<vmem>>, vector<256x16xf32>,
    %c2_51 = arith.constant 2 : index
    %c0_52 = arith.constant 0 : index
    %c0_53 = arith.constant 0 : index
    %29 = vector.load %arg12[%c2_51, %c0_52, %c0_53] : memref<18x18x16xf32, #tpu.memory_space<vmem>>, vector<16x16x16xf32>
    %30 = vector.shape_cast %29 : vector<16x16x16xf32> to vector<256x16xf32>
    %c0_54 = arith.constant 0 : index
    %c96 = arith.constant 96 : index
    %31 = vector.load %arg13[%c0_54, %c96] : memref<256x144xf32, #tpu.memory_space<vmem>>, vector<256x16xf32>
    tpu.vector_store %arg13[%c0_54, %c96], %30 {strides = array<i32>} : memref<256x144xf32, #tpu.memory_space<vmem>>, vector<256x16xf32>,
    %c2_55 = arith.constant 2 : index
    %c1_56 = arith.constant 1 : index
    %c0_57 = arith.constant 0 : index
    %32 = vector.load %arg12[%c2_55, %c1_56, %c0_57] : memref<18x18x16xf32, #tpu.memory_space<vmem>>, vector<16x16x16xf32>
    %33 = vector.shape_cast %32 : vector<16x16x16xf32> to vector<256x16xf32>
    %c0_58 = arith.constant 0 : index
    %c112 = arith.constant 112 : index
    %34 = vector.load %arg13[%c0_58, %c112] : memref<256x144xf32, #tpu.memory_space<vmem>>, vector<256x16xf32>
    tpu.vector_store %arg13[%c0_58, %c112], %33 {strides = array<i32>} : memref<256x144xf32, #tpu.memory_space<vmem>>, vector<256x16xf32>,
    %c2_59 = arith.constant 2 : index
    %c2_60 = arith.constant 2 : index
    %c0_61 = arith.constant 0 : index
    %35 = vector.load %arg12[%c2_59, %c2_60, %c0_61] : memref<18x18x16xf32, #tpu.memory_space<vmem>>, vector<16x16x16xf32>
    %36 = vector.shape_cast %35 : vector<16x16x16xf32> to vector<256x16xf32>
    %c0_62 = arith.constant 0 : index
    %c128 = arith.constant 128 : index
    %37 = vector.load %arg13[%c0_62, %c128] : memref<256x144xf32, #tpu.memory_space<vmem>>, vector<256x16xf32>
    tpu.vector_store %arg13[%c0_62, %c128], %36 {strides = array<i32>} : memref<256x144xf32, #tpu.memory_space<vmem>>, vector<256x16xf32>,
    %c0_63 = arith.constant 0 : index
    %c0_64 = arith.constant 0 : index
    %38 = vector.load %arg13[%c0_63, %c0_64] : memref<256x144xf32, #tpu.memory_space<vmem>>, vector<256x144xf32>
    %c0_65 = arith.constant 0 : index
    %c0_66 = arith.constant 0 : index
    %39 = vector.load %arg2[%c0_65, %c0_66] : memref<144x16xf32, #tpu.memory_space<vmem>>, vector<144x16xf32>
    %cst = arith.constant dense<0.000000e+00> : vector<256x16xf32>
    %40 = tpu.matmul %38, %39, %cst {dimension_numbers = #tpu.dot_dimension_numbers<[1], [0], [0], [1], [0, 0, 1, 1], [], []>} : vector<256x144xf32>, vector<144x16xf32>, vector<256x16xf32> -> vector<256x16xf32>
    %c0_67 = arith.constant 0 : index
    %c0_68 = arith.constant 0 : index
    %41 = vector.load %arg3[%c0_67, %c0_68] : memref<1x16xf32, #tpu.memory_space<vmem>>, vector<1x16xf32>
    %42 = vector.broadcast %41 : vector<1x16xf32> to vector<256x16xf32>
    %43 = arith.addf %40, %42 : vector<256x16xf32>
    %cst_69 = arith.constant 0.000000e+00 : f32
    %44 = vector.broadcast %cst_69 : f32 to vector<256x16xf32>
    %45 = arith.maximumf %43, %44 : vector<256x16xf32>
    %46 = vector.shape_cast %45 : vector<256x16xf32> to vector<16x16x16xf32>
    %c1_70 = arith.constant 1 : index
    %c1_71 = arith.constant 1 : index
    %c0_72 = arith.constant 0 : index
    %47 = vector.load %arg12[%c1_70, %c1_71, %c0_72] : memref<18x18x16xf32, #tpu.memory_space<vmem>>, vector<16x16x16xf32>
    tpu.vector_store %arg12[%c1_70, %c1_71, %c0_72], %46 {strides = array<i32>} : memref<18x18x16xf32, #tpu.memory_space<vmem>>, vector<16x16x16xf32>,
    %c2_73 = arith.constant 2 : index
    %c1_74 = arith.constant 1 : index
    %c0_75 = arith.constant 0 : index
    %48 = vector.load %arg12[%c2_73, %c1_74, %c0_75] : memref<18x18x16xf32, #tpu.memory_space<vmem>>, vector<1x16x16xf32>
    %c0_76 = arith.constant 0 : index
    %c1_77 = arith.constant 1 : index
    %c0_78 = arith.constant 0 : index
    %49 = vector.load %arg12[%c0_76, %c1_77, %c0_78] : memref<18x18x16xf32, #tpu.memory_space<vmem>>, vector<1x16x16xf32>
    tpu.vector_store %arg12[%c0_76, %c1_77, %c0_78], %48 {strides = array<i32>} : memref<18x18x16xf32, #tpu.memory_space<vmem>>, vector<1x16x16xf32>,
    %c15_79 = arith.constant 15 : index
    %c1_80 = arith.constant 1 : index
    %c0_81 = arith.constant 0 : index
    %50 = vector.load %arg12[%c15_79, %c1_80, %c0_81] : memref<18x18x16xf32, #tpu.memory_space<vmem>>, vector<1x16x16xf32>
    %c17_82 = arith.constant 17 : index
    %c1_83 = arith.constant 1 : index
    %c0_84 = arith.constant 0 : index
    %51 = vector.load %arg12[%c17_82, %c1_83, %c0_84] : memref<18x18x16xf32, #tpu.memory_space<vmem>>, vector<1x16x16xf32>
    tpu.vector_store %arg12[%c17_82, %c1_83, %c0_84], %50 {strides = array<i32>} : memref<18x18x16xf32, #tpu.memory_space<vmem>>, vector<1x16x16xf32>,
    %c0_85 = arith.constant 0 : index
    %c2_86 = arith.constant 2 : index
    %c0_87 = arith.constant 0 : index
    %52 = vector.load %arg12[%c0_85, %c2_86, %c0_87] : memref<18x18x16xf32, #tpu.memory_space<vmem>>, vector<18x1x16xf32>
    %c0_88 = arith.constant 0 : index
    %c0_89 = arith.constant 0 : index
    %c0_90 = arith.constant 0 : index
    %53 = vector.load %arg12[%c0_88, %c0_89, %c0_90] : memref<18x18x16xf32, #tpu.memory_space<vmem>>, vector<18x1x16xf32>
    tpu.vector_store %arg12[%c0_88, %c0_89, %c0_90], %52 {strides = array<i32>} : memref<18x18x16xf32, #tpu.memory_space<vmem>>, vector<18x1x16xf32>,
    %c0_91 = arith.constant 0 : index
    %c15_92 = arith.constant 15 : index
    %c0_93 = arith.constant 0 : index
    %54 = vector.load %arg12[%c0_91, %c15_92, %c0_93] : memref<18x18x16xf32, #tpu.memory_space<vmem>>, vector<18x1x16xf32>
    %c0_94 = arith.constant 0 : index
    %c17_95 = arith.constant 17 : index
    %c0_96 = arith.constant 0 : index
    %55 = vector.load %arg12[%c0_94, %c17_95, %c0_96] : memref<18x18x16xf32, #tpu.memory_space<vmem>>, vector<18x1x16xf32>
    tpu.vector_store %arg12[%c0_94, %c17_95, %c0_96], %54 {strides = array<i32>} : memref<18x18x16xf32, #tpu.memory_space<vmem>>, vector<18x1x16xf32>,
    %c0_97 = arith.constant 0 : index
    %c0_98 = arith.constant 0 : index
    %c0_99 = arith.constant 0 : index
    %56 = vector.load %arg12[%c0_97, %c0_98, %c0_99] : memref<18x18x16xf32, #tpu.memory_space<vmem>>, vector<16x16x16xf32>
    %57 = vector.shape_cast %56 : vector<16x16x16xf32> to vector<256x16xf32>
    %c0_100 = arith.constant 0 : index
    %c0_101 = arith.constant 0 : index
    %58 = vector.load %arg13[%c0_100, %c0_101] : memref<256x144xf32, #tpu.memory_space<vmem>>, vector<256x16xf32>
    tpu.vector_store %arg13[%c0_100, %c0_101], %57 {strides = array<i32>} : memref<256x144xf32, #tpu.memory_space<vmem>>, vector<256x16xf32>,
    %c0_102 = arith.constant 0 : index
    %c1_103 = arith.constant 1 : index
    %c0_104 = arith.constant 0 : index
    %59 = vector.load %arg12[%c0_102, %c1_103, %c0_104] : memref<18x18x16xf32, #tpu.memory_space<vmem>>, vector<16x16x16xf32>
    %60 = vector.shape_cast %59 : vector<16x16x16xf32> to vector<256x16xf32>
    %c0_105 = arith.constant 0 : index
    %c16_106 = arith.constant 16 : index
    %61 = vector.load %arg13[%c0_105, %c16_106] : memref<256x144xf32, #tpu.memory_space<vmem>>, vector<256x16xf32>
    tpu.vector_store %arg13[%c0_105, %c16_106], %60 {strides = array<i32>} : memref<256x144xf32, #tpu.memory_space<vmem>>, vector<256x16xf32>,
    %c0_107 = arith.constant 0 : index
    %c2_108 = arith.constant 2 : index
    %c0_109 = arith.constant 0 : index
    %62 = vector.load %arg12[%c0_107, %c2_108, %c0_109] : memref<18x18x16xf32, #tpu.memory_space<vmem>>, vector<16x16x16xf32>
    %63 = vector.shape_cast %62 : vector<16x16x16xf32> to vector<256x16xf32>
    %c0_110 = arith.constant 0 : index
    %c32_111 = arith.constant 32 : index
    %64 = vector.load %arg13[%c0_110, %c32_111] : memref<256x144xf32, #tpu.memory_space<vmem>>, vector<256x16xf32>
    tpu.vector_store %arg13[%c0_110, %c32_111], %63 {strides = array<i32>} : memref<256x144xf32, #tpu.memory_space<vmem>>, vector<256x16xf32>,
    %c1_112 = arith.constant 1 : index
    %c0_113 = arith.constant 0 : index
    %c0_114 = arith.constant 0 : index
    %65 = vector.load %arg12[%c1_112, %c0_113, %c0_114] : memref<18x18x16xf32, #tpu.memory_space<vmem>>, vector<16x16x16xf32>
    %66 = vector.shape_cast %65 : vector<16x16x16xf32> to vector<256x16xf32>
    %c0_115 = arith.constant 0 : index
    %c48_116 = arith.constant 48 : index
    %67 = vector.load %arg13[%c0_115, %c48_116] : memref<256x144xf32, #tpu.memory_space<vmem>>, vector<256x16xf32>
    tpu.vector_store %arg13[%c0_115, %c48_116], %66 {strides = array<i32>} : memref<256x144xf32, #tpu.memory_space<vmem>>, vector<256x16xf32>,
    %c1_117 = arith.constant 1 : index
    %c1_118 = arith.constant 1 : index
    %c0_119 = arith.constant 0 : index
    %68 = vector.load %arg12[%c1_117, %c1_118, %c0_119] : memref<18x18x16xf32, #tpu.memory_space<vmem>>, vector<16x16x16xf32>
    %69 = vector.shape_cast %68 : vector<16x16x16xf32> to vector<256x16xf32>
    %c0_120 = arith.constant 0 : index
    %c64_121 = arith.constant 64 : index
    %70 = vector.load %arg13[%c0_120, %c64_121] : memref<256x144xf32, #tpu.memory_space<vmem>>, vector<256x16xf32>
    tpu.vector_store %arg13[%c0_120, %c64_121], %69 {strides = array<i32>} : memref<256x144xf32, #tpu.memory_space<vmem>>, vector<256x16xf32>,
    %c1_122 = arith.constant 1 : index
    %c2_123 = arith.constant 2 : index
    %c0_124 = arith.constant 0 : index
    %71 = vector.load %arg12[%c1_122, %c2_123, %c0_124] : memref<18x18x16xf32, #tpu.memory_space<vmem>>, vector<16x16x16xf32>
    %72 = vector.shape_cast %71 : vector<16x16x16xf32> to vector<256x16xf32>
    %c0_125 = arith.constant 0 : index
    %c80_126 = arith.constant 80 : index
    %73 = vector.load %arg13[%c0_125, %c80_126] : memref<256x144xf32, #tpu.memory_space<vmem>>, vector<256x16xf32>
    tpu.vector_store %arg13[%c0_125, %c80_126], %72 {strides = array<i32>} : memref<256x144xf32, #tpu.memory_space<vmem>>, vector<256x16xf32>,
    %c2_127 = arith.constant 2 : index
    %c0_128 = arith.constant 0 : index
    %c0_129 = arith.constant 0 : index
    %74 = vector.load %arg12[%c2_127, %c0_128, %c0_129] : memref<18x18x16xf32, #tpu.memory_space<vmem>>, vector<16x16x16xf32>
    %75 = vector.shape_cast %74 : vector<16x16x16xf32> to vector<256x16xf32>
    %c0_130 = arith.constant 0 : index
    %c96_131 = arith.constant 96 : index
    %76 = vector.load %arg13[%c0_130, %c96_131] : memref<256x144xf32, #tpu.memory_space<vmem>>, vector<256x16xf32>
    tpu.vector_store %arg13[%c0_130, %c96_131], %75 {strides = array<i32>} : memref<256x144xf32, #tpu.memory_space<vmem>>, vector<256x16xf32>,
    %c2_132 = arith.constant 2 : index
    %c1_133 = arith.constant 1 : index
    %c0_134 = arith.constant 0 : index
    %77 = vector.load %arg12[%c2_132, %c1_133, %c0_134] : memref<18x18x16xf32, #tpu.memory_space<vmem>>, vector<16x16x16xf32>
    %78 = vector.shape_cast %77 : vector<16x16x16xf32> to vector<256x16xf32>
    %c0_135 = arith.constant 0 : index
    %c112_136 = arith.constant 112 : index
    %79 = vector.load %arg13[%c0_135, %c112_136] : memref<256x144xf32, #tpu.memory_space<vmem>>, vector<256x16xf32>
    tpu.vector_store %arg13[%c0_135, %c112_136], %78 {strides = array<i32>} : memref<256x144xf32, #tpu.memory_space<vmem>>, vector<256x16xf32>,
    %c2_137 = arith.constant 2 : index
    %c2_138 = arith.constant 2 : index
    %c0_139 = arith.constant 0 : index
    %80 = vector.load %arg12[%c2_137, %c2_138, %c0_139] : memref<18x18x16xf32, #tpu.memory_space<vmem>>, vector<16x16x16xf32>
    %81 = vector.shape_cast %80 : vector<16x16x16xf32> to vector<256x16xf32>
    %c0_140 = arith.constant 0 : index
    %c128_141 = arith.constant 128 : index
    %82 = vector.load %arg13[%c0_140, %c128_141] : memref<256x144xf32, #tpu.memory_space<vmem>>, vector<256x16xf32>
    tpu.vector_store %arg13[%c0_140, %c128_141], %81 {strides = array<i32>} : memref<256x144xf32, #tpu.memory_space<vmem>>, vector<256x16xf32>,
    %c0_142 = arith.constant 0 : index
    %c0_143 = arith.constant 0 : index
    %83 = vector.load %arg13[%c0_142, %c0_143] : memref<256x144xf32, #tpu.memory_space<vmem>>, vector<256x144xf32>
    %c0_144 = arith.constant 0 : index
    %c0_145 = arith.constant 0 : index
    %84 = vector.load %arg4[%c0_144, %c0_145] : memref<144x16xf32, #tpu.memory_space<vmem>>, vector<144x16xf32>
    %cst_146 = arith.constant dense<0.000000e+00> : vector<256x16xf32>
    %85 = tpu.matmul %83, %84, %cst_146 {dimension_numbers = #tpu.dot_dimension_numbers<[1], [0], [0], [1], [0, 0, 1, 1], [], []>} : vector<256x144xf32>, vector<144x16xf32>, vector<256x16xf32> -> vector<256x16xf32>
    %c0_147 = arith.constant 0 : index
    %c0_148 = arith.constant 0 : index
    %86 = vector.load %arg5[%c0_147, %c0_148] : memref<1x16xf32, #tpu.memory_space<vmem>>, vector<1x16xf32>
    %87 = vector.broadcast %86 : vector<1x16xf32> to vector<256x16xf32>
    %88 = arith.addf %85, %87 : vector<256x16xf32>
    %cst_149 = arith.constant dense<0.000000e+00> : vector<16xf32>
    %89 = vector.multi_reduction <add>, %88, %cst_149 [0] : vector<256x16xf32> to vector<16xf32>
    %90 = vector.shape_cast %89 : vector<16xf32> to vector<1x16xf32>
    %cst_150 = arith.constant 2.560000e+02 : f32
    %91 = vector.broadcast %cst_150 : f32 to vector<1x16xf32>
    %92 = arith.divf %90, %91 : vector<1x16xf32>
    %c0_151 = arith.constant 0 : index
    %c0_152 = arith.constant 0 : index
    %93 = vector.load %arg6[%c0_151, %c0_152] : memref<16x1xf32, #tpu.memory_space<vmem>>, vector<16x1xf32>
    %cst_153 = arith.constant dense<0.000000e+00> : vector<1x1xf32>
    %94 = tpu.matmul %92, %93, %cst_153 {dimension_numbers = #tpu.dot_dimension_numbers<[1], [0], [0], [1], [0, 0, 1, 1], [], []>} : vector<1x16xf32>, vector<16x1xf32>, vector<1x1xf32> -> vector<1x1xf32>
    %c0_154 = arith.constant 0 : index
    %c0_155 = arith.constant 0 : index
    %95 = vector.load %arg7[%c0_154, %c0_155] : memref<1x1xf32, #tpu.memory_space<vmem>>, vector<1x1xf32>
    %96 = arith.addf %94, %95 : vector<1x1xf32>
    %cst_156 = arith.constant 0.000000e+00 : f32
    %97 = vector.broadcast %cst_156 : f32 to vector<1x1xf32>
    %98 = arith.maximumf %96, %97 : vector<1x1xf32>
    %c0_157 = arith.constant 0 : index
    %c0_158 = arith.constant 0 : index
    %99 = vector.load %arg8[%c0_157, %c0_158] : memref<1x16xf32, #tpu.memory_space<vmem>>, vector<1x16xf32>
    %cst_159 = arith.constant dense<0.000000e+00> : vector<1x16xf32>
    %100 = tpu.matmul %98, %99, %cst_159 {dimension_numbers = #tpu.dot_dimension_numbers<[1], [0], [0], [1], [0, 0, 1, 1], [], []>} : vector<1x1xf32>, vector<1x16xf32>, vector<1x16xf32> -> vector<1x16xf32>
    %c0_160 = arith.constant 0 : index
    %c0_161 = arith.constant 0 : index
    %101 = vector.load %arg9[%c0_160, %c0_161] : memref<1x16xf32, #tpu.memory_space<vmem>>, vector<1x16xf32>
    %102 = arith.addf %100, %101 : vector<1x16xf32>
    %103 = arith.negf %102 : vector<1x16xf32>
    %104 = math.exp %103 : vector<1x16xf32>
    %cst_162 = arith.constant 1.000000e+00 : f32
    %105 = vector.broadcast %cst_162 : f32 to vector<1x16xf32>
    %106 = arith.addf %105, %104 : vector<1x16xf32>
    %107 = arith.divf %105, %106 : vector<1x16xf32>
    %108 = vector.broadcast %107 : vector<1x16xf32> to vector<256x16xf32>
    %109 = arith.mulf %88, %108 : vector<256x16xf32>
    %110 = vector.shape_cast %109 : vector<256x16xf32> to vector<16x16x16xf32>
    %cst_163 = arith.constant 0.000000e+00 : f32
    %111 = vector.broadcast %cst_163 : f32 to vector<2x22x22xf32>
    %c0_164 = arith.constant 0 : index
    %c0_165 = arith.constant 0 : index
    %c0_166 = arith.constant 0 : index
    %112 = vector.load %arg14[%c0_164, %c0_165, %c0_166] : memref<2x22x22xf32, #tpu.memory_space<vmem>>, vector<2x22x22xf32>
    tpu.vector_store %arg14[%c0_164, %c0_165, %c0_166], %111 {strides = array<i32>} : memref<2x22x22xf32, #tpu.memory_space<vmem>>, vector<2x22x22xf32>,
    %cst_167 = arith.constant dense<0.000000e+00> : vector<16x16xf32>
    %113 = vector.multi_reduction <add>, %110, %cst_167 [2] : vector<16x16x16xf32> to vector<16x16xf32>
    %cst_168 = arith.constant 1.600000e+01 : f32
    %114 = vector.broadcast %cst_168 : f32 to vector<16x16xf32>
    %115 = arith.divf %113, %114 : vector<16x16xf32>
    %116 = vector.shape_cast %115 : vector<16x16xf32> to vector<1x16x16xf32>
    %c0_169 = arith.constant 0 : index
    %c3 = arith.constant 3 : index
    %c3_170 = arith.constant 3 : index
    %117 = vector.load %arg14[%c0_169, %c3, %c3_170] : memref<2x22x22xf32, #tpu.memory_space<vmem>>, vector<1x16x16xf32>
    tpu.vector_store %arg14[%c0_169, %c3, %c3_170], %116 {strides = array<i32>} : memref<2x22x22xf32, #tpu.memory_space<vmem>>, vector<1x16x16xf32>,
    %cst_171 = arith.constant dense<0xFF800000> : vector<16x16xf32>
    %118 = vector.multi_reduction <maximumf>, %110, %cst_171 [2] : vector<16x16x16xf32> to vector<16x16xf32>
    %119 = vector.shape_cast %118 : vector<16x16xf32> to vector<1x16x16xf32>
    %c1_172 = arith.constant 1 : index
    %c3_173 = arith.constant 3 : index
    %c3_174 = arith.constant 3 : index
    %120 = vector.load %arg14[%c1_172, %c3_173, %c3_174] : memref<2x22x22xf32, #tpu.memory_space<vmem>>, vector<1x16x16xf32>
    tpu.vector_store %arg14[%c1_172, %c3_173, %c3_174], %119 {strides = array<i32>} : memref<2x22x22xf32, #tpu.memory_space<vmem>>, vector<1x16x16xf32>,
    %cst_175 = arith.constant 0.000000e+00 : f32
    %121 = vector.broadcast %cst_175 : f32 to vector<16x16xf32>
    %c0_176 = arith.constant 0 : index
    %c0_177 = arith.constant 0 : index
    %c0_178 = arith.constant 0 : index
    %122 = vector.load %arg14[%c0_176, %c0_177, %c0_178] : memref<2x22x22xf32, #tpu.memory_space<vmem>>, vector<1x22x22xf32>
    %123 = vector.shape_cast %122 : vector<1x22x22xf32> to vector<22x22xf32>
    %124 = vector.extract_strided_slice %123 {offsets = [0, 0], sizes = [16, 22], strides = [1, 1]} : vector<22x22xf32> to vector<16x22xf32>
    %c0_179 = arith.constant 0 : index
    %c0_180 = arith.constant 0 : index
    %c0_181 = arith.constant 0 : index
    %125 = vector.load %arg10[%c0_179, %c0_180, %c0_181] : memref<14x22x16xf32, #tpu.memory_space<vmem>>, vector<1x22x16xf32>
    %126 = vector.shape_cast %125 : vector<1x22x16xf32> to vector<22x16xf32>
    %cst_182 = arith.constant dense<0.000000e+00> : vector<16x16xf32>
    %127 = tpu.matmul %124, %126, %cst_182 {dimension_numbers = #tpu.dot_dimension_numbers<[1], [0], [0], [1], [0, 0, 1, 1], [], []>} : vector<16x22xf32>, vector<22x16xf32>, vector<16x16xf32> -> vector<16x16xf32>
    %128 = arith.addf %121, %127 : vector<16x16xf32>
    %129 = vector.extract_strided_slice %123 {offsets = [1, 0], sizes = [16, 22], strides = [1, 1]} : vector<22x22xf32> to vector<16x22xf32>
    %c1_183 = arith.constant 1 : index
    %c0_184 = arith.constant 0 : index
    %c0_185 = arith.constant 0 : index
    %130 = vector.load %arg10[%c1_183, %c0_184, %c0_185] : memref<14x22x16xf32, #tpu.memory_space<vmem>>, vector<1x22x16xf32>
    %131 = vector.shape_cast %130 : vector<1x22x16xf32> to vector<22x16xf32>
    %cst_186 = arith.constant dense<0.000000e+00> : vector<16x16xf32>
    %132 = tpu.matmul %129, %131, %cst_186 {dimension_numbers = #tpu.dot_dimension_numbers<[1], [0], [0], [1], [0, 0, 1, 1], [], []>} : vector<16x22xf32>, vector<22x16xf32>, vector<16x16xf32> -> vector<16x16xf32>
    %133 = arith.addf %128, %132 : vector<16x16xf32>
    %134 = vector.extract_strided_slice %123 {offsets = [2, 0], sizes = [16, 22], strides = [1, 1]} : vector<22x22xf32> to vector<16x22xf32>
    %c2_187 = arith.constant 2 : index
    %c0_188 = arith.constant 0 : index
    %c0_189 = arith.constant 0 : index
    %135 = vector.load %arg10[%c2_187, %c0_188, %c0_189] : memref<14x22x16xf32, #tpu.memory_space<vmem>>, vector<1x22x16xf32>
    %136 = vector.shape_cast %135 : vector<1x22x16xf32> to vector<22x16xf32>
    %cst_190 = arith.constant dense<0.000000e+00> : vector<16x16xf32>
    %137 = tpu.matmul %134, %136, %cst_190 {dimension_numbers = #tpu.dot_dimension_numbers<[1], [0], [0], [1], [0, 0, 1, 1], [], []>} : vector<16x22xf32>, vector<22x16xf32>, vector<16x16xf32> -> vector<16x16xf32>
    %138 = arith.addf %133, %137 : vector<16x16xf32>
    %139 = vector.extract_strided_slice %123 {offsets = [3, 0], sizes = [16, 22], strides = [1, 1]} : vector<22x22xf32> to vector<16x22xf32>
    %c3_191 = arith.constant 3 : index
    %c0_192 = arith.constant 0 : index
    %c0_193 = arith.constant 0 : index
    %140 = vector.load %arg10[%c3_191, %c0_192, %c0_193] : memref<14x22x16xf32, #tpu.memory_space<vmem>>, vector<1x22x16xf32>
    %141 = vector.shape_cast %140 : vector<1x22x16xf32> to vector<22x16xf32>
    %cst_194 = arith.constant dense<0.000000e+00> : vector<16x16xf32>
    %142 = tpu.matmul %139, %141, %cst_194 {dimension_numbers = #tpu.dot_dimension_numbers<[1], [0], [0], [1], [0, 0, 1, 1], [], []>} : vector<16x22xf32>, vector<22x16xf32>, vector<16x16xf32> -> vector<16x16xf32>
    %143 = arith.addf %138, %142 : vector<16x16xf32>
    %144 = vector.extract_strided_slice %123 {offsets = [4, 0], sizes = [16, 22], strides = [1, 1]} : vector<22x22xf32> to vector<16x22xf32>
    %c4 = arith.constant 4 : index
    %c0_195 = arith.constant 0 : index
    %c0_196 = arith.constant 0 : index
    %145 = vector.load %arg10[%c4, %c0_195, %c0_196] : memref<14x22x16xf32, #tpu.memory_space<vmem>>, vector<1x22x16xf32>
    %146 = vector.shape_cast %145 : vector<1x22x16xf32> to vector<22x16xf32>
    %cst_197 = arith.constant dense<0.000000e+00> : vector<16x16xf32>
    %147 = tpu.matmul %144, %146, %cst_197 {dimension_numbers = #tpu.dot_dimension_numbers<[1], [0], [0], [1], [0, 0, 1, 1], [], []>} : vector<16x22xf32>, vector<22x16xf32>, vector<16x16xf32> -> vector<16x16xf32>
    %148 = arith.addf %143, %147 : vector<16x16xf32>
    %149 = vector.extract_strided_slice %123 {offsets = [5, 0], sizes = [16, 22], strides = [1, 1]} : vector<22x22xf32> to vector<16x22xf32>
    %c5 = arith.constant 5 : index
    %c0_198 = arith.constant 0 : index
    %c0_199 = arith.constant 0 : index
    %150 = vector.load %arg10[%c5, %c0_198, %c0_199] : memref<14x22x16xf32, #tpu.memory_space<vmem>>, vector<1x22x16xf32>
    %151 = vector.shape_cast %150 : vector<1x22x16xf32> to vector<22x16xf32>
    %cst_200 = arith.constant dense<0.000000e+00> : vector<16x16xf32>
    %152 = tpu.matmul %149, %151, %cst_200 {dimension_numbers = #tpu.dot_dimension_numbers<[1], [0], [0], [1], [0, 0, 1, 1], [], []>} : vector<16x22xf32>, vector<22x16xf32>, vector<16x16xf32> -> vector<16x16xf32>
    %153 = arith.addf %148, %152 : vector<16x16xf32>
    %154 = vector.extract_strided_slice %123 {offsets = [6, 0], sizes = [16, 22], strides = [1, 1]} : vector<22x22xf32> to vector<16x22xf32>
    %c6 = arith.constant 6 : index
    %c0_201 = arith.constant 0 : index
    %c0_202 = arith.constant 0 : index
    %155 = vector.load %arg10[%c6, %c0_201, %c0_202] : memref<14x22x16xf32, #tpu.memory_space<vmem>>, vector<1x22x16xf32>
    %156 = vector.shape_cast %155 : vector<1x22x16xf32> to vector<22x16xf32>
    %cst_203 = arith.constant dense<0.000000e+00> : vector<16x16xf32>
    %157 = tpu.matmul %154, %156, %cst_203 {dimension_numbers = #tpu.dot_dimension_numbers<[1], [0], [0], [1], [0, 0, 1, 1], [], []>} : vector<16x22xf32>, vector<22x16xf32>, vector<16x16xf32> -> vector<16x16xf32>
    %158 = arith.addf %153, %157 : vector<16x16xf32>
    %c1_204 = arith.constant 1 : index
    %c0_205 = arith.constant 0 : index
    %c0_206 = arith.constant 0 : index
    %159 = vector.load %arg14[%c1_204, %c0_205, %c0_206] : memref<2x22x22xf32, #tpu.memory_space<vmem>>, vector<1x22x22xf32>
    %160 = vector.shape_cast %159 : vector<1x22x22xf32> to vector<22x22xf32>
    %161 = vector.extract_strided_slice %160 {offsets = [0, 0], sizes = [16, 22], strides = [1, 1]} : vector<22x22xf32> to vector<16x22xf32>
    %c7 = arith.constant 7 : index
    %c0_207 = arith.constant 0 : index
    %c0_208 = arith.constant 0 : index
    %162 = vector.load %arg10[%c7, %c0_207, %c0_208] : memref<14x22x16xf32, #tpu.memory_space<vmem>>, vector<1x22x16xf32>
    %163 = vector.shape_cast %162 : vector<1x22x16xf32> to vector<22x16xf32>
    %cst_209 = arith.constant dense<0.000000e+00> : vector<16x16xf32>
    %164 = tpu.matmul %161, %163, %cst_209 {dimension_numbers = #tpu.dot_dimension_numbers<[1], [0], [0], [1], [0, 0, 1, 1], [], []>} : vector<16x22xf32>, vector<22x16xf32>, vector<16x16xf32> -> vector<16x16xf32>
    %165 = arith.addf %158, %164 : vector<16x16xf32>
    %166 = vector.extract_strided_slice %160 {offsets = [1, 0], sizes = [16, 22], strides = [1, 1]} : vector<22x22xf32> to vector<16x22xf32>
    %c8 = arith.constant 8 : index
    %c0_210 = arith.constant 0 : index
    %c0_211 = arith.constant 0 : index
    %167 = vector.load %arg10[%c8, %c0_210, %c0_211] : memref<14x22x16xf32, #tpu.memory_space<vmem>>, vector<1x22x16xf32>
    %168 = vector.shape_cast %167 : vector<1x22x16xf32> to vector<22x16xf32>
    %cst_212 = arith.constant dense<0.000000e+00> : vector<16x16xf32>
    %169 = tpu.matmul %166, %168, %cst_212 {dimension_numbers = #tpu.dot_dimension_numbers<[1], [0], [0], [1], [0, 0, 1, 1], [], []>} : vector<16x22xf32>, vector<22x16xf32>, vector<16x16xf32> -> vector<16x16xf32>
    %170 = arith.addf %165, %169 : vector<16x16xf32>
    %171 = vector.extract_strided_slice %160 {offsets = [2, 0], sizes = [16, 22], strides = [1, 1]} : vector<22x22xf32> to vector<16x22xf32>
    %c9 = arith.constant 9 : index
    %c0_213 = arith.constant 0 : index
    %c0_214 = arith.constant 0 : index
    %172 = vector.load %arg10[%c9, %c0_213, %c0_214] : memref<14x22x16xf32, #tpu.memory_space<vmem>>, vector<1x22x16xf32>
    %173 = vector.shape_cast %172 : vector<1x22x16xf32> to vector<22x16xf32>
    %cst_215 = arith.constant dense<0.000000e+00> : vector<16x16xf32>
    %174 = tpu.matmul %171, %173, %cst_215 {dimension_numbers = #tpu.dot_dimension_numbers<[1], [0], [0], [1], [0, 0, 1, 1], [], []>} : vector<16x22xf32>, vector<22x16xf32>, vector<16x16xf32> -> vector<16x16xf32>
    %175 = arith.addf %170, %174 : vector<16x16xf32>
    %176 = vector.extract_strided_slice %160 {offsets = [3, 0], sizes = [16, 22], strides = [1, 1]} : vector<22x22xf32> to vector<16x22xf32>
    %c10 = arith.constant 10 : index
    %c0_216 = arith.constant 0 : index
    %c0_217 = arith.constant 0 : index
    %177 = vector.load %arg10[%c10, %c0_216, %c0_217] : memref<14x22x16xf32, #tpu.memory_space<vmem>>, vector<1x22x16xf32>
    %178 = vector.shape_cast %177 : vector<1x22x16xf32> to vector<22x16xf32>
    %cst_218 = arith.constant dense<0.000000e+00> : vector<16x16xf32>
    %179 = tpu.matmul %176, %178, %cst_218 {dimension_numbers = #tpu.dot_dimension_numbers<[1], [0], [0], [1], [0, 0, 1, 1], [], []>} : vector<16x22xf32>, vector<22x16xf32>, vector<16x16xf32> -> vector<16x16xf32>
    %180 = arith.addf %175, %179 : vector<16x16xf32>
    %181 = vector.extract_strided_slice %160 {offsets = [4, 0], sizes = [16, 22], strides = [1, 1]} : vector<22x22xf32> to vector<16x22xf32>
    %c11 = arith.constant 11 : index
    %c0_219 = arith.constant 0 : index
    %c0_220 = arith.constant 0 : index
    %182 = vector.load %arg10[%c11, %c0_219, %c0_220] : memref<14x22x16xf32, #tpu.memory_space<vmem>>, vector<1x22x16xf32>
    %183 = vector.shape_cast %182 : vector<1x22x16xf32> to vector<22x16xf32>
    %cst_221 = arith.constant dense<0.000000e+00> : vector<16x16xf32>
    %184 = tpu.matmul %181, %183, %cst_221 {dimension_numbers = #tpu.dot_dimension_numbers<[1], [0], [0], [1], [0, 0, 1, 1], [], []>} : vector<16x22xf32>, vector<22x16xf32>, vector<16x16xf32> -> vector<16x16xf32>
    %185 = arith.addf %180, %184 : vector<16x16xf32>
    %186 = vector.extract_strided_slice %160 {offsets = [5, 0], sizes = [16, 22], strides = [1, 1]} : vector<22x22xf32> to vector<16x22xf32>
    %c12 = arith.constant 12 : index
    %c0_222 = arith.constant 0 : index
    %c0_223 = arith.constant 0 : index
    %187 = vector.load %arg10[%c12, %c0_222, %c0_223] : memref<14x22x16xf32, #tpu.memory_space<vmem>>, vector<1x22x16xf32>
    %188 = vector.shape_cast %187 : vector<1x22x16xf32> to vector<22x16xf32>
    %cst_224 = arith.constant dense<0.000000e+00> : vector<16x16xf32>
    %189 = tpu.matmul %186, %188, %cst_224 {dimension_numbers = #tpu.dot_dimension_numbers<[1], [0], [0], [1], [0, 0, 1, 1], [], []>} : vector<16x22xf32>, vector<22x16xf32>, vector<16x16xf32> -> vector<16x16xf32>
    %190 = arith.addf %185, %189 : vector<16x16xf32>
    %191 = vector.extract_strided_slice %160 {offsets = [6, 0], sizes = [16, 22], strides = [1, 1]} : vector<22x22xf32> to vector<16x22xf32>
    %c13 = arith.constant 13 : index
    %c0_225 = arith.constant 0 : index
    %c0_226 = arith.constant 0 : index
    %192 = vector.load %arg10[%c13, %c0_225, %c0_226] : memref<14x22x16xf32, #tpu.memory_space<vmem>>, vector<1x22x16xf32>
    %193 = vector.shape_cast %192 : vector<1x22x16xf32> to vector<22x16xf32>
    %cst_227 = arith.constant dense<0.000000e+00> : vector<16x16xf32>
    %194 = tpu.matmul %191, %193, %cst_227 {dimension_numbers = #tpu.dot_dimension_numbers<[1], [0], [0], [1], [0, 0, 1, 1], [], []>} : vector<16x22xf32>, vector<22x16xf32>, vector<16x16xf32> -> vector<16x16xf32>
    %195 = arith.addf %190, %194 : vector<16x16xf32>
    %196 = arith.negf %195 : vector<16x16xf32>
    %197 = math.exp %196 : vector<16x16xf32>
    %cst_228 = arith.constant 1.000000e+00 : f32
    %198 = vector.broadcast %cst_228 : f32 to vector<16x16xf32>
    %199 = arith.addf %198, %197 : vector<16x16xf32>
    %200 = arith.divf %198, %199 : vector<16x16xf32>
    %201 = vector.shape_cast %200 : vector<16x16xf32> to vector<16x16x1xf32>
    %202 = vector.broadcast %201 : vector<16x16x1xf32> to vector<16x16x16xf32>
    %203 = arith.mulf %110, %202 : vector<16x16x16xf32>
    %204 = arith.addf %203, %1 : vector<16x16x16xf32>
    %205 = vector.shape_cast %204 : vector<16x16x16xf32> to vector<1x16x16x16xf32>
    %c0_229 = arith.constant 0 : index
    %c0_230 = arith.constant 0 : index
    %c0_231 = arith.constant 0 : index
    %c0_232 = arith.constant 0 : index
    %206 = vector.load %arg11[%c0_229, %c0_230, %c0_231, %c0_232] : memref<1x16x16x16xf32, #tpu.memory_space<vmem>>, vector<1x16x16x16xf32>
    tpu.vector_store %arg11[%c0_229, %c0_230, %c0_231, %c0_232], %205 {strides = array<i32>} : memref<1x16x16x16xf32, #tpu.memory_space<vmem>>, vector<1x16x16x16xf32>,
    return
  }
  func.func @transform_0(%arg0: i32) -> (i32, i32, i32, i32) {
    %c0_i32 = arith.constant 0 : i32
    %c0_i32_0 = arith.constant 0 : i32
    %c0_i32_1 = arith.constant 0 : i32
    %c0_i32_2 = arith.constant 0 : i32
    return %arg0, %c0_i32, %c0_i32_0, %c0_i32_1 : i32, i32, i32, i32
  }
  func.func @transform_1(%arg0: i32) -> (i32, i32) {
    %c0_i32 = arith.constant 0 : i32
    %c0_i32_0 = arith.constant 0 : i32
    %c0_i32_1 = arith.constant 0 : i32
    return %c0_i32, %c0_i32_0 : i32, i32
  }
  func.func @transform_2(%arg0: i32) -> (i32, i32) {
    %c0_i32 = arith.constant 0 : i32
    %c0_i32_0 = arith.constant 0 : i32
    %c0_i32_1 = arith.constant 0 : i32
    return %c0_i32, %c0_i32_0 : i32, i32
  }
  func.func @transform_3(%arg0: i32) -> (i32, i32) {
    %c0_i32 = arith.constant 0 : i32
    %c0_i32_0 = arith.constant 0 : i32
    %c0_i32_1 = arith.constant 0 : i32
    return %c0_i32, %c0_i32_0 : i32, i32
  }
  func.func @transform_4(%arg0: i32) -> (i32, i32) {
    %c0_i32 = arith.constant 0 : i32
    %c0_i32_0 = arith.constant 0 : i32
    %c0_i32_1 = arith.constant 0 : i32
    return %c0_i32, %c0_i32_0 : i32, i32
  }
  func.func @transform_5(%arg0: i32) -> (i32, i32) {
    %c0_i32 = arith.constant 0 : i32
    %c0_i32_0 = arith.constant 0 : i32
    %c0_i32_1 = arith.constant 0 : i32
    return %c0_i32, %c0_i32_0 : i32, i32
  }
  func.func @transform_6(%arg0: i32) -> (i32, i32) {
    %c0_i32 = arith.constant 0 : i32
    %c0_i32_0 = arith.constant 0 : i32
    %c0_i32_1 = arith.constant 0 : i32
    return %c0_i32, %c0_i32_0 : i32, i32
  }
  func.func @transform_7(%arg0: i32) -> (i32, i32) {
    %c0_i32 = arith.constant 0 : i32
    %c0_i32_0 = arith.constant 0 : i32
    %c0_i32_1 = arith.constant 0 : i32
    return %c0_i32, %c0_i32_0 : i32, i32
  }
  func.func @transform_8(%arg0: i32) -> (i32, i32) {
    %c0_i32 = arith.constant 0 : i32
    %c0_i32_0 = arith.constant 0 : i32
    %c0_i32_1 = arith.constant 0 : i32
    return %c0_i32, %c0_i32_0 : i32, i32
  }
  func.func @transform_9(%arg0: i32) -> (i32, i32, i32) {
    %c0_i32 = arith.constant 0 : i32
    %c0_i32_0 = arith.constant 0 : i32
    %c0_i32_1 = arith.constant 0 : i32
    %c0_i32_2 = arith.constant 0 : i32
    return %c0_i32, %c0_i32_0, %c0_i32_1 : i32, i32, i32
  }
  func.func @transform_10(%arg0: i32) -> (i32, i32, i32, i32) {
    %c0_i32 = arith.constant 0 : i32
    %c0_i32_0 = arith.constant 0 : i32
    %c0_i32_1 = arith.constant 0 : i32
    %c0_i32_2 = arith.constant 0 : i32
    return %arg0, %c0_i32, %c0_i32_0, %c0_i32_1 : i32, i32, i32, i32
  }
}

</mosaic_0001>

<bundles_post_ra>
// kernel: tpu_custom_call.1
= control target key start
LH: loop header
LB: loop body
LE: loop exit
PB: predicated region body
PF: predicated region fallthrough
CT: control target
= control target key end

     0   :  { %s11402_s0 = inlined_call_operand.vmem [shape: f32[2,16,16,16], index: 0, kind: input, shape index: {}]   ;;  %s11403_s1 = inlined_call_operand.vmem [shape: f32[144,16], index: 1, kind: input, shape index: {}]   ;;  %s11404_s2 = inlined_call_operand.vmem [shape: f32[1,16], index: 2, kind: input, shape index: {}]   ;;  %s11405_s3 = inlined_call_operand.vmem [shape: f32[144,16], index: 3, kind: input, shape index: {}]   ;;  %s11406_s4 = inlined_call_operand.vmem [shape: f32[1,16], index: 4, kind: input, shape index: {}]   ;;  %s11407_s5 = inlined_call_operand.vmem [shape: f32[16,1], index: 5, kind: input, shape index: {}]   ;;  %s11408_s6 = inlined_call_operand.<no memory space> [shape: f32[1,1], index: 6, kind: input, shape index: {}]   ;;  %s11409_s7 = inlined_call_operand.vmem [shape: f32[1,16], index: 7, kind: input, shape index: {}]   ;;  %s11410_s8 = inlined_call_operand.vmem [shape: f32[1,16], index: 8, kind: input, shape index: {}]   ;;  %s11411_s9 = inlined_call_operand.vmem [shape: f32[14,22,16], index: 9, kind: input, shape index: {}]   ;;  %s11412_s10 = inlined_call_operand.hbm [shape: f32[2,16,16,16], index: 10, kind: output, shape index: {}]  }
   0x1   :  { %v15_v0 = vstv %s11408_s6 }
   0x2   :  { %16 = vst [vmem:[#allocation5] sm:$0x1] %v15_v0 }
   0x3   :  { %17 = vsyncpa [#allocation7], 0 }
   0x4   :  { %19 = vsyncpa [#allocation7 + $0x1], 0  ;;  %s7732_s15 = smov 0   ;;  %s7734_s16 = smov 0  }
   0x5   :  { %s7736_s17 = smov 0   ;;  %s7738_s18 = smov 0  }
   0x6 LB: > { %s7753_s6 = sadd.s32 4294967295, %s7659_s18   ;;  %s6995_s19 = sadd.s32 4294967294, %s7659_s18   ;;  %s7659_s18 = sphi %s7738_s18, %s11605_s18   ;;  %s7655_s17 = sphi %s7736_s17, %s11604_s17   ;;  %s7651_s16 = sphi %s7734_s16, %s11603_s16   ;;  %s7647_s15 = sphi %s7732_s15, %s11602_s15  }
   0x7   : > { %s7757_s20 = sadd.s32 1, %s7659_s18   ;;  %s247_s21 = sadd.s32 1, %s7655_s17 }
   0x8   : > { %s244_s22 = ssub.s32 %s7659_s18, %s7757_s20  ;;  %p257_p0 = scmp.ne.s32.totalorder %s7655_s17, %s7651_s16 }
   0x9   : > { %p245_p1 = scmp.eq.s32.totalorder %s244_s22, 0  ;;  %p258_p2 = scmp.eq.s32.totalorder %s7753_s6, 1 }
   0xa   : > { %p263_p3 = scmp.ne.s32.totalorder %s7651_s16, %s7647_s15  ;;  %p264_p4 = scmp.eq.s32.totalorder %s6995_s19, 1 }
   0xb   : > { %s7768_s23 = scalar_select %p245_p1, %s7655_s17, %s247_s21  }
   0xc   : > { %p7770_p5 = por %p258_p2, %p257_p0  ;;  %p7774_p6 = por %p264_p4, %p263_p3 }
   0xd   : > { %p6998_p7 = scmp.ge.s32.totalorder %s7659_s18, 1  ;;  %p317_p8 = scmp.lt.s32.totalorder %s7659_s18, 3 }
   0xf   : > { %p318_p9 = pnand %p6998_p7, %p317_p8 }
  0x11   : > { %321 = sbr.rel (%p318_p9) target bundleno = 2520 (0x9d8), region = 60 }
  0x18   : > { %p355_p10 = scmp.lt.s32.totalorder %s7753_s6, 1  ;;  %v2053_v1 = vld [vmem:[%s11403_s1] sm:$0xff]  ;;  %v11415_v2 = vmov 0.0|0.0   ;;  %v2054_v3 = vld [vmem:[%s11403_s1 + $0x8] sm:$0xff]  ;;  %v2055_v4 = vld [vmem:[%s11403_s1 + $0x10] sm:$0xff]  ;;  %vm11463_vm0 = vcmask 130048  }
  0x19   : > { %7375 = vmatprep.subr.bf16.mxu0 %v11415_v2  ;;  %v2056_v5 = vld [vmem:[%s11403_s1 + $0x18] sm:$0xff]  ;;  %7488 = vmatprep.subr.bf16.mxu1 %v11415_v2  ;;  %v7376_v6 = vpack.c.bf16 %v2054_v3, %v2053_v1  ;;  %v2057_v8 = vld [vmem:[%s11403_s1 + $0x20] sm:$0xff]  ;;  %v2058_v9 = vld [vmem:[%s11403_s1 + $0x28] sm:$0xff]  ;;  %vm455_vm1 = vcmask 122880   ;;  %s7662_s28 = smov 64   ;;  %s7663_s29 = smov 48  }
  0x1a   : > { %s356_s14 = scalar_select %p355_p10, %s7753_s6, 1  ;;  %v7379_v7 = vpack.c.bf16 %v2056_v5, %v2055_v4  ;;  %v7382_v19 = vpack.c.bf16 %v2058_v9, %v2057_v8  ;;  %v2059_v21 = vld [vmem:[%s11403_s1 + $0x30] sm:$0xff]  ;;  %v2060_v22 = vld [vmem:[%s11403_s1 + $0x38] sm:$0xff]  ;;  %v2061_v25 = vld [vmem:[%s11403_s1 + $0x40] sm:$0xff]  ;;  %vm734_vm2 = vcmask 261248   ;;  %vm927_vm3 = vcmask 392448  }
  0x1b   : > { %7377 = vmatpush1.bf16.msra.mxu0 %v7376_v6  ;;  %7497 = vmatpush1.bf16.msra.mxu1 %v7376_v6  ;;  %v7385_v24 = vpack.c.bf16 %v2060_v22, %v2059_v21  ;;  %v2062_v26 = vld [vmem:[%s11403_s1 + $0x48] sm:$0xff]  ;;  %s7664_s30 = smov 80   ;;  %s11413_s11 = smov 112   ;;  %v2063_v63 = vld [vmem:[%s11403_s1 + $0x50] sm:$0xff]  ;;  %v2064_v0 = vld [vmem:[%s11403_s1 + $0x58] sm:$0xff]  ;;  %vm1120_vm4 = vcmask 523648  }
  0x1c   : > { %s7160_s19 = sshll.u32 %s356_s14, 8  ;;  %7378 = vmatprep.subr.bf16.mxu0 %v11415_v2  ;;  %7489 = vmatprep.subr.bf16.mxu1 %v11415_v2  ;;  %v7388_v36 = vpack.c.bf16 %v2062_v26, %v2061_v25  ;;  %s7666_s12 = smov 16   ;;  %v7391_v3 = vpack.c.bf16 %v2064_v0, %v2063_v63  ;;  %v2065_v5 = vld [vmem:[%s11403_s1 + $0x60] sm:$0xff]  ;;  %v2067_v21 = vld [vmem:[%s11403_s1 + $0x70] sm:$0xff]  ;;  %v2068_v22 = vld [vmem:[%s11403_s1 + $0x78] sm:$0xff]  ;;  %vm1313_vm5 = vcmask 654848  }
  0x1d   : > { %s7799_s26 = scalar_lea.vmem %s11402_s0, %s7160_s19  ;;  %s7667_s13 = smov 32   ;;  %vm1506_vm6 = vcmask 786048   ;;  %vm1699_vm7 = vcmask 917248   ;;  %vm1892_vm8 = vcmask 1048448   ;;  %vm7669_vm9 = vmmov 0  }
  0x1e   : > { %v7810_v10 = vld [vmem:[%s7799_s26] sm:$0xff]  ;;  %v7813_v11 = vld [vmem:[%s7799_s26 + $0x8] sm:$0xff]  ;;  %v7816_v12 = vld [vmem:[%s7799_s26 + $0x10] sm:$0xff]  ;;  %s7668_s14 = smov 96   ;;  %s11485_s27 = smov 112   ;;  %vm4579_vm10 = vcmask 1040384  }
  0x1f   : > { %11471 = vst [vmem:[#allocation9_spill] sm:$0xff] %v7810_v10  ;;  %11472 = vst [vmem:[#allocation10_spill] sm:$0xff] %v7813_v11  ;;  %v7825_v13 = vld [vmem:[%s7799_s26 + $0x18] sm:$0xff]  ;;  %v7828_v14 = vld [vmem:[%s7799_s26 + $0x20] sm:$0xff]  ;;  %7380 = vmatpush1.bf16.msra.mxu0 %v7379_v7  ;;  %7498 = vmatpush1.bf16.msra.mxu1 %v7379_v7  ;;  %vm4575_vm11 = vcmask 7168   ;;  %vm4695_vm12 = vcmask 179200  }
  0x20   : > { %11473 = vst [vmem:[#allocation11_spill] sm:$0xff] %v7816_v12  ;;  %394 = vst.msk [vmem:[#allocation2 + $0x19] sm:$0xff] %vm11463_vm0, %v7810_v10  ;;  %v7831_v15 = vld [vmem:[%s7799_s26 + $0x28] sm:$0xff]  ;;  %v7840_v16 = vld [vmem:[%s7799_s26 + $0x30] sm:$0xff]  ;;  %7381 = vmatprep.subr.bf16.mxu0 %v11415_v2  ;;  %7490 = vmatprep.subr.bf16.mxu1 %v11415_v2  ;;  %vm4698_vm13 = vcmask 177152   ;;  %vm5353_vm14 = vcmask 1045504  }
  0x21   : > { %395 = vst.msk [vmem:[#allocation2 + $0x21] sm:$0xff] %vm11463_vm0, %v7813_v11  ;;  %396 = vst.msk [vmem:[#allocation2 + $0x31] sm:$0xff] %vm11463_vm0, %v7816_v12  ;;  %v7843_v17 = vld [vmem:[%s7799_s26 + $0x38] sm:$0xff]  ;;  %v7846_v18 = vld [vmem:[%s7799_s26 + $0x40] sm:$0xff]  ;;  %vm4876_vm15 = vcmask 154712  }
  0x22   : > { %11474 = vst [vmem:[#allocation12_spill] sm:$0xff] %v7825_v13  ;;  %11475 = vst [vmem:[#allocation13_spill] sm:$0xff] %v7828_v14  ;;  %v7855_v20 = vld [vmem:[%s7799_s26 + $0x48] sm:$0xff]  ;;  %v7868_v23 = vld [vmem:[%s7799_s26 + $0x50] sm:$0xff] }
  0x23   : > { %11476 = vst [vmem:[#allocation14_spill] sm:$0xff] %v7831_v15  ;;  %397 = vst.msk [vmem:[#allocation2 + $0x39] sm:$0xff] %vm11463_vm0, %v7825_v13  ;;  %7383 = vmatpush1.bf16.msra.mxu0 %v7382_v19  ;;  %7499 = vmatpush1.bf16.msra.mxu1 %v7382_v19  ;;  %v2066_v7 = vld [vmem:[%s11403_s1 + $0x68] sm:$0xff]  ;;  %v7999_v19 = vld [vmem:[%s7799_s26 + $0x58] sm:$0xff] }
  0x24   : > { %398 = vst.msk [vmem:[#allocation2 + $0x49] sm:$0xff] %vm11463_vm0, %v7828_v14  ;;  %399 = vst.msk [vmem:[#allocation2 + $0x51] sm:$0xff] %vm11463_vm0, %v7831_v15  ;;  %7384 = vmatprep.subr.bf16.mxu0 %v11415_v2  ;;  %7491 = vmatprep.subr.bf16.mxu1 %v11415_v2  ;;  %v7394_v9 = vpack.c.bf16 %v2066_v7, %v2065_v5  ;;  %v8015_v26 = vld [vmem:[%s7799_s26 + $0x60] sm:$0xff]  ;;  %v8120_v63 = vld [vmem:[%s7799_s26 + $0x78] sm:$0xff] }
  0x25   : > { %11477 = vst [vmem:[#allocation15_spill] sm:$0xff] %v7840_v16  ;;  %11478 = vst [vmem:[#allocation16_spill] sm:$0xff] %v7843_v17  ;;  %v8131_v0 = vld [vmem:[%s7799_s26 + $0x80] sm:$0xff]  ;;  %v8182_v5 = vld [vmem:[%s7799_s26 + $0x90] sm:$0xff] }
  0x26   : > { %11479 = vst [vmem:[#allocation17_spill] sm:$0xff] %v7846_v18  ;;  %400 = vst.msk [vmem:[#allocation2 + $0x61] sm:$0xff] %vm11463_vm0, %v7840_v16 }
  0x27   : > { %401 = vst.msk [vmem:[#allocation2 + $0x69] sm:$0xff] %vm11463_vm0, %v7843_v17  ;;  %402 = vst.msk [vmem:[#allocation2 + $0x79] sm:$0xff] %vm11463_vm0, %v7846_v18  ;;  %v7880_v27 = vld [vmem:[#allocation2 + $0x19] sm:$0xff]  ;;  %7386 = vmatpush1.bf16.msra.mxu0 %v7385_v24  ;;  %7500 = vmatpush1.bf16.msra.mxu1 %v7385_v24 }
  0x28   : > { %11480 = vst [vmem:[#allocation18_spill] sm:$0xff] %v7855_v20  ;;  %403 = vst.msk [vmem:[#allocation2 + $0x81] sm:$0xff] %vm11463_vm0, %v7855_v20  ;;  %v961_v28 = vld [vmem:[#allocation2 + $0x20] sm:$0xff]  ;;  %1217 = vrot.lane.b32.xlu1 %v7880_v27, %s7662_s28  ;;  %v7889_v31 = vld [vmem:[#allocation2 + $0x31] sm:$0xff]  ;;  %7387 = vmatprep.subr.bf16.mxu0 %v11415_v2 }
  0x29   : > { %11481 = vst [vmem:[#allocation19_spill] sm:$0xff] %v7868_v23  ;;  %404 = vst.msk [vmem:[#allocation2 + $0x91] sm:$0xff] %vm11463_vm0, %v7868_v23  ;;  %v7882_v29 = vld [vmem:[#allocation2 + $0x1a] sm:$0xff]  ;;  %1026 = vrot.lane.b32.xlu0 %v961_v28, %s7663_s29  ;;  %v475_v34 = vld [vmem:[#allocation2 + $0x27] sm:$0x1]  ;;  %7492 = vmatprep.subr.bf16.mxu1 %v11415_v2 }
  0x2a   : > { %v7887_v30 = vld [vmem:[#allocation2 + $0x21] sm:$0xff]  ;;  %v7891_v32 = vld [vmem:[#allocation2 + $0x39] sm:$0xff]  ;;  %545 = vst.msk [vmem:[#allocation3 + $0x30] sm:$0xff] %vm11463_vm0, %v961_v28  ;;  %429 = vst.msk [vmem:[#allocation2 + $0x1] sm:$0xff] %vm11463_vm0, %v7889_v31 }
  0x2b   : > { %430 = vst.msk [vmem:[#allocation2 + $0x9] sm:$0xff] %vm11463_vm0, %v7891_v32  ;;  %v438_v33 = vld [vmem:[#allocation2 + $0x1a] sm:$0x1]  ;;  %v439_v35 = vld [vmem:[#allocation2 + $0x32] sm:$0x1]  ;;  %v7919_v42 = vld [vmem:[#allocation2 + $0x4a] sm:$0xff]  ;;  %7389 = vmatpush1.bf16.msra.mxu0 %v7388_v36  ;;  %7501 = vmatpush1.bf16.msra.mxu1 %v7388_v36 }
  0x2c   : > { %457 = vst.msk [vmem:[#allocation2 + $0x18] sm:$0x1] %vm455_vm1, %v438_v33  ;;  %493 = vst.msk [vmem:[#allocation2 + $0x29] sm:$0x1] %vm455_vm1, %v475_v34  ;;  %v7901_v37 = vld [vmem:[#allocation2 + $0x38] sm:$0xff]  ;;  %v7908_v41 = vld [vmem:[#allocation2 + $0x50] sm:$0xff]  ;;  %1410 = vrot.lane.b32.xlu1 %v7882_v29, %s7664_s30  ;;  %7390 = vmatprep.subr.bf16.mxu0 %v11415_v2  ;;  %v7397_v33 = vpack.c.bf16 %v2068_v22, %v2067_v21 }
  0x2d   : > { %458 = vst.msk [vmem:[#allocation2 + $0x30] sm:$0x1] %vm455_vm1, %v439_v35  ;;  %v7903_v38 = vld [vmem:[#allocation2 + $0x32] sm:$0xff]  ;;  %v440_v39 = vld [vmem:[#allocation2 + $0x4a] sm:$0x1]  ;;  %1219 = vrot.lane.b32.xlu0 %v7887_v30, %s7662_s28  ;;  %7493 = vmatprep.subr.bf16.mxu1 %v11415_v2  ;;  %11482 = vst [vmem:[#allocation20_spill] sm:$0xff] %v7999_v19 }
  0x2e   : > { %459 = vst.msk [vmem:[#allocation2 + $0x48] sm:$0x1] %vm455_vm1, %v440_v39  ;;  %v476_v40 = vld [vmem:[#allocation2 + $0x3f] sm:$0x1]  ;;  %v441_v43 = vld [vmem:[#allocation2 + $0x62] sm:$0x1] }
  0x2f   : > { %1957 = vst.msk [vmem:[#allocation3 + $0x8] sm:$0xff] %vm11463_vm0, %v7903_v38  ;;  %547 = vst.msk [vmem:[#allocation3 + $0x50] sm:$0xff] %vm11463_vm0, %v7901_v37  ;;  %v477_v44 = vld [vmem:[#allocation2 + $0x57] sm:$0x1]  ;;  %v7924_v45 = vld [vmem:[#allocation2 + $0x68] sm:$0xff]  ;;  %7392 = vmatpush1.bf16.msra.mxu0 %v7391_v3  ;;  %7502 = vmatpush1.bf16.msra.mxu1 %v7391_v3 }
  0x30   : > { %494 = vst.msk [vmem:[#allocation2 + $0x41] sm:$0x1] %vm455_vm1, %v476_v40  ;;  %460 = vst.msk [vmem:[#allocation2 + $0x60] sm:$0x1] %vm455_vm1, %v441_v43  ;;  %v7929_v46 = vld [vmem:[#allocation2 + $0x62] sm:$0xff]  ;;  %1796 = vrot.lane.b32.xlu1 %v7889_v31, %s11413_s11  ;;  %v7956_v57 = vld [vmem:[#allocation2 + $0x7a] sm:$0xff]  ;;  %7393 = vmatprep.subr.bf16.mxu0 %v11415_v2 }
  0x31   : > { %549 = vst.msk [vmem:[#allocation3 + $0x70] sm:$0xff] %vm11463_vm0, %v7908_v41  ;;  %1959 = vst.msk [vmem:[#allocation3 + $0x28] sm:$0xff] %vm11463_vm0, %v7919_v42  ;;  %v442_v47 = vld [vmem:[#allocation2 + $0x7a] sm:$0x1]  ;;  %v478_v48 = vld [vmem:[#allocation2 + $0x6f] sm:$0x1]  ;;  %7494 = vmatprep.subr.bf16.mxu1 %v11415_v2 }
  0x32   : > { %495 = vst.msk [vmem:[#allocation2 + $0x59] sm:$0x1] %vm455_vm1, %v477_v44  ;;  %461 = vst.msk [vmem:[#allocation2 + $0x78] sm:$0x1] %vm455_vm1, %v442_v47  ;;  %v7936_v49 = vld [vmem:[#allocation2 + $0x80] sm:$0xff]  ;;  %v575_v59 = vld [vmem:[#allocation2 + $0x9] sm:$0xff] }
  0x33   : > { %551 = vst.msk [vmem:[#allocation3 + $0x90] sm:$0xff] %vm11463_vm0, %v7924_v45  ;;  %1961 = vst.msk [vmem:[#allocation3 + $0x48] sm:$0xff] %vm11463_vm0, %v7929_v46  ;;  %v574_v50 = vld [vmem:[#allocation2 + $0x1] sm:$0xff]  ;;  %v960_v51 = vld [vmem:[#allocation2 + $0x18] sm:$0xff]  ;;  %7395 = vmatpush1.bf16.msra.mxu0 %v7394_v9  ;;  %7503 = vmatpush1.bf16.msra.mxu1 %v7394_v9  ;;  %s7671_s11 = smov [#allocation6]  }
  0x34   : > { %496 = vst.msk [vmem:[#allocation2 + $0x71] sm:$0x1] %vm455_vm1, %v478_v48  ;;  %638 = vrot.lane.b32.xlu0 %v574_v50, %s7666_s12  ;;  %v7946_v52 = vld [vmem:[#allocation2 + $0x30] sm:$0xff]  ;;  %v767_v53 = vld [vmem:[#allocation2 + $0x2] sm:$0xff]  ;;  %v474_v54 = vld [vmem:[#allocation2 + $0xf] sm:$0x1]  ;;  %642 = vrot.lane.b32.xlu1 %v7880_v27, %s7666_s12 }
  0x35   : > { %553 = vst.msk [vmem:[#allocation3 + $0xb0] sm:$0xff] %vm11463_vm0, %v7936_v49  ;;  %v7948_v55 = vld [vmem:[#allocation2 + $0x48] sm:$0xff]  ;;  %544 = vst.msk [vmem:[#allocation3 + $0x20] sm:$0xff] %vm11463_vm0, %v960_v51  ;;  %v437_v58 = vld [vmem:[#allocation2 + $0x2] sm:$0x1]  ;;  %7396 = vmatprep.subr.bf16.mxu0 %v11415_v2  ;;  %7495 = vmatprep.subr.bf16.mxu1 %v11415_v2  ;;  %s7601_s21 = sshll.u32 %s7671_s11, 4  ;;  %s7602_s21 = int_to_ptr.vmem [resolvable:$false] %s7601_s21 }
  0x36   : > { %546 = vst.msk [vmem:[#allocation3 + $0x40] sm:$0xff] %vm11463_vm0, %v7946_v52  ;;  %548 = vst.msk [vmem:[#allocation3 + $0x60] sm:$0xff] %vm11463_vm0, %v7948_v55  ;;  %v443_v61 = vld [vmem:[#allocation2 + $0x92] sm:$0x1]  ;;  %v511_v4 = vld [vmem:[#allocation2 + $0x8] sm:$0xff]  ;;  %s7603_s22 = scalar_lea.vmem %s7602_s21, 8192 }
  0x37   : > { %492 = vst.msk [vmem:[#allocation2 + $0x11] sm:$0x1] %vm455_vm1, %v474_v54  ;;  %v7954_v56 = vld [vmem:[#allocation2 + $0x3a] sm:$0xff]  ;;  %456 = vst.msk [vmem:[#allocation2] sm:$0x1] %vm455_vm1, %v437_v58  ;;  %v1347_v25 = vld [vmem:[#allocation2 + $0x22] sm:$0xff]  ;;  %7398 = vmatpush1.bf16.msra.mxu0 %v7397_v33  ;;  %7504 = vmatpush1.bf16.msra.mxu1 %v7397_v33 }
  0x38   : > { %v7962_v60 = vld [vmem:[#allocation2 + $0x60] sm:$0xff]  ;;  %1958 = vst.msk [vmem:[#allocation3 + $0x18] sm:$0xff] %vm11463_vm0, %v7954_v56  ;;  %1963 = vst.msk [vmem:[#allocation3 + $0x68] sm:$0xff] %vm11463_vm0, %v7956_v57  ;;  %831 = vrot.lane.b32.xlu0 %v767_v53, %s7667_s13  ;;  %1024 = vrot.lane.b32.xlu1 %v960_v51, %s7663_s29  ;;  %v1990_v24 = vld [vmem:[#allocation3 + $0x8] sm:$0xff] }
  0x39   : > { %v7970_v62 = vld [vmem:[#allocation2 + $0x52] sm:$0xff]  ;;  %462 = vst.msk [vmem:[#allocation2 + $0x90] sm:$0x1] %vm455_vm1, %v443_v61  ;;  %v479_v8 = vld [vmem:[#allocation2 + $0x87] sm:$0x1]  ;;  %7003 = vmatprep.mubr.msk.f32.mxu0 %vm11463_vm0, %v1990_v24  ;;  %11483 = vst [vmem:[#allocation21_spill] sm:$0xff] %v8015_v26  ;;  %7399 = vmatprep.subr.bf16.mxu0 %v11415_v2 }
  0x3a   : > { %550 = vst.msk [vmem:[#allocation3 + $0x80] sm:$0xff] %vm11463_vm0, %v7962_v60  ;;  %v7981_v1 = vld [vmem:[#allocation2 + $0x78] sm:$0xff]  ;;  %1960 = vst.msk [vmem:[#allocation3 + $0x38] sm:$0xff] %vm11463_vm0, %v7970_v62  ;;  %v2069_v34 = vld [vmem:[%s11403_s1 + $0x80] sm:$0xff]  ;;  %7496 = vmatprep.subr.bf16.mxu1 %v11415_v2 }
  0x3b   : > { %v7988_v6 = vld [vmem:[#allocation2 + $0x6a] sm:$0xff]  ;;  %543 = vst.msk [vmem:[#allocation3 + $0x10] sm:$0xff] %vm11463_vm0, %v511_v4  ;;  %552 = vst.msk [vmem:[#allocation3 + $0xa0] sm:$0xff] %vm11463_vm0, %v7981_v1  ;;  %v8222_v24 = vld [vmem:[#allocation2 + $0x81] sm:$0xff] }
  0x3c   : > { %497 = vst.msk [vmem:[#allocation2 + $0x89] sm:$0x1] %vm455_vm1, %v479_v8  ;;  %640 = vrot.lane.b32.xlu0 %v575_v59, %s7666_s12  ;;  %1603 = vrot.lane.b32.xlu1 %v7946_v52, %s7668_s14  ;;  %v2070_v35 = vld [vmem:[%s11403_s1 + $0x88] sm:$0xff]  ;;  %v1735_v59 = vld [vmem:[#allocation2 + $0x51] sm:$0xff]  ;;  %11487 = vst [vmem:[#allocation24_spill] sm:$0xff] %v8120_v63 }
  0x3d   : > { %1962 = vst.msk [vmem:[#allocation3 + $0x58] sm:$0xff] %vm11463_vm0, %v7988_v6  ;;  %405 = vst.msk [vmem:[#allocation2 + $0x99] sm:$0xff] %vm11463_vm0, %v7999_v19  ;;  %v7400_v40 = vpack.c.bf16 %v2070_v35, %v2069_v34  ;;  %v8064_v48 = vld [vmem:[%s7799_s26 + $0x68] sm:$0xff]  ;;  %v1738_v8 = vld [vmem:[#allocation2 + $0x79] sm:$0xff] }
  0x3e   : > { %v510_v27 = vld [vmem:[#allocation2] sm:$0xff]  ;;  %406 = vst.msk [vmem:[#allocation2 + $0xa9] sm:$0xff] %vm11463_vm0, %v8015_v26  ;;  %11484 = vst [vmem:[#allocation22_spill] sm:$0xff] %v8064_v48  ;;  %v1734_v54 = vld [vmem:[#allocation2 + $0x49] sm:$0xff] }
  0x3f   : > { %542 = vst.msk [vmem:[#allocation3] sm:$0xff] %vm11463_vm0, %v510_v27  ;;  %7401 = vmatpush1.bf16.msra.mxu0 %v7400_v40  ;;  %7505 = vmatpush1.bf16.msra.mxu1 %v7400_v40  ;;  %407 = vst.msk [vmem:[#allocation2 + $0xb1] sm:$0xff] %vm11463_vm0, %v8064_v48  ;;  %v1737_v4 = vld [vmem:[#allocation2 + $0x69] sm:$0xff]  ;;  %v8239_v34 = vld [vmem:[%s7799_s26 + $0xa0] sm:$0xff] }
  0x40   : > { %v8023_v28 = vld [vmem:[#allocation2 + $0x90] sm:$0xff]  ;;  %1412 = vrot.lane.b32.xlu0 %v1347_v25, %s7664_s30  ;;  %835 = vrot.lane.b32.xlu1 %v7882_v29, %s7667_s13  ;;  %409 = vst.msk [vmem:[#allocation2 + $0xc9] sm:$0xff] %vm11463_vm0, %v8120_v63  ;;  %410 = vst.msk [vmem:[#allocation2 + $0xd9] sm:$0xff] %vm11463_vm0, %v8131_v0  ;;  %v10251_v63 = vld [vmem:[%s11406_s4] ss:$0 sm:$0xff] }
  0x41   : > { %554 = vst.msk [vmem:[#allocation3 + $0xc0] sm:$0xff] %vm11463_vm0, %v8023_v28  ;;  %v768_v29 = vld [vmem:[#allocation2 + $0xa] sm:$0xff]  ;;  %7429 = vmatprep.subr.bf16.mxu0 %v11415_v2  ;;  %7402 = vmatprep.subr.bf16.mxu1 %v11415_v2  ;;  %412 = vst.msk [vmem:[#allocation2 + $0xf1] sm:$0xff] %vm11463_vm0, %v8182_v5 }
  0x42   : > { %414 = vst.msk [vmem:[#allocation2 + $0x109] sm:$0xff] %vm11463_vm0, %v8239_v34 }
  0x43   : > { %v8035_v36 = vld [vmem:[#allocation2 + $0x82] sm:$0xff] }
  0x44   : > { %v8040_v39 = vld [vmem:[#allocation2 + $0x98] sm:$0xff]  ;;  %1964 = vst.msk [vmem:[#allocation3 + $0x78] sm:$0xff] %vm11463_vm0, %v8035_v36  ;;  %1605 = vrot.lane.b32.xlu0 %v7901_v37, %s7668_s14  ;;  %1028 = vrot.lane.b32.xlu1 %v7946_v52, %s7663_s29  ;;  %v8079_v52 = vld [vmem:[%s7799_s26 + $0x70] sm:$0xff] }
  0x45   : > { %v8042_v43 = vld [vmem:[#allocation2 + $0x92] sm:$0xff]  ;;  %555 = vst.msk [vmem:[#allocation3 + $0xd0] sm:$0xff] %vm11463_vm0, %v8040_v39  ;;  %v444_v44 = vld [vmem:[#allocation2 + $0xaa] sm:$0x1]  ;;  %v480_v47 = vld [vmem:[#allocation2 + $0x9f] sm:$0x1] }
  0x46   : > { %1965 = vst.msk [vmem:[#allocation3 + $0x88] sm:$0xff] %vm11463_vm0, %v8042_v43  ;;  %11486 = vst [vmem:[#allocation23_spill] sm:$0xff] %v8079_v52  ;;  %v8089_v53 = vld [vmem:[#allocation2 + $0xb0] sm:$0xff] }
  0x47   : > { %463 = vst.msk [vmem:[#allocation2 + $0xa8] sm:$0x1] %vm455_vm1, %v444_v44  ;;  %498 = vst.msk [vmem:[#allocation2 + $0xa1] sm:$0x1] %vm455_vm1, %v480_v47  ;;  %v8100_v58 = vld [vmem:[#allocation2 + $0xaa] sm:$0xff] }
  0x48   : > { %833 = vrot.lane.b32.xlu0 %v768_v29, %s7667_s13  ;;  %1221 = vrot.lane.b32.xlu1 %v7889_v31, %s7662_s28  ;;  %408 = vst.msk [vmem:[#allocation2 + $0xc1] sm:$0xff] %vm11463_vm0, %v8079_v52  ;;  %557 = vst.msk [vmem:[#allocation3 + $0xf0] sm:$0xff] %vm11463_vm0, %v8089_v53  ;;  %v447_v9 = vld [vmem:[#allocation2 + $0xf2] sm:$0x1] }
  0x49   : > { %1967 = vst.msk [vmem:[#allocation3 + $0xa8] sm:$0xff] %vm11463_vm0, %v8100_v58  ;;  %v8253_v44 = vld [vmem:[#allocation2 + $0x91] sm:$0xff] }
  0x4a   : > { %466 = vst.msk [vmem:[#allocation2 + $0xf0] sm:$0x1] %vm455_vm1, %v447_v9  ;;  %v8291_v9 = vld [vmem:[#allocation2 + $0x99] sm:$0xff] }
  0x4c   : > { %1798 = vrot.lane.b32.xlu0 %v7891_v32, %s11485_s27  ;;  %1414 = vrot.lane.b32.xlu1 %v7903_v38, %s7664_s30 }
  0x4e   : > { %v8070_v50 = vld [vmem:[#allocation2 + $0xa8] sm:$0xff]  ;;  %v8076_v51 = vld [vmem:[#allocation2 + $0x9a] sm:$0xff] }
  0x4f   : > { %556 = vst.msk [vmem:[#allocation3 + $0xe0] sm:$0xff] %vm11463_vm0, %v8070_v50  ;;  %1966 = vst.msk [vmem:[#allocation3 + $0x98] sm:$0xff] %vm11463_vm0, %v8076_v51  ;;  %v8152_v3 = vld [vmem:[#allocation2 + $0xc2] sm:$0xff] }
  0x50   : > { %644 = vrot.lane.b32.xlu0 %v7887_v30, %s7666_s12  ;;  %1607 = vrot.lane.b32.xlu1 %v7948_v55, %s7668_s14  ;;  %v445_v30 = vld [vmem:[#allocation2 + $0xc2] sm:$0x1]  ;;  %1969 = vst.msk [vmem:[#allocation3 + $0xc8] sm:$0xff] %vm11463_vm0, %v8152_v3 }
  0x51   : > { %464 = vst.msk [vmem:[#allocation2 + $0xc0] sm:$0x1] %vm455_vm1, %v445_v30  ;;  %v448_v30 = vld [vmem:[#allocation2 + $0x10a] sm:$0x1] }
  0x52   : > { %467 = vst.msk [vmem:[#allocation2 + $0x108] sm:$0x1] %vm455_vm1, %v448_v30 }
  0x54   : > { %837 = vrot.lane.b32.xlu0 %v1347_v25, %s7667_s13  ;;  %1800 = vrot.lane.b32.xlu1 %v1734_v54, %s11485_s27  ;;  %v8226_v25 = vld [vmem:[%s7799_s26 + $0x98] sm:$0xff] }
  0x55   : > { %413 = vst.msk [vmem:[#allocation2 + $0xf9] sm:$0xff] %vm11463_vm0, %v8226_v25 }
  0x58   : > { %1030 = vrot.lane.b32.xlu0 %v7901_v37, %s7663_s29  ;;  %1416 = vrot.lane.b32.xlu1 %v7954_v56, %s7664_s30  ;;  %v8107_v61 = vld [vmem:[#allocation2 + $0xc0] sm:$0xff]  ;;  %v481_v37 = vld [vmem:[#allocation2 + $0xb7] sm:$0x1] }
  0x59   : > { %558 = vst.msk [vmem:[#allocation3 + $0x100] sm:$0xff] %vm11463_vm0, %v8107_v61 }
  0x5a   : > { %499 = vst.msk [vmem:[#allocation2 + $0xb9] sm:$0x1] %vm455_vm1, %v481_v37 }
  0x5c   : > { %1223 = vrot.lane.b32.xlu0 %v7891_v32, %s7662_s28  ;;  %1802 = vrot.lane.b32.xlu1 %v1735_v59, %s11485_s27  ;;  %v8249_v29 = vld [vmem:[#allocation2 + $0xf8] sm:$0xff] }
  0x5d   : > { %563 = vst.msk [vmem:[#allocation3 + $0x150] sm:$0xff] %vm11463_vm0, %v8249_v29  ;;  %v8268_v37 = vld [vmem:[#allocation2 + $0xf2] sm:$0xff] }
  0x5e   : > { %1973 = vst.msk [vmem:[#allocation3 + $0x108] sm:$0xff] %vm11463_vm0, %v8268_v37 }
  0x60   : > { %1609 = vrot.lane.b32.xlu0 %v7908_v41, %s7668_s14  ;;  %839 = vrot.lane.b32.xlu1 %v7903_v38, %s7667_s13 }
  0x61   : > { %v8128_v38 = vld [vmem:[#allocation2 + $0xb2] sm:$0xff] }
  0x62   : > { %1968 = vst.msk [vmem:[#allocation3 + $0xb8] sm:$0xff] %vm11463_vm0, %v8128_v38 }
  0x64   : > { %646 = vrot.lane.b32.xlu0 %v7889_v31, %s7666_s12  ;;  %1225 = vrot.lane.b32.xlu1 %v1734_v54, %s7662_s28  ;;  %v8141_v31 = vld [vmem:[#allocation2 + $0xc8] sm:$0xff] }
  0x65   : > { %559 = vst.msk [vmem:[#allocation3 + $0x110] sm:$0xff] %vm11463_vm0, %v8141_v31 }
  0x68   : > { %1032 = vrot.lane.b32.xlu0 %v7948_v55, %s7663_s29  ;;  %1418 = vrot.lane.b32.xlu1 %v7919_v42, %s7664_s30  ;;  %v1736_v55 = vld [vmem:[#allocation2 + $0x61] sm:$0xff] }
  0x6c   : > { %648 = vrot.lane.b32.xlu0 %v7891_v32, %s7666_s12  ;;  %1611 = vrot.lane.b32.xlu1 %v7962_v60, %s7668_s14  ;;  %v446_v32 = vld [vmem:[#allocation2 + $0xda] sm:$0x1] }
  0x6d   : > { %465 = vst.msk [vmem:[#allocation2 + $0xd8] sm:$0x1] %vm455_vm1, %v446_v32  ;;  %v8279_v32 = vld [vmem:[#allocation2 + $0x108] sm:$0xff] }
  0x6e   : > { %564 = vst.msk [vmem:[#allocation3 + $0x160] sm:$0xff] %vm11463_vm0, %v8279_v32 }
  0x70   : > { %841 = vrot.lane.b32.xlu0 %v7954_v56, %s7667_s13  ;;  %1804 = vrot.lane.b32.xlu1 %v1736_v55, %s11485_s27 }
  0x74   : > { %1034 = vrot.lane.b32.xlu0 %v7908_v41, %s7663_s29  ;;  %650 = vrot.lane.b32.xlu1 %v1734_v54, %s7666_s12  ;;  %v8159_v56 = vld [vmem:[#allocation2 + $0xd8] sm:$0xff]  ;;  %v482_v41 = vld [vmem:[#allocation2 + $0xcf] sm:$0x1] }
  0x75   : > { %560 = vst.msk [vmem:[#allocation3 + $0x120] sm:$0xff] %vm11463_vm0, %v8159_v56 }
  0x76   : > { %500 = vst.msk [vmem:[#allocation2 + $0xd1] sm:$0x1] %vm455_vm1, %v482_v41 }
  0x78   : > { %1227 = vrot.lane.b32.xlu0 %v1735_v59, %s7662_s28  ;;  %843 = vrot.lane.b32.xlu1 %v7919_v42, %s7667_s13  ;;  %v8172_v42 = vld [vmem:[%s7799_s26 + $0x88] sm:$0xff] }
  0x79   : > { %411 = vst.msk [vmem:[#allocation2 + $0xe1] sm:$0xff] %vm11463_vm0, %v8172_v42 }
  0x7c   : > { %1420 = vrot.lane.b32.xlu0 %v7970_v62, %s7664_s30  ;;  %1036 = vrot.lane.b32.xlu1 %v7962_v60, %s7663_s29 }
  0x7d   : > { %v8179_v60 = vld [vmem:[#allocation2 + $0xca] sm:$0xff] }
  0x7e   : > { %1970 = vst.msk [vmem:[#allocation3 + $0xd8] sm:$0xff] %vm11463_vm0, %v8179_v60 }
  0x80   : > { %1613 = vrot.lane.b32.xlu0 %v7924_v45, %s7668_s14  ;;  %1229 = vrot.lane.b32.xlu1 %v1736_v55, %s7662_s28  ;;  %v8191_v7 = vld [vmem:[#allocation2 + $0xe0] sm:$0xff] }
  0x81   : > { %561 = vst.msk [vmem:[#allocation3 + $0x130] sm:$0xff] %vm11463_vm0, %v8191_v7  ;;  %v8202_v21 = vld [vmem:[#allocation2 + $0xda] sm:$0xff] }
  0x82   : > { %1971 = vst.msk [vmem:[#allocation3 + $0xe8] sm:$0xff] %vm11463_vm0, %v8202_v21 }
  0x84   : > { %1806 = vrot.lane.b32.xlu0 %v1737_v4, %s11485_s27  ;;  %1422 = vrot.lane.b32.xlu1 %v7929_v46, %s7664_s30 }
  0x88   : > { %652 = vrot.lane.b32.xlu0 %v1735_v59, %s7666_s12  ;;  %1615 = vrot.lane.b32.xlu1 %v7981_v1, %s7668_s14 }
  0x8c   : > { %845 = vrot.lane.b32.xlu0 %v7970_v62, %s7667_s13  ;;  %1808 = vrot.lane.b32.xlu1 %v1738_v8, %s11485_s27  ;;  %v8209_v62 = vld [vmem:[#allocation2 + $0xf0] sm:$0xff] }
  0x8d   : > { %562 = vst.msk [vmem:[#allocation3 + $0x140] sm:$0xff] %vm11463_vm0, %v8209_v62 }
  0x90   : > { %1038 = vrot.lane.b32.xlu0 %v7924_v45, %s7663_s29  ;;  %654 = vrot.lane.b32.xlu1 %v1736_v55, %s7666_s12  ;;  %v483_v45 = vld [vmem:[#allocation2 + $0xe7] sm:$0x1] }
  0x91   : > { %501 = vst.msk [vmem:[#allocation2 + $0xe9] sm:$0x1] %vm455_vm1, %v483_v45  ;;  %v1992_v45 = vld [vmem:[#allocation3 + $0x18] sm:$0xff] }
  0x94   : > { %1231 = vrot.lane.b32.xlu0 %v1737_v4, %s7662_s28  ;;  %847 = vrot.lane.b32.xlu1 %v7929_v46, %s7667_s13 }
  0x98   : > { %1424 = vrot.lane.b32.xlu0 %v7988_v6, %s7664_s30  ;;  %1040 = vrot.lane.b32.xlu1 %v7981_v1, %s7663_s29  ;;  %v8236_v33 = vld [vmem:[#allocation2 + $0xe2] sm:$0xff] }
  0x99   : > { %1972 = vst.msk [vmem:[#allocation3 + $0xf8] sm:$0xff] %vm11463_vm0, %v8236_v33 }
  0x9a   : > { %v1218_v22 = vpop.permute.xlu1 %1217 }
  0x9b   : > { %v8220_v46 = vpop.permute.xlu0 %1026 }
  0x9c   : > { %1617 = vrot.lane.b32.xlu0 %v7936_v49, %s7668_s14  ;;  %1233 = vrot.lane.b32.xlu1 %v1738_v8, %s7662_s28 }
  0x9e   : > { %v1411_v1 = vpop.permute.xlu1 %1410 }
  0x9f   : > { %v8232_v27 = vpop.permute.xlu0 %1219 }
  0xa0   : > { %1810 = vrot.lane.b32.xlu0 %v8222_v24, %s11485_s27  ;;  %1426 = vrot.lane.b32.xlu1 %v7956_v57, %s7664_s30 }
  0xa2   : > { %v1797_v35 = vpop.permute.xlu1 %1796 }
  0xa4   : > { %656 = vrot.lane.b32.xlu0 %v1737_v4, %s7666_s12  ;;  %1619 = vrot.lane.b32.xlu1 %v8023_v28, %s7668_s14 }
  0xa6   : > { %v639_v40 = vpop.permute.xlu0 %638  ;;  %v643_v47 = vpop.permute.xlu1 %642 }
  0xa7   : > { %735 = vst.msk [vmem:[#allocation3] sm:$0xff] %vm734_vm2, %v639_v40  ;;  %737 = vst.msk [vmem:[#allocation3 + $0x20] sm:$0xff] %vm734_vm2, %v643_v47 }
  0xa8   : > { %849 = vrot.lane.b32.xlu0 %v7988_v6, %s7667_s13  ;;  %1812 = vrot.lane.b32.xlu1 %v8253_v44, %s11485_s27 }
  0xaa   : > { %v832_v54 = vpop.permute.xlu0 %831  ;;  %v1025_v6 = vpop.permute.xlu1 %1024 }
  0xab   : > { %928 = vst.msk [vmem:[#allocation3] sm:$0xff] %vm927_vm3, %v832_v54 }
  0xac   : > { %1042 = vrot.lane.b32.xlu0 %v7936_v49, %s7663_s29  ;;  %1121 = vst.msk [vmem:[#allocation3] sm:$0xff] %vm1120_vm4, %v1025_v6  ;;  %658 = vrot.lane.b32.xlu1 %v1738_v8, %s7666_s12  ;;  %v484_v8 = vld [vmem:[#allocation2 + $0xff] sm:$0x1] }
  0xad   : > { %1314 = vst.msk [vmem:[#allocation3] sm:$0xff] %vm1313_vm5, %v1218_v22 }
  0xae   : > { %v641_v59 = vpop.permute.xlu0 %640  ;;  %1507 = vst.msk [vmem:[#allocation3] sm:$0xff] %vm1506_vm6, %v1411_v1  ;;  %v1604_v49 = vpop.permute.xlu1 %1603 }
  0xaf   : > { %736 = vst.msk [vmem:[#allocation3 + $0x10] sm:$0xff] %vm734_vm2, %v641_v59  ;;  %v8334_v59 = vld [vmem:[#allocation2 + $0xa9] sm:$0xff] }
  0xb0   : > { %1235 = vrot.lane.b32.xlu0 %v8222_v24, %s7662_s28  ;;  %1700 = vst.msk [vmem:[#allocation3] sm:$0xff] %vm1699_vm7, %v1604_v49  ;;  %851 = vrot.lane.b32.xlu1 %v7956_v57, %s7667_s13 }
  0xb1   : > { %1893 = vst.msk [vmem:[#allocation3] sm:$0xff] %vm1892_vm8, %v1797_v35  ;;  %v8301_v35 = vld [vmem:[%s7799_s26 + $0xb0] sm:$0xff] }
  0xb2   : > { %v1413_v55 = vpop.permute.xlu0 %1412  ;;  %v836_v41 = vpop.permute.xlu1 %835  ;;  %502 = vst.msk [vmem:[#allocation2 + $0x101] sm:$0x1] %vm455_vm1, %v484_v8 }
  0xb3   : > { %930 = vst.msk [vmem:[#allocation3 + $0x20] sm:$0xff] %vm927_vm3, %v836_v41 }
  0xb4   : > { %1428 = vrot.lane.b32.xlu0 %v8035_v36, %s7664_s30  ;;  %1044 = vrot.lane.b32.xlu1 %v8023_v28, %s7663_s29  ;;  %v8298_v28 = vld [vmem:[%s7799_s26 + $0xa8] sm:$0xff]  ;;  %416 = vst.msk [vmem:[#allocation2 + $0x121] sm:$0xff] %vm11463_vm0, %v8301_v35 }
  0xb5   : > { %415 = vst.msk [vmem:[#allocation2 + $0x111] sm:$0xff] %vm11463_vm0, %v8298_v28 }
  0xb6   : > { %v1606_v4 = vpop.permute.xlu0 %1605  ;;  %v1029_v57 = vpop.permute.xlu1 %1028 }
  0xb7   : > { %1123 = vst.msk [vmem:[#allocation3 + $0x20] sm:$0xff] %vm1120_vm4, %v1029_v57 }
  0xb8   : > { %1621 = vrot.lane.b32.xlu0 %v8040_v39, %s7668_s14  ;;  %v1989_v1 = vld [vmem:[#allocation3] sm:$0xff]  ;;  %1237 = vrot.lane.b32.xlu1 %v8253_v44, %s7662_s28 }
  0xb9   : > { %2239 = vmatmul.mubr.f32.vlgmr.msra.gmra.mrb[0].mxu0 %v1989_v1 }
  0xba   : > { %v834_v22 = vpop.permute.xlu0 %833  ;;  %7004 = vmatprep.mubr.msk.f32.mxu0 %vm11463_vm0, %v1992_v45  ;;  %v1222_v40 = vpop.permute.xlu1 %1221 }
  0xbb   : > { %929 = vst.msk [vmem:[#allocation3 + $0x10] sm:$0xff] %vm927_vm3, %v834_v22  ;;  %v449_v6 = vld [vmem:[#allocation2 + $0x122] sm:$0x1] }
  0xbc   : > { %1122 = vst.msk [vmem:[#allocation3 + $0x10] sm:$0xff] %vm1120_vm4, %v8220_v46  ;;  %1814 = vrot.lane.b32.xlu0 %v8291_v9, %s11485_s27  ;;  %1430 = vrot.lane.b32.xlu1 %v8042_v43, %s7664_s30  ;;  %v8319_v46 = vld [vmem:[#allocation2 + $0xfa] sm:$0xff]  ;;  %v8330_v30 = vld [vmem:[#allocation2 + $0x110] sm:$0xff] }
  0xbd   : > { %1315 = vst.msk [vmem:[#allocation3 + $0x10] sm:$0xff] %vm1313_vm5, %v8232_v27  ;;  %1316 = vst.msk [vmem:[#allocation3 + $0x20] sm:$0xff] %vm1313_vm5, %v1222_v40  ;;  %v8350_v8 = vld [vmem:[#allocation2 + $0x10a] sm:$0xff] }
  0xbe   : > { %1508 = vst.msk [vmem:[#allocation3 + $0x10] sm:$0xff] %vm1506_vm6, %v1413_v55  ;;  %v1799_v47 = vpop.permute.xlu0 %1798  ;;  %v1415_v27 = vpop.permute.xlu1 %1414  ;;  %v1994_v55 = vld [vmem:[#allocation3 + $0x28] sm:$0xff] }
  0xbf   : > { %1701 = vst.msk [vmem:[#allocation3 + $0x10] sm:$0xff] %vm1699_vm7, %v1606_v4 }
  0xc0   : > { %1894 = vst.msk [vmem:[#allocation3 + $0x10] sm:$0xff] %vm1892_vm8, %v1799_v47  ;;  %660 = vrot.lane.b32.xlu0 %v8222_v24, %s7666_s12  ;;  %1623 = vrot.lane.b32.xlu1 %v8070_v50, %s7668_s14  ;;  %v8371_v47 = vld [vmem:[%s7799_s26 + $0xc0] sm:$0xff] }
  0xc1   : > { %1974 = vst.msk [vmem:[#allocation3 + $0x118] sm:$0xff] %vm11463_vm0, %v8319_v46  ;;  %565 = vst.msk [vmem:[#allocation3 + $0x170] sm:$0xff] %vm11463_vm0, %v8330_v30 }
  0xc2   : > { %v645_v54 = vpop.permute.xlu0 %644  ;;  %1509 = vst.msk [vmem:[#allocation3 + $0x20] sm:$0xff] %vm1506_vm6, %v1415_v27  ;;  %v1608_v24 = vpop.permute.xlu1 %1607  ;;  %11488 = vst [vmem:[#allocation25_spill] sm:$0xff] %v8371_v47  ;;  %v8378_v27 = vld [vmem:[#allocation2 + $0xb1] sm:$0xff] }
  0xc3   : > { %738 = vst.msk [vmem:[#allocation3 + $0x30] sm:$0xff] %vm734_vm2, %v645_v54 }
  0xc4   : > { %853 = vrot.lane.b32.xlu0 %v8035_v36, %s7667_s13  ;;  %468 = vst.msk [vmem:[#allocation2 + $0x120] sm:$0x1] %vm455_vm1, %v449_v6  ;;  %1816 = vrot.lane.b32.xlu1 %v8334_v59, %s11485_s27  ;;  %v485_v6 = vld [vmem:[#allocation2 + $0x117] sm:$0x1] }
  0xc5   : > { %1702 = vst.msk [vmem:[#allocation3 + $0x20] sm:$0xff] %vm1699_vm7, %v1608_v24 }
  0xc6   : > { %v838_v49 = vpop.permute.xlu0 %837  ;;  %v1801_v36 = vpop.permute.xlu1 %1800  ;;  %1975 = vst.msk [vmem:[#allocation3 + $0x128] sm:$0xff] %vm11463_vm0, %v8350_v8  ;;  %418 = vst.msk [vmem:[#allocation2 + $0x139] sm:$0xff] %vm11463_vm0, %v8371_v47 }
  0xc7   : > { %931 = vst.msk [vmem:[#allocation3 + $0x30] sm:$0xff] %vm927_vm3, %v838_v49  ;;  %v1991_v41 = vld [vmem:[#allocation3 + $0x10] sm:$0xff] }
  0xc8   : > { %1046 = vrot.lane.b32.xlu0 %v8040_v39, %s7663_s29  ;;  %2244 = vmatmul.mubr.f32.gmra.mrb[2].mxu0 %v1991_v41  ;;  %1895 = vst.msk [vmem:[#allocation3 + $0x20] sm:$0xff] %vm1892_vm8, %v1801_v36 }
  0xc9   : > { %7005 = vmatprep.mubr.msk.f32.mxu0 %vm11463_vm0, %v1994_v55  ;;  %662 = vrot.lane.b32.xlu1 %v8253_v44, %s7666_s12  ;;  %v1996_v44 = vld [vmem:[#allocation3 + $0x38] sm:$0xff]  ;;  %503 = vst.msk [vmem:[#allocation2 + $0x119] sm:$0x1] %vm455_vm1, %v485_v6  ;;  %v1998_v55 = vld [vmem:[#allocation3 + $0x48] sm:$0xff] }
  0xca   : > { %v1031_v4 = vpop.permute.xlu0 %1030  ;;  %v1417_v39 = vpop.permute.xlu1 %1416 }
  0xcb   : > { %1124 = vst.msk [vmem:[#allocation3 + $0x30] sm:$0xff] %vm1120_vm4, %v1031_v4  ;;  %v8352_v57 = vld [vmem:[#allocation2 + $0x120] sm:$0xff] }
  0xcc   : > { %1239 = vrot.lane.b32.xlu0 %v8291_v9, %s7662_s28  ;;  %566 = vst.msk [vmem:[#allocation3 + $0x180] sm:$0xff] %vm11463_vm0, %v8352_v57 }
  0xcd   : > { %855 = vrot.lane.b32.xlu1 %v8042_v43, %s7667_s13  ;;  %v450_v36 = vld [vmem:[#allocation2 + $0x13a] sm:$0x1] }
  0xce   : > { %v1224_v45 = vpop.permute.xlu0 %1223  ;;  %v1803_v22 = vpop.permute.xlu1 %1802  ;;  %469 = vst.msk [vmem:[#allocation2 + $0x138] sm:$0x1] %vm455_vm1, %v450_v36  ;;  %v8451_v36 = vld [vmem:[#allocation2 + $0xc9] sm:$0xff] }
  0xcf   : > { %1317 = vst.msk [vmem:[#allocation3 + $0x30] sm:$0xff] %vm1313_vm5, %v1224_v45  ;;  %v1993_v1 = vld [vmem:[#allocation3 + $0x20] sm:$0xff] }
  0xd0   : > { %1510 = vst.msk [vmem:[#allocation3 + $0x30] sm:$0xff] %vm1506_vm6, %v1417_v39  ;;  %1432 = vrot.lane.b32.xlu0 %v8076_v51, %s7664_s30  ;;  %2249 = vmatmul.mubr.f32.gmra.mrb[4].mxu0 %v1993_v1 }
  0xd1   : > { %1048 = vrot.lane.b32.xlu1 %v8070_v50, %s7663_s29  ;;  %7006 = vmatprep.mubr.msk.f32.mxu0 %vm11463_vm0, %v1996_v44  ;;  %v8384_v50 = vld [vmem:[%s7799_s26 + $0xb8] sm:$0xff] }
  0xd2   : > { %v1610_v40 = vpop.permute.xlu0 %1609  ;;  %v840_v43 = vpop.permute.xlu1 %839  ;;  %417 = vst.msk [vmem:[#allocation2 + $0x129] sm:$0xff] %vm11463_vm0, %v8384_v50  ;;  %v8406_v44 = vld [vmem:[#allocation2 + $0x112] sm:$0xff] }
  0xd3   : > { %1703 = vst.msk [vmem:[#allocation3 + $0x30] sm:$0xff] %vm1699_vm7, %v1610_v40 }
  0xd4   : > { %1896 = vst.msk [vmem:[#allocation3 + $0x30] sm:$0xff] %vm1892_vm8, %v1803_v22  ;;  %1625 = vrot.lane.b32.xlu0 %v8089_v53, %s7668_s14 }
  0xd5   : > { %1241 = vrot.lane.b32.xlu1 %v8334_v59, %s7662_s28  ;;  %1976 = vst.msk [vmem:[#allocation3 + $0x138] sm:$0xff] %vm11463_vm0, %v8406_v44 }
  0xd6   : > { %v647_v54 = vpop.permute.xlu0 %646  ;;  %v1226_v24 = vpop.permute.xlu1 %1225 }
  0xd7   : > { %739 = vst.msk [vmem:[#allocation3 + $0x40] sm:$0xff] %vm734_vm2, %v647_v54 }
  0xd8   : > { %932 = vst.msk [vmem:[#allocation3 + $0x40] sm:$0xff] %vm927_vm3, %v840_v43  ;;  %1818 = vrot.lane.b32.xlu0 %v8378_v27, %s11485_s27 }
  0xd9   : > { %1434 = vrot.lane.b32.xlu1 %v8100_v58, %s7664_s30  ;;  %v8404_v45 = vld [vmem:[#allocation2 + $0x122] sm:$0xff] }
  0xda   : > { %v1033_v49 = vpop.permute.xlu0 %1032  ;;  %v1419_v4 = vpop.permute.xlu1 %1418  ;;  %1977 = vst.msk [vmem:[#allocation3 + $0x148] sm:$0xff] %vm11463_vm0, %v8404_v45  ;;  %v8426_v43 = vld [vmem:[#allocation2 + $0x128] sm:$0xff] }
  0xdb   : > { %1125 = vst.msk [vmem:[#allocation3 + $0x40] sm:$0xff] %vm1120_vm4, %v1033_v49  ;;  %v1995_v41 = vld [vmem:[#allocation3 + $0x30] sm:$0xff] }
  0xdc   : > { %1318 = vst.msk [vmem:[#allocation3 + $0x40] sm:$0xff] %vm1313_vm5, %v1226_v24  ;;  %664 = vrot.lane.b32.xlu0 %v8291_v9, %s7666_s12  ;;  %2254 = vmatmul.mubr.f32.gmra.mrb[6].mxu0 %v1995_v41  ;;  %v8410_v9 = vld [vmem:[#allocation2 + $0xc1] sm:$0xff] }
  0xdd   : > { %7007 = vmatprep.mubr.msk.f32.mxu0 %vm11463_vm0, %v1998_v55  ;;  %1511 = vst.msk [vmem:[#allocation3 + $0x40] sm:$0xff] %vm1506_vm6, %v1419_v4  ;;  %1627 = vrot.lane.b32.xlu1 %v8107_v61, %s7668_s14 }
  0xde   : > { %v649_v39 = vpop.permute.xlu0 %648  ;;  %v1612_v22 = vpop.permute.xlu1 %1611  ;;  %567 = vst.msk [vmem:[#allocation3 + $0x190] sm:$0xff] %vm11463_vm0, %v8426_v43 }
  0xdf   : > { %740 = vst.msk [vmem:[#allocation3 + $0x50] sm:$0xff] %vm734_vm2, %v649_v39 }
  0xe0   : > { %857 = vrot.lane.b32.xlu0 %v8076_v51, %s7667_s13  ;;  %1704 = vst.msk [vmem:[#allocation3 + $0x40] sm:$0xff] %vm1699_vm7, %v1612_v22 }
  0xe1   : > { %1820 = vrot.lane.b32.xlu1 %v8410_v9, %s11485_s27 }
  0xe2   : > { %v842_v1 = vpop.permute.xlu0 %841  ;;  %v1805_v51 = vpop.permute.xlu1 %1804 }
  0xe3   : > { %933 = vst.msk [vmem:[#allocation3 + $0x50] sm:$0xff] %vm927_vm3, %v842_v1 }
  0xe4   : > { %1050 = vrot.lane.b32.xlu0 %v8089_v53, %s7663_s29  ;;  %1897 = vst.msk [vmem:[#allocation3 + $0x40] sm:$0xff] %vm1892_vm8, %v1805_v51  ;;  %v486_v53 = vld [vmem:[#allocation2 + $0x12f] sm:$0x1]  ;;  %v8470_v51 = vld [vmem:[%s7799_s26 + $0xd0] sm:$0xff] }
  0xe5   : > { %666 = vrot.lane.b32.xlu1 %v8334_v59, %s7666_s12  ;;  %v2000_v59 = vld [vmem:[#allocation3 + $0x58] sm:$0xff]  ;;  %504 = vst.msk [vmem:[#allocation2 + $0x131] sm:$0x1] %vm455_vm1, %v486_v53  ;;  %11490 = vst [vmem:[#allocation27_spill] sm:$0xff] %v8470_v51  ;;  %v2002_v53 = vld [vmem:[#allocation3 + $0x68] sm:$0xff] }
  0xe6   : > { %v1035_v40 = vpop.permute.xlu0 %1034  ;;  %v651_v54 = vpop.permute.xlu1 %650  ;;  %420 = vst.msk [vmem:[#allocation2 + $0x151] sm:$0xff] %vm11463_vm0, %v8470_v51 }
  0xe7   : > { %1126 = vst.msk [vmem:[#allocation3 + $0x50] sm:$0xff] %vm1120_vm4, %v1035_v40 }
  0xe8   : > { %1243 = vrot.lane.b32.xlu0 %v8378_v27, %s7662_s28  ;;  %741 = vst.msk [vmem:[#allocation3 + $0x60] sm:$0xff] %vm734_vm2, %v651_v54 }
  0xe9   : > { %859 = vrot.lane.b32.xlu1 %v8100_v58, %s7667_s13  ;;  %v8445_v58 = vld [vmem:[%s7799_s26 + $0xc8] sm:$0xff] }
  0xea   : > { %v1228_v6 = vpop.permute.xlu0 %1227  ;;  %v844_v24 = vpop.permute.xlu1 %843  ;;  %11489 = vst [vmem:[#allocation26_spill] sm:$0xff] %v8445_v58  ;;  %419 = vst.msk [vmem:[#allocation2 + $0x141] sm:$0xff] %vm11463_vm0, %v8445_v58 }
  0xeb   : > { %1319 = vst.msk [vmem:[#allocation3 + $0x50] sm:$0xff] %vm1313_vm5, %v1228_v6  ;;  %v1997_v49 = vld [vmem:[#allocation3 + $0x40] sm:$0xff]  ;;  %v8484_v6 = vld [vmem:[#allocation2 + $0xd9] sm:$0xff] }
  0xec   : > { %1436 = vrot.lane.b32.xlu0 %v8128_v38, %s7664_s30  ;;  %934 = vst.msk [vmem:[#allocation3 + $0x60] sm:$0xff] %vm927_vm3, %v844_v24  ;;  %2259 = vmatmul.mubr.f32.gmra.mrb[8].mxu0 %v1997_v49 }
  0xed   : > { %1052 = vrot.lane.b32.xlu1 %v8107_v61, %s7663_s29  ;;  %7008 = vmatprep.mubr.msk.f32.mxu0 %vm11463_vm0, %v2000_v59  ;;  %v8457_v61 = vld [vmem:[#allocation2 + $0x12a] sm:$0xff]  ;;  %v451_v49 = vld [vmem:[#allocation2 + $0x152] sm:$0x1] }
  0xee   : > { %v1421_v55 = vpop.permute.xlu0 %1420  ;;  %v1037_v41 = vpop.permute.xlu1 %1036  ;;  %1978 = vst.msk [vmem:[#allocation3 + $0x158] sm:$0xff] %vm11463_vm0, %v8457_v61 }
  0xef   : > { %1512 = vst.msk [vmem:[#allocation3 + $0x50] sm:$0xff] %vm1506_vm6, %v1421_v55 }
  0xf0   : > { %1629 = vrot.lane.b32.xlu0 %v8141_v31, %s7668_s14  ;;  %1127 = vst.msk [vmem:[#allocation3 + $0x60] sm:$0xff] %vm1120_vm4, %v1037_v41 }
  0xf1   : > { %1245 = vrot.lane.b32.xlu1 %v8410_v9, %s7662_s28  ;;  %v8467_v1 = vld [vmem:[#allocation2 + $0x140] sm:$0xff]  ;;  %470 = vst.msk [vmem:[#allocation2 + $0x150] sm:$0x1] %vm455_vm1, %v451_v49 }
  0xf2   : > { %v1614_v4 = vpop.permute.xlu0 %1613  ;;  %v1230_v39 = vpop.permute.xlu1 %1229  ;;  %569 = vst.msk [vmem:[#allocation3 + $0x1b0] sm:$0xff] %vm11463_vm0, %v8467_v1  ;;  %v8498_v41 = vld [vmem:[#allocation2 + $0x13a] sm:$0xff] }
  0xf3   : > { %1705 = vst.msk [vmem:[#allocation3 + $0x50] sm:$0xff] %vm1699_vm7, %v1614_v4 }
  0xf4   : > { %1822 = vrot.lane.b32.xlu0 %v8451_v36, %s11485_s27  ;;  %1320 = vst.msk [vmem:[#allocation3 + $0x60] sm:$0xff] %vm1313_vm5, %v1230_v39 }
  0xf5   : > { %1438 = vrot.lane.b32.xlu1 %v8152_v3, %s7664_s30  ;;  %1979 = vst.msk [vmem:[#allocation3 + $0x168] sm:$0xff] %vm11463_vm0, %v8498_v41 }
  0xf6   : > { %v1807_v22 = vpop.permute.xlu0 %1806  ;;  %v1423_v40 = vpop.permute.xlu1 %1422 }
  0xf7   : > { %1898 = vst.msk [vmem:[#allocation3 + $0x50] sm:$0xff] %vm1892_vm8, %v1807_v22 }
  0xf8   : > { %668 = vrot.lane.b32.xlu0 %v8378_v27, %s7666_s12  ;;  %1513 = vst.msk [vmem:[#allocation3 + $0x60] sm:$0xff] %vm1506_vm6, %v1423_v40  ;;  %v8508_v39 = vld [vmem:[#allocation2 + $0x150] sm:$0xff] }
  0xf9   : > { %1631 = vrot.lane.b32.xlu1 %v8159_v56, %s7668_s14  ;;  %570 = vst.msk [vmem:[#allocation3 + $0x1c0] sm:$0xff] %vm11463_vm0, %v8508_v39 }
  0xfa   : > { %v653_v54 = vpop.permute.xlu0 %652  ;;  %v1616_v27 = vpop.permute.xlu1 %1615 }
  0xfb   : > { %742 = vst.msk [vmem:[#allocation3 + $0x70] sm:$0xff] %vm734_vm2, %v653_v54 }
  0xfc   : > { %861 = vrot.lane.b32.xlu0 %v8128_v38, %s7667_s13  ;;  %1706 = vst.msk [vmem:[#allocation3 + $0x60] sm:$0xff] %vm1699_vm7, %v1616_v27 }
  0xfd   : > { %1824 = vrot.lane.b32.xlu1 %v8484_v6, %s11485_s27 }
  0xfe   : > { %v846_v59 = vpop.permute.xlu0 %845  ;;  %v1999_v24 = vld [vmem:[#allocation3 + $0x50] sm:$0xff]  ;;  %v1809_v38 = vpop.permute.xlu1 %1808 }
  0xff   : > { %935 = vst.msk [vmem:[#allocation3 + $0x70] sm:$0xff] %vm927_vm3, %v846_v59  ;;  %2264 = vmatmul.mubr.f32.gmra.mrb[10].mxu0 %v1999_v24 }
 0x100   : > { %1054 = vrot.lane.b32.xlu0 %v8141_v31, %s7663_s29  ;;  %7009 = vmatprep.mubr.msk.f32.mxu0 %vm11463_vm0, %v2002_v53  ;;  %1899 = vst.msk [vmem:[#allocation3 + $0x60] sm:$0xff] %vm1892_vm8, %v1809_v38  ;;  %v8522_v53 = vld [vmem:[#allocation2 + $0xe1] sm:$0xff] }
 0x101   : > { %670 = vrot.lane.b32.xlu1 %v8410_v9, %s7666_s12  ;;  %v2004_v9 = vld [vmem:[#allocation3 + $0x78] sm:$0xff] }
 0x102   : > { %v1039_v55 = vpop.permute.xlu0 %1038  ;;  %v655_v31 = vpop.permute.xlu1 %654 }
 0x103   : > { %1128 = vst.msk [vmem:[#allocation3 + $0x70] sm:$0xff] %vm1120_vm4, %v1039_v55  ;;  %v8542_v55 = vld [vmem:[%s7799_s26 + $0xe0] sm:$0xff] }
 0x104   : > { %1247 = vrot.lane.b32.xlu0 %v8451_v36, %s7662_s28  ;;  %743 = vst.msk [vmem:[#allocation3 + $0x80] sm:$0xff] %vm734_vm2, %v655_v31  ;;  %11492 = vst [vmem:[#allocation29_spill] sm:$0xff] %v8542_v55 }
 0x105   : > { %863 = vrot.lane.b32.xlu1 %v8152_v3, %s7667_s13  ;;  %v487_v3 = vld [vmem:[#allocation2 + $0x147] sm:$0x1]  ;;  %422 = vst.msk [vmem:[#allocation2 + $0x169] sm:$0xff] %vm11463_vm0, %v8542_v55 }
 0x106   : > { %v1232_v4 = vpop.permute.xlu0 %1231  ;;  %v848_v22 = vpop.permute.xlu1 %847  ;;  %505 = vst.msk [vmem:[#allocation2 + $0x149] sm:$0x1] %vm455_vm1, %v487_v3 }
 0x107   : > { %1321 = vst.msk [vmem:[#allocation3 + $0x70] sm:$0xff] %vm1313_vm5, %v1232_v4  ;;  %v2001_v40 = vld [vmem:[#allocation3 + $0x60] sm:$0xff] }
 0x108   : > { %1440 = vrot.lane.b32.xlu0 %v8179_v60, %s7664_s30  ;;  %936 = vst.msk [vmem:[#allocation3 + $0x80] sm:$0xff] %vm927_vm3, %v848_v22  ;;  %2269 = vmatmul.mubr.f32.gmra.mrb[12].mxu0 %v2001_v40  ;;  %v2006_v40 = vld [vmem:[#allocation3 + $0x88] sm:$0xff] }
 0x109   : > { %1056 = vrot.lane.b32.xlu1 %v8159_v56, %s7663_s29  ;;  %7010 = vmatprep.mubr.msk.f32.mxu0 %vm11463_vm0, %v2004_v9  ;;  %v8529_v56 = vld [vmem:[%s7799_s26 + $0xd8] sm:$0xff] }
 0x10a   : > { %v1425_v54 = vpop.permute.xlu0 %1424  ;;  %v1041_v27 = vpop.permute.xlu1 %1040  ;;  %11491 = vst [vmem:[#allocation28_spill] sm:$0xff] %v8529_v56  ;;  %421 = vst.msk [vmem:[#allocation2 + $0x159] sm:$0xff] %vm11463_vm0, %v8529_v56 }
 0x10b   : > { %1514 = vst.msk [vmem:[#allocation3 + $0x70] sm:$0xff] %vm1506_vm6, %v1425_v54 }
 0x10c   : > { %1633 = vrot.lane.b32.xlu0 %v8191_v7, %s7668_s14  ;;  %1129 = vst.msk [vmem:[#allocation3 + $0x80] sm:$0xff] %vm1120_vm4, %v1041_v27  ;;  %v452_v27 = vld [vmem:[#allocation2 + $0x16a] sm:$0x1] }
 0x10d   : > { %1249 = vrot.lane.b32.xlu1 %v8484_v6, %s7662_s28  ;;  %v8539_v38 = vld [vmem:[#allocation2 + $0x142] sm:$0xff]  ;;  %471 = vst.msk [vmem:[#allocation2 + $0x168] sm:$0x1] %vm455_vm1, %v452_v27  ;;  %v8602_v27 = vld [vmem:[#allocation2 + $0xf9] sm:$0xff] }
 0x10e   : > { %v1618_v59 = vpop.permute.xlu0 %1617  ;;  %v1234_v24 = vpop.permute.xlu1 %1233  ;;  %1980 = vst.msk [vmem:[#allocation3 + $0x178] sm:$0xff] %vm11463_vm0, %v8539_v38 }
 0x10f   : > { %1707 = vst.msk [vmem:[#allocation3 + $0x70] sm:$0xff] %vm1699_vm7, %v1618_v59 }
 0x110   : > { %1826 = vrot.lane.b32.xlu0 %v8522_v53, %s11485_s27  ;;  %1322 = vst.msk [vmem:[#allocation3 + $0x80] sm:$0xff] %vm1313_vm5, %v1234_v24 }
 0x111   : > { %1442 = vrot.lane.b32.xlu1 %v8202_v21, %s7664_s30  ;;  %v8554_v9 = vld [vmem:[#allocation2 + $0x158] sm:$0xff] }
 0x112   : > { %v1811_v49 = vpop.permute.xlu0 %1810  ;;  %v1427_v31 = vpop.permute.xlu1 %1426  ;;  %571 = vst.msk [vmem:[#allocation3 + $0x1d0] sm:$0xff] %vm11463_vm0, %v8554_v9  ;;  %v8574_v24 = vld [vmem:[#allocation2 + $0x152] sm:$0xff] }
 0x113   : > { %1900 = vst.msk [vmem:[#allocation3 + $0x70] sm:$0xff] %vm1892_vm8, %v1811_v49 }
 0x114   : > { %672 = vrot.lane.b32.xlu0 %v8451_v36, %s7666_s12  ;;  %1515 = vst.msk [vmem:[#allocation3 + $0x80] sm:$0xff] %vm1506_vm6, %v1427_v31  ;;  %v8558_v36 = vld [vmem:[#allocation2 + $0xf1] sm:$0xff]  ;;  %v8584_v31 = vld [vmem:[#allocation2 + $0x168] sm:$0xff] }
 0x115   : > { %1635 = vrot.lane.b32.xlu1 %v8209_v62, %s7668_s14  ;;  %1981 = vst.msk [vmem:[#allocation3 + $0x188] sm:$0xff] %vm11463_vm0, %v8574_v24  ;;  %572 = vst.msk [vmem:[#allocation3 + $0x1e0] sm:$0xff] %vm11463_vm0, %v8584_v31 }
 0x116   : > { %v657_v4 = vpop.permute.xlu0 %656  ;;  %v1620_v22 = vpop.permute.xlu1 %1619 }
 0x117   : > { %744 = vst.msk [vmem:[#allocation3 + $0x90] sm:$0xff] %vm734_vm2, %v657_v4 }
 0x118   : > { %865 = vrot.lane.b32.xlu0 %v8179_v60, %s7667_s13  ;;  %1708 = vst.msk [vmem:[#allocation3 + $0x80] sm:$0xff] %vm1699_vm7, %v1620_v22 }
 0x119   : > { %1828 = vrot.lane.b32.xlu1 %v8558_v36, %s11485_s27 }
 0x11a   : > { %v850_v54 = vpop.permute.xlu0 %849  ;;  %v2003_v3 = vld [vmem:[#allocation3 + $0x70] sm:$0xff]  ;;  %v1813_v60 = vpop.permute.xlu1 %1812 }
 0x11b   : > { %937 = vst.msk [vmem:[#allocation3 + $0x90] sm:$0xff] %vm927_vm3, %v850_v54  ;;  %2274 = vmatmul.mubr.f32.gmra.mrb[14].mxu0 %v2003_v3  ;;  %v488_v54 = vld [vmem:[#allocation2 + $0x15f] sm:$0x1] }
 0x11c   : > { %1058 = vrot.lane.b32.xlu0 %v8191_v7, %s7663_s29  ;;  %7011 = vmatprep.mubr.msk.f32.mxu0 %vm11463_vm0, %v2006_v40  ;;  %1901 = vst.msk [vmem:[#allocation3 + $0x80] sm:$0xff] %vm1892_vm8, %v1813_v60 }
 0x11d   : > { %674 = vrot.lane.b32.xlu1 %v8484_v6, %s7666_s12  ;;  %v2008_v6 = vld [vmem:[#allocation3 + $0x98] sm:$0xff]  ;;  %506 = vst.msk [vmem:[#allocation2 + $0x161] sm:$0x1] %vm455_vm1, %v488_v54 }
 0x11e   : > { %v1043_v59 = vpop.permute.xlu0 %1042  ;;  %v659_v7 = vpop.permute.xlu1 %658 }
 0x11f   : > { %1130 = vst.msk [vmem:[#allocation3 + $0x90] sm:$0xff] %vm1120_vm4, %v1043_v59 }
 0x120   : > { %1251 = vrot.lane.b32.xlu0 %v8522_v53, %s7662_s28  ;;  %745 = vst.msk [vmem:[#allocation3 + $0xa0] sm:$0xff] %vm734_vm2, %v659_v7 }
 0x121   : > { %867 = vrot.lane.b32.xlu1 %v8202_v21, %s7667_s13  ;;  %v8595_v21 = vld [vmem:[#allocation2 + $0x169] sm:$0xff] }
 0x122   : > { %v1236_v49 = vpop.permute.xlu0 %1235  ;;  %v852_v4 = vpop.permute.xlu1 %851  ;;  %435 = vst.msk [vmem:[#allocation2 + $0x199] sm:$0xff] %vm11463_vm0, %v8595_v21 }
 0x123   : > { %1323 = vst.msk [vmem:[#allocation3 + $0x90] sm:$0xff] %vm1313_vm5, %v1236_v49  ;;  %v2005_v22 = vld [vmem:[#allocation3 + $0x80] sm:$0xff] }
 0x124   : > { %1444 = vrot.lane.b32.xlu0 %v8236_v33, %s7664_s30  ;;  %938 = vst.msk [vmem:[#allocation3 + $0xa0] sm:$0xff] %vm927_vm3, %v852_v4  ;;  %2279 = vmatmul.mubr.f32.gmra.mrb[16].mxu0 %v2005_v22  ;;  %v8619_v49 = vld [vmem:[#allocation2 + $0x15a] sm:$0xff] }
 0x125   : > { %1060 = vrot.lane.b32.xlu1 %v8209_v62, %s7663_s29  ;;  %7012 = vmatprep.mubr.msk.f32.mxu0 %vm11463_vm0, %v2008_v6  ;;  %v8609_v62 = vld [vmem:[%s7799_s26 + $0xe8] sm:$0xff]  ;;  %v8622_v6 = vld [vmem:[%s7799_s26 + $0xf0] sm:$0xff]  ;;  %1982 = vst.msk [vmem:[#allocation3 + $0x198] sm:$0xff] %vm11463_vm0, %v8619_v49 }
 0x126   : > { %v1429_v40 = vpop.permute.xlu0 %1428  ;;  %v1045_v3 = vpop.permute.xlu1 %1044  ;;  %11493 = vst [vmem:[#allocation30_spill] sm:$0xff] %v8609_v62  ;;  %423 = vst.msk [vmem:[#allocation2 + $0x171] sm:$0xff] %vm11463_vm0, %v8609_v62 }
 0x127   : > { %1516 = vst.msk [vmem:[#allocation3 + $0x90] sm:$0xff] %vm1506_vm6, %v1429_v40  ;;  %11494 = vst [vmem:[#allocation31_spill] sm:$0xff] %v8622_v6 }
 0x128   : > { %1637 = vrot.lane.b32.xlu0 %v8249_v29, %s7668_s14  ;;  %1131 = vst.msk [vmem:[#allocation3 + $0xa0] sm:$0xff] %vm1120_vm4, %v1045_v3  ;;  %v2010_v3 = vld [vmem:[#allocation3 + $0xa8] sm:$0xff] }
 0x129   : > { %1253 = vrot.lane.b32.xlu1 %v8558_v36, %s7662_s28  ;;  %424 = vst.msk [vmem:[#allocation2 + $0x181] sm:$0xff] %vm11463_vm0, %v8622_v6 }
 0x12a   : > { %v1622_v60 = vpop.permute.xlu0 %1621  ;;  %v1238_v59 = vpop.permute.xlu1 %1237 }
 0x12b   : > { %1709 = vst.msk [vmem:[#allocation3 + $0x90] sm:$0xff] %vm1699_vm7, %v1622_v60 }
 0x12c   : > { %1830 = vrot.lane.b32.xlu0 %v8602_v27, %s11485_s27  ;;  %1324 = vst.msk [vmem:[#allocation3 + $0xa0] sm:$0xff] %vm1313_vm5, %v1238_v59 }
 0x12d   : > { %1446 = vrot.lane.b32.xlu1 %v8268_v37, %s7664_s30  ;;  %v8634_v40 = vld [vmem:[#allocation2 + $0x170] sm:$0xff] }
 0x12e   : > { %v1815_v7 = vpop.permute.xlu0 %1814  ;;  %v1431_v4 = vpop.permute.xlu1 %1430  ;;  %573 = vst.msk [vmem:[#allocation3 + $0x1f0] sm:$0xff] %vm11463_vm0, %v8634_v40 }
 0x12f   : > { %1902 = vst.msk [vmem:[#allocation3 + $0x90] sm:$0xff] %vm1892_vm8, %v1815_v7  ;;  %v8646_v7 = vld [vmem:[#allocation2 + $0x171] sm:$0xff] }
 0x130   : > { %676 = vrot.lane.b32.xlu0 %v8522_v53, %s7666_s12  ;;  %1517 = vst.msk [vmem:[#allocation3 + $0xa0] sm:$0xff] %vm1506_vm6, %v1431_v4  ;;  %v8638_v53 = vld [vmem:[#allocation2 + $0x109] sm:$0xff] }
 0x131   : > { %1639 = vrot.lane.b32.xlu1 %v8279_v32, %s7668_s14  ;;  %436 = vst.msk [vmem:[#allocation2 + $0x1a1] sm:$0xff] %vm11463_vm0, %v8646_v7 }
 0x132   : > { %v661_v22 = vpop.permute.xlu0 %660  ;;  %v1624_v54 = vpop.permute.xlu1 %1623 }
 0x133   : > { %746 = vst.msk [vmem:[#allocation3 + $0xb0] sm:$0xff] %vm734_vm2, %v661_v22 }
 0x134   : > { %869 = vrot.lane.b32.xlu0 %v8236_v33, %s7667_s13  ;;  %1710 = vst.msk [vmem:[#allocation3 + $0xa0] sm:$0xff] %vm1699_vm7, %v1624_v54  ;;  %v453_v33 = vld [vmem:[#allocation2 + $0x182] sm:$0x1]  ;;  %v8658_v54 = vld [vmem:[#allocation2 + $0x16a] sm:$0xff] }
 0x135   : > { %1832 = vrot.lane.b32.xlu1 %v8638_v53, %s11485_s27  ;;  %472 = vst.msk [vmem:[#allocation2 + $0x180] sm:$0x1] %vm455_vm1, %v453_v33 }
 0x136   : > { %v854_v60 = vpop.permute.xlu0 %853  ;;  %v2007_v59 = vld [vmem:[#allocation3 + $0x90] sm:$0xff]  ;;  %v1817_v4 = vpop.permute.xlu1 %1816  ;;  %1983 = vst.msk [vmem:[#allocation3 + $0x1a8] sm:$0xff] %vm11463_vm0, %v8658_v54 }
 0x137   : > { %939 = vst.msk [vmem:[#allocation3 + $0xb0] sm:$0xff] %vm927_vm3, %v854_v60  ;;  %2284 = vmatmul.mubr.f32.gmra.mrb[18].mxu0 %v2007_v59 }
 0x138   : > { %1062 = vrot.lane.b32.xlu0 %v8249_v29, %s7663_s29  ;;  %7013 = vmatprep.mubr.msk.f32.mxu0 %vm11463_vm0, %v2010_v3  ;;  %1903 = vst.msk [vmem:[#allocation3 + $0xa0] sm:$0xff] %vm1892_vm8, %v1817_v4  ;;  %v489_v4 = vld [vmem:[#allocation2 + $0x177] sm:$0x1] }
 0x139   : > { %678 = vrot.lane.b32.xlu1 %v8558_v36, %s7666_s12  ;;  %v2012_v36 = vld [vmem:[#allocation3 + $0xb8] sm:$0xff]  ;;  %507 = vst.msk [vmem:[#allocation2 + $0x179] sm:$0x1] %vm455_vm1, %v489_v4 }
 0x13a   : > { %v1047_v22 = vpop.permute.xlu0 %1046 }
 0x13b   : > { %1132 = vst.msk [vmem:[#allocation3 + $0xb0] sm:$0xff] %vm1120_vm4, %v1047_v22  ;;  %v663_v29 = vpop.permute.xlu1 %662  ;;  %v8678_v22 = vld [vmem:[#allocation2 + $0x111] sm:$0xff] }
 0x13c   : > { %1255 = vrot.lane.b32.xlu0 %v8602_v27, %s7662_s28  ;;  %747 = vst.msk [vmem:[#allocation3 + $0xc0] sm:$0xff] %vm734_vm2, %v663_v29 }
 0x13d   : > { %871 = vrot.lane.b32.xlu1 %v8268_v37, %s7667_s13 }
 0x13e   : > { %v1240_v3 = vpop.permute.xlu0 %1239 }
 0x13f   : > { %1325 = vst.msk [vmem:[#allocation3 + $0xb0] sm:$0xff] %vm1313_vm5, %v1240_v3  ;;  %v856_v60 = vpop.permute.xlu1 %855  ;;  %v2009_v59 = vld [vmem:[#allocation3 + $0xa0] sm:$0xff] }
 0x140   : > { %1448 = vrot.lane.b32.xlu0 %v8319_v46, %s7664_s30  ;;  %940 = vst.msk [vmem:[#allocation3 + $0xc0] sm:$0xff] %vm927_vm3, %v856_v60  ;;  %2289 = vmatmul.mubr.f32.gmra.mrb[20].mxu0 %v2009_v59  ;;  %v8695_v60 = vld [vmem:[#allocation2 + $0x172] sm:$0xff] }
 0x141   : > { %1064 = vrot.lane.b32.xlu1 %v8279_v32, %s7663_s29  ;;  %7014 = vmatprep.mubr.msk.f32.mxu0 %vm11463_vm0, %v2012_v36  ;;  %v8685_v32 = vld [vmem:[%s7799_s26 + $0xf8] sm:$0xff]  ;;  %1984 = vst.msk [vmem:[#allocation3 + $0x1b8] sm:$0xff] %vm11463_vm0, %v8695_v60  ;;  %s352_s26 = sand.u32 1, %s7651_s16  }
 0x142   : > { %v1433_v33 = vpop.permute.xlu0 %1432  ;;  %11495 = vst [vmem:[#allocation32_spill] sm:$0xff] %v8685_v32  ;;  %425 = vst.msk [vmem:[#allocation2 + $0x189] sm:$0xff] %vm11463_vm0, %v8685_v32  ;;  %s6999_s19 = sshll.u32 %s352_s26, 8 }
 0x143   : > { %1518 = vst.msk [vmem:[#allocation3 + $0xb0] sm:$0xff] %vm1506_vm6, %v1433_v33  ;;  %v1049_v37 = vpop.permute.xlu1 %1048  ;;  %v8701_v33 = vld [vmem:[#allocation2 + $0x121] sm:$0xff] }
 0x144   : > { %1641 = vrot.lane.b32.xlu0 %v8330_v30, %s7668_s14  ;;  %1133 = vst.msk [vmem:[#allocation3 + $0xc0] sm:$0xff] %vm1120_vm4, %v1049_v37  ;;  %v454_v37 = vld [vmem:[#allocation2 + $0x19a] sm:$0x1] }
 0x145   : > { %1257 = vrot.lane.b32.xlu1 %v8638_v53, %s7662_s28  ;;  %473 = vst.msk [vmem:[#allocation2 + $0x198] sm:$0x1] %vm455_vm1, %v454_v37  ;;  %v2016_v37 = vld [vmem:[#allocation3 + $0xd8] sm:$0xff] }
 0x146   : > { %v1626_v29 = vpop.permute.xlu0 %1625 }
 0x147   : > { %1711 = vst.msk [vmem:[#allocation3 + $0xb0] sm:$0xff] %vm1699_vm7, %v1626_v29  ;;  %v1242_v3 = vpop.permute.xlu1 %1241 }
 0x148   : > { %1834 = vrot.lane.b32.xlu0 %v8678_v22, %s11485_s27  ;;  %1326 = vst.msk [vmem:[#allocation3 + $0xc0] sm:$0xff] %vm1313_vm5, %v1242_v3  ;;  %v2014_v3 = vld [vmem:[#allocation3 + $0xc8] sm:$0xff] }
 0x149   : > { %1643 = vrot.lane.b32.xlu1 %v8352_v57, %s7668_s14 }
 0x14a   : > { %v1819_v36 = vpop.permute.xlu0 %1818 }
 0x14b   : > { %1904 = vst.msk [vmem:[#allocation3 + $0xb0] sm:$0xff] %vm1892_vm8, %v1819_v36  ;;  %v1435_v59 = vpop.permute.xlu1 %1434 }
 0x14c   : > { %1450 = vrot.lane.b32.xlu0 %v8350_v8, %s7664_s30  ;;  %1519 = vst.msk [vmem:[#allocation3 + $0xc0] sm:$0xff] %vm1506_vm6, %v1435_v59 }
 0x14d   : > { %682 = vrot.lane.b32.xlu1 %v8638_v53, %s7666_s12 }
 0x14e   : > { %v665_v4 = vpop.permute.xlu0 %664 }
 0x14f   : > { %748 = vst.msk [vmem:[#allocation3 + $0xd0] sm:$0xff] %vm734_vm2, %v665_v4  ;;  %v1628_v29 = vpop.permute.xlu1 %1627  ;;  %v8721_v4 = vld [vmem:[#allocation2 + $0x182] sm:$0xff] }
 0x150   : > { %1836 = vrot.lane.b32.xlu0 %v8701_v33, %s11485_s27  ;;  %1712 = vst.msk [vmem:[#allocation3 + $0xc0] sm:$0xff] %vm1699_vm7, %v1628_v29 }
 0x151   : > { %1068 = vrot.lane.b32.xlu1 %v8352_v57, %s7663_s29  ;;  %1985 = vst.msk [vmem:[#allocation3 + $0x1c8] sm:$0xff] %vm11463_vm0, %v8721_v4  ;;  %v490_v57 = vld [vmem:[#allocation2 + $0x18f] sm:$0x1] }
 0x152   : > { %v858_v36 = vpop.permute.xlu0 %857  ;;  %v2011_v2 = vld [vmem:[#allocation3 + $0xb0] sm:$0xff]  ;;  %508 = vst.msk [vmem:[#allocation2 + $0x191] sm:$0x1] %vm455_vm1, %v490_v57 }
 0x153   : > { %941 = vst.msk [vmem:[#allocation3 + $0xd0] sm:$0xff] %vm927_vm3, %v858_v36  ;;  %2294 = vmatmul.mubr.f32.gmra.mrb[22].mxu0 %v2011_v2  ;;  %v1821_v53 = vpop.permute.xlu1 %1820 }
 0x154   : > { %875 = vrot.lane.b32.xlu0 %v8350_v8, %s7667_s13  ;;  %7015 = vmatprep.mubr.msk.f32.mxu0 %vm11463_vm0, %v2014_v3  ;;  %1905 = vst.msk [vmem:[#allocation3 + $0xc0] sm:$0xff] %vm1892_vm8, %v1821_v53 }
 0x155   : > { %1261 = vrot.lane.b32.xlu1 %v8701_v33, %s7662_s28 }
 0x156   : > { %v1051_v59 = vpop.permute.xlu0 %1050 }
 0x157   : > { %1134 = vst.msk [vmem:[#allocation3 + $0xd0] sm:$0xff] %vm1120_vm4, %v1051_v59  ;;  %v667_v2 = vpop.permute.xlu1 %666 }
 0x158   : > { %680 = vrot.lane.b32.xlu0 %v8602_v27, %s7666_s12  ;;  %749 = vst.msk [vmem:[#allocation3 + $0xe0] sm:$0xff] %vm734_vm2, %v667_v2  ;;  %v2034_v2 = vld [vmem:[#allocation3 + $0x168] sm:$0xff] }
 0x159   : > { %873 = vrot.lane.b32.xlu1 %v8319_v46, %s7667_s13  ;;  %v1561_v46 = vld [vmem:[#allocation2 + $0x138] sm:$0xff]  ;;  %v8744_v59 = vld [vmem:[#allocation2 + $0x18a] sm:$0xff]  ;;  %7025 = vmatprep.mubr.msk.f32.mxu1 %vm11463_vm0, %v2034_v2 }
 0x15a   : > { %v1244_v8 = vpop.permute.xlu0 %1243  ;;  %1986 = vst.msk [vmem:[#allocation3 + $0x1d8] sm:$0xff] %vm11463_vm0, %v8744_v59 }
 0x15b   : > { %1327 = vst.msk [vmem:[#allocation3 + $0xd0] sm:$0xff] %vm1313_vm5, %v1244_v8  ;;  %v860_v27 = vpop.permute.xlu1 %859  ;;  %v2013_v29 = vld [vmem:[#allocation3 + $0xc0] sm:$0xff] }
 0x15c   : > { %684 = vrot.lane.b32.xlu0 %v8678_v22, %s7666_s12  ;;  %942 = vst.msk [vmem:[#allocation3 + $0xe0] sm:$0xff] %vm927_vm3, %v860_v27  ;;  %2299 = vmatmul.mubr.f32.gmra.mrb[24].mxu0 %v2013_v29  ;;  %v8758_v29 = vld [vmem:[#allocation2 + $0x139] sm:$0xff] }
 0x15d   : > { %877 = vrot.lane.b32.xlu1 %v8406_v44, %s7667_s13  ;;  %7016 = vmatprep.mubr.msk.f32.mxu0 %vm11463_vm0, %v2016_v37  ;;  %v491_v37 = vld [vmem:[#allocation2 + $0x1a7] sm:$0x1] }
 0x15e   : > { %v1437_v3 = vpop.permute.xlu0 %1436  ;;  %509 = vst.msk [vmem:[#allocation2 + $0x1a9] sm:$0x1] %vm455_vm1, %v491_v37 }
 0x15f   : > { %1520 = vst.msk [vmem:[#allocation3 + $0xd0] sm:$0xff] %vm1506_vm6, %v1437_v3  ;;  %v1053_v36 = vpop.permute.xlu1 %1052 }
 0x160   : > { %1454 = vrot.lane.b32.xlu0 %v8404_v45, %s7664_s30  ;;  %1135 = vst.msk [vmem:[#allocation3 + $0xe0] sm:$0xff] %vm1120_vm4, %v1053_v36  ;;  %v2018_v36 = vld [vmem:[#allocation3 + $0xe8] sm:$0xff] }
 0x161   : > { %1647 = vrot.lane.b32.xlu1 %v1561_v46, %s7668_s14 }
 0x162   : > { %v1630_v53 = vpop.permute.xlu0 %1629 }
 0x163   : > { %1713 = vst.msk [vmem:[#allocation3 + $0xd0] sm:$0xff] %vm1699_vm7, %v1630_v53  ;;  %v1246_v8 = vpop.permute.xlu1 %1245 }
 0x164   : > { %1066 = vrot.lane.b32.xlu0 %v8330_v30, %s7663_s29  ;;  %1328 = vst.msk [vmem:[#allocation3 + $0xe0] sm:$0xff] %vm1313_vm5, %v1246_v8  ;;  %v1176_v30 = vld [vmem:[#allocation2 + $0x129] sm:$0xff] }
 0x165   : > { %1259 = vrot.lane.b32.xlu1 %v8678_v22, %s7662_s28 }
 0x166   : > { %v1823_v57 = vpop.permute.xlu0 %1822 }
 0x167   : > { %1906 = vst.msk [vmem:[#allocation3 + $0xd0] sm:$0xff] %vm1892_vm8, %v1823_v57  ;;  %v1439_v27 = vpop.permute.xlu1 %1438 }
 0x168   : > { %1070 = vrot.lane.b32.xlu0 %v8426_v43, %s7663_s29  ;;  %1521 = vst.msk [vmem:[#allocation3 + $0xe0] sm:$0xff] %vm1506_vm6, %v1439_v27 }
 0x169   : > { %1263 = vrot.lane.b32.xlu1 %v1176_v30, %s7662_s28 }
 0x16a   : > { %v669_v3 = vpop.permute.xlu0 %668 }
 0x16b   : > { %750 = vst.msk [vmem:[#allocation3 + $0xf0] sm:$0xff] %vm734_vm2, %v669_v3  ;;  %v1632_v22 = vpop.permute.xlu1 %1631 }
 0x16c   : > { %1840 = vrot.lane.b32.xlu0 %v8758_v29, %s11485_s27  ;;  %1714 = vst.msk [vmem:[#allocation3 + $0xe0] sm:$0xff] %vm1699_vm7, %v1632_v22 }
 0x16d   : > { %686 = vrot.lane.b32.xlu1 %v8701_v33, %s7666_s12 }
 0x16e   : > { %v862_v53 = vpop.permute.xlu0 %861  ;;  %v2015_v2 = vld [vmem:[#allocation3 + $0xd0] sm:$0xff] }
 0x16f   : > { %943 = vst.msk [vmem:[#allocation3 + $0xf0] sm:$0xff] %vm927_vm3, %v862_v53  ;;  %2304 = vmatmul.mubr.f32.gmra.mrb[26].mxu0 %v2015_v2  ;;  %v1825_v8 = vpop.permute.xlu1 %1824  ;;  %v536_v2 = vld [vmem:[#allocation2 + $0x138] sm:$0xff] }
 0x170   : > { %1452 = vrot.lane.b32.xlu0 %v8406_v44, %s7664_s30  ;;  %7017 = vmatprep.mubr.msk.f32.mxu0 %vm11463_vm0, %v2018_v36  ;;  %1907 = vst.msk [vmem:[#allocation3 + $0xe0] sm:$0xff] %vm1892_vm8, %v1825_v8  ;;  %v2020_v44 = vld [vmem:[#allocation3 + $0xf8] sm:$0xff] }
 0x171   : > { %1645 = vrot.lane.b32.xlu1 %v8426_v43, %s7668_s14  ;;  %v8789_v36 = vld [vmem:[#allocation2 + $0x141] sm:$0xff]  ;;  %568 = vst.msk [vmem:[#allocation3 + $0x1a0] sm:$0xff] %vm11463_vm0, %v536_v2 }
 0x172   : > { %v1055_v57 = vpop.permute.xlu0 %1054 }
 0x173   : > { %1136 = vst.msk [vmem:[#allocation3 + $0xf0] sm:$0xff] %vm1120_vm4, %v1055_v57  ;;  %v671_v37 = vpop.permute.xlu1 %670 }
 0x174   : > { %1456 = vrot.lane.b32.xlu0 %v8457_v61, %s7664_s30  ;;  %751 = vst.msk [vmem:[#allocation3 + $0x100] sm:$0xff] %vm734_vm2, %v671_v37  ;;  %v8809_v37 = vld [vmem:[#allocation2 + $0x151] sm:$0xff] }
 0x175   : > { %1649 = vrot.lane.b32.xlu1 %v8467_v1, %s7668_s14 }
 0x176   : > { %v1248_v27 = vpop.permute.xlu0 %1247 }
 0x177   : > { %1329 = vst.msk [vmem:[#allocation3 + $0xf0] sm:$0xff] %vm1313_vm5, %v1248_v27  ;;  %v864_v33 = vpop.permute.xlu1 %863  ;;  %v2017_v3 = vld [vmem:[#allocation3 + $0xe0] sm:$0xff] }
 0x178   : > { %879 = vrot.lane.b32.xlu0 %v8404_v45, %s7667_s13  ;;  %944 = vst.msk [vmem:[#allocation3 + $0x100] sm:$0xff] %vm927_vm3, %v864_v33  ;;  %2309 = vmatmul.mubr.f32.gmra.mrb[28].mxu0 %v2017_v3 }
 0x179   : > { %1072 = vrot.lane.b32.xlu1 %v1561_v46, %s7663_s29  ;;  %7018 = vmatprep.mubr.msk.f32.mxu0 %vm11463_vm0, %v2020_v44  ;;  %v2022_v44 = vld [vmem:[#allocation3 + $0x108] sm:$0xff] }
 0x17a   : > { %v1441_v22 = vpop.permute.xlu0 %1440 }
 0x17b   : > { %1522 = vst.msk [vmem:[#allocation3 + $0xf0] sm:$0xff] %vm1506_vm6, %v1441_v22  ;;  %v1057_v43 = vpop.permute.xlu1 %1056 }
 0x17c   : > { %1838 = vrot.lane.b32.xlu0 %v1176_v30, %s11485_s27  ;;  %1137 = vst.msk [vmem:[#allocation3 + $0x100] sm:$0xff] %vm1120_vm4, %v1057_v43 }
 0x17d   : > { %1265 = vrot.lane.b32.xlu1 %v8758_v29, %s7662_s28 }
 0x17e   : > { %v1634_v53 = vpop.permute.xlu0 %1633 }
 0x17f   : > { %1715 = vst.msk [vmem:[#allocation3 + $0xf0] sm:$0xff] %vm1699_vm7, %v1634_v53  ;;  %v1250_v45 = vpop.permute.xlu1 %1249 }
 0x180   : > { %1842 = vrot.lane.b32.xlu0 %v8789_v36, %s11485_s27  ;;  %1330 = vst.msk [vmem:[#allocation3 + $0x100] sm:$0xff] %vm1313_vm5, %v1250_v45 }
 0x181   : > { %1458 = vrot.lane.b32.xlu1 %v8498_v41, %s7664_s30 }
 0x182   : > { %v1827_v46 = vpop.permute.xlu0 %1826 }
 0x183   : > { %1908 = vst.msk [vmem:[#allocation3 + $0xf0] sm:$0xff] %vm1892_vm8, %v1827_v46  ;;  %v1443_v8 = vpop.permute.xlu1 %1442 }
 0x184   : > { %688 = vrot.lane.b32.xlu0 %v1176_v30, %s7666_s12  ;;  %1523 = vst.msk [vmem:[#allocation3 + $0x100] sm:$0xff] %vm1506_vm6, %v1443_v8  ;;  %v2024_v8 = vld [vmem:[#allocation3 + $0x118] sm:$0xff] }
 0x185   : > { %1651 = vrot.lane.b32.xlu1 %v8508_v39, %s7668_s14 }
 0x186   : > { %v673_v57 = vpop.permute.xlu0 %672 }
 0x187   : > { %752 = vst.msk [vmem:[#allocation3 + $0x110] sm:$0xff] %vm734_vm2, %v673_v57  ;;  %v1636_v27 = vpop.permute.xlu1 %1635 }
 0x188   : > { %881 = vrot.lane.b32.xlu0 %v8457_v61, %s7667_s13  ;;  %1716 = vst.msk [vmem:[#allocation3 + $0x100] sm:$0xff] %vm1699_vm7, %v1636_v27  ;;  %v8820_v61 = vld [vmem:[%s11404_s2] ss:$0 sm:$0xff] }
 0x189   : > { %1844 = vrot.lane.b32.xlu1 %v8809_v37, %s11485_s27 }
 0x18a   : > { %v866_v33 = vpop.permute.xlu0 %865  ;;  %v2019_v30 = vld [vmem:[#allocation3 + $0xf0] sm:$0xff] }
 0x18b   : > { %945 = vst.msk [vmem:[#allocation3 + $0x110] sm:$0xff] %vm927_vm3, %v866_v33  ;;  %2314 = vmatmul.mubr.f32.gmra.mrb[30].mxu0 %v2019_v30  ;;  %v1829_v3 = vpop.permute.xlu1 %1828 }
 0x18c   : > { %1074 = vrot.lane.b32.xlu0 %v8467_v1, %s7663_s29  ;;  %7019 = vmatprep.mubr.msk.f32.mxu0 %vm11463_vm0, %v2022_v44  ;;  %1909 = vst.msk [vmem:[#allocation3 + $0x100] sm:$0xff] %vm1892_vm8, %v1829_v3  ;;  %v2240_v43 = vpop.f32.mrb[0].mxu0  ;;  %v8844_v44 = vld [vmem:[#allocation2 + $0x159] sm:$0xff] }
 0x18d   : > { %v2241_v53 = vadd.f32 %v8820_v61, %v2240_v43  ;;  %v2242_v45 = vpop.f32.mrb[1].mxu0  ;;  %690 = vrot.lane.b32.xlu1 %v8758_v29, %s7666_s12 }
 0x18e   : > { %v1059_v22 = vpop.permute.xlu0 %1058 }
 0x18f   : > { %1138 = vst.msk [vmem:[#allocation3 + $0x110] sm:$0xff] %vm1120_vm4, %v1059_v22  ;;  %v2399_v1 = vmax.f32 %v2241_v53, 0.0  ;;  %v675_v46 = vpop.permute.xlu1 %674 }
 0x190   : > { %1267 = vrot.lane.b32.xlu0 %v8789_v36, %s7662_s28  ;;  %753 = vst.msk [vmem:[#allocation3 + $0x120] sm:$0xff] %vm734_vm2, %v675_v46 }
 0x191   : > { %2431 = vst.msk [vmem:[#allocation2 + $0x19] sm:$0xff] %vm11463_vm0, %v2399_v1  ;;  %883 = vrot.lane.b32.xlu1 %v8498_v41, %s7667_s13 }
 0x192   : > { %v1252_v2 = vpop.permute.xlu0 %1251 }
 0x193   : > { %1331 = vst.msk [vmem:[#allocation3 + $0x110] sm:$0xff] %vm1313_vm5, %v1252_v2  ;;  %v868_v29 = vpop.permute.xlu1 %867  ;;  %v2021_v57 = vld [vmem:[#allocation3 + $0x100] sm:$0xff] }
 0x194   : > { %1460 = vrot.lane.b32.xlu0 %v8539_v38, %s7664_s30  ;;  %946 = vst.msk [vmem:[#allocation3 + $0x120] sm:$0xff] %vm927_vm3, %v868_v29  ;;  %2319 = vmatmul.mubr.f32.gmra.mrb[32].mxu0 %v2021_v57 }
 0x195   : > { %1076 = vrot.lane.b32.xlu1 %v8508_v39, %s7663_s29  ;;  %7020 = vmatprep.mubr.msk.f32.mxu0 %vm11463_vm0, %v2024_v8 }
 0x196   : > { %v1445_v27 = vpop.permute.xlu0 %1444 }
 0x197   : > { %1524 = vst.msk [vmem:[#allocation3 + $0x110] sm:$0xff] %vm1506_vm6, %v1445_v27  ;;  %v1061_v41 = vpop.permute.xlu1 %1060 }
 0x198   : > { %1653 = vrot.lane.b32.xlu0 %v8554_v9, %s7668_s14  ;;  %1139 = vst.msk [vmem:[#allocation3 + $0x120] sm:$0xff] %vm1120_vm4, %v1061_v41  ;;  %v2472_v30 = vld [vmem:[#allocation2 + $0x1a] sm:$0x1] }
 0x199   : > { %1269 = vrot.lane.b32.xlu1 %v8809_v37, %s7662_s28  ;;  %2490 = vst.msk [vmem:[#allocation2 + $0x18] sm:$0x1] %vm455_vm1, %v2472_v30 }
 0x19a   : > { %v1638_v33 = vpop.permute.xlu0 %1637 }
 0x19b   : > { %1717 = vst.msk [vmem:[#allocation3 + $0x110] sm:$0xff] %vm1699_vm7, %v1638_v33  ;;  %v2245_v3 = vpop.f32.mrb[2].mxu0  ;;  %v1254_v43 = vpop.permute.xlu1 %1253 }
 0x19c   : > { %v2246_v39 = vadd.f32 %v8820_v61, %v2245_v3  ;;  %1846 = vrot.lane.b32.xlu0 %v8844_v44, %s11485_s27  ;;  %v2247_v22 = vpop.f32.mrb[3].mxu0  ;;  %1332 = vst.msk [vmem:[#allocation3 + $0x120] sm:$0xff] %vm1313_vm5, %v1254_v43 }
 0x19d   : > { %1462 = vrot.lane.b32.xlu1 %v8574_v24, %s7664_s30 }
 0x19e   : > { %v2400_v53 = vmax.f32 %v2246_v39, 0.0  ;;  %v1831_v45 = vpop.permute.xlu0 %1830 }
 0x19f   : > { %1910 = vst.msk [vmem:[#allocation3 + $0x110] sm:$0xff] %vm1892_vm8, %v1831_v45  ;;  %v1447_v1 = vpop.permute.xlu1 %1446 }
 0x1a0   : > { %2432 = vst.msk [vmem:[#allocation2 + $0x21] sm:$0xff] %vm11463_vm0, %v2400_v53  ;;  %692 = vrot.lane.b32.xlu0 %v8789_v36, %s7666_s12  ;;  %v8862_v2 = vld [vmem:[#allocation2 + $0x18] sm:$0xff] }
 0x1a1   : > { %1525 = vst.msk [vmem:[#allocation3 + $0x120] sm:$0xff] %vm1506_vm6, %v1447_v1  ;;  %1655 = vrot.lane.b32.xlu1 %v8584_v31, %s7668_s14  ;;  %v2026_v36 = vld [vmem:[#allocation3 + $0x128] sm:$0xff] }
 0x1a2   : > { %v677_v46 = vpop.permute.xlu0 %676  ;;  %2577 = vst.msk [vmem:[#allocation3 + $0x20] sm:$0xff] %vm11463_vm0, %v8862_v2 }
 0x1a3   : > { %754 = vst.msk [vmem:[#allocation3 + $0x130] sm:$0xff] %vm734_vm2, %v677_v46  ;;  %v1640_v8 = vpop.permute.xlu1 %1639  ;;  %v2250_v29 = vpop.f32.mrb[4].mxu0 }
 0x1a4   : > { %885 = vrot.lane.b32.xlu0 %v8539_v38, %s7667_s13  ;;  %1718 = vst.msk [vmem:[#allocation3 + $0x120] sm:$0xff] %vm1699_vm7, %v1640_v8  ;;  %v2251_v27 = vadd.f32 %v8820_v61, %v2250_v29  ;;  %v2252_v41 = vpop.f32.mrb[5].mxu0 }
 0x1a5   : > { %1848 = vrot.lane.b32.xlu1 %v8595_v21, %s11485_s27 }
 0x1a6   : > { %v870_v57 = vpop.permute.xlu0 %869  ;;  %v2023_v33 = vld [vmem:[#allocation3 + $0x110] sm:$0xff]  ;;  %v2401_v3 = vmax.f32 %v2251_v27, 0.0 }
 0x1a7   : > { %947 = vst.msk [vmem:[#allocation3 + $0x130] sm:$0xff] %vm927_vm3, %v870_v57  ;;  %2324 = vmatmul.mubr.f32.gmra.mrb[34].mxu0 %v2023_v33  ;;  %v8876_v30 = vld [vmem:[#allocation2 + $0x20] sm:$0xff]  ;;  %v1833_v39 = vpop.permute.xlu1 %1832 }
 0x1a8   : > { %1078 = vrot.lane.b32.xlu0 %v8554_v9, %s7663_s29  ;;  %7021 = vmatprep.mubr.msk.f32.mxu0 %vm11463_vm0, %v2026_v36  ;;  %v2508_v38 = vld [vmem:[#allocation2 + $0x27] sm:$0x1]  ;;  %2578 = vst.msk [vmem:[#allocation3 + $0x30] sm:$0xff] %vm11463_vm0, %v8876_v30  ;;  %2433 = vst.msk [vmem:[#allocation2 + $0x31] sm:$0xff] %vm11463_vm0, %v2401_v3 }
 0x1a9   : > { %2526 = vst.msk [vmem:[#allocation2 + $0x29] sm:$0x1] %vm455_vm1, %v2508_v38  ;;  %694 = vrot.lane.b32.xlu1 %v8809_v37, %s7666_s12  ;;  %v2028_v37 = vld [vmem:[#allocation3 + $0x138] sm:$0xff] }
 0x1aa   : > { %v1063_v22 = vpop.permute.xlu0 %1062  ;;  %1911 = vst.msk [vmem:[#allocation3 + $0x120] sm:$0xff] %vm1892_vm8, %v1833_v39 }
 0x1ab   : > { %1140 = vst.msk [vmem:[#allocation3 + $0x130] sm:$0xff] %vm1120_vm4, %v1063_v22  ;;  %v679_v9 = vpop.permute.xlu1 %678 }
 0x1ac   : > { %1271 = vrot.lane.b32.xlu0 %v8844_v44, %s7662_s28  ;;  %755 = vst.msk [vmem:[#allocation3 + $0x140] sm:$0xff] %vm734_vm2, %v679_v9 }
 0x1ad   : > { %887 = vrot.lane.b32.xlu1 %v8574_v24, %s7667_s13 }
 0x1ae   : > { %v1256_v43 = vpop.permute.xlu0 %1255 }
 0x1af   : > { %1333 = vst.msk [vmem:[#allocation3 + $0x130] sm:$0xff] %vm1313_vm5, %v1256_v43  ;;  %v2255_v53 = vpop.f32.mrb[6].mxu0  ;;  %v872_v46 = vpop.permute.xlu1 %871  ;;  %v8898_v29 = vld [vmem:[#allocation2 + $0x31] sm:$0xff]  ;;  %v1567_v43 = vld [vmem:[#allocation2 + $0x180] sm:$0xff] }
 0x1b0   : > { %v2256_v45 = vadd.f32 %v8820_v61, %v2255_v53  ;;  %1464 = vrot.lane.b32.xlu0 %v8619_v49, %s7664_s30  ;;  %v2257_v1 = vpop.f32.mrb[7].mxu0  ;;  %v2473_v36 = vld [vmem:[#allocation2 + $0x32] sm:$0x1]  ;;  %948 = vst.msk [vmem:[#allocation3 + $0x140] sm:$0xff] %vm927_vm3, %v872_v46 }
 0x1b1   : > { %v2025_v8 = vld [vmem:[#allocation3 + $0x120] sm:$0xff]  ;;  %2465 = vst.msk [vmem:[#allocation2 + $0x1] sm:$0xff] %vm11463_vm0, %v8898_v29  ;;  %1080 = vrot.lane.b32.xlu1 %v8584_v31, %s7663_s29 }
 0x1b2   : > { %v2402_v57 = vmax.f32 %v2256_v45, 0.0  ;;  %v1449_v27 = vpop.permute.xlu0 %1448  ;;  %2329 = vmatmul.mubr.f32.gmra.mrb[36].mxu0 %v2025_v8  ;;  %2491 = vst.msk [vmem:[#allocation2 + $0x30] sm:$0x1] %vm455_vm1, %v2473_v36  ;;  %v2030_v8 = vld [vmem:[#allocation3 + $0x148] sm:$0xff] }
 0x1b3   : > { %1526 = vst.msk [vmem:[#allocation3 + $0x130] sm:$0xff] %vm1506_vm6, %v1449_v27  ;;  %7022 = vmatprep.mubr.msk.f32.mxu0 %vm11463_vm0, %v2028_v37  ;;  %v1065_v24 = vpop.permute.xlu1 %1064 }
 0x1b4   : > { %2434 = vst.msk [vmem:[#allocation2 + $0x39] sm:$0xff] %vm11463_vm0, %v2402_v57  ;;  %1657 = vrot.lane.b32.xlu0 %v8634_v40, %s7668_s14 }
 0x1b5   : > { %1141 = vst.msk [vmem:[#allocation3 + $0x140] sm:$0xff] %vm1120_vm4, %v1065_v24  ;;  %1273 = vrot.lane.b32.xlu1 %v8595_v21, %s7662_s28 }
 0x1b6   : > { %v1642_v41 = vpop.permute.xlu0 %1641 }
 0x1b7   : > { %1719 = vst.msk [vmem:[#allocation3 + $0x130] sm:$0xff] %vm1699_vm7, %v1642_v41  ;;  %v1258_v31 = vpop.permute.xlu1 %1257 }
 0x1b8   : > { %1850 = vrot.lane.b32.xlu0 %v8646_v7, %s11485_s27  ;;  %v2471_v33 = vld [vmem:[#allocation2 + $0x2] sm:$0x1]  ;;  %1334 = vst.msk [vmem:[#allocation3 + $0x140] sm:$0xff] %vm1313_vm5, %v1258_v31 }
 0x1b9   : > { %2489 = vst.msk [vmem:[#allocation2] sm:$0x1] %vm455_vm1, %v2471_v33  ;;  %v2547_v38 = vld [vmem:[#allocation2 + $0x30] sm:$0xff]  ;;  %1466 = vrot.lane.b32.xlu1 %v8658_v54, %s7664_s30 }
 0x1ba   : > { %v1835_v3 = vpop.permute.xlu0 %1834  ;;  %2579 = vst.msk [vmem:[#allocation3 + $0x40] sm:$0xff] %vm11463_vm0, %v2547_v38 }
 0x1bb   : > { %1912 = vst.msk [vmem:[#allocation3 + $0x130] sm:$0xff] %vm1892_vm8, %v1835_v3  ;;  %v8922_v39 = vld [vmem:[#allocation2 + $0x39] sm:$0xff]  ;;  %v1644_v45 = vpop.permute.xlu1 %1643 }
 0x1bc   : > { %v8924_v22 = vld [vmem:[#allocation2 + $0x38] sm:$0xff]  ;;  %696 = vrot.lane.b32.xlu0 %v8844_v44, %s7666_s12  ;;  %2466 = vst.msk [vmem:[#allocation2 + $0x9] sm:$0xff] %vm11463_vm0, %v8922_v39  ;;  %v1760_v44 = vld [vmem:[#allocation2 + $0x181] sm:$0xff] }
 0x1bd   : > { %v8926_v9 = vld [vmem:[#allocation2 + $0x32] sm:$0xff]  ;;  %v2509_v53 = vld [vmem:[#allocation2 + $0x3f] sm:$0x1]  ;;  %2580 = vst.msk [vmem:[#allocation3 + $0x50] sm:$0xff] %vm11463_vm0, %v8924_v22  ;;  %1659 = vrot.lane.b32.xlu1 %v1567_v43, %s7668_s14 }
 0x1be   : > { %3983 = vst.msk [vmem:[#allocation3 + $0x8] sm:$0xff] %vm11463_vm0, %v8926_v9  ;;  %v1451_v1 = vpop.permute.xlu0 %1450 }
 0x1bf   : > { %2527 = vst.msk [vmem:[#allocation2 + $0x41] sm:$0x1] %vm455_vm1, %v2509_v53  ;;  %v683_v37 = vpop.permute.xlu1 %682  ;;  %v2260_v46 = vpop.f32.mrb[8].mxu0 }
 0x1c0   : > { %1527 = vst.msk [vmem:[#allocation3 + $0x140] sm:$0xff] %vm1506_vm6, %v1451_v1  ;;  %889 = vrot.lane.b32.xlu0 %v8619_v49, %s7667_s13  ;;  %v2543_v36 = vld [vmem:[#allocation2] sm:$0xff]  ;;  %v2261_v27 = vadd.f32 %v8820_v61, %v2260_v46  ;;  %v2262_v24 = vpop.f32.mrb[9].mxu0  ;;  %v1568_v46 = vld [vmem:[#allocation2 + $0x188] sm:$0xff] }
 0x1c1   : > { %1720 = vst.msk [vmem:[#allocation3 + $0x140] sm:$0xff] %vm1699_vm7, %v1644_v45  ;;  %1852 = vrot.lane.b32.xlu1 %v1760_v44, %s11485_s27  ;;  %v2032_v45 = vld [vmem:[#allocation3 + $0x158] sm:$0xff] }
 0x1c2   : > { %v1837_v57 = vpop.permute.xlu0 %1836  ;;  %757 = vst.msk [vmem:[#allocation3 + $0x160] sm:$0xff] %vm734_vm2, %v683_v37  ;;  %v2027_v41 = vld [vmem:[#allocation3 + $0x130] sm:$0xff]  ;;  %v2403_v31 = vmax.f32 %v2261_v27, 0.0  ;;  %v1761_v27 = vld [vmem:[#allocation2 + $0x189] sm:$0xff] }
 0x1c3   : > { %2575 = vst.msk [vmem:[#allocation3] sm:$0xff] %vm11463_vm0, %v2543_v36  ;;  %2334 = vmatmul.mubr.f32.gmra.mrb[38].mxu0 %v2027_v41  ;;  %v2507_v49 = vld [vmem:[#allocation2 + $0xf] sm:$0x1]  ;;  %v1069_v38 = vpop.permute.xlu1 %1068 }
 0x1c4   : > { %1913 = vst.msk [vmem:[#allocation3 + $0x140] sm:$0xff] %vm1892_vm8, %v1837_v57  ;;  %1082 = vrot.lane.b32.xlu0 %v8634_v40, %s7663_s29  ;;  %7023 = vmatprep.mubr.msk.f32.mxu0 %vm11463_vm0, %v2030_v8  ;;  %v2544_v3 = vld [vmem:[#allocation2 + $0x8] sm:$0xff]  ;;  %v1955_v57 = vld [vmem:[#allocation2 + $0x19a] sm:$0xff] }
 0x1c5   : > { %2525 = vst.msk [vmem:[#allocation2 + $0x11] sm:$0x1] %vm455_vm1, %v2507_v49  ;;  %698 = vrot.lane.b32.xlu1 %v8595_v21, %s7666_s12 }
 0x1c6   : > { %v8952_v33 = vld [vmem:[#allocation2 + $0x3a] sm:$0xff]  ;;  %2576 = vst.msk [vmem:[#allocation3 + $0x10] sm:$0xff] %vm11463_vm0, %v2544_v3  ;;  %2435 = vst.msk [vmem:[#allocation2 + $0x49] sm:$0xff] %vm11463_vm0, %v2403_v31  ;;  %v876_v53 = vpop.permute.xlu0 %875 }
 0x1c7   : > { %3984 = vst.msk [vmem:[#allocation3 + $0x18] sm:$0xff] %vm11463_vm0, %v8952_v33  ;;  %v1262_v40 = vpop.permute.xlu1 %1261  ;;  %1987 = vst.msk [vmem:[#allocation3 + $0x1e8] sm:$0xff] %vm11463_vm0, %v1955_v57 }
 0x1c8   : > { %950 = vst.msk [vmem:[#allocation3 + $0x160] sm:$0xff] %vm927_vm3, %v876_v53  ;;  %1275 = vrot.lane.b32.xlu0 %v8646_v7, %s7662_s28 }
 0x1c9   : > { %1143 = vst.msk [vmem:[#allocation3 + $0x160] sm:$0xff] %vm1120_vm4, %v1069_v38  ;;  %891 = vrot.lane.b32.xlu1 %v8658_v54, %s7667_s13 }
 0x1ca   : > { %v681_v1 = vpop.permute.xlu0 %680  ;;  %1336 = vst.msk [vmem:[#allocation3 + $0x160] sm:$0xff] %vm1313_vm5, %v1262_v40 }
 0x1cb   : > { %v2029_v37 = vld [vmem:[#allocation3 + $0x140] sm:$0xff]  ;;  %756 = vst.msk [vmem:[#allocation3 + $0x150] sm:$0xff] %vm734_vm2, %v681_v1  ;;  %v874_v21 = vpop.permute.xlu1 %873 }
 0x1cc   : > { %2339 = vmatmul.mubr.f32.gmra.mrb[40].mxu0 %v2029_v37  ;;  %1468 = vrot.lane.b32.xlu0 %v8695_v60, %s7664_s30  ;;  %949 = vst.msk [vmem:[#allocation3 + $0x150] sm:$0xff] %vm927_vm3, %v874_v21  ;;  %v1956_v37 = vld [vmem:[#allocation2 + $0x1a2] sm:$0xff] }
 0x1cd   : > { %7024 = vmatprep.mubr.msk.f32.mxu0 %vm11463_vm0, %v2032_v45  ;;  %v2474_v8 = vld [vmem:[#allocation2 + $0x4a] sm:$0x1]  ;;  %1084 = vrot.lane.b32.xlu1 %v1567_v43, %s7663_s29  ;;  %v1569_v43 = vld [vmem:[#allocation2 + $0x198] sm:$0xff]  ;;  %1988 = vst.msk [vmem:[#allocation3 + $0x1f8] sm:$0xff] %vm11463_vm0, %v1956_v37  ;;  %v4081_v37 = vld [vmem:[%s11405_s3 + $0x10] sm:$0xff] }
 0x1ce   : > { %v685_v36 = vpop.permute.xlu0 %684  ;;  %2492 = vst.msk [vmem:[#allocation2 + $0x48] sm:$0x1] %vm455_vm1, %v2474_v8  ;;  %v1762_v45 = vld [vmem:[#allocation2 + $0x199] sm:$0xff] }
 0x1cf   : > { %758 = vst.msk [vmem:[#allocation3 + $0x170] sm:$0xff] %vm734_vm2, %v685_v36  ;;  %v878_v54 = vpop.permute.xlu1 %877 }
 0x1d0   : > { %1661 = vrot.lane.b32.xlu0 %v1568_v46, %s7668_s14  ;;  %951 = vst.msk [vmem:[#allocation3 + $0x170] sm:$0xff] %vm927_vm3, %v878_v54 }
 0x1d1   : > { %1277 = vrot.lane.b32.xlu1 %v1760_v44, %s7662_s28 }
 0x1d2   : > { %v1455_v24 = vpop.permute.xlu0 %1454  ;;  %v2265_v41 = vpop.f32.mrb[10].mxu0 }
 0x1d3   : > { %1529 = vst.msk [vmem:[#allocation3 + $0x160] sm:$0xff] %vm1506_vm6, %v1455_v24  ;;  %v2266_v49 = vadd.f32 %v8820_v61, %v2265_v41  ;;  %v2267_v31 = vpop.f32.mrb[11].mxu0  ;;  %v1648_v38 = vpop.permute.xlu1 %1647 }
 0x1d4   : > { %1854 = vrot.lane.b32.xlu0 %v1761_v27, %s11485_s27  ;;  %1722 = vst.msk [vmem:[#allocation3 + $0x160] sm:$0xff] %vm1699_vm7, %v1648_v38  ;;  %v1570_v38 = vld [vmem:[#allocation2 + $0x1a0] sm:$0xff] }
 0x1d5   : > { %v2404_v3 = vmax.f32 %v2266_v49, 0.0  ;;  %v8982_v53 = vld [vmem:[#allocation2 + $0x48] sm:$0xff]  ;;  %1663 = vrot.lane.b32.xlu1 %v1569_v43, %s7668_s14 }
 0x1d6   : > { %v1067_v40 = vpop.permute.xlu0 %1066  ;;  %2581 = vst.msk [vmem:[#allocation3 + $0x60] sm:$0xff] %vm11463_vm0, %v8982_v53  ;;  %v4080_v43 = vld [vmem:[%s11405_s3 + $0x8] sm:$0xff] }
 0x1d7   : > { %2436 = vst.msk [vmem:[#allocation2 + $0x51] sm:$0xff] %vm11463_vm0, %v2404_v3  ;;  %v1260_v44 = vpop.permute.xlu1 %1259 }
 0x1d8   : > { %1142 = vst.msk [vmem:[#allocation3 + $0x150] sm:$0xff] %vm1120_vm4, %v1067_v40  ;;  %1470 = vrot.lane.b32.xlu0 %v8721_v4, %s7664_s30  ;;  %v2036_v40 = vld [vmem:[#allocation3 + $0x178] sm:$0xff] }
 0x1d9   : > { %1335 = vst.msk [vmem:[#allocation3 + $0x150] sm:$0xff] %vm1313_vm5, %v1260_v44  ;;  %700 = vrot.lane.b32.xlu1 %v8646_v7, %s7666_s12 }
 0x1da   : > { %v1071_v1 = vpop.permute.xlu0 %1070 }
 0x1db   : > { %1144 = vst.msk [vmem:[#allocation3 + $0x170] sm:$0xff] %vm1120_vm4, %v1071_v1  ;;  %v1264_v21 = vpop.permute.xlu1 %1263  ;;  %v2270_v8 = vpop.f32.mrb[12].mxu0 }
 0x1dc   : > { %1856 = vrot.lane.b32.xlu0 %v1762_v45, %s11485_s27  ;;  %1337 = vst.msk [vmem:[#allocation3 + $0x170] sm:$0xff] %vm1313_vm5, %v1264_v21  ;;  %v2271_v4 = vadd.f32 %v8820_v61, %v2270_v8  ;;  %v2272_v57 = vpop.f32.mrb[13].mxu0  ;;  %v4082_v21 = vld [vmem:[%s11405_s3 + $0x18] sm:$0xff] }
 0x1dd   : > { %1086 = vrot.lane.b32.xlu1 %v1568_v46, %s7663_s29  ;;  %v4079_v46 = vld [vmem:[%s11405_s3] sm:$0xff] }
 0x1de   : > { %v1841_v36 = vpop.permute.xlu0 %1840  ;;  %v9000_v54 = vld [vmem:[#allocation2 + $0x50] sm:$0xff]  ;;  %v2405_v41 = vmax.f32 %v2271_v4, 0.0  ;;  %v7403_v44 = vpack.c.bf16 %v4080_v43, %v4079_v46  ;;  %v2799_v57 = vld [vmem:[#allocation2 + $0x2] sm:$0xff] }
 0x1df   : > { %v9002_v24 = vld [vmem:[#allocation2 + $0x4a] sm:$0xff]  ;;  %1915 = vst.msk [vmem:[#allocation3 + $0x160] sm:$0xff] %vm1892_vm8, %v1841_v36  ;;  %v2510_v7 = vld [vmem:[#allocation2 + $0x57] sm:$0x1]  ;;  %v687_v49 = vpop.permute.xlu1 %686  ;;  %v7406_v36 = vpack.c.bf16 %v4082_v21, %v4081_v37 }
 0x1e0   : > { %3985 = vst.msk [vmem:[#allocation3 + $0x28] sm:$0xff] %vm11463_vm0, %v9002_v24  ;;  %2582 = vst.msk [vmem:[#allocation3 + $0x70] sm:$0xff] %vm11463_vm0, %v9000_v54  ;;  %893 = vrot.lane.b32.xlu0 %v8695_v60, %s7667_s13  ;;  %v1763_v60 = vld [vmem:[#allocation2 + $0x1a1] sm:$0xff] }
 0x1e1   : > { %2528 = vst.msk [vmem:[#allocation2 + $0x59] sm:$0x1] %vm455_vm1, %v2510_v7  ;;  %1472 = vrot.lane.b32.xlu1 %v8744_v59, %s7664_s30  ;;  %v11496_v7 = vmov 0.0|0.0  }
 0x1e2   : > { %2437 = vst.msk [vmem:[#allocation2 + $0x61] sm:$0xff] %vm11463_vm0, %v2405_v41  ;;  %v1453_v31 = vpop.permute.xlu0 %1452  ;;  %v4083_v41 = vld [vmem:[%s11405_s3 + $0x20] sm:$0xff] }
 0x1e3   : > { %759 = vst.msk [vmem:[#allocation3 + $0x180] sm:$0xff] %vm734_vm2, %v687_v49  ;;  %v1646_v3 = vpop.permute.xlu1 %1645  ;;  %v4084_v49 = vld [vmem:[%s11405_s3 + $0x28] sm:$0xff] }
 0x1e4   : > { %1528 = vst.msk [vmem:[#allocation3 + $0x150] sm:$0xff] %vm1506_vm6, %v1453_v31  ;;  %1279 = vrot.lane.b32.xlu0 %v1761_v27, %s7662_s28  ;;  %v2607_v31 = vld [vmem:[#allocation2 + $0x1] sm:$0xff]  ;;  %v7409_v43 = vpack.c.bf16 %v4084_v49, %v4083_v41  ;;  %v2608_v41 = vld [vmem:[#allocation2 + $0x9] sm:$0xff] }
 0x1e5   : > { %1721 = vst.msk [vmem:[#allocation3 + $0x150] sm:$0xff] %vm1699_vm7, %v1646_v3  ;;  %1858 = vrot.lane.b32.xlu1 %v1763_v60, %s11485_s27 }
 0x1e6   : > { %v1457_v45 = vpop.permute.xlu0 %1456  ;;  %v2033_v1 = vld [vmem:[#allocation3 + $0x160] sm:$0xff] }
 0x1e7   : > { %1530 = vst.msk [vmem:[#allocation3 + $0x170] sm:$0xff] %vm1506_vm6, %v1457_v45  ;;  %2349 = vmatmul.mubr.f32.vlgmr.msra.gmra.mrb[0].mxu1 %v2033_v1  ;;  %v1650_v27 = vpop.permute.xlu1 %1649 }
 0x1e8   : > { %v9034_v59 = vld [vmem:[#allocation2 + $0x52] sm:$0xff]  ;;  %1665 = vrot.lane.b32.xlu0 %v1570_v38, %s7668_s14  ;;  %7026 = vmatprep.mubr.msk.f32.mxu1 %vm11463_vm0, %v2036_v40  ;;  %1723 = vst.msk [vmem:[#allocation3 + $0x170] sm:$0xff] %vm1699_vm7, %v1650_v27 }
 0x1e9   : > { %3986 = vst.msk [vmem:[#allocation3 + $0x38] sm:$0xff] %vm11463_vm0, %v9034_v59  ;;  %v2475_v8 = vld [vmem:[#allocation2 + $0x62] sm:$0x1]  ;;  %7404 = vmatpush1.bf16.msra.mxu1 %v7403_v44  ;;  %2863 = vrot.lane.b32.xlu1 %v2799_v57, %s7667_s13  ;;  %v9053_v38 = vld [vmem:[#allocation2 + $0x19] sm:$0xff]  ;;  %v4085_v40 = vld [vmem:[%s11405_s3 + $0x30] sm:$0xff] }
 0x1ea   : > { %v880_v4 = vpop.permute.xlu0 %879  ;;  %2493 = vst.msk [vmem:[#allocation2 + $0x60] sm:$0x1] %vm455_vm1, %v2475_v8  ;;  %7405 = vmatprep.subr.bf16.mxu1 %v11496_v7  ;;  %v4086_v44 = vld [vmem:[%s11405_s3 + $0x38] sm:$0xff]  ;;  %v4087_v57 = vld [vmem:[%s11405_s3 + $0x40] sm:$0xff] }
 0x1eb   : > { %952 = vst.msk [vmem:[#allocation3 + $0x180] sm:$0xff] %vm927_vm3, %v880_v4  ;;  %v1073_v46 = vpop.permute.xlu1 %1072  ;;  %v7412_v8 = vpack.c.bf16 %v4086_v44, %v4085_v40  ;;  %v9071_v4 = vld [vmem:[#allocation2 + $0x1a] sm:$0xff]  ;;  %v2800_v44 = vld [vmem:[#allocation2 + $0xa] sm:$0xff] }
 0x1ec   : > { %2671 = vrot.lane.b32.xlu0 %v2607_v31, %s7666_s12  ;;  %1145 = vst.msk [vmem:[#allocation3 + $0x180] sm:$0xff] %vm1120_vm4, %v1073_v46  ;;  %v9087_v31 = vld [vmem:[#allocation2 + $0x30] sm:$0xff]  ;;  %v4090_v40 = vld [vmem:[%s11405_s3 + $0x58] sm:$0xff] }
 0x1ed   : > { %7407 = vmatpush1.bf16.msra.mxu1 %v7406_v36  ;;  %3247 = vrot.lane.b32.xlu1 %v9053_v38, %s7662_s28 }
 0x1ee   : > { %v1839_v60 = vpop.permute.xlu0 %1838  ;;  %v2275_v3 = vpop.f32.mrb[14].mxu0  ;;  %7408 = vmatprep.subr.bf16.mxu1 %v11496_v7 }
 0x1ef   : > { %1914 = vst.msk [vmem:[#allocation3 + $0x150] sm:$0xff] %vm1892_vm8, %v1839_v60  ;;  %v2276_v45 = vadd.f32 %v8820_v61, %v2275_v3  ;;  %v2277_v1 = vpop.f32.mrb[15].mxu0  ;;  %v1266_v21 = vpop.permute.xlu1 %1265  ;;  %v4089_v3 = vld [vmem:[%s11405_s3 + $0x50] sm:$0xff] }
 0x1f0   : > { %3055 = vrot.lane.b32.xlu0 %v8862_v2, %s7663_s29  ;;  %1338 = vst.msk [vmem:[#allocation3 + $0x180] sm:$0xff] %vm1313_vm5, %v1266_v21  ;;  %v4088_v2 = vld [vmem:[%s11405_s3 + $0x48] sm:$0xff]  ;;  %v7418_v21 = vpack.c.bf16 %v4090_v40, %v4089_v3 }
 0x1f1   : > { %v2406_v37 = vmax.f32 %v2276_v45, 0.0  ;;  %v9068_v27 = vld [vmem:[#allocation2 + $0x60] sm:$0xff]  ;;  %7410 = vmatpush1.bf16.msra.mxu1 %v7409_v43  ;;  %3439 = vrot.lane.b32.xlu1 %v9071_v4, %s7664_s30  ;;  %v7415_v46 = vpack.c.bf16 %v4088_v2, %v4087_v57 }
 0x1f2   : > { %v1843_v36 = vpop.permute.xlu0 %1842  ;;  %7411 = vmatprep.subr.bf16.mxu1 %v11496_v7  ;;  %2583 = vst.msk [vmem:[#allocation3 + $0x80] sm:$0xff] %vm11463_vm0, %v9068_v27 }
 0x1f3   : > { %2438 = vst.msk [vmem:[#allocation2 + $0x69] sm:$0xff] %vm11463_vm0, %v2406_v37  ;;  %v1459_v49 = vpop.permute.xlu1 %1458  ;;  %v2038_v37 = vld [vmem:[#allocation3 + $0x188] sm:$0xff] }
 0x1f4   : > { %1916 = vst.msk [vmem:[#allocation3 + $0x170] sm:$0xff] %vm1892_vm8, %v1843_v36  ;;  %2673 = vrot.lane.b32.xlu0 %v2608_v41, %s7666_s12 }
 0x1f5   : > { %7413 = vmatpush1.bf16.msra.mxu1 %v7412_v8  ;;  %1531 = vst.msk [vmem:[#allocation3 + $0x180] sm:$0xff] %vm1506_vm6, %v1459_v49  ;;  %3631 = vrot.lane.b32.xlu1 %v9087_v31, %s7668_s14  ;;  %v4091_v8 = vld [vmem:[%s11405_s3 + $0x60] sm:$0xff] }
 0x1f6   : > { %v689_v43 = vpop.permute.xlu0 %688  ;;  %v2031_v60 = vld [vmem:[#allocation3 + $0x150] sm:$0xff]  ;;  %7414 = vmatprep.subr.bf16.mxu1 %v11496_v7 }
 0x1f7   : > { %760 = vst.msk [vmem:[#allocation3 + $0x190] sm:$0xff] %vm734_vm2, %v689_v43  ;;  %2344 = vmatmul.mubr.f32.gmra.mrb[42].mxu0 %v2031_v60  ;;  %v1652_v45 = vpop.permute.xlu1 %1651  ;;  %v2280_v1 = vpop.f32.mrb[16].mxu0 }
 0x1f8   : > { %2865 = vrot.lane.b32.xlu0 %v2800_v44, %s7667_s13  ;;  %1724 = vst.msk [vmem:[#allocation3 + $0x180] sm:$0xff] %vm1699_vm7, %v1652_v45  ;;  %v2281_v57 = vadd.f32 %v8820_v61, %v2280_v1  ;;  %v2282_v2 = vpop.f32.mrb[17].mxu0  ;;  %v4094_v1 = vld [vmem:[%s11405_s3 + $0x78] sm:$0xff] }
 0x1f9   : > { %7416 = vmatpush1.bf16.msra.mxu1 %v7415_v46  ;;  %v4092_v46 = vld [vmem:[%s11405_s3 + $0x68] sm:$0xff]  ;;  %3823 = vrot.lane.b32.xlu1 %v8898_v29, %s11485_s27 }
 0x1fa   : > { %v882_v36 = vpop.permute.xlu0 %881  ;;  %v9106_v49 = vld [vmem:[#allocation2 + $0x68] sm:$0xff]  ;;  %7417 = vmatprep.subr.bf16.mxu1 %v11496_v7  ;;  %v2407_v3 = vmax.f32 %v2281_v57, 0.0  ;;  %v7421_v44 = vpack.c.bf16 %v4092_v46, %v4091_v8  ;;  %v4095_v57 = vld [vmem:[%s11405_s3 + $0x80] sm:$0xff] }
 0x1fb   : > { %v2035_v41 = vld [vmem:[#allocation3 + $0x170] sm:$0xff]  ;;  %953 = vst.msk [vmem:[#allocation3 + $0x190] sm:$0xff] %vm927_vm3, %v882_v36  ;;  %v2511_v60 = vld [vmem:[#allocation2 + $0x6f] sm:$0x1]  ;;  %v1845_v40 = vpop.permute.xlu1 %1844 }
 0x1fc   : > { %2354 = vmatmul.mubr.f32.gmra.mrb[2].mxu1 %v2035_v41  ;;  %v9115_v43 = vld [vmem:[#allocation2 + $0x62] sm:$0xff]  ;;  %2584 = vst.msk [vmem:[#allocation3 + $0x90] sm:$0xff] %vm11463_vm0, %v9106_v49  ;;  %3057 = vrot.lane.b32.xlu0 %v8876_v30, %s7663_s29  ;;  %2439 = vst.msk [vmem:[#allocation2 + $0x79] sm:$0xff] %vm11463_vm0, %v2407_v3  ;;  %v4093_v30 = vld [vmem:[%s11405_s3 + $0x70] sm:$0xff] }
 0x1fd   : > { %7027 = vmatprep.mubr.msk.f32.mxu1 %vm11463_vm0, %v2038_v37  ;;  %2529 = vst.msk [vmem:[#allocation2 + $0x71] sm:$0x1] %vm455_vm1, %v2511_v60  ;;  %7419 = vmatpush1.bf16.msra.mxu1 %v7418_v21  ;;  %v3184_v37 = vld [vmem:[#allocation2 + $0x21] sm:$0xff]  ;;  %v7424_v8 = vpack.c.bf16 %v4094_v1, %v4093_v30 }
 0x1fe   : > { %3987 = vst.msk [vmem:[#allocation3 + $0x48] sm:$0xff] %vm11463_vm0, %v9115_v43  ;;  %v1075_v45 = vpop.permute.xlu0 %1074  ;;  %7420 = vmatprep.subr.bf16.mxu1 %v11496_v7  ;;  %2675 = vrot.lane.b32.xlu1 %v9053_v38, %s7666_s12  ;;  %v4096_v2 = vld [vmem:[%s11405_s3 + $0x88] sm:$0xff] }
 0x1ff   : > { %1917 = vst.msk [vmem:[#allocation3 + $0x180] sm:$0xff] %vm1892_vm8, %v1845_v40  ;;  %v691_v21 = vpop.permute.xlu1 %690  ;;  %v3376_v38 = vld [vmem:[#allocation2 + $0x22] sm:$0xff] }
 0x200   : > { %1146 = vst.msk [vmem:[#allocation3 + $0x190] sm:$0xff] %vm1120_vm4, %v1075_v45  ;;  %3249 = vrot.lane.b32.xlu0 %v3184_v37, %s7662_s28  ;;  %v2040_v46 = vld [vmem:[#allocation3 + $0x198] sm:$0xff] }
 0x201   : > { %7422 = vmatpush1.bf16.msra.mxu1 %v7421_v44  ;;  %761 = vst.msk [vmem:[#allocation3 + $0x1a0] sm:$0xff] %vm734_vm2, %v691_v21  ;;  %v7427_v44 = vpack.c.bf16 %v4096_v2, %v4095_v57 }
 0x202   : > { %v1268_v36 = vpop.permute.xlu0 %1267  ;;  %7423 = vmatprep.subr.bf16.mxu1 %v11496_v7  ;;  %2867 = vrot.lane.b32.xlu1 %v9071_v4, %s7667_s13 }
 0x203   : > { %1339 = vst.msk [vmem:[#allocation3 + $0x190] sm:$0xff] %vm1313_vm5, %v1268_v36  ;;  %v884_v60 = vpop.permute.xlu1 %883  ;;  %v2476_v40 = vld [vmem:[#allocation2 + $0x7a] sm:$0x1] }
 0x204   : > { %v9149_v41 = vld [vmem:[#allocation2 + $0x6a] sm:$0xff]  ;;  %3441 = vrot.lane.b32.xlu0 %v3376_v38, %s7664_s30  ;;  %954 = vst.msk [vmem:[#allocation3 + $0x1a0] sm:$0xff] %vm927_vm3, %v884_v60 }
 0x205   : > { %3988 = vst.msk [vmem:[#allocation3 + $0x58] sm:$0xff] %vm11463_vm0, %v9149_v41  ;;  %7425 = vmatpush1.bf16.msra.mxu1 %v7424_v8 }
 0x206   : > { %v2037_v3 = vld [vmem:[#allocation3 + $0x180] sm:$0xff]  ;;  %v1461_v45 = vpop.permute.xlu0 %1460  ;;  %2494 = vst.msk [vmem:[#allocation2 + $0x78] sm:$0x1] %vm455_vm1, %v2476_v40  ;;  %7426 = vmatprep.subr.bf16.mxu1 %v11496_v7  ;;  %3059 = vrot.lane.b32.xlu1 %v9087_v31, %s7663_s29  ;;  %v2042_v40 = vld [vmem:[#allocation3 + $0x1a8] sm:$0xff] }
 0x207   : > { %2359 = vmatmul.mubr.f32.gmra.mrb[4].mxu1 %v2037_v3  ;;  %1532 = vst.msk [vmem:[#allocation3 + $0x190] sm:$0xff] %vm1506_vm6, %v1461_v45  ;;  %v1077_v4 = vpop.permute.xlu1 %1076 }
 0x208   : > { %7028 = vmatprep.mubr.msk.f32.mxu1 %vm11463_vm0, %v2040_v46  ;;  %3633 = vrot.lane.b32.xlu0 %v8924_v22, %s7668_s14  ;;  %1147 = vst.msk [vmem:[#allocation3 + $0x1a0] sm:$0xff] %vm1120_vm4, %v1077_v4 }
 0x209   : > { %7428 = vmatpush1.bf16.msra.mxu1 %v7427_v44 }
 0x20a   : > { %v1654_v30 = vpop.permute.xlu0 %1653  ;;  %v2285_v1 = vpop.f32.mrb[18].mxu0  ;;  %3251 = vrot.lane.b32.xlu1 %v8898_v29, %s7662_s28 }
 0x20b   : > { %1725 = vst.msk [vmem:[#allocation3 + $0x190] sm:$0xff] %vm1699_vm7, %v1654_v30  ;;  %v2286_v7 = vadd.f32 %v8820_v61, %v2285_v1  ;;  %v2287_v21 = vpop.f32.mrb[19].mxu0  ;;  %v1270_v8 = vpop.permute.xlu1 %1269  ;;  %v9184_v30 = vld [vmem:[#allocation2 + $0x49] sm:$0xff] }
 0x20c   : > { %3825 = vrot.lane.b32.xlu0 %v8922_v39, %s11485_s27  ;;  %1340 = vst.msk [vmem:[#allocation3 + $0x1a0] sm:$0xff] %vm1313_vm5, %v1270_v8 }
 0x20d   : > { %v2408_v31 = vmax.f32 %v2286_v7, 0.0  ;;  %v2553_v36 = vld [vmem:[#allocation2 + $0x78] sm:$0xff] }
 0x20e   : > { %v1847_v57 = vpop.permute.xlu0 %1846  ;;  %2585 = vst.msk [vmem:[#allocation3 + $0xa0] sm:$0xff] %vm11463_vm0, %v2553_v36  ;;  %3443 = vrot.lane.b32.xlu1 %v8926_v9, %s7664_s30 }
 0x20f   : > { %2440 = vst.msk [vmem:[#allocation2 + $0x81] sm:$0xff] %vm11463_vm0, %v2408_v31  ;;  %v1463_v2 = vpop.permute.xlu1 %1462 }
 0x210   : > { %1918 = vst.msk [vmem:[#allocation3 + $0x190] sm:$0xff] %vm1892_vm8, %v1847_v57  ;;  %2677 = vrot.lane.b32.xlu0 %v3184_v37, %s7666_s12 }
 0x211   : > { %1533 = vst.msk [vmem:[#allocation3 + $0x1a0] sm:$0xff] %vm1506_vm6, %v1463_v2  ;;  %v2044_v2 = vld [vmem:[#allocation3 + $0x1b8] sm:$0xff] }
 0x212   : > { %v693_v46 = vpop.permute.xlu0 %692  ;;  %3635 = vrot.lane.b32.xlu1 %v8982_v53, %s7668_s14 }
 0x213   : > { %762 = vst.msk [vmem:[#allocation3 + $0x1b0] sm:$0xff] %vm734_vm2, %v693_v46  ;;  %v1656_v60 = vpop.permute.xlu1 %1655  ;;  %v2290_v3 = vpop.f32.mrb[20].mxu0 }
 0x214   : > { %2869 = vrot.lane.b32.xlu0 %v3376_v38, %s7667_s13  ;;  %1726 = vst.msk [vmem:[#allocation3 + $0x1a0] sm:$0xff] %vm1699_vm7, %v1656_v60  ;;  %v2291_v45 = vadd.f32 %v8820_v61, %v2290_v3  ;;  %v2292_v37 = vpop.f32.mrb[21].mxu0 }
 0x216   : > { %v886_v44 = vpop.permute.xlu0 %885  ;;  %v9186_v1 = vld [vmem:[#allocation2 + $0x80] sm:$0xff]  ;;  %3827 = vrot.lane.b32.xlu1 %v9184_v30, %s11485_s27  ;;  %v2409_v21 = vmax.f32 %v2291_v45, 0.0 }
 0x217   : > { %v2039_v4 = vld [vmem:[#allocation3 + $0x190] sm:$0xff]  ;;  %955 = vst.msk [vmem:[#allocation3 + $0x1b0] sm:$0xff] %vm927_vm3, %v886_v44  ;;  %v1849_v31 = vpop.permute.xlu1 %1848 }
 0x218   : > { %2364 = vmatmul.mubr.f32.gmra.mrb[6].mxu1 %v2039_v4  ;;  %v9191_v38 = vld [vmem:[#allocation2 + $0x7a] sm:$0xff]  ;;  %v2512_v7 = vld [vmem:[#allocation2 + $0x87] sm:$0x1]  ;;  %2586 = vst.msk [vmem:[#allocation3 + $0xb0] sm:$0xff] %vm11463_vm0, %v9186_v1  ;;  %3061 = vrot.lane.b32.xlu0 %v8924_v22, %s7663_s29  ;;  %2441 = vst.msk [vmem:[#allocation2 + $0x91] sm:$0xff] %vm11463_vm0, %v2409_v21 }
 0x219   : > { %7029 = vmatprep.mubr.msk.f32.mxu1 %vm11463_vm0, %v2042_v40  ;;  %2530 = vst.msk [vmem:[#allocation2 + $0x89] sm:$0x1] %vm455_vm1, %v2512_v7  ;;  %v9231_v4 = vld [vmem:[#allocation2 + $0x51] sm:$0xff] }
 0x21a   : > { %3989 = vst.msk [vmem:[#allocation3 + $0x68] sm:$0xff] %vm11463_vm0, %v9191_v38  ;;  %v1079_v8 = vpop.permute.xlu0 %1078  ;;  %2679 = vrot.lane.b32.xlu1 %v8898_v29, %s7666_s12 }
 0x21b   : > { %1919 = vst.msk [vmem:[#allocation3 + $0x1a0] sm:$0xff] %vm1892_vm8, %v1849_v31  ;;  %v695_v22 = vpop.permute.xlu1 %694 }
 0x21c   : > { %1148 = vst.msk [vmem:[#allocation3 + $0x1b0] sm:$0xff] %vm1120_vm4, %v1079_v8  ;;  %3253 = vrot.lane.b32.xlu0 %v8922_v39, %s7662_s28 }
 0x21d   : > { %763 = vst.msk [vmem:[#allocation3 + $0x1c0] sm:$0xff] %vm734_vm2, %v695_v22 }
 0x21e   : > { %v1272_v36 = vpop.permute.xlu0 %1271  ;;  %2871 = vrot.lane.b32.xlu1 %v8926_v9, %s7667_s13 }
 0x21f   : > { %1341 = vst.msk [vmem:[#allocation3 + $0x1b0] sm:$0xff] %vm1313_vm5, %v1272_v36  ;;  %v888_v29 = vpop.permute.xlu1 %887  ;;  %v2477_v60 = vld [vmem:[#allocation2 + $0x92] sm:$0x1] }
 0x220   : > { %v9212_v57 = vld [vmem:[#allocation2 + $0x82] sm:$0xff]  ;;  %3445 = vrot.lane.b32.xlu0 %v8952_v33, %s7664_s30  ;;  %956 = vst.msk [vmem:[#allocation3 + $0x1c0] sm:$0xff] %vm927_vm3, %v888_v29  ;;  %v2046_v29 = vld [vmem:[#allocation3 + $0x1c8] sm:$0xff] }
 0x221   : > { %3990 = vst.msk [vmem:[#allocation3 + $0x78] sm:$0xff] %vm11463_vm0, %v9212_v57 }
 0x222   : > { %v2041_v46 = vld [vmem:[#allocation3 + $0x1a0] sm:$0xff]  ;;  %v1465_v3 = vpop.permute.xlu0 %1464  ;;  %2495 = vst.msk [vmem:[#allocation2 + $0x90] sm:$0x1] %vm455_vm1, %v2477_v60  ;;  %3063 = vrot.lane.b32.xlu1 %v8982_v53, %s7663_s29 }
 0x223   : > { %2369 = vmatmul.mubr.f32.gmra.mrb[8].mxu1 %v2041_v46  ;;  %1534 = vst.msk [vmem:[#allocation3 + $0x1b0] sm:$0xff] %vm1506_vm6, %v1465_v3  ;;  %v1081_v9 = vpop.permute.xlu1 %1080 }
 0x224   : > { %7030 = vmatprep.mubr.msk.f32.mxu1 %vm11463_vm0, %v2044_v2  ;;  %3637 = vrot.lane.b32.xlu0 %v9000_v54, %s7668_s14  ;;  %1149 = vst.msk [vmem:[#allocation3 + $0x1c0] sm:$0xff] %vm1120_vm4, %v1081_v9  ;;  %v9254_v9 = vld [vmem:[#allocation2 + $0x61] sm:$0xff] }
 0x226   : > { %v1658_v40 = vpop.permute.xlu0 %1657  ;;  %v2295_v44 = vpop.f32.mrb[22].mxu0  ;;  %3255 = vrot.lane.b32.xlu1 %v9184_v30, %s7662_s28 }
 0x227   : > { %1727 = vst.msk [vmem:[#allocation3 + $0x1b0] sm:$0xff] %vm1699_vm7, %v1658_v40  ;;  %v2296_v45 = vadd.f32 %v8820_v61, %v2295_v44  ;;  %v2297_v37 = vpop.f32.mrb[23].mxu0  ;;  %v1274_v7 = vpop.permute.xlu1 %1273 }
 0x228   : > { %3829 = vrot.lane.b32.xlu0 %v9231_v4, %s11485_s27  ;;  %1342 = vst.msk [vmem:[#allocation3 + $0x1c0] sm:$0xff] %vm1313_vm5, %v1274_v7 }
 0x229   : > { %v2410_v53 = vmax.f32 %v2296_v45, 0.0  ;;  %v9235_v21 = vld [vmem:[#allocation2 + $0x90] sm:$0xff] }
 0x22a   : > { %v1851_v31 = vpop.permute.xlu0 %1850  ;;  %2587 = vst.msk [vmem:[#allocation3 + $0xc0] sm:$0xff] %vm11463_vm0, %v9235_v21  ;;  %3447 = vrot.lane.b32.xlu1 %v9002_v24, %s7664_s30 }
 0x22b   : > { %2442 = vst.msk [vmem:[#allocation2 + $0x99] sm:$0xff] %vm11463_vm0, %v2410_v53  ;;  %v1467_v8 = vpop.permute.xlu1 %1466 }
 0x22c   : > { %1920 = vst.msk [vmem:[#allocation3 + $0x1b0] sm:$0xff] %vm1892_vm8, %v1851_v31  ;;  %2681 = vrot.lane.b32.xlu0 %v8922_v39, %s7666_s12  ;;  %v2048_v31 = vld [vmem:[#allocation3 + $0x1d8] sm:$0xff] }
 0x22d   : > { %1535 = vst.msk [vmem:[#allocation3 + $0x1c0] sm:$0xff] %vm1506_vm6, %v1467_v8 }
 0x22e   : > { %v697_v22 = vpop.permute.xlu0 %696  ;;  %3639 = vrot.lane.b32.xlu1 %v9068_v27, %s7668_s14 }
 0x22f   : > { %764 = vst.msk [vmem:[#allocation3 + $0x1d0] sm:$0xff] %vm734_vm2, %v697_v22  ;;  %v1660_v36 = vpop.permute.xlu1 %1659  ;;  %v2300_v2 = vpop.f32.mrb[24].mxu0 }
 0x230   : > { %2873 = vrot.lane.b32.xlu0 %v8952_v33, %s7667_s13  ;;  %1728 = vst.msk [vmem:[#allocation3 + $0x1c0] sm:$0xff] %vm1699_vm7, %v1660_v36  ;;  %v2301_v39 = vadd.f32 %v8820_v61, %v2300_v2  ;;  %v2302_v60 = vpop.f32.mrb[25].mxu0 }
 0x231   : > { %v9306_v60 = vld [vmem:[#allocation2 + $0x69] sm:$0xff] }
 0x232   : > { %v890_v46 = vpop.permute.xlu0 %889  ;;  %v9256_v40 = vld [vmem:[#allocation2 + $0x98] sm:$0xff]  ;;  %3831 = vrot.lane.b32.xlu1 %v9254_v9, %s11485_s27  ;;  %v2411_v45 = vmax.f32 %v2301_v39, 0.0 }
 0x233   : > { %v2043_v3 = vld [vmem:[#allocation3 + $0x1b0] sm:$0xff]  ;;  %957 = vst.msk [vmem:[#allocation3 + $0x1d0] sm:$0xff] %vm927_vm3, %v890_v46  ;;  %v9261_v33 = vld [vmem:[#allocation2 + $0x92] sm:$0xff]  ;;  %v2513_v44 = vld [vmem:[#allocation2 + $0x9f] sm:$0x1]  ;;  %v1853_v61 = vpop.permute.xlu1 %1852 }
 0x234   : > { %2374 = vmatmul.mubr.f32.gmra.mrb[10].mxu1 %v2043_v3  ;;  %2588 = vst.msk [vmem:[#allocation3 + $0xd0] sm:$0xff] %vm11463_vm0, %v9256_v40  ;;  %3065 = vrot.lane.b32.xlu0 %v9000_v54, %s7663_s29  ;;  %3991 = vst.msk [vmem:[#allocation3 + $0x88] sm:$0xff] %vm11463_vm0, %v9261_v33  ;;  %v9301_v46 = vld [vmem:[%s11404_s2] ss:$0 sm:$0xff] }
 0x235   : > { %7031 = vmatprep.mubr.msk.f32.mxu1 %vm11463_vm0, %v2046_v29  ;;  %2531 = vst.msk [vmem:[#allocation2 + $0xa1] sm:$0x1] %vm455_vm1, %v2513_v44 }
 0x236   : > { %2443 = vst.msk [vmem:[#allocation2 + $0xa9] sm:$0xff] %vm11463_vm0, %v2411_v45  ;;  %v1083_v37 = vpop.permute.xlu0 %1082  ;;  %2683 = vrot.lane.b32.xlu1 %v9184_v30, %s7666_s12 }
 0x237   : > { %1921 = vst.msk [vmem:[#allocation3 + $0x1c0] sm:$0xff] %vm1892_vm8, %v1853_v61  ;;  %v699_v54 = vpop.permute.xlu1 %698 }
 0x238   : > { %1150 = vst.msk [vmem:[#allocation3 + $0x1d0] sm:$0xff] %vm1120_vm4, %v1083_v37  ;;  %3257 = vrot.lane.b32.xlu0 %v9231_v4, %s7662_s28 }
 0x239   : > { %765 = vst.msk [vmem:[#allocation3 + $0x1e0] sm:$0xff] %vm734_vm2, %v699_v54 }
 0x23a   : > { %v1276_v53 = vpop.permute.xlu0 %1275  ;;  %2875 = vrot.lane.b32.xlu1 %v9002_v24, %s7667_s13 }
 0x23b   : > { %1343 = vst.msk [vmem:[#allocation3 + $0x1d0] sm:$0xff] %vm1313_vm5, %v1276_v53  ;;  %v892_v30 = vpop.permute.xlu1 %891  ;;  %v3573_v53 = vld [vmem:[#allocation2 + $0x78] sm:$0xff] }
 0x23c   : > { %v9282_v7 = vld [vmem:[#allocation2 + $0x9a] sm:$0xff]  ;;  %3449 = vrot.lane.b32.xlu0 %v9034_v59, %s7664_s30  ;;  %958 = vst.msk [vmem:[#allocation3 + $0x1e0] sm:$0xff] %vm927_vm3, %v892_v30 }
 0x23d   : > { %3992 = vst.msk [vmem:[#allocation3 + $0x98] sm:$0xff] %vm11463_vm0, %v9282_v7  ;;  %v2478_v22 = vld [vmem:[#allocation2 + $0xaa] sm:$0x1] }
 0x23e   : > { %v2045_v8 = vld [vmem:[#allocation3 + $0x1c0] sm:$0xff]  ;;  %v1469_v36 = vpop.permute.xlu0 %1468  ;;  %2496 = vst.msk [vmem:[#allocation2 + $0xa8] sm:$0x1] %vm455_vm1, %v2478_v22  ;;  %3067 = vrot.lane.b32.xlu1 %v9068_v27, %s7663_s29 }
 0x23f   : > { %2379 = vmatmul.mubr.f32.gmra.mrb[12].mxu1 %v2045_v8  ;;  %1536 = vst.msk [vmem:[#allocation3 + $0x1d0] sm:$0xff] %vm1506_vm6, %v1469_v36  ;;  %v1085_v24 = vpop.permute.xlu1 %1084  ;;  %v2050_v8 = vld [vmem:[#allocation3 + $0x1e8] sm:$0xff] }
 0x240   : > { %7032 = vmatprep.mubr.msk.f32.mxu1 %vm11463_vm0, %v2048_v31  ;;  %3641 = vrot.lane.b32.xlu0 %v9106_v49, %s7668_s14  ;;  %1151 = vst.msk [vmem:[#allocation3 + $0x1e0] sm:$0xff] %vm1120_vm4, %v1085_v24 }
 0x242   : > { %v1662_v2 = vpop.permute.xlu0 %1661  ;;  %v2305_v29 = vpop.f32.mrb[26].mxu0  ;;  %3259 = vrot.lane.b32.xlu1 %v9254_v9, %s7662_s28 }
 0x243   : > { %1729 = vst.msk [vmem:[#allocation3 + $0x1d0] sm:$0xff] %vm1699_vm7, %v1662_v2  ;;  %v2306_v39 = vadd.f32 %v9301_v46, %v2305_v29  ;;  %v2307_v27 = vpop.f32.mrb[27].mxu0  ;;  %v1278_v44 = vpop.permute.xlu1 %1277  ;;  %v9328_v2 = vld [vmem:[#allocation2 + $0x79] sm:$0xff] }
 0x244   : > { %3833 = vrot.lane.b32.xlu0 %v9306_v60, %s11485_s27  ;;  %1344 = vst.msk [vmem:[#allocation3 + $0x1e0] sm:$0xff] %vm1313_vm5, %v1278_v44 }
 0x245   : > { %v2412_v3 = vmax.f32 %v2306_v39, 0.0  ;;  %v9310_v45 = vld [vmem:[#allocation2 + $0xa8] sm:$0xff] }
 0x246   : > { %v1855_v61 = vpop.permute.xlu0 %1854  ;;  %2589 = vst.msk [vmem:[#allocation3 + $0xe0] sm:$0xff] %vm11463_vm0, %v9310_v45  ;;  %3451 = vrot.lane.b32.xlu1 %v9115_v43, %s7664_s30 }
 0x247   : > { %2444 = vst.msk [vmem:[#allocation2 + $0xb1] sm:$0xff] %vm11463_vm0, %v2412_v3  ;;  %v1664_v37 = vpop.permute.xlu1 %1663 }
 0x248   : > { %1922 = vst.msk [vmem:[#allocation3 + $0x1d0] sm:$0xff] %vm1892_vm8, %v1855_v61  ;;  %2685 = vrot.lane.b32.xlu0 %v9231_v4, %s7666_s12  ;;  %v2052_v61 = vld [vmem:[#allocation3 + $0x1f8] sm:$0xff] }
 0x24a   : > { %v1471_v54 = vpop.permute.xlu0 %1470  ;;  %3643 = vrot.lane.b32.xlu1 %v3573_v53, %s7668_s14 }
 0x24b   : > { %1537 = vst.msk [vmem:[#allocation3 + $0x1e0] sm:$0xff] %vm1506_vm6, %v1471_v54  ;;  %v701_v31 = vpop.permute.xlu1 %700  ;;  %v2310_v30 = vpop.f32.mrb[28].mxu0 }
 0x24c   : > { %1730 = vst.msk [vmem:[#allocation3 + $0x1e0] sm:$0xff] %vm1699_vm7, %v1664_v37  ;;  %2877 = vrot.lane.b32.xlu0 %v9034_v59, %s7667_s13  ;;  %v2311_v4 = vadd.f32 %v9301_v46, %v2310_v30  ;;  %v2312_v36 = vpop.f32.mrb[29].mxu0 }
 0x24d   : > { %766 = vst.msk [vmem:[#allocation3 + $0x1f0] sm:$0xff] %vm734_vm2, %v701_v31 }
 0x24e   : > { %v1857_v22 = vpop.permute.xlu0 %1856  ;;  %v9330_v29 = vld [vmem:[#allocation2 + $0xb0] sm:$0xff]  ;;  %3835 = vrot.lane.b32.xlu1 %v9328_v2, %s11485_s27  ;;  %v2413_v27 = vmax.f32 %v2311_v4, 0.0 }
 0x24f   : > { %v2047_v24 = vld [vmem:[#allocation3 + $0x1d0] sm:$0xff]  ;;  %1923 = vst.msk [vmem:[#allocation3 + $0x1e0] sm:$0xff] %vm1892_vm8, %v1857_v22  ;;  %v9335_v59 = vld [vmem:[#allocation2 + $0xaa] sm:$0xff]  ;;  %v2514_v39 = vld [vmem:[#allocation2 + $0xb7] sm:$0x1]  ;;  %v1087_v3 = vpop.permute.xlu1 %1086 }
 0x250   : > { %2384 = vmatmul.mubr.f32.gmra.mrb[14].mxu1 %v2047_v24  ;;  %2590 = vst.msk [vmem:[#allocation3 + $0xf0] sm:$0xff] %vm11463_vm0, %v9330_v29  ;;  %3069 = vrot.lane.b32.xlu0 %v9106_v49, %s7663_s29  ;;  %3993 = vst.msk [vmem:[#allocation3 + $0xa8] sm:$0xff] %vm11463_vm0, %v9335_v59 }
 0x251   : > { %7033 = vmatprep.mubr.msk.f32.mxu1 %vm11463_vm0, %v2050_v8  ;;  %2532 = vst.msk [vmem:[#allocation2 + $0xb9] sm:$0x1] %vm455_vm1, %v2514_v39  ;;  %v9373_v39 = vld [vmem:[#allocation2 + $0x81] sm:$0xff] }
 0x252   : > { %2445 = vst.msk [vmem:[#allocation2 + $0xc1] sm:$0xff] %vm11463_vm0, %v2413_v27  ;;  %v894_v44 = vpop.permute.xlu0 %893  ;;  %2687 = vrot.lane.b32.xlu1 %v9254_v9, %s7666_s12 }
 0x253   : > { %959 = vst.msk [vmem:[#allocation3 + $0x1f0] sm:$0xff] %vm927_vm3, %v894_v44  ;;  %v1473_v49 = vpop.permute.xlu1 %1472 }
 0x254   : > { %1152 = vst.msk [vmem:[#allocation3 + $0x1f0] sm:$0xff] %vm1120_vm4, %v1087_v3  ;;  %3261 = vrot.lane.b32.xlu0 %v9306_v60, %s7662_s28 }
 0x256   : > { %v1280_v37 = vpop.permute.xlu0 %1279  ;;  %v2049_v54 = vld [vmem:[#allocation3 + $0x1e0] sm:$0xff]  ;;  %2879 = vrot.lane.b32.xlu1 %v9115_v43, %s7667_s13 }
 0x257   : > { %1345 = vst.msk [vmem:[#allocation3 + $0x1f0] sm:$0xff] %vm1313_vm5, %v1280_v37  ;;  %2389 = vmatmul.mubr.f32.gmra.mrb[16].mxu1 %v2049_v54  ;;  %v1859_v9 = vpop.permute.xlu1 %1858 }
 0x258   : > { %v9355_v31 = vld [vmem:[#allocation2 + $0xb2] sm:$0xff]  ;;  %1538 = vst.msk [vmem:[#allocation3 + $0x1f0] sm:$0xff] %vm1506_vm6, %v1473_v49  ;;  %3453 = vrot.lane.b32.xlu0 %v9149_v41, %s7664_s30  ;;  %7034 = vmatprep.mubr.msk.f32.mxu1 %vm11463_vm0, %v2052_v61 }
 0x259   : > { %3994 = vst.msk [vmem:[#allocation3 + $0xb8] sm:$0xff] %vm11463_vm0, %v9355_v31  ;;  %v2479_v30 = vld [vmem:[#allocation2 + $0xc2] sm:$0x1]  ;;  %v4016_v61 = vld [vmem:[#allocation3 + $0x8] sm:$0xff] }
 0x25a   : > { %v1666_v8 = vpop.permute.xlu0 %1665  ;;  %2497 = vst.msk [vmem:[#allocation2 + $0xc0] sm:$0x1] %vm455_vm1, %v2479_v30  ;;  %3071 = vrot.lane.b32.xlu1 %v3573_v53, %s7663_s29 }
 0x25b   : > { %1731 = vst.msk [vmem:[#allocation3 + $0x1f0] sm:$0xff] %vm1699_vm7, %v1666_v8  ;;  %v2864_v43 = vpop.permute.xlu1 %2863 }
 0x25c   : > { %1924 = vst.msk [vmem:[#allocation3 + $0x1f0] sm:$0xff] %vm1892_vm8, %v1859_v9  ;;  %3645 = vrot.lane.b32.xlu0 %v9186_v1, %s7668_s14 }
 0x25e   : > { %v2315_v22 = vpop.f32.mrb[30].mxu0  ;;  %v2672_v4 = vpop.permute.xlu0 %2671  ;;  %3263 = vrot.lane.b32.xlu1 %v9328_v2, %s7662_s28 }
 0x25f   : > { %v2316_v36 = vadd.f32 %v9301_v46, %v2315_v22  ;;  %2767 = vst.msk [vmem:[#allocation3] sm:$0xff] %vm734_vm2, %v2672_v4  ;;  %v2317_v24 = vpop.f32.mrb[31].mxu0  ;;  %v3248_v27 = vpop.permute.xlu1 %3247  ;;  %v9398_v22 = vld [vmem:[#allocation2 + $0x91] sm:$0xff] }
 0x260   : > { %2959 = vst.msk [vmem:[#allocation3] sm:$0xff] %vm927_vm3, %v2864_v43  ;;  %3837 = vrot.lane.b32.xlu0 %v9373_v39, %s11485_s27 }
 0x261   : > { %v2414_v53 = vmax.f32 %v2316_v36, 0.0  ;;  %v9378_v3 = vld [vmem:[#allocation2 + $0xc0] sm:$0xff] }
 0x262   : > { %v3056_v44 = vpop.permute.xlu0 %3055  ;;  %2591 = vst.msk [vmem:[#allocation3 + $0x100] sm:$0xff] %vm11463_vm0, %v9378_v3  ;;  %3455 = vrot.lane.b32.xlu1 %v9191_v38, %s7664_s30 }
 0x263   : > { %2446 = vst.msk [vmem:[#allocation2 + $0xc9] sm:$0xff] %vm11463_vm0, %v2414_v53  ;;  %v2051_v49 = vld [vmem:[#allocation3 + $0x1f0] sm:$0xff]  ;;  %v3440_v37 = vpop.permute.xlu1 %3439 }
 0x264   : > { %3151 = vst.msk [vmem:[#allocation3] sm:$0xff] %vm1120_vm4, %v3056_v44  ;;  %2394 = vmatmul.mubr.f32.gmra.mrb[18].mxu1 %v2051_v49  ;;  %2689 = vrot.lane.b32.xlu0 %v9306_v60, %s7666_s12 }
 0x265   : > { %3343 = vst.msk [vmem:[#allocation3] sm:$0xff] %vm1313_vm5, %v3248_v27  ;;  %7036 = vmatprep.mubr.msk.f32.mxu1 %vm11463_vm0, %v4016_v61 }
 0x266   : > { %3535 = vst.msk [vmem:[#allocation3] sm:$0xff] %vm1506_vm6, %v3440_v37  ;;  %v2674_v54 = vpop.permute.xlu0 %2673  ;;  %3647 = vrot.lane.b32.xlu1 %v9235_v21, %s7668_s14 }
 0x267   : > { %2768 = vst.msk [vmem:[#allocation3 + $0x10] sm:$0xff] %vm734_vm2, %v2674_v54  ;;  %v2320_v9 = vpop.f32.mrb[32].mxu0  ;;  %v3632_v30 = vpop.permute.xlu1 %3631 }
 0x268   : > { %2881 = vrot.lane.b32.xlu0 %v9149_v41, %s7667_s13  ;;  %v2321_v8 = vadd.f32 %v9301_v46, %v2320_v9  ;;  %3727 = vst.msk [vmem:[#allocation3] sm:$0xff] %vm1699_vm7, %v3632_v30  ;;  %v2322_v43 = vpop.f32.mrb[33].mxu0  ;;  %v4018_v9 = vld [vmem:[#allocation3 + $0x18] sm:$0xff] }
 0x26a   : > { %v2866_v60 = vpop.permute.xlu0 %2865  ;;  %v9400_v4 = vld [vmem:[#allocation2 + $0xc8] sm:$0xff]  ;;  %3839 = vrot.lane.b32.xlu1 %v9398_v22, %s11485_s27  ;;  %v2415_v24 = vmax.f32 %v2321_v8, 0.0 }
 0x26b   : > { %v9402_v36 = vld [vmem:[#allocation2 + $0xc2] sm:$0xff]  ;;  %2960 = vst.msk [vmem:[#allocation3 + $0x10] sm:$0xff] %vm927_vm3, %v2866_v60  ;;  %v2515_v41 = vld [vmem:[#allocation2 + $0xcf] sm:$0x1]  ;;  %v3824_v53 = vpop.permute.xlu1 %3823 }
 0x26c   : > { %3995 = vst.msk [vmem:[#allocation3 + $0xc8] sm:$0xff] %vm11463_vm0, %v9402_v36  ;;  %2592 = vst.msk [vmem:[#allocation3 + $0x110] sm:$0xff] %vm11463_vm0, %v9400_v4  ;;  %3073 = vrot.lane.b32.xlu0 %v9186_v1, %s7663_s29 }
 0x26d   : > { %2533 = vst.msk [vmem:[#allocation2 + $0xd1] sm:$0x1] %vm455_vm1, %v2515_v41  ;;  %v9444_v41 = vld [vmem:[#allocation2 + $0x99] sm:$0xff] }
 0x26e   : > { %2447 = vst.msk [vmem:[#allocation2 + $0xd9] sm:$0xff] %vm11463_vm0, %v2415_v24  ;;  %v3058_v27 = vpop.permute.xlu0 %3057  ;;  %2691 = vrot.lane.b32.xlu1 %v9328_v2, %s7666_s12 }
 0x26f   : > { %3919 = vst.msk [vmem:[#allocation3] sm:$0xff] %vm1892_vm8, %v3824_v53 }
 0x270   : > { %3152 = vst.msk [vmem:[#allocation3 + $0x10] sm:$0xff] %vm1120_vm4, %v3058_v27  ;;  %3265 = vrot.lane.b32.xlu0 %v9373_v39, %s7662_s28  ;;  %v2676_v44 = vpop.permute.xlu1 %2675 }
 0x271   : > { %2769 = vst.msk [vmem:[#allocation3 + $0x20] sm:$0xff] %vm734_vm2, %v2676_v44 }
 0x272   : > { %v3250_v1 = vpop.permute.xlu0 %3249  ;;  %2883 = vrot.lane.b32.xlu1 %v9191_v38, %s7667_s13 }
 0x273   : > { %3344 = vst.msk [vmem:[#allocation3 + $0x10] sm:$0xff] %vm1313_vm5, %v3250_v1 }
 0x274   : > { %v9425_v49 = vld [vmem:[#allocation2 + $0xca] sm:$0xff]  ;;  %3457 = vrot.lane.b32.xlu0 %v9212_v57, %s7664_s30  ;;  %v2868_v2 = vpop.permute.xlu1 %2867 }
 0x275   : > { %3996 = vst.msk [vmem:[#allocation3 + $0xd8] sm:$0xff] %vm11463_vm0, %v9425_v49  ;;  %v2480_v37 = vld [vmem:[#allocation2 + $0xda] sm:$0x1] }
 0x276   : > { %v4015_v61 = vld [vmem:[#allocation3] sm:$0xff]  ;;  %2961 = vst.msk [vmem:[#allocation3 + $0x20] sm:$0xff] %vm927_vm3, %v2868_v2  ;;  %v3442_v54 = vpop.permute.xlu0 %3441  ;;  %3075 = vrot.lane.b32.xlu1 %v9235_v21, %s7663_s29 }
 0x277   : > { %4265 = vmatmul.mubr.f32.vlgmr.msra.gmra.mrb[20].mxu1 %v4015_v61  ;;  %2498 = vst.msk [vmem:[#allocation2 + $0xd8] sm:$0x1] %vm455_vm1, %v2480_v37 }
 0x278   : > { %3536 = vst.msk [vmem:[#allocation3 + $0x10] sm:$0xff] %vm1506_vm6, %v3442_v54  ;;  %7037 = vmatprep.mubr.msk.f32.mxu1 %vm11463_vm0, %v4018_v9  ;;  %3649 = vrot.lane.b32.xlu0 %v9256_v40, %s7668_s14  ;;  %v3060_v38 = vpop.permute.xlu1 %3059 }
 0x279   : > { %3153 = vst.msk [vmem:[#allocation3 + $0x20] sm:$0xff] %vm1120_vm4, %v3060_v38  ;;  %v9467_v38 = vld [vmem:[#allocation2 + $0xa9] sm:$0xff] }
 0x27a   : > { %v2325_v30 = vpop.f32.mrb[34].mxu0  ;;  %v3634_v8 = vpop.permute.xlu0 %3633  ;;  %3267 = vrot.lane.b32.xlu1 %v9398_v22, %s7662_s28 }
 0x27b   : > { %v2326_v60 = vadd.f32 %v9301_v46, %v2325_v30  ;;  %3728 = vst.msk [vmem:[#allocation3 + $0x10] sm:$0xff] %vm1699_vm7, %v3634_v8  ;;  %v2327_v43 = vpop.f32.mrb[35].mxu0 }
 0x27c   : > { %3841 = vrot.lane.b32.xlu0 %v9444_v41, %s11485_s27  ;;  %v3252_v24 = vpop.permute.xlu1 %3251 }
 0x27d   : > { %v2416_v21 = vmax.f32 %v2326_v60, 0.0  ;;  %3345 = vst.msk [vmem:[#allocation3 + $0x20] sm:$0xff] %vm1313_vm5, %v3252_v24 }
 0x27e   : > { %v9448_v53 = vld [vmem:[#allocation2 + $0xd8] sm:$0xff]  ;;  %v3826_v27 = vpop.permute.xlu0 %3825  ;;  %3459 = vrot.lane.b32.xlu1 %v9261_v33, %s7664_s30 }
 0x27f   : > { %2593 = vst.msk [vmem:[#allocation3 + $0x120] sm:$0xff] %vm11463_vm0, %v9448_v53  ;;  %2448 = vst.msk [vmem:[#allocation2 + $0xe1] sm:$0xff] %vm11463_vm0, %v2416_v21 }
 0x280   : > { %3920 = vst.msk [vmem:[#allocation3 + $0x10] sm:$0xff] %vm1892_vm8, %v3826_v27  ;;  %2693 = vrot.lane.b32.xlu0 %v9373_v39, %s7666_s12  ;;  %v3444_v44 = vpop.permute.xlu1 %3443 }
 0x281   : > { %3537 = vst.msk [vmem:[#allocation3 + $0x20] sm:$0xff] %vm1506_vm6, %v3444_v44 }
 0x282   : > { %v2678_v1 = vpop.permute.xlu0 %2677  ;;  %3651 = vrot.lane.b32.xlu1 %v9310_v45, %s7668_s14 }
 0x283   : > { %2770 = vst.msk [vmem:[#allocation3 + $0x30] sm:$0xff] %vm734_vm2, %v2678_v1 }
 0x284   : > { %2885 = vrot.lane.b32.xlu0 %v9212_v57, %s7667_s13  ;;  %v3636_v61 = vpop.permute.xlu1 %3635  ;;  %v4020_v57 = vld [vmem:[#allocation3 + $0x28] sm:$0xff] }
 0x285   : > { %v2330_v2 = vpop.f32.mrb[36].mxu0  ;;  %3729 = vst.msk [vmem:[#allocation3 + $0x20] sm:$0xff] %vm1699_vm7, %v3636_v61 }
 0x286   : > { %v2331_v37 = vadd.f32 %v9301_v46, %v2330_v2  ;;  %v2870_v54 = vpop.permute.xlu0 %2869  ;;  %v2332_v39 = vpop.f32.mrb[37].mxu0  ;;  %v9469_v30 = vld [vmem:[#allocation2 + $0xe0] sm:$0xff]  ;;  %3843 = vrot.lane.b32.xlu1 %v9467_v38, %s11485_s27 }
 0x287   : > { %v4017_v9 = vld [vmem:[#allocation3 + $0x10] sm:$0xff]  ;;  %2962 = vst.msk [vmem:[#allocation3 + $0x30] sm:$0xff] %vm927_vm3, %v2870_v54 }
 0x288   : > { %4270 = vmatmul.mubr.f32.gmra.mrb[22].mxu1 %v4017_v9  ;;  %v9474_v8 = vld [vmem:[#allocation2 + $0xda] sm:$0xff]  ;;  %v2516_v60 = vld [vmem:[#allocation2 + $0xe7] sm:$0x1]  ;;  %2594 = vst.msk [vmem:[#allocation3 + $0x130] sm:$0xff] %vm11463_vm0, %v9469_v30  ;;  %v2417_v43 = vmax.f32 %v2331_v37, 0.0  ;;  %3077 = vrot.lane.b32.xlu0 %v9256_v40, %s7663_s29  ;;  %v3828_v21 = vpop.permute.xlu1 %3827  ;;  %v4022_v37 = vld [vmem:[#allocation3 + $0x38] sm:$0xff] }
 0x289   : > { %7038 = vmatprep.mubr.msk.f32.mxu1 %vm11463_vm0, %v4020_v57  ;;  %2534 = vst.msk [vmem:[#allocation2 + $0xe9] sm:$0x1] %vm455_vm1, %v2516_v60  ;;  %v9514_v60 = vld [vmem:[#allocation2 + $0xb1] sm:$0xff] }
 0x28a   : > { %3997 = vst.msk [vmem:[#allocation3 + $0xe8] sm:$0xff] %vm11463_vm0, %v9474_v8  ;;  %2449 = vst.msk [vmem:[#allocation2 + $0xf1] sm:$0xff] %vm11463_vm0, %v2417_v43  ;;  %v3062_v24 = vpop.permute.xlu0 %3061  ;;  %2695 = vrot.lane.b32.xlu1 %v9398_v22, %s7666_s12 }
 0x28b   : > { %3921 = vst.msk [vmem:[#allocation3 + $0x20] sm:$0xff] %vm1892_vm8, %v3828_v21 }
 0x28c   : > { %3154 = vst.msk [vmem:[#allocation3 + $0x30] sm:$0xff] %vm1120_vm4, %v3062_v24  ;;  %3269 = vrot.lane.b32.xlu0 %v9444_v41, %s7662_s28  ;;  %v2680_v40 = vpop.permute.xlu1 %2679 }
 0x28d   : > { %2771 = vst.msk [vmem:[#allocation3 + $0x40] sm:$0xff] %vm734_vm2, %v2680_v40 }
 0x28e   : > { %v3254_v27 = vpop.permute.xlu0 %3253  ;;  %2887 = vrot.lane.b32.xlu1 %v9261_v33, %s7667_s13 }
 0x28f   : > { %3346 = vst.msk [vmem:[#allocation3 + $0x30] sm:$0xff] %vm1313_vm5, %v3254_v27 }
 0x290   : > { %v9495_v44 = vld [vmem:[#allocation2 + $0xe2] sm:$0xff]  ;;  %3461 = vrot.lane.b32.xlu0 %v9282_v7, %s7664_s30  ;;  %v2872_v22 = vpop.permute.xlu1 %2871 }
 0x291   : > { %3998 = vst.msk [vmem:[#allocation3 + $0xf8] sm:$0xff] %vm11463_vm0, %v9495_v44  ;;  %v2481_v2 = vld [vmem:[#allocation2 + $0xf2] sm:$0x1] }
 0x292   : > { %v4019_v1 = vld [vmem:[#allocation3 + $0x20] sm:$0xff]  ;;  %2963 = vst.msk [vmem:[#allocation3 + $0x40] sm:$0xff] %vm927_vm3, %v2872_v22  ;;  %v3446_v61 = vpop.permute.xlu0 %3445  ;;  %3079 = vrot.lane.b32.xlu1 %v9310_v45, %s7663_s29 }
 0x293   : > { %4275 = vmatmul.mubr.f32.gmra.mrb[24].mxu1 %v4019_v1  ;;  %2499 = vst.msk [vmem:[#allocation2 + $0xf0] sm:$0x1] %vm455_vm1, %v2481_v2 }
 0x294   : > { %3538 = vst.msk [vmem:[#allocation3 + $0x30] sm:$0xff] %vm1506_vm6, %v3446_v61  ;;  %7039 = vmatprep.mubr.msk.f32.mxu1 %vm11463_vm0, %v4022_v37  ;;  %3653 = vrot.lane.b32.xlu0 %v9330_v29, %s7668_s14  ;;  %v3064_v33 = vpop.permute.xlu1 %3063 }
 0x295   : > { %3155 = vst.msk [vmem:[#allocation3 + $0x40] sm:$0xff] %vm1120_vm4, %v3064_v33 }
 0x296   : > { %v2335_v54 = vpop.f32.mrb[38].mxu0  ;;  %v3638_v39 = vpop.permute.xlu0 %3637  ;;  %3271 = vrot.lane.b32.xlu1 %v9467_v38, %s7662_s28 }
 0x297   : > { %v2336_v9 = vadd.f32 %v9301_v46, %v2335_v54  ;;  %3730 = vst.msk [vmem:[#allocation3 + $0x30] sm:$0xff] %vm1699_vm7, %v3638_v39  ;;  %v2337_v57 = vpop.f32.mrb[39].mxu0  ;;  %v9537_v54 = vld [vmem:[#allocation2 + $0xc1] sm:$0xff] }
 0x298   : > { %3845 = vrot.lane.b32.xlu0 %v9514_v60, %s11485_s27  ;;  %v3256_v43 = vpop.permute.xlu1 %3255 }
 0x299   : > { %v2418_v45 = vmax.f32 %v2336_v9, 0.0  ;;  %3347 = vst.msk [vmem:[#allocation3 + $0x40] sm:$0xff] %vm1313_vm5, %v3256_v43  ;;  %v4024_v9 = vld [vmem:[#allocation3 + $0x48] sm:$0xff] }
 0x29a   : > { %v9518_v21 = vld [vmem:[#allocation2 + $0xf0] sm:$0xff]  ;;  %v3830_v24 = vpop.permute.xlu0 %3829  ;;  %3463 = vrot.lane.b32.xlu1 %v9335_v59, %s7664_s30 }
 0x29b   : > { %2595 = vst.msk [vmem:[#allocation3 + $0x140] sm:$0xff] %vm11463_vm0, %v9518_v21  ;;  %2450 = vst.msk [vmem:[#allocation2 + $0xf9] sm:$0xff] %vm11463_vm0, %v2418_v45 }
 0x29c   : > { %3922 = vst.msk [vmem:[#allocation3 + $0x30] sm:$0xff] %vm1892_vm8, %v3830_v24  ;;  %2697 = vrot.lane.b32.xlu0 %v9444_v41, %s7666_s12  ;;  %v3448_v40 = vpop.permute.xlu1 %3447 }
 0x29d   : > { %3539 = vst.msk [vmem:[#allocation3 + $0x40] sm:$0xff] %vm1506_vm6, %v3448_v40 }
 0x29e   : > { %v2682_v22 = vpop.permute.xlu0 %2681  ;;  %3655 = vrot.lane.b32.xlu1 %v9378_v3, %s7668_s14 }
 0x29f   : > { %v2340_v27 = vpop.f32.mrb[40].mxu0  ;;  %2772 = vst.msk [vmem:[#allocation3 + $0x50] sm:$0xff] %vm734_vm2, %v2682_v22 }
 0x2a0   : > { %v2341_v1 = vadd.f32 %v9301_v46, %v2340_v27  ;;  %v2342_v2 = vpop.f32.mrb[41].mxu0  ;;  %2889 = vrot.lane.b32.xlu0 %v9282_v7, %s7667_s13  ;;  %v3640_v37 = vpop.permute.xlu1 %3639 }
 0x2a1   : > { %3731 = vst.msk [vmem:[#allocation3 + $0x40] sm:$0xff] %vm1699_vm7, %v3640_v37  ;;  %v4026_v2 = vld [vmem:[#allocation3 + $0x58] sm:$0xff] }
 0x2a2   : > { %v2419_v61 = vmax.f32 %v2341_v1, 0.0  ;;  %v2874_v41 = vpop.permute.xlu0 %2873  ;;  %v9539_v39 = vld [vmem:[#allocation2 + $0xf8] sm:$0xff]  ;;  %3847 = vrot.lane.b32.xlu1 %v9537_v54, %s11485_s27 }
 0x2a3   : > { %v4021_v33 = vld [vmem:[#allocation3 + $0x30] sm:$0xff]  ;;  %2964 = vst.msk [vmem:[#allocation3 + $0x50] sm:$0xff] %vm927_vm3, %v2874_v41  ;;  %v9545_v7 = vld [vmem:[#allocation2 + $0xf2] sm:$0xff]  ;;  %v2517_v57 = vld [vmem:[#allocation2 + $0xff] sm:$0x1] }
 0x2a4   : > { %2451 = vst.msk [vmem:[#allocation2 + $0x109] sm:$0xff] %vm11463_vm0, %v2419_v61  ;;  %4280 = vmatmul.mubr.f32.gmra.mrb[26].mxu1 %v4021_v33  ;;  %2596 = vst.msk [vmem:[#allocation3 + $0x150] sm:$0xff] %vm11463_vm0, %v9539_v39  ;;  %3081 = vrot.lane.b32.xlu0 %v9330_v29, %s7663_s29  ;;  %v3832_v45 = vpop.permute.xlu1 %3831  ;;  %v9585_v41 = vld [vmem:[#allocation2 + $0xc9] sm:$0xff] }
 0x2a5   : > { %7040 = vmatprep.mubr.msk.f32.mxu1 %vm11463_vm0, %v4024_v9  ;;  %2535 = vst.msk [vmem:[#allocation2 + $0x101] sm:$0x1] %vm455_vm1, %v2517_v57 }
 0x2a6   : > { %3999 = vst.msk [vmem:[#allocation3 + $0x108] sm:$0xff] %vm11463_vm0, %v9545_v7  ;;  %v3066_v43 = vpop.permute.xlu0 %3065  ;;  %2699 = vrot.lane.b32.xlu1 %v9467_v38, %s7666_s12 }
 0x2a7   : > { %3923 = vst.msk [vmem:[#allocation3 + $0x40] sm:$0xff] %vm1892_vm8, %v3832_v45 }
 0x2a8   : > { %3156 = vst.msk [vmem:[#allocation3 + $0x50] sm:$0xff] %vm1120_vm4, %v3066_v43  ;;  %3273 = vrot.lane.b32.xlu0 %v9514_v60, %s7662_s28  ;;  %v2684_v29 = vpop.permute.xlu1 %2683 }
 0x2a9   : > { %2773 = vst.msk [vmem:[#allocation3 + $0x60] sm:$0xff] %vm734_vm2, %v2684_v29 }
 0x2aa   : > { %v3258_v24 = vpop.permute.xlu0 %3257  ;;  %2891 = vrot.lane.b32.xlu1 %v9335_v59, %s7667_s13 }
 0x2ab   : > { %v2482_v40 = vld [vmem:[#allocation2 + $0x10a] sm:$0x1]  ;;  %3348 = vst.msk [vmem:[#allocation3 + $0x50] sm:$0xff] %vm1313_vm5, %v3258_v24 }
 0x2ac   : > { %2500 = vst.msk [vmem:[#allocation2 + $0x108] sm:$0x1] %vm455_vm1, %v2482_v40  ;;  %v9566_v27 = vld [vmem:[#allocation2 + $0xfa] sm:$0xff]  ;;  %3465 = vrot.lane.b32.xlu0 %v9355_v31, %s7664_s30  ;;  %v2876_v38 = vpop.permute.xlu1 %2875 }
 0x2ad   : > { %4000 = vst.msk [vmem:[#allocation3 + $0x118] sm:$0xff] %vm11463_vm0, %v9566_v27 }
 0x2ae   : > { %v4023_v22 = vld [vmem:[#allocation3 + $0x40] sm:$0xff]  ;;  %2965 = vst.msk [vmem:[#allocation3 + $0x60] sm:$0xff] %vm927_vm3, %v2876_v38  ;;  %v3450_v1 = vpop.permute.xlu0 %3449  ;;  %3083 = vrot.lane.b32.xlu1 %v9378_v3, %s7663_s29 }
 0x2af   : > { %4285 = vmatmul.mubr.f32.gmra.mrb[28].mxu1 %v4023_v22  ;;  %3540 = vst.msk [vmem:[#allocation3 + $0x50] sm:$0xff] %vm1506_vm6, %v3450_v1  ;;  %v9605_v22 = vld [vmem:[#allocation2 + $0xd9] sm:$0xff] }
 0x2b0   : > { %7041 = vmatprep.mubr.msk.f32.mxu1 %vm11463_vm0, %v4026_v2  ;;  %3657 = vrot.lane.b32.xlu0 %v9400_v4, %s7668_s14  ;;  %v3068_v59 = vpop.permute.xlu1 %3067  ;;  %v4028_v1 = vld [vmem:[#allocation3 + $0x68] sm:$0xff] }
 0x2b1   : > { %3157 = vst.msk [vmem:[#allocation3 + $0x60] sm:$0xff] %vm1120_vm4, %v3068_v59 }
 0x2b2   : > { %v3642_v61 = vpop.permute.xlu0 %3641  ;;  %3275 = vrot.lane.b32.xlu1 %v9537_v54, %s7662_s28 }
 0x2b3   : > { %v9580_v37 = vld [vmem:[#allocation2 + $0x108] sm:$0xff]  ;;  %3732 = vst.msk [vmem:[#allocation3 + $0x50] sm:$0xff] %vm1699_vm7, %v3642_v61 }
 0x2b4   : > { %2597 = vst.msk [vmem:[#allocation3 + $0x160] sm:$0xff] %vm11463_vm0, %v9580_v37  ;;  %3849 = vrot.lane.b32.xlu0 %v9585_v41, %s11485_s27  ;;  %v3260_v3 = vpop.permute.xlu1 %3259 }
 0x2b5   : > { %3349 = vst.msk [vmem:[#allocation3 + $0x60] sm:$0xff] %vm1313_vm5, %v3260_v3 }
 0x2b6   : > { %v3834_v33 = vpop.permute.xlu0 %3833  ;;  %3467 = vrot.lane.b32.xlu1 %v9402_v36, %s7664_s30 }
 0x2b7   : > { %3924 = vst.msk [vmem:[#allocation3 + $0x50] sm:$0xff] %vm1892_vm8, %v3834_v33 }
 0x2b8   : > { %2701 = vrot.lane.b32.xlu0 %v9514_v60, %s7666_s12  ;;  %v3452_v9 = vpop.permute.xlu1 %3451 }
 0x2b9   : > { %3541 = vst.msk [vmem:[#allocation3 + $0x60] sm:$0xff] %vm1506_vm6, %v3452_v9 }
 0x2ba   : > { %v2350_v57 = vpop.f32.mrb[0].mxu1  ;;  %v2686_v45 = vpop.permute.xlu0 %2685  ;;  %3659 = vrot.lane.b32.xlu1 %v9448_v53, %s7668_s14 }
 0x2bb   : > { %v2351_v43 = vadd.f32 %v9301_v46, %v2350_v57  ;;  %2774 = vst.msk [vmem:[#allocation3 + $0x70] sm:$0xff] %vm734_vm2, %v2686_v45  ;;  %v2352_v29 = vpop.f32.mrb[1].mxu1  ;;  %v4030_v57 = vld [vmem:[#allocation3 + $0x78] sm:$0xff] }
 0x2bc   : > { %2893 = vrot.lane.b32.xlu0 %v9355_v31, %s7667_s13  ;;  %v3644_v40 = vpop.permute.xlu1 %3643 }
 0x2bd   : > { %v2421_v24 = vmax.f32 %v2351_v43, 0.0  ;;  %3733 = vst.msk [vmem:[#allocation3 + $0x60] sm:$0xff] %vm1699_vm7, %v3644_v40 }
 0x2be   : > { %v2878_v60 = vpop.permute.xlu0 %2877  ;;  %v4025_v38 = vld [vmem:[#allocation3 + $0x50] sm:$0xff]  ;;  %3851 = vrot.lane.b32.xlu1 %v9605_v22, %s11485_s27 }
 0x2bf   : > { %2453 = vst.msk [vmem:[#allocation2 + $0x121] sm:$0xff] %vm11463_vm0, %v2421_v24  ;;  %4290 = vmatmul.mubr.f32.gmra.mrb[30].mxu1 %v4025_v38 }
 0x2c0   : > { %2966 = vst.msk [vmem:[#allocation3 + $0x70] sm:$0xff] %vm927_vm3, %v2878_v60  ;;  %3085 = vrot.lane.b32.xlu0 %v9400_v4, %s7663_s29  ;;  %7042 = vmatprep.mubr.msk.f32.mxu1 %vm11463_vm0, %v4028_v1  ;;  %v3836_v31 = vpop.permute.xlu1 %3835  ;;  %v9643_v1 = vld [vmem:[#allocation2 + $0xe1] sm:$0xff] }
 0x2c1   : > { %3925 = vst.msk [vmem:[#allocation3 + $0x60] sm:$0xff] %vm1892_vm8, %v3836_v31 }
 0x2c2   : > { %v3070_v2 = vpop.permute.xlu0 %3069  ;;  %2703 = vrot.lane.b32.xlu1 %v9537_v54, %s7666_s12 }
 0x2c3   : > { %3158 = vst.msk [vmem:[#allocation3 + $0x70] sm:$0xff] %vm1120_vm4, %v3070_v2 }
 0x2c4   : > { %3277 = vrot.lane.b32.xlu0 %v9585_v41, %s7662_s28  ;;  %v2688_v59 = vpop.permute.xlu1 %2687 }
 0x2c5   : > { %2775 = vst.msk [vmem:[#allocation3 + $0x80] sm:$0xff] %vm734_vm2, %v2688_v59 }
 0x2c6   : > { %v3262_v61 = vpop.permute.xlu0 %3261  ;;  %v2483_v3 = vld [vmem:[#allocation2 + $0x122] sm:$0x1]  ;;  %2895 = vrot.lane.b32.xlu1 %v9402_v36, %s7667_s13 }
 0x2c7   : > { %3350 = vst.msk [vmem:[#allocation3 + $0x70] sm:$0xff] %vm1313_vm5, %v3262_v61 }
 0x2c8   : > { %2501 = vst.msk [vmem:[#allocation2 + $0x120] sm:$0x1] %vm455_vm1, %v2483_v3  ;;  %3469 = vrot.lane.b32.xlu0 %v9425_v49, %s7664_s30  ;;  %v2880_v4 = vpop.permute.xlu1 %2879  ;;  %v4027_v54 = vld [vmem:[#allocation3 + $0x60] sm:$0xff] }
 0x2c9   : > { %2967 = vst.msk [vmem:[#allocation3 + $0x80] sm:$0xff] %vm927_vm3, %v2880_v4  ;;  %4295 = vmatmul.mubr.f32.gmra.mrb[32].mxu1 %v4027_v54 }
 0x2ca   : > { %v2345_v33 = vpop.f32.mrb[42].mxu0  ;;  %v3454_v9 = vpop.permute.xlu0 %3453  ;;  %3087 = vrot.lane.b32.xlu1 %v9448_v53, %s7663_s29  ;;  %7043 = vmatprep.mubr.msk.f32.mxu1 %vm11463_vm0, %v4030_v57 }
 0x2cb   : > { %v2346_v45 = vadd.f32 %v9301_v46, %v2345_v33  ;;  %3542 = vst.msk [vmem:[#allocation3 + $0x70] sm:$0xff] %vm1506_vm6, %v3454_v9  ;;  %v2347_v43 = vpop.f32.mrb[43].mxu0 }
 0x2cc   : > { %3661 = vrot.lane.b32.xlu0 %v9469_v30, %s7668_s14  ;;  %v3072_v29 = vpop.permute.xlu1 %3071 }
 0x2cd   : > { %v2420_v36 = vmax.f32 %v2346_v45, 0.0  ;;  %3159 = vst.msk [vmem:[#allocation3 + $0x80] sm:$0xff] %vm1120_vm4, %v3072_v29  ;;  %v9673_v29 = vld [vmem:[#allocation2 + $0xf1] sm:$0xff] }
 0x2ce   : > { %v3646_v40 = vpop.permute.xlu0 %3645  ;;  %3279 = vrot.lane.b32.xlu1 %v9605_v22, %s7662_s28 }
 0x2cf   : > { %v2355_v24 = vpop.f32.mrb[2].mxu1  ;;  %v9636_v60 = vld [vmem:[#allocation2 + $0x120] sm:$0xff]  ;;  %2452 = vst.msk [vmem:[#allocation2 + $0x111] sm:$0xff] %vm11463_vm0, %v2420_v36 }
 0x2d0   : > { %v2356_v38 = vadd.f32 %v9301_v46, %v2355_v24  ;;  %3734 = vst.msk [vmem:[#allocation3 + $0x70] sm:$0xff] %vm1699_vm7, %v3646_v40  ;;  %v2357_v53 = vpop.f32.mrb[3].mxu1  ;;  %3853 = vrot.lane.b32.xlu0 %v9643_v1, %s11485_s27  ;;  %v3264_v2 = vpop.permute.xlu1 %3263 }
 0x2d1   : > { %2599 = vst.msk [vmem:[#allocation3 + $0x180] sm:$0xff] %vm11463_vm0, %v9636_v60 }
 0x2d2   : > { %v2422_v31 = vmax.f32 %v2356_v38, 0.0  ;;  %3351 = vst.msk [vmem:[#allocation3 + $0x80] sm:$0xff] %vm1313_vm5, %v3264_v2  ;;  %v3838_v59 = vpop.permute.xlu0 %3837  ;;  %3471 = vrot.lane.b32.xlu1 %v9474_v8, %s7664_s30 }
 0x2d3   : > { %3926 = vst.msk [vmem:[#allocation3 + $0x70] sm:$0xff] %vm1892_vm8, %v3838_v59 }
 0x2d4   : > { %2454 = vst.msk [vmem:[#allocation2 + $0x129] sm:$0xff] %vm11463_vm0, %v2422_v31  ;;  %2705 = vrot.lane.b32.xlu0 %v9585_v41, %s7666_s12  ;;  %v3456_v61 = vpop.permute.xlu1 %3455 }
 0x2d5   : > { %3543 = vst.msk [vmem:[#allocation3 + $0x80] sm:$0xff] %vm1506_vm6, %v3456_v61 }
 0x2d6   : > { %v2690_v3 = vpop.permute.xlu0 %2689  ;;  %v9657_v4 = vld [vmem:[#allocation2 + $0x110] sm:$0xff]  ;;  %3663 = vrot.lane.b32.xlu1 %v9518_v21, %s7668_s14 }
 0x2d7   : > { %v9659_v54 = vld [vmem:[#allocation2 + $0x10a] sm:$0xff]  ;;  %2776 = vst.msk [vmem:[#allocation3 + $0x90] sm:$0xff] %vm734_vm2, %v2690_v3  ;;  %v2518_v33 = vld [vmem:[#allocation2 + $0x117] sm:$0x1] }
 0x2d8   : > { %4001 = vst.msk [vmem:[#allocation3 + $0x128] sm:$0xff] %vm11463_vm0, %v9659_v54  ;;  %2598 = vst.msk [vmem:[#allocation3 + $0x170] sm:$0xff] %vm11463_vm0, %v9657_v4  ;;  %2897 = vrot.lane.b32.xlu0 %v9425_v49, %s7667_s13  ;;  %v3648_v9 = vpop.permute.xlu1 %3647  ;;  %v4032_v49 = vld [vmem:[#allocation3 + $0x88] sm:$0xff] }
 0x2d9   : > { %2536 = vst.msk [vmem:[#allocation2 + $0x119] sm:$0x1] %vm455_vm1, %v2518_v33 }
 0x2da   : > { %v2360_v41 = vpop.f32.mrb[4].mxu1  ;;  %3735 = vst.msk [vmem:[#allocation3 + $0x80] sm:$0xff] %vm1699_vm7, %v3648_v9  ;;  %v2882_v45 = vpop.permute.xlu0 %2881  ;;  %v4029_v36 = vld [vmem:[#allocation3 + $0x70] sm:$0xff]  ;;  %3855 = vrot.lane.b32.xlu1 %v9673_v29, %s11485_s27 }
 0x2db   : > { %v2361_v57 = vadd.f32 %v9301_v46, %v2360_v41  ;;  %v2362_v43 = vpop.f32.mrb[5].mxu1  ;;  %v9675_v24 = vld [vmem:[#allocation2 + $0x128] sm:$0xff]  ;;  %2968 = vst.msk [vmem:[#allocation3 + $0x90] sm:$0xff] %vm927_vm3, %v2882_v45  ;;  %4300 = vmatmul.mubr.f32.gmra.mrb[34].mxu1 %v4029_v36 }
 0x2dc   : > { %v9680_v40 = vld [vmem:[#allocation2 + $0x122] sm:$0xff]  ;;  %v2519_v38 = vld [vmem:[#allocation2 + $0x12f] sm:$0x1]  ;;  %2600 = vst.msk [vmem:[#allocation3 + $0x190] sm:$0xff] %vm11463_vm0, %v9675_v24  ;;  %3089 = vrot.lane.b32.xlu0 %v9469_v30, %s7663_s29  ;;  %7044 = vmatprep.mubr.msk.f32.mxu1 %vm11463_vm0, %v4032_v49  ;;  %v3840_v31 = vpop.permute.xlu1 %3839 }
 0x2dd   : > { %v2423_v53 = vmax.f32 %v2361_v57, 0.0  ;;  %2537 = vst.msk [vmem:[#allocation2 + $0x131] sm:$0x1] %vm455_vm1, %v2519_v38  ;;  %v4034_v57 = vld [vmem:[#allocation3 + $0x98] sm:$0xff]  ;;  %v9724_v38 = vld [vmem:[#allocation2 + $0xf9] sm:$0xff] }
 0x2de   : > { %4003 = vst.msk [vmem:[#allocation3 + $0x148] sm:$0xff] %vm11463_vm0, %v9680_v40  ;;  %v3074_v2 = vpop.permute.xlu0 %3073  ;;  %2707 = vrot.lane.b32.xlu1 %v9605_v22, %s7666_s12 }
 0x2df   : > { %2455 = vst.msk [vmem:[#allocation2 + $0x139] sm:$0xff] %vm11463_vm0, %v2423_v53 }
 0x2e0   : > { %3927 = vst.msk [vmem:[#allocation3 + $0x80] sm:$0xff] %vm1892_vm8, %v3840_v31  ;;  %v9695_v59 = vld [vmem:[#allocation2 + $0x112] sm:$0xff]  ;;  %3281 = vrot.lane.b32.xlu0 %v9643_v1, %s7662_s28  ;;  %v2692_v30 = vpop.permute.xlu1 %2691 }
 0x2e1   : > { %3160 = vst.msk [vmem:[#allocation3 + $0x90] sm:$0xff] %vm1120_vm4, %v3074_v2 }
 0x2e2   : > { %4002 = vst.msk [vmem:[#allocation3 + $0x138] sm:$0xff] %vm11463_vm0, %v9695_v59  ;;  %v3266_v61 = vpop.permute.xlu0 %3265  ;;  %2899 = vrot.lane.b32.xlu1 %v9474_v8, %s7667_s13 }
 0x2e3   : > { %2777 = vst.msk [vmem:[#allocation3 + $0xa0] sm:$0xff] %vm734_vm2, %v2692_v30 }
 0x2e4   : > { %3352 = vst.msk [vmem:[#allocation3 + $0x90] sm:$0xff] %vm1313_vm5, %v3266_v61  ;;  %v9705_v3 = vld [vmem:[#allocation2 + $0x12a] sm:$0xff]  ;;  %3473 = vrot.lane.b32.xlu0 %v9495_v44, %s7664_s30  ;;  %v2884_v22 = vpop.permute.xlu1 %2883 }
 0x2e5   : > { %4004 = vst.msk [vmem:[#allocation3 + $0x158] sm:$0xff] %vm11463_vm0, %v9705_v3 }
 0x2e6   : > { %v2484_v41 = vld [vmem:[#allocation2 + $0x13a] sm:$0x1]  ;;  %2969 = vst.msk [vmem:[#allocation3 + $0xa0] sm:$0xff] %vm927_vm3, %v2884_v22  ;;  %v3458_v9 = vpop.permute.xlu0 %3457  ;;  %3091 = vrot.lane.b32.xlu1 %v9518_v21, %s7663_s29 }
 0x2e7   : > { %v4031_v33 = vld [vmem:[#allocation3 + $0x80] sm:$0xff]  ;;  %2502 = vst.msk [vmem:[#allocation2 + $0x138] sm:$0x1] %vm455_vm1, %v2484_v41 }
 0x2e8   : > { %4305 = vmatmul.mubr.f32.gmra.mrb[36].mxu1 %v4031_v33  ;;  %3544 = vst.msk [vmem:[#allocation3 + $0x90] sm:$0xff] %vm1506_vm6, %v3458_v9  ;;  %3665 = vrot.lane.b32.xlu0 %v9539_v39, %s7668_s14  ;;  %v3076_v8 = vpop.permute.xlu1 %3075 }
 0x2e9   : > { %7045 = vmatprep.mubr.msk.f32.mxu1 %vm11463_vm0, %v4034_v57  ;;  %3161 = vst.msk [vmem:[#allocation3 + $0xa0] sm:$0xff] %vm1120_vm4, %v3076_v8  ;;  %v9747_v8 = vld [vmem:[#allocation2 + $0x109] sm:$0xff] }
 0x2ea   : > { %v3650_v43 = vpop.permute.xlu0 %3649  ;;  %3283 = vrot.lane.b32.xlu1 %v9673_v29, %s7662_s28 }
 0x2eb   : > { %v2365_v45 = vpop.f32.mrb[6].mxu1  ;;  %3736 = vst.msk [vmem:[#allocation3 + $0x90] sm:$0xff] %vm1699_vm7, %v3650_v43 }
 0x2ec   : > { %v2366_v36 = vadd.f32 %v9301_v46, %v2365_v45  ;;  %v2367_v49 = vpop.f32.mrb[7].mxu1  ;;  %3857 = vrot.lane.b32.xlu0 %v9724_v38, %s11485_s27  ;;  %v3268_v53 = vpop.permute.xlu1 %3267 }
 0x2ed   : > { %3353 = vst.msk [vmem:[#allocation3 + $0xa0] sm:$0xff] %vm1313_vm5, %v3268_v53 }
 0x2ee   : > { %v2424_v21 = vmax.f32 %v2366_v36, 0.0  ;;  %v9728_v31 = vld [vmem:[#allocation2 + $0x138] sm:$0xff]  ;;  %v3842_v2 = vpop.permute.xlu0 %3841  ;;  %3475 = vrot.lane.b32.xlu1 %v9545_v7, %s7664_s30 }
 0x2ef   : > { %2601 = vst.msk [vmem:[#allocation3 + $0x1a0] sm:$0xff] %vm11463_vm0, %v9728_v31 }
 0x2f0   : > { %2456 = vst.msk [vmem:[#allocation2 + $0x141] sm:$0xff] %vm11463_vm0, %v2424_v21  ;;  %2709 = vrot.lane.b32.xlu0 %v9643_v1, %s7666_s12  ;;  %v3460_v30 = vpop.permute.xlu1 %3459 }
 0x2f1   : > { %3928 = vst.msk [vmem:[#allocation3 + $0x90] sm:$0xff] %vm1892_vm8, %v3842_v2 }
 0x2f2   : > { %3545 = vst.msk [vmem:[#allocation3 + $0xa0] sm:$0xff] %vm1506_vm6, %v3460_v30  ;;  %v2694_v61 = vpop.permute.xlu0 %2693  ;;  %3667 = vrot.lane.b32.xlu1 %v9580_v37, %s7668_s14 }
 0x2f3   : > { %2778 = vst.msk [vmem:[#allocation3 + $0xb0] sm:$0xff] %vm734_vm2, %v2694_v61 }
 0x2f4   : > { %2901 = vrot.lane.b32.xlu0 %v9495_v44, %s7667_s13  ;;  %v3652_v33 = vpop.permute.xlu1 %3651  ;;  %v4036_v44 = vld [vmem:[#allocation3 + $0xa8] sm:$0xff] }
 0x2f5   : > { %3737 = vst.msk [vmem:[#allocation3 + $0xa0] sm:$0xff] %vm1699_vm7, %v3652_v33  ;;  %v4038_v33 = vld [vmem:[#allocation3 + $0xb8] sm:$0xff] }
 0x2f6   : > { %v2370_v22 = vpop.f32.mrb[8].mxu1  ;;  %v2886_v9 = vpop.permute.xlu0 %2885  ;;  %3859 = vrot.lane.b32.xlu1 %v9747_v8, %s11485_s27 }
 0x2f7   : > { %v2371_v41 = vadd.f32 %v9301_v46, %v2370_v22  ;;  %v2372_v1 = vpop.f32.mrb[9].mxu1  ;;  %v9749_v45 = vld [vmem:[#allocation2 + $0x140] sm:$0xff]  ;;  %2970 = vst.msk [vmem:[#allocation3 + $0xb0] sm:$0xff] %vm927_vm3, %v2886_v9 }
 0x2f8   : > { %v4033_v57 = vld [vmem:[#allocation3 + $0x90] sm:$0xff]  ;;  %2602 = vst.msk [vmem:[#allocation3 + $0x1b0] sm:$0xff] %vm11463_vm0, %v9749_v45  ;;  %3093 = vrot.lane.b32.xlu0 %v9539_v39, %s7663_s29  ;;  %v3844_v49 = vpop.permute.xlu1 %3843 }
 0x2f9   : > { %4310 = vmatmul.mubr.f32.gmra.mrb[38].mxu1 %v4033_v57  ;;  %v9754_v43 = vld [vmem:[#allocation2 + $0x13a] sm:$0xff]  ;;  %v2520_v36 = vld [vmem:[#allocation2 + $0x147] sm:$0x1]  ;;  %v2425_v46 = vmax.f32 %v2371_v41, 0.0  ;;  %3929 = vst.msk [vmem:[#allocation3 + $0xa0] sm:$0xff] %vm1892_vm8, %v3844_v49 }
 0x2fa   : > { %7046 = vmatprep.mubr.msk.f32.mxu1 %vm11463_vm0, %v4036_v44  ;;  %2538 = vst.msk [vmem:[#allocation2 + $0x149] sm:$0x1] %vm455_vm1, %v2520_v36  ;;  %v3078_v21 = vpop.permute.xlu0 %3077  ;;  %2711 = vrot.lane.b32.xlu1 %v9673_v29, %s7666_s12  ;;  %v9793_v1 = vld [vmem:[%s11404_s2] ss:$0 sm:$0xff]  ;;  %v9799_v44 = vld [vmem:[#allocation2 + $0x111] sm:$0xff] }
 0x2fb   : > { %4005 = vst.msk [vmem:[#allocation3 + $0x168] sm:$0xff] %vm11463_vm0, %v9754_v43  ;;  %2457 = vst.msk [vmem:[#allocation2 + $0x151] sm:$0xff] %vm11463_vm0, %v2425_v46 }
 0x2fc   : > { %3162 = vst.msk [vmem:[#allocation3 + $0xb0] sm:$0xff] %vm1120_vm4, %v3078_v21  ;;  %3285 = vrot.lane.b32.xlu0 %v9724_v38, %s7662_s28  ;;  %v2696_v39 = vpop.permute.xlu1 %2695 }
 0x2fd   : > { %2779 = vst.msk [vmem:[#allocation3 + $0xc0] sm:$0xff] %vm734_vm2, %v2696_v39 }
 0x2fe   : > { %v3270_v53 = vpop.permute.xlu0 %3269  ;;  %2903 = vrot.lane.b32.xlu1 %v9545_v7, %s7667_s13 }
 0x2ff   : > { %3354 = vst.msk [vmem:[#allocation3 + $0xb0] sm:$0xff] %vm1313_vm5, %v3270_v53 }
 0x300   : > { %3477 = vrot.lane.b32.xlu0 %v9566_v27, %s7664_s30  ;;  %v2888_v29 = vpop.permute.xlu1 %2887  ;;  %v4035_v30 = vld [vmem:[#allocation3 + $0xa0] sm:$0xff] }
 0x301   : > { %v9775_v2 = vld [vmem:[#allocation2 + $0x142] sm:$0xff]  ;;  %2971 = vst.msk [vmem:[#allocation3 + $0xc0] sm:$0xff] %vm927_vm3, %v2888_v29  ;;  %4315 = vmatmul.mubr.f32.gmra.mrb[40].mxu1 %v4035_v30 }
 0x302   : > { %4006 = vst.msk [vmem:[#allocation3 + $0x178] sm:$0xff] %vm11463_vm0, %v9775_v2  ;;  %v2485_v61 = vld [vmem:[#allocation2 + $0x152] sm:$0x1]  ;;  %v3462_v22 = vpop.permute.xlu0 %3461  ;;  %3095 = vrot.lane.b32.xlu1 %v9580_v37, %s7663_s29  ;;  %7047 = vmatprep.mubr.msk.f32.mxu1 %vm11463_vm0, %v4038_v33 }
 0x303   : > { %2503 = vst.msk [vmem:[#allocation2 + $0x150] sm:$0x1] %vm455_vm1, %v2485_v61 }
 0x304   : > { %3546 = vst.msk [vmem:[#allocation3 + $0xb0] sm:$0xff] %vm1506_vm6, %v3462_v22  ;;  %3669 = vrot.lane.b32.xlu0 %v9657_v4, %s7668_s14  ;;  %v3080_v7 = vpop.permute.xlu1 %3079 }
 0x305   : > { %3163 = vst.msk [vmem:[#allocation3 + $0xc0] sm:$0xff] %vm1120_vm4, %v3080_v7  ;;  %v9822_v7 = vld [vmem:[#allocation2 + $0x121] sm:$0xff] }
 0x306   : > { %v3654_v9 = vpop.permute.xlu0 %3653  ;;  %3287 = vrot.lane.b32.xlu1 %v9747_v8, %s7662_s28 }
 0x307   : > { %v2375_v41 = vpop.f32.mrb[10].mxu1  ;;  %3738 = vst.msk [vmem:[#allocation3 + $0xb0] sm:$0xff] %vm1699_vm7, %v3654_v9 }
 0x308   : > { %v2376_v57 = vadd.f32 %v9793_v1, %v2375_v41  ;;  %v2377_v37 = vpop.f32.mrb[11].mxu1  ;;  %3861 = vrot.lane.b32.xlu0 %v9799_v44, %s11485_s27  ;;  %v3272_v46 = vpop.permute.xlu1 %3271 }
 0x309   : > { %3355 = vst.msk [vmem:[#allocation3 + $0xc0] sm:$0xff] %vm1313_vm5, %v3272_v46 }
 0x30a   : > { %v2426_v36 = vmax.f32 %v2376_v57, 0.0  ;;  %v9803_v49 = vld [vmem:[#allocation2 + $0x150] sm:$0xff]  ;;  %v3846_v21 = vpop.permute.xlu0 %3845  ;;  %3479 = vrot.lane.b32.xlu1 %v9659_v54, %s7664_s30 }
 0x30b   : > { %2603 = vst.msk [vmem:[#allocation3 + $0x1c0] sm:$0xff] %vm11463_vm0, %v9803_v49 }
 0x30c   : > { %2458 = vst.msk [vmem:[#allocation2 + $0x159] sm:$0xff] %vm11463_vm0, %v2426_v36  ;;  %2713 = vrot.lane.b32.xlu0 %v9724_v38, %s7666_s12  ;;  %v3464_v39 = vpop.permute.xlu1 %3463 }
 0x30d   : > { %3930 = vst.msk [vmem:[#allocation3 + $0xb0] sm:$0xff] %vm1892_vm8, %v3846_v21 }
 0x30e   : > { %3547 = vst.msk [vmem:[#allocation3 + $0xc0] sm:$0xff] %vm1506_vm6, %v3464_v39  ;;  %v2698_v53 = vpop.permute.xlu0 %2697  ;;  %3671 = vrot.lane.b32.xlu1 %v9636_v60, %s7668_s14 }
 0x30f   : > { %2780 = vst.msk [vmem:[#allocation3 + $0xd0] sm:$0xff] %vm734_vm2, %v2698_v53 }
 0x310   : > { %2905 = vrot.lane.b32.xlu0 %v9566_v27, %s7667_s13  ;;  %v3656_v30 = vpop.permute.xlu1 %3655  ;;  %v4040_v27 = vld [vmem:[#allocation3 + $0xc8] sm:$0xff] }
 0x311   : > { %3739 = vst.msk [vmem:[#allocation3 + $0xc0] sm:$0xff] %vm1699_vm7, %v3656_v30 }
 0x312   : > { %v2380_v29 = vpop.f32.mrb[12].mxu1  ;;  %v2890_v22 = vpop.permute.xlu0 %2889  ;;  %3863 = vrot.lane.b32.xlu1 %v9822_v7, %s11485_s27 }
 0x313   : > { %v2381_v61 = vadd.f32 %v9793_v1, %v2380_v29  ;;  %v2382_v38 = vpop.f32.mrb[13].mxu1  ;;  %v9824_v41 = vld [vmem:[#allocation2 + $0x158] sm:$0xff]  ;;  %2972 = vst.msk [vmem:[#allocation3 + $0xd0] sm:$0xff] %vm927_vm3, %v2890_v22  ;;  %v4042_v22 = vld [vmem:[#allocation3 + $0xd8] sm:$0xff] }
 0x314   : > { %v4037_v33 = vld [vmem:[#allocation3 + $0xb0] sm:$0xff]  ;;  %v9829_v9 = vld [vmem:[#allocation2 + $0x152] sm:$0xff]  ;;  %v2521_v57 = vld [vmem:[#allocation2 + $0x15f] sm:$0x1]  ;;  %2604 = vst.msk [vmem:[#allocation3 + $0x1d0] sm:$0xff] %vm11463_vm0, %v9824_v41  ;;  %3097 = vrot.lane.b32.xlu0 %v9657_v4, %s7663_s29  ;;  %v3848_v36 = vpop.permute.xlu1 %3847 }
 0x315   : > { %4320 = vmatmul.mubr.f32.gmra.mrb[42].mxu1 %v4037_v33  ;;  %v2427_v37 = vmax.f32 %v2381_v61, 0.0  ;;  %2539 = vst.msk [vmem:[#allocation2 + $0x161] sm:$0x1] %vm455_vm1, %v2521_v57 }
 0x316   : > { %7048 = vmatprep.mubr.msk.f32.mxu1 %vm11463_vm0, %v4040_v27  ;;  %4007 = vst.msk [vmem:[#allocation3 + $0x188] sm:$0xff] %vm11463_vm0, %v9829_v9  ;;  %v3082_v46 = vpop.permute.xlu0 %3081  ;;  %2715 = vrot.lane.b32.xlu1 %v9747_v8, %s7666_s12 }
 0x317   : > { %2459 = vst.msk [vmem:[#allocation2 + $0x169] sm:$0xff] %vm11463_vm0, %v2427_v37  ;;  %v9873_v37 = vld [vmem:[#allocation2 + $0x129] sm:$0xff] }
 0x318   : > { %3931 = vst.msk [vmem:[#allocation3 + $0xc0] sm:$0xff] %vm1892_vm8, %v3848_v36  ;;  %3289 = vrot.lane.b32.xlu0 %v9799_v44, %s7662_s28  ;;  %v2700_v4 = vpop.permute.xlu1 %2699 }
 0x319   : > { %3164 = vst.msk [vmem:[#allocation3 + $0xd0] sm:$0xff] %vm1120_vm4, %v3082_v46 }
 0x31a   : > { %2781 = vst.msk [vmem:[#allocation3 + $0xe0] sm:$0xff] %vm734_vm2, %v2700_v4  ;;  %v3274_v21 = vpop.permute.xlu0 %3273  ;;  %2907 = vrot.lane.b32.xlu1 %v9659_v54, %s7667_s13 }
 0x31b   : > { %3356 = vst.msk [vmem:[#allocation3 + $0xd0] sm:$0xff] %vm1313_vm5, %v3274_v21 }
 0x31c   : > { %v9850_v39 = vld [vmem:[#allocation2 + $0x15a] sm:$0xff]  ;;  %3481 = vrot.lane.b32.xlu0 %v9695_v59, %s7664_s30  ;;  %v2892_v8 = vpop.permute.xlu1 %2891 }
 0x31d   : > { %4008 = vst.msk [vmem:[#allocation3 + $0x198] sm:$0xff] %vm11463_vm0, %v9850_v39 }
 0x31e   : > { %v2486_v29 = vld [vmem:[#allocation2 + $0x16a] sm:$0x1]  ;;  %2973 = vst.msk [vmem:[#allocation3 + $0xe0] sm:$0xff] %vm927_vm3, %v2892_v8  ;;  %v3466_v61 = vpop.permute.xlu0 %3465  ;;  %3099 = vrot.lane.b32.xlu1 %v9636_v60, %s7663_s29 }
 0x31f   : > { %v4039_v53 = vld [vmem:[#allocation3 + $0xc0] sm:$0xff]  ;;  %2504 = vst.msk [vmem:[#allocation2 + $0x168] sm:$0x1] %vm455_vm1, %v2486_v29 }
 0x320   : > { %v9856_v30 = vld [vmem:[#allocation2 + $0x169] sm:$0xff]  ;;  %4325 = vmatmul.mubr.f32.gmra.mrb[44].mxu1 %v4039_v53  ;;  %3548 = vst.msk [vmem:[#allocation3 + $0xd0] sm:$0xff] %vm1506_vm6, %v3466_v61  ;;  %3673 = vrot.lane.b32.xlu0 %v9675_v24, %s7668_s14  ;;  %v3084_v54 = vpop.permute.xlu1 %3083 }
 0x321   : > { %2469 = vst.msk [vmem:[#allocation2 + $0x199] sm:$0xff] %vm11463_vm0, %v9856_v30  ;;  %7049 = vmatprep.mubr.msk.f32.mxu1 %vm11463_vm0, %v4042_v22 }
 0x322   : > { %3165 = vst.msk [vmem:[#allocation3 + $0xe0] sm:$0xff] %vm1120_vm4, %v3084_v54  ;;  %v3658_v33 = vpop.permute.xlu0 %3657  ;;  %3291 = vrot.lane.b32.xlu1 %v9822_v7, %s7662_s28 }
 0x323   : > { %v2385_v38 = vpop.f32.mrb[14].mxu1  ;;  %3740 = vst.msk [vmem:[#allocation3 + $0xd0] sm:$0xff] %vm1699_vm7, %v3658_v33  ;;  %v9896_v33 = vld [vmem:[#allocation2 + $0x139] sm:$0xff] }
 0x324   : > { %v2386_v27 = vadd.f32 %v9793_v1, %v2385_v38  ;;  %v2387_v57 = vpop.f32.mrb[15].mxu1  ;;  %3865 = vrot.lane.b32.xlu0 %v9873_v37, %s11485_s27  ;;  %v3276_v36 = vpop.permute.xlu1 %3275 }
 0x325   : > { %3357 = vst.msk [vmem:[#allocation3 + $0xe0] sm:$0xff] %vm1313_vm5, %v3276_v36 }
 0x326   : > { %v2428_v60 = vmax.f32 %v2386_v27, 0.0  ;;  %v9877_v46 = vld [vmem:[#allocation2 + $0x168] sm:$0xff]  ;;  %v3850_v21 = vpop.permute.xlu0 %3849  ;;  %3483 = vrot.lane.b32.xlu1 %v9680_v40, %s7664_s30 }
 0x327   : > { %2605 = vst.msk [vmem:[#allocation3 + $0x1e0] sm:$0xff] %vm11463_vm0, %v9877_v46 }
 0x328   : > { %v2488_v4 = vld [vmem:[#allocation2 + $0x19a] sm:$0x1]  ;;  %2460 = vst.msk [vmem:[#allocation2 + $0x171] sm:$0xff] %vm11463_vm0, %v2428_v60  ;;  %2717 = vrot.lane.b32.xlu0 %v9799_v44, %s7666_s12  ;;  %v3468_v8 = vpop.permute.xlu1 %3467 }
 0x329   : > { %2506 = vst.msk [vmem:[#allocation2 + $0x198] sm:$0x1] %vm455_vm1, %v2488_v4 }
 0x32a   : > { %3932 = vst.msk [vmem:[#allocation3 + $0xd0] sm:$0xff] %vm1892_vm8, %v3850_v21  ;;  %v2390_v53 = vpop.f32.mrb[16].mxu1  ;;  %v2702_v29 = vpop.permute.xlu0 %2701  ;;  %3675 = vrot.lane.b32.xlu1 %v9728_v31, %s7668_s14 }
 0x32b   : > { %3549 = vst.msk [vmem:[#allocation3 + $0xe0] sm:$0xff] %vm1506_vm6, %v3468_v8  ;;  %v2391_v61 = vadd.f32 %v9793_v1, %v2390_v53  ;;  %v2392_v22 = vpop.f32.mrb[17].mxu1 }
 0x32c   : > { %2782 = vst.msk [vmem:[#allocation3 + $0xf0] sm:$0xff] %vm734_vm2, %v2702_v29  ;;  %2909 = vrot.lane.b32.xlu0 %v9695_v59, %s7667_s13  ;;  %v3660_v38 = vpop.permute.xlu1 %3659  ;;  %v4044_v59 = vld [vmem:[#allocation3 + $0xe8] sm:$0xff] }
 0x32d   : > { %v2429_v54 = vmax.f32 %v2391_v61, 0.0  ;;  %3741 = vst.msk [vmem:[#allocation3 + $0xe0] sm:$0xff] %vm1699_vm7, %v3660_v38 }
 0x32e   : > { %v2894_v44 = vpop.permute.xlu0 %2893  ;;  %3867 = vrot.lane.b32.xlu1 %v9896_v33, %s11485_s27 }
 0x32f   : > { %v9899_v57 = vld [vmem:[#allocation2 + $0x170] sm:$0xff]  ;;  %2461 = vst.msk [vmem:[#allocation2 + $0x181] sm:$0xff] %vm11463_vm0, %v2429_v54 }
 0x330   : > { %v9901_v60 = vld [vmem:[#allocation2 + $0x171] sm:$0xff]  ;;  %2974 = vst.msk [vmem:[#allocation3 + $0xf0] sm:$0xff] %vm927_vm3, %v2894_v44  ;;  %3101 = vrot.lane.b32.xlu0 %v9675_v24, %s7663_s29  ;;  %v3852_v21 = vpop.permute.xlu1 %3851 }
 0x331   : > { %v4041_v27 = vld [vmem:[#allocation3 + $0xd0] sm:$0xff]  ;;  %v9907_v36 = vld [vmem:[#allocation2 + $0x16a] sm:$0xff]  ;;  %v2522_v4 = vld [vmem:[#allocation2 + $0x177] sm:$0x1]  ;;  %2470 = vst.msk [vmem:[#allocation2 + $0x1a1] sm:$0xff] %vm11463_vm0, %v9901_v60 }
 0x332   : > { %4330 = vmatmul.mubr.f32.gmra.mrb[46].mxu1 %v4041_v27  ;;  %2606 = vst.msk [vmem:[#allocation3 + $0x1f0] sm:$0xff] %vm11463_vm0, %v9899_v57  ;;  %4009 = vst.msk [vmem:[#allocation3 + $0x1a8] sm:$0xff] %vm11463_vm0, %v9907_v36  ;;  %v3086_v8 = vpop.permute.xlu0 %3085  ;;  %2719 = vrot.lane.b32.xlu1 %v9822_v7, %s7666_s12 }
 0x333   : > { %7050 = vmatprep.mubr.msk.f32.mxu1 %vm11463_vm0, %v4044_v59  ;;  %2540 = vst.msk [vmem:[#allocation2 + $0x179] sm:$0x1] %vm455_vm1, %v2522_v4 }
 0x334   : > { %3933 = vst.msk [vmem:[#allocation3 + $0xe0] sm:$0xff] %vm1892_vm8, %v3852_v21  ;;  %3293 = vrot.lane.b32.xlu0 %v9873_v37, %s7662_s28  ;;  %v2704_v24 = vpop.permute.xlu1 %2703  ;;  %v4046_v21 = vld [vmem:[#allocation3 + $0xf8] sm:$0xff] }
 0x335   : > { %3166 = vst.msk [vmem:[#allocation3 + $0xf0] sm:$0xff] %vm1120_vm4, %v3086_v8 }
 0x336   : > { %2783 = vst.msk [vmem:[#allocation3 + $0x100] sm:$0xff] %vm734_vm2, %v2704_v24  ;;  %v3278_v53 = vpop.permute.xlu0 %3277  ;;  %v2487_v29 = vld [vmem:[#allocation2 + $0x182] sm:$0x1]  ;;  %2911 = vrot.lane.b32.xlu1 %v9680_v40, %s7667_s13 }
 0x337   : > { %3358 = vst.msk [vmem:[#allocation3 + $0xf0] sm:$0xff] %vm1313_vm5, %v3278_v53  ;;  %v2395_v22 = vpop.f32.mrb[18].mxu1  ;;  %v9951_v53 = vld [vmem:[#allocation2 + $0x141] sm:$0xff] }
 0x338   : > { %v2524_v61 = vld [vmem:[#allocation2 + $0x1a7] sm:$0x1]  ;;  %2505 = vst.msk [vmem:[#allocation2 + $0x180] sm:$0x1] %vm455_vm1, %v2487_v29  ;;  %v2396_v7 = vadd.f32 %v9793_v1, %v2395_v22  ;;  %v2397_v38 = vpop.f32.mrb[19].mxu1  ;;  %3485 = vrot.lane.b32.xlu0 %v9705_v3, %s7664_s30  ;;  %v3981_v44 = vld [vmem:[#allocation2 + $0x19a] sm:$0xff]  ;;  %v2896_v27 = vpop.permute.xlu1 %2895 }
 0x339   : > { %2542 = vst.msk [vmem:[#allocation2 + $0x1a9] sm:$0x1] %vm455_vm1, %v2524_v61 }
 0x33a   : > { %v9930_v54 = vld [vmem:[#allocation2 + $0x172] sm:$0xff]  ;;  %4013 = vst.msk [vmem:[#allocation3 + $0x1e8] sm:$0xff] %vm11463_vm0, %v3981_v44  ;;  %v2430_v40 = vmax.f32 %v2396_v7, 0.0  ;;  %v3470_v4 = vpop.permute.xlu0 %3469  ;;  %3103 = vrot.lane.b32.xlu1 %v9728_v31, %s7663_s29 }
 0x33b   : > { %4010 = vst.msk [vmem:[#allocation3 + $0x1b8] sm:$0xff] %vm11463_vm0, %v9930_v54  ;;  %v4043_v59 = vld [vmem:[#allocation3 + $0xe0] sm:$0xff] }
 0x33c   : > { %2975 = vst.msk [vmem:[#allocation3 + $0x100] sm:$0xff] %vm927_vm3, %v2896_v27  ;;  %4335 = vmatmul.mubr.f32.gmra.mrb[48].mxu1 %v4043_v59  ;;  %3677 = vrot.lane.b32.xlu0 %v9749_v45, %s7668_s14  ;;  %v3088_v1 = vpop.permute.xlu1 %3087 }
 0x33d   : > { %3550 = vst.msk [vmem:[#allocation3 + $0xf0] sm:$0xff] %vm1506_vm6, %v3470_v4  ;;  %7051 = vmatprep.mubr.msk.f32.mxu1 %vm11463_vm0, %v4046_v21  ;;  %v9976_v4 = vld [vmem:[#allocation2 + $0x151] sm:$0xff] }
 0x33e   : > { %2462 = vst.msk [vmem:[#allocation2 + $0x189] sm:$0xff] %vm11463_vm0, %v2430_v40  ;;  %v3662_v8 = vpop.permute.xlu0 %3661  ;;  %3295 = vrot.lane.b32.xlu1 %v9896_v33, %s7662_s28  ;;  %v4048_v21 = vld [vmem:[#allocation3 + $0x108] sm:$0xff] }
 0x33f   : > { %3167 = vst.msk [vmem:[#allocation3 + $0x100] sm:$0xff] %vm1120_vm4, %v3088_v1 }
 0x340   : > { %v3982_v24 = vld [vmem:[#allocation2 + $0x1a2] sm:$0xff]  ;;  %3742 = vst.msk [vmem:[#allocation3 + $0xf0] sm:$0xff] %vm1699_vm7, %v3662_v8  ;;  %3869 = vrot.lane.b32.xlu0 %v9951_v53, %s11485_s27  ;;  %v3280_v31 = vpop.permute.xlu1 %3279 }
 0x341   : > { %4014 = vst.msk [vmem:[#allocation3 + $0x1f8] sm:$0xff] %vm11463_vm0, %v3982_v24 }
 0x342   : > { %3359 = vst.msk [vmem:[#allocation3 + $0x100] sm:$0xff] %vm1313_vm5, %v3280_v31  ;;  %v3854_v29 = vpop.permute.xlu0 %3853  ;;  %3487 = vrot.lane.b32.xlu1 %v9754_v43, %s7664_s30 }
 0x343   : > { %3934 = vst.msk [vmem:[#allocation3 + $0xf0] sm:$0xff] %vm1892_vm8, %v3854_v29 }
 0x344   : > { %2721 = vrot.lane.b32.xlu0 %v9873_v37, %s7666_s12  ;;  %v3472_v7 = vpop.permute.xlu1 %3471 }
 0x345   : > { %v9960_v61 = vld [vmem:[#allocation2 + $0x182] sm:$0xff]  ;;  %v2523_v22 = vld [vmem:[#allocation2 + $0x18f] sm:$0x1]  ;;  %3551 = vst.msk [vmem:[#allocation3 + $0x100] sm:$0xff] %vm1506_vm6, %v3472_v7 }
 0x346   : > { %4011 = vst.msk [vmem:[#allocation3 + $0x1c8] sm:$0xff] %vm11463_vm0, %v9960_v61  ;;  %v2706_v38 = vpop.permute.xlu0 %2705  ;;  %3679 = vrot.lane.b32.xlu1 %v9803_v49, %s7668_s14 }
 0x347   : > { %2541 = vst.msk [vmem:[#allocation2 + $0x191] sm:$0x1] %vm455_vm1, %v2523_v22  ;;  %v4050_v22 = vld [vmem:[#allocation3 + $0x118] sm:$0xff]  ;;  %vm5013_vm1 = vcmask 1041409  }
 0x348   : > { %2784 = vst.msk [vmem:[#allocation3 + $0x110] sm:$0xff] %vm734_vm2, %v2706_v38  ;;  %2913 = vrot.lane.b32.xlu0 %v9705_v3, %s7667_s13  ;;  %v3664_v44 = vpop.permute.xlu1 %3663 }
 0x349   : > { %3743 = vst.msk [vmem:[#allocation3 + $0x100] sm:$0xff] %vm1699_vm7, %v3664_v44 }
 0x34a   : > { %v9973_v37 = vpop.f32.mrb[20].mxu1  ;;  %v2898_v27 = vpop.permute.xlu0 %2897  ;;  %v4045_v40 = vld [vmem:[#allocation3 + $0xf0] sm:$0xff]  ;;  %3871 = vrot.lane.b32.xlu1 %v9976_v4, %s11485_s27 }
 0x34b   : > { %v4268_v59 = vpop.f32.mrb[21].mxu1  ;;  %2976 = vst.msk [vmem:[#allocation3 + $0x110] sm:$0xff] %vm927_vm3, %v2898_v27  ;;  %4340 = vmatmul.mubr.f32.gmra.mrb[50].mxu1 %v4045_v40  ;;  %v3784_v27 = vld [vmem:[#allocation2 + $0x159] sm:$0xff] }
 0x34c   : > { %3105 = vrot.lane.b32.xlu0 %v9749_v45, %s7663_s29  ;;  %7052 = vmatprep.mubr.msk.f32.mxu1 %vm11463_vm0, %v4048_v21  ;;  %v3856_v1 = vpop.permute.xlu1 %3855 }
 0x34d   : > { %3935 = vst.msk [vmem:[#allocation3 + $0x100] sm:$0xff] %vm1892_vm8, %v3856_v1 }
 0x34e   : > { %v9984_v3 = vld [vmem:[#allocation2 + $0x18a] sm:$0xff]  ;;  %v3090_v8 = vpop.permute.xlu0 %3089  ;;  %2723 = vrot.lane.b32.xlu1 %v9896_v33, %s7666_s12 }
 0x34f   : > { %4012 = vst.msk [vmem:[#allocation3 + $0x1d8] sm:$0xff] %vm11463_vm0, %v9984_v3 }
 0x350   : > { %3168 = vst.msk [vmem:[#allocation3 + $0x110] sm:$0xff] %vm1120_vm4, %v3090_v8  ;;  %3297 = vrot.lane.b32.xlu0 %v9951_v53, %s7662_s28  ;;  %v2708_v45 = vpop.permute.xlu1 %2707 }
 0x351   : > { %2785 = vst.msk [vmem:[#allocation3 + $0x120] sm:$0xff] %vm734_vm2, %v2708_v45 }
 0x352   : > { %v3282_v24 = vpop.permute.xlu0 %3281  ;;  %2915 = vrot.lane.b32.xlu1 %v9754_v43, %s7667_s13 }
 0x353   : > { %3360 = vst.msk [vmem:[#allocation3 + $0x110] sm:$0xff] %vm1313_vm5, %v3282_v24 }
 0x354   : > { %3489 = vrot.lane.b32.xlu0 %v9775_v2, %s7664_s30  ;;  %v2900_v31 = vpop.permute.xlu1 %2899  ;;  %v4047_v29 = vld [vmem:[#allocation3 + $0x100] sm:$0xff] }
 0x355   : > { %2977 = vst.msk [vmem:[#allocation3 + $0x120] sm:$0xff] %vm927_vm3, %v2900_v31  ;;  %4345 = vmatmul.mubr.f32.gmra.mrb[52].mxu1 %v4047_v29  ;;  %v4052_v31 = vld [vmem:[#allocation3 + $0x128] sm:$0xff] }
 0x356   : > { %v3474_v33 = vpop.permute.xlu0 %3473  ;;  %3107 = vrot.lane.b32.xlu1 %v9803_v49, %s7663_s29  ;;  %7053 = vmatprep.mubr.msk.f32.mxu1 %vm11463_vm0, %v4050_v22 }
 0x357   : > { %3552 = vst.msk [vmem:[#allocation3 + $0x110] sm:$0xff] %vm1506_vm6, %v3474_v33 }
 0x358   : > { %3681 = vrot.lane.b32.xlu0 %v9824_v41, %s7668_s14  ;;  %v3092_v43 = vpop.permute.xlu1 %3091 }
 0x359   : > { %3169 = vst.msk [vmem:[#allocation3 + $0x120] sm:$0xff] %vm1120_vm4, %v3092_v43 }
 0x35a   : > { %v3666_v7 = vpop.permute.xlu0 %3665  ;;  %3299 = vrot.lane.b32.xlu1 %v9976_v4, %s7662_s28 }
 0x35b   : > { %v10008_v38 = vpop.f32.mrb[22].mxu1  ;;  %3744 = vst.msk [vmem:[#allocation3 + $0x110] sm:$0xff] %vm1699_vm7, %v3666_v7 }
 0x35c   : > { %v4273_v44 = vpop.f32.mrb[23].mxu1  ;;  %3873 = vrot.lane.b32.xlu0 %v3784_v27, %s11485_s27  ;;  %v3284_v49 = vpop.permute.xlu1 %3283 }
 0x35d   : > { %3361 = vst.msk [vmem:[#allocation3 + $0x120] sm:$0xff] %vm1313_vm5, %v3284_v49 }
 0x35e   : > { %v3858_v59 = vpop.permute.xlu0 %3857  ;;  %3491 = vrot.lane.b32.xlu1 %v9829_v9, %s7664_s30 }
 0x35f   : > { %3936 = vst.msk [vmem:[#allocation3 + $0x110] sm:$0xff] %vm1892_vm8, %v3858_v59 }
 0x360   : > { %2725 = vrot.lane.b32.xlu0 %v9951_v53, %s7666_s12  ;;  %v3476_v40 = vpop.permute.xlu1 %3475 }
 0x361   : > { %3553 = vst.msk [vmem:[#allocation3 + $0x120] sm:$0xff] %vm1506_vm6, %v3476_v40 }
 0x362   : > { %v2710_v21 = vpop.permute.xlu0 %2709  ;;  %3683 = vrot.lane.b32.xlu1 %v9877_v46, %s7668_s14 }
 0x363   : > { %2786 = vst.msk [vmem:[#allocation3 + $0x130] sm:$0xff] %vm734_vm2, %v2710_v21 }
 0x364   : > { %2917 = vrot.lane.b32.xlu0 %v9775_v2, %s7667_s13  ;;  %v3668_v1 = vpop.permute.xlu1 %3667 }
 0x365   : > { %3745 = vst.msk [vmem:[#allocation3 + $0x120] sm:$0xff] %vm1699_vm7, %v3668_v1 }
 0x366   : > { %v10026_v8 = vpop.f32.mrb[24].mxu1  ;;  %v2902_v45 = vpop.permute.xlu0 %2901  ;;  %v4049_v53 = vld [vmem:[#allocation3 + $0x110] sm:$0xff]  ;;  %3875 = vrot.lane.b32.xlu1 %v9856_v30, %s11485_s27 }
 0x367   : > { %v4278_v24 = vpop.f32.mrb[25].mxu1  ;;  %2978 = vst.msk [vmem:[#allocation3 + $0x130] sm:$0xff] %vm927_vm3, %v2902_v45  ;;  %4350 = vmatmul.mubr.f32.gmra.mrb[54].mxu1 %v4049_v53  ;;  %v3595_v45 = vld [vmem:[#allocation2 + $0x180] sm:$0xff] }
 0x368   : > { %3109 = vrot.lane.b32.xlu0 %v9824_v41, %s7663_s29  ;;  %7054 = vmatprep.mubr.msk.f32.mxu1 %vm11463_vm0, %v4052_v31  ;;  %v3860_v2 = vpop.permute.xlu1 %3859 }
 0x369   : > { %3937 = vst.msk [vmem:[#allocation3 + $0x120] sm:$0xff] %vm1892_vm8, %v3860_v2 }
 0x36a   : > { %v3094_v29 = vpop.permute.xlu0 %3093  ;;  %2727 = vrot.lane.b32.xlu1 %v9976_v4, %s7666_s12  ;;  %v4054_v4 = vld [vmem:[#allocation3 + $0x138] sm:$0xff] }
 0x36b   : > { %3170 = vst.msk [vmem:[#allocation3 + $0x130] sm:$0xff] %vm1120_vm4, %v3094_v29  ;;  %v3787_v29 = vld [vmem:[#allocation2 + $0x181] sm:$0xff] }
 0x36c   : > { %3301 = vrot.lane.b32.xlu0 %v3784_v27, %s7662_s28  ;;  %v2712_v33 = vpop.permute.xlu1 %2711 }
 0x36d   : > { %2787 = vst.msk [vmem:[#allocation3 + $0x140] sm:$0xff] %vm734_vm2, %v2712_v33  ;;  %v4056_v33 = vld [vmem:[#allocation3 + $0x148] sm:$0xff] }
 0x36e   : > { %v3286_v22 = vpop.permute.xlu0 %3285  ;;  %2919 = vrot.lane.b32.xlu1 %v9829_v9, %s7667_s13 }
 0x36f   : > { %3362 = vst.msk [vmem:[#allocation3 + $0x130] sm:$0xff] %vm1313_vm5, %v3286_v22 }
 0x370   : > { %3493 = vrot.lane.b32.xlu0 %v9850_v39, %s7664_s30  ;;  %v2904_v41 = vpop.permute.xlu1 %2903  ;;  %v4051_v43 = vld [vmem:[#allocation3 + $0x120] sm:$0xff] }
 0x371   : > { %2979 = vst.msk [vmem:[#allocation3 + $0x140] sm:$0xff] %vm927_vm3, %v2904_v41  ;;  %4355 = vmatmul.mubr.f32.gmra.mrb[56].mxu1 %v4051_v43 }
 0x372   : > { %v3478_v7 = vpop.permute.xlu0 %3477  ;;  %3111 = vrot.lane.b32.xlu1 %v9877_v46, %s7663_s29  ;;  %7055 = vmatprep.mubr.msk.f32.mxu1 %vm11463_vm0, %v4054_v4  ;;  %v4058_v4 = vld [vmem:[#allocation3 + $0x158] sm:$0xff] }
 0x373   : > { %3554 = vst.msk [vmem:[#allocation3 + $0x130] sm:$0xff] %vm1506_vm6, %v3478_v7 }
 0x374   : > { %3685 = vrot.lane.b32.xlu0 %v9899_v57, %s7668_s14  ;;  %v3096_v9 = vpop.permute.xlu1 %3095 }
 0x375   : > { %3171 = vst.msk [vmem:[#allocation3 + $0x140] sm:$0xff] %vm1120_vm4, %v3096_v9  ;;  %v3596_v9 = vld [vmem:[#allocation2 + $0x188] sm:$0xff] }
 0x376   : > { %v3670_v44 = vpop.permute.xlu0 %3669  ;;  %3303 = vrot.lane.b32.xlu1 %v9856_v30, %s7662_s28 }
 0x377   : > { %v10054_v49 = vpop.f32.mrb[26].mxu1  ;;  %3746 = vst.msk [vmem:[#allocation3 + $0x130] sm:$0xff] %vm1699_vm7, %v3670_v44 }
 0x378   : > { %v4283_v59 = vpop.f32.mrb[27].mxu1  ;;  %3877 = vrot.lane.b32.xlu0 %v9901_v60, %s11485_s27  ;;  %v3288_v46 = vpop.permute.xlu1 %3287 }
 0x379   : > { %3363 = vst.msk [vmem:[#allocation3 + $0x140] sm:$0xff] %vm1313_vm5, %v3288_v46 }
 0x37a   : > { %v3862_v40 = vpop.permute.xlu0 %3861  ;;  %3495 = vrot.lane.b32.xlu1 %v9907_v36, %s7664_s30 }
 0x37b   : > { %3938 = vst.msk [vmem:[#allocation3 + $0x130] sm:$0xff] %vm1892_vm8, %v3862_v40  ;;  %v3788_v40 = vld [vmem:[#allocation2 + $0x189] sm:$0xff] }
 0x37c   : > { %2729 = vrot.lane.b32.xlu0 %v3784_v27, %s7666_s12  ;;  %v3480_v21 = vpop.permute.xlu1 %3479 }
 0x37d   : > { %3555 = vst.msk [vmem:[#allocation3 + $0x140] sm:$0xff] %vm1506_vm6, %v3480_v21 }
 0x37e   : > { %v2714_v1 = vpop.permute.xlu0 %2713  ;;  %3687 = vrot.lane.b32.xlu1 %v3595_v45, %s7668_s14 }
 0x37f   : > { %2788 = vst.msk [vmem:[#allocation3 + $0x150] sm:$0xff] %vm734_vm2, %v2714_v1 }
 0x380   : > { %2921 = vrot.lane.b32.xlu0 %v9850_v39, %s7667_s13  ;;  %v3672_v24 = vpop.permute.xlu1 %3671 }
 0x381   : > { %3747 = vst.msk [vmem:[#allocation3 + $0x140] sm:$0xff] %vm1699_vm7, %v3672_v24 }
 0x382   : > { %v10071_v53 = vpop.f32.mrb[28].mxu1  ;;  %v2906_v31 = vpop.permute.xlu0 %2905  ;;  %v4053_v27 = vld [vmem:[#allocation3 + $0x130] sm:$0xff]  ;;  %3879 = vrot.lane.b32.xlu1 %v3787_v29, %s11485_s27 }
 0x383   : > { %v4288_v2 = vpop.f32.mrb[29].mxu1  ;;  %2980 = vst.msk [vmem:[#allocation3 + $0x150] sm:$0xff] %vm927_vm3, %v2906_v31  ;;  %4360 = vmatmul.mubr.f32.gmra.mrb[58].mxu1 %v4053_v27  ;;  %v3597_v31 = vld [vmem:[#allocation2 + $0x198] sm:$0xff] }
 0x384   : > { %3113 = vrot.lane.b32.xlu0 %v9899_v57, %s7663_s29  ;;  %7056 = vmatprep.mubr.msk.f32.mxu1 %vm11463_vm0, %v4056_v33  ;;  %v3864_v39 = vpop.permute.xlu1 %3863  ;;  %v3789_v33 = vld [vmem:[#allocation2 + $0x199] sm:$0xff] }
 0x385   : > { %3939 = vst.msk [vmem:[#allocation3 + $0x140] sm:$0xff] %vm1892_vm8, %v3864_v39  ;;  %v4060_v39 = vld [vmem:[#allocation3 + $0x168] sm:$0xff] }
 0x386   : > { %v3098_v22 = vpop.permute.xlu0 %3097  ;;  %2731 = vrot.lane.b32.xlu1 %v9856_v30, %s7666_s12 }
 0x387   : > { %3172 = vst.msk [vmem:[#allocation3 + $0x150] sm:$0xff] %vm1120_vm4, %v3098_v22 }
 0x388   : > { %3305 = vrot.lane.b32.xlu0 %v9901_v60, %s7662_s28  ;;  %v2716_v41 = vpop.permute.xlu1 %2715 }
 0x389   : > { %2789 = vst.msk [vmem:[#allocation3 + $0x160] sm:$0xff] %vm734_vm2, %v2716_v41 }
 0x38a   : > { %v3290_v43 = vpop.permute.xlu0 %3289  ;;  %2923 = vrot.lane.b32.xlu1 %v9907_v36, %s7667_s13 }
 0x38b   : > { %3364 = vst.msk [vmem:[#allocation3 + $0x150] sm:$0xff] %vm1313_vm5, %v3290_v43 }
 0x38c   : > { %3497 = vrot.lane.b32.xlu0 %v9930_v54, %s7664_s30  ;;  %v2908_v57 = vpop.permute.xlu1 %2907  ;;  %v4055_v7 = vld [vmem:[#allocation3 + $0x140] sm:$0xff] }
 0x38d   : > { %2981 = vst.msk [vmem:[#allocation3 + $0x160] sm:$0xff] %vm927_vm3, %v2908_v57  ;;  %4365 = vmatmul.mubr.f32.gmra.mrb[60].mxu1 %v4055_v7  ;;  %v3790_v57 = vld [vmem:[#allocation2 + $0x1a1] sm:$0xff] }
 0x38e   : > { %v3482_v30 = vpop.permute.xlu0 %3481  ;;  %3115 = vrot.lane.b32.xlu1 %v3595_v45, %s7663_s29  ;;  %7057 = vmatprep.mubr.msk.f32.mxu1 %vm11463_vm0, %v4058_v4  ;;  %v3598_v7 = vld [vmem:[#allocation2 + $0x1a0] sm:$0xff] }
 0x38f   : > { %3556 = vst.msk [vmem:[#allocation3 + $0x150] sm:$0xff] %vm1506_vm6, %v3482_v30 }
 0x390   : > { %3689 = vrot.lane.b32.xlu0 %v3596_v9, %s7668_s14  ;;  %v3100_v36 = vpop.permute.xlu1 %3099 }
 0x391   : > { %3173 = vst.msk [vmem:[#allocation3 + $0x160] sm:$0xff] %vm1120_vm4, %v3100_v36 }
 0x392   : > { %v3674_v44 = vpop.permute.xlu0 %3673  ;;  %v10097_v59 = vpop.f32.mrb[30].mxu1  ;;  %3307 = vrot.lane.b32.xlu1 %v3787_v29, %s7662_s28 }
 0x393   : > { %3748 = vst.msk [vmem:[#allocation3 + $0x150] sm:$0xff] %vm1699_vm7, %v3674_v44  ;;  %v4293_v46 = vpop.f32.mrb[31].mxu1  ;;  %v10283_v6 = vadd.f32 %v10251_v63, %v10097_v59 }
 0x394   : > { %3881 = vrot.lane.b32.xlu0 %v3788_v40, %s11485_s27  ;;  %v3292_v21 = vpop.permute.xlu1 %3291 }
 0x395   : > { %3365 = vst.msk [vmem:[#allocation3 + $0x160] sm:$0xff] %vm1313_vm5, %v3292_v21 }
 0x396   : > { %v3866_v1 = vpop.permute.xlu0 %3865  ;;  %3499 = vrot.lane.b32.xlu1 %v9960_v61, %s7664_s30 }
 0x397   : > { %3940 = vst.msk [vmem:[#allocation3 + $0x150] sm:$0xff] %vm1892_vm8, %v3866_v1 }
 0x398   : > { %2733 = vrot.lane.b32.xlu0 %v9901_v60, %s7666_s12  ;;  %v3484_v45 = vpop.permute.xlu1 %3483 }
 0x399   : > { %3557 = vst.msk [vmem:[#allocation3 + $0x160] sm:$0xff] %vm1506_vm6, %v3484_v45 }
 0x39a   : > { %v2718_v24 = vpop.permute.xlu0 %2717  ;;  %3691 = vrot.lane.b32.xlu1 %v3597_v31, %s7668_s14 }
 0x39b   : > { %2790 = vst.msk [vmem:[#allocation3 + $0x170] sm:$0xff] %vm734_vm2, %v2718_v24 }
 0x39c   : > { %2925 = vrot.lane.b32.xlu0 %v9930_v54, %s7667_s13  ;;  %v3676_v2 = vpop.permute.xlu1 %3675  ;;  %v10113_v27 = vpop.f32.mrb[32].mxu1 }
 0x39d   : > { %3749 = vst.msk [vmem:[#allocation3 + $0x160] sm:$0xff] %vm1699_vm7, %v3676_v2  ;;  %v4298_v29 = vpop.f32.mrb[33].mxu1  ;;  %v10289_v52 = vadd.f32 %v10251_v63, %v10113_v27 }
 0x39e   : > { %v2910_v61 = vpop.permute.xlu0 %2909  ;;  %v4057_v60 = vld [vmem:[#allocation3 + $0x150] sm:$0xff]  ;;  %3883 = vrot.lane.b32.xlu1 %v3789_v33, %s11485_s27  ;;  %v4064_v33 = vld [vmem:[#allocation3 + $0x188] sm:$0xff] }
 0x39f   : > { %2982 = vst.msk [vmem:[#allocation3 + $0x170] sm:$0xff] %vm927_vm3, %v2910_v61  ;;  %4370 = vmatmul.mubr.f32.gmra.mrb[62].mxu1 %v4057_v60  ;;  %v4436_v59 = vsel %vm11463_vm0, %v10289_v52, 0.0 }
 0x3a0   : > { %3117 = vrot.lane.b32.xlu0 %v3596_v9, %s7663_s29  ;;  %7058 = vmatprep.mubr.msk.f32.mxu1 %vm11463_vm0, %v4060_v39  ;;  %v3868_v54 = vpop.permute.xlu1 %3867  ;;  %s7161_s29 = sshll.u32 %s7753_s6, 12  ;;  %s11361_s6 = scalar_lea.sflag [#allocation7], %s352_s26 }
 0x3a1   : > { %3941 = vst.msk [vmem:[#allocation3 + $0x160] sm:$0xff] %vm1892_vm8, %v3868_v54 }
 0x3a2   : > { %v3102_v22 = vpop.permute.xlu0 %3101  ;;  %3501 = vrot.lane.b32.xlu1 %v9984_v3, %s7664_s30  ;;  %v4062_v3 = vld [vmem:[#allocation3 + $0x178] sm:$0xff] }
 0x3a3   : > { %3174 = vst.msk [vmem:[#allocation3 + $0x170] sm:$0xff] %vm1120_vm4, %v3102_v22 }
 0x3a4   : > { %3309 = vrot.lane.b32.xlu0 %v3788_v40, %s7662_s28  ;;  %v2720_v41 = vpop.permute.xlu1 %2719  ;;  %s11224_s28 = scalar_lea.vmem [#allocation6], %s6999_s19 }
 0x3a5   : > { %2791 = vst.msk [vmem:[#allocation3 + $0x180] sm:$0xff] %vm734_vm2, %v2720_v41  ;;  %s6933_s30 = sshll.u32 %s11224_s28, 4  ;;  %s11354_s30 = int_to_ptr.vmem [resolvable:$true] %s6933_s30 }
 0x3a6   : > { %v3294_v43 = vpop.permute.xlu0 %3293  ;;  %3885 = vrot.lane.b32.xlu1 %v3790_v57, %s11485_s27  ;;  %s7597_s27 = scalar_lea.vmem %s11354_s30, 4096  ;;  %p7604_p0 = scmp.lt.s32.totalorder %s11354_s30, %s7602_s21 }
 0x3a7   : > { %3366 = vst.msk [vmem:[#allocation3 + $0x170] sm:$0xff] %vm1313_vm5, %v3294_v43  ;;  %p7598_p11 = scmp.ne.s32.totalorder %s11354_s30, %s7597_s27  ;;  %p7605_p1 = scmp.lt.s32.totalorder %s7603_s22, %s7597_s27 }
 0x3a8   : > { %3693 = vrot.lane.b32.xlu0 %v3598_v7, %s7668_s14  ;;  %v2912_v30 = vpop.permute.xlu1 %2911  ;;  %v4059_v4 = vld [vmem:[#allocation3 + $0x160] sm:$0xff]  ;;  %s11352_s14 = scalar_lea.hbm %s11412_s10, %s7161_s29 }
 0x3a9   : > { %2983 = vst.msk [vmem:[#allocation3 + $0x180] sm:$0xff] %vm927_vm3, %v2912_v30  ;;  %4375 = vmatmul.mubr.f32.gmra.mrb[64].mxu1 %v4059_v4  ;;  %v4066_v30 = vld [vmem:[#allocation3 + $0x198] sm:$0xff]  ;;  %p7599_p12 = pnand %p7598_p11, %p7770_p5  ;;  %p7606_p2 = por %p7605_p1, %p7604_p0 }
 0x3aa   : > { %v3486_v9 = vpop.permute.xlu0 %3485  ;;  %7059 = vmatprep.mubr.msk.f32.mxu1 %vm11463_vm0, %v4062_v3 }
 0x3ab   : > { %3558 = vst.msk [vmem:[#allocation3 + $0x170] sm:$0xff] %vm1506_vm6, %v3486_v9  ;;  %p7600_p13 = pneg %p7599_p12 }
 0x3ac   : > { %v3104_v36 = vpop.permute.xlu1 %3103 }
 0x3ad   : > { %3175 = vst.msk [vmem:[#allocation3 + $0x180] sm:$0xff] %vm1120_vm4, %v3104_v36  ;;  %p7607_p3 = pnand %p7606_p2, %p7600_p13 }
 0x3ae   : > { %v3678_v44 = vpop.permute.xlu0 %3677  ;;  %v10133_v46 = vpop.f32.mrb[34].mxu1 }
 0x3af   : > { %3750 = vst.msk [vmem:[#allocation3 + $0x170] sm:$0xff] %vm1699_vm7, %v3678_v44  ;;  %v4303_v40 = vpop.f32.mrb[35].mxu1 }
 0x3b0   : > { %v3296_v21 = vpop.permute.xlu1 %3295 }
 0x3b1   : > { %3367 = vst.msk [vmem:[#allocation3 + $0x180] sm:$0xff] %vm1313_vm5, %v3296_v21 }
 0x3b2   : > { %v3870_v1 = vpop.permute.xlu0 %3869 }
 0x3b3   : > { %3942 = vst.msk [vmem:[#allocation3 + $0x170] sm:$0xff] %vm1892_vm8, %v3870_v1 }
 0x3b4   : > { %v3488_v45 = vpop.permute.xlu1 %3487 }
 0x3b5   : > { %3559 = vst.msk [vmem:[#allocation3 + $0x180] sm:$0xff] %vm1506_vm6, %v3488_v45 }
 0x3b6   : > { %v2722_v24 = vpop.permute.xlu0 %2721 }
 0x3b7   : > { %2792 = vst.msk [vmem:[#allocation3 + $0x190] sm:$0xff] %vm734_vm2, %v2722_v24 }
 0x3b8   : > { %v3680_v31 = vpop.permute.xlu1 %3679 }
 0x3b9   : > { %3751 = vst.msk [vmem:[#allocation3 + $0x180] sm:$0xff] %vm1699_vm7, %v3680_v31 }
 0x3ba   : > { %v2914_v61 = vpop.permute.xlu0 %2913  ;;  %v4061_v60 = vld [vmem:[#allocation3 + $0x170] sm:$0xff] }
 0x3bb   : > { %v10140_v2 = vpop.f32.mrb[36].mxu1  ;;  %2984 = vst.msk [vmem:[#allocation3 + $0x190] sm:$0xff] %vm927_vm3, %v2914_v61  ;;  %4380 = vmatmul.mubr.f32.gmra.mrb[66].mxu1 %v4061_v60  ;;  %v4068_v60 = vld [vmem:[#allocation3 + $0x1a8] sm:$0xff] }
 0x3bc   : > { %v4308_v29 = vpop.f32.mrb[37].mxu1  ;;  %7060 = vmatprep.mubr.msk.f32.mxu1 %vm11463_vm0, %v4064_v33  ;;  %v3872_v39 = vpop.permute.xlu1 %3871 }
 0x3bd   : > { %3943 = vst.msk [vmem:[#allocation3 + $0x180] sm:$0xff] %vm1892_vm8, %v3872_v39 }
 0x3be   : > { %v3106_v54 = vpop.permute.xlu0 %3105 }
 0x3bf   : > { %3176 = vst.msk [vmem:[#allocation3 + $0x190] sm:$0xff] %vm1120_vm4, %v3106_v54 }
 0x3c0   : > { %v2724_v22 = vpop.permute.xlu1 %2723 }
 0x3c1   : > { %2793 = vst.msk [vmem:[#allocation3 + $0x1a0] sm:$0xff] %vm734_vm2, %v2724_v22 }
 0x3c2   : > { %v3298_v41 = vpop.permute.xlu0 %3297 }
 0x3c3   : > { %3368 = vst.msk [vmem:[#allocation3 + $0x190] sm:$0xff] %vm1313_vm5, %v3298_v41 }
 0x3c4   : > { %v2916_v43 = vpop.permute.xlu1 %2915  ;;  %v4063_v57 = vld [vmem:[#allocation3 + $0x180] sm:$0xff] }
 0x3c5   : > { %2985 = vst.msk [vmem:[#allocation3 + $0x1a0] sm:$0xff] %vm927_vm3, %v2916_v43  ;;  %4385 = vmatmul.mubr.f32.gmra.mrb[68].mxu1 %v4063_v57 }
 0x3c6   : > { %v3490_v7 = vpop.permute.xlu0 %3489  ;;  %7061 = vmatprep.mubr.msk.f32.mxu1 %vm11463_vm0, %v4066_v30 }
 0x3c7   : > { %3560 = vst.msk [vmem:[#allocation3 + $0x190] sm:$0xff] %vm1506_vm6, %v3490_v7  ;;  %v4070_v7 = vld [vmem:[#allocation3 + $0x1b8] sm:$0xff] }
 0x3c8   : > { %v3108_v4 = vpop.permute.xlu1 %3107 }
 0x3c9   : > { %3177 = vst.msk [vmem:[#allocation3 + $0x1a0] sm:$0xff] %vm1120_vm4, %v3108_v4 }
 0x3ca   : > { %v3682_v9 = vpop.permute.xlu0 %3681 }
 0x3cb   : > { %3752 = vst.msk [vmem:[#allocation3 + $0x190] sm:$0xff] %vm1699_vm7, %v3682_v9 }
 0x3cc   : > { %v10153_v3 = vpop.f32.mrb[38].mxu1  ;;  %v3300_v44 = vpop.permute.xlu1 %3299 }
 0x3cd   : > { %v4313_v36 = vpop.f32.mrb[39].mxu1  ;;  %3369 = vst.msk [vmem:[#allocation3 + $0x1a0] sm:$0xff] %vm1313_vm5, %v3300_v44 }
 0x3ce   : > { %v3874_v40 = vpop.permute.xlu0 %3873 }
 0x3cf   : > { %3944 = vst.msk [vmem:[#allocation3 + $0x190] sm:$0xff] %vm1892_vm8, %v3874_v40 }
 0x3d0   : > { %v3492_v21 = vpop.permute.xlu1 %3491 }
 0x3d1   : > { %3561 = vst.msk [vmem:[#allocation3 + $0x1a0] sm:$0xff] %vm1506_vm6, %v3492_v21 }
 0x3d2   : > { %v2726_v1 = vpop.permute.xlu0 %2725 }
 0x3d3   : > { %2794 = vst.msk [vmem:[#allocation3 + $0x1b0] sm:$0xff] %vm734_vm2, %v2726_v1 }
 0x3d4   : > { %v3684_v45 = vpop.permute.xlu1 %3683  ;;  %v10160_v24 = vpop.f32.mrb[40].mxu1 }
 0x3d5   : > { %3753 = vst.msk [vmem:[#allocation3 + $0x1a0] sm:$0xff] %vm1699_vm7, %v3684_v45  ;;  %v4318_v61 = vpop.f32.mrb[41].mxu1 }
 0x3d6   : > { %v2918_v31 = vpop.permute.xlu0 %2917  ;;  %v4065_v29 = vld [vmem:[#allocation3 + $0x190] sm:$0xff] }
 0x3d7   : > { %2986 = vst.msk [vmem:[#allocation3 + $0x1b0] sm:$0xff] %vm927_vm3, %v2918_v31  ;;  %4390 = vmatmul.mubr.f32.gmra.mrb[70].mxu1 %v4065_v29 }
 0x3d8   : > { %7062 = vmatprep.mubr.msk.f32.mxu1 %vm11463_vm0, %v4068_v60  ;;  %v3876_v33 = vpop.permute.xlu1 %3875 }
 0x3d9   : > { %3945 = vst.msk [vmem:[#allocation3 + $0x1a0] sm:$0xff] %vm1892_vm8, %v3876_v33  ;;  %v4072_v33 = vld [vmem:[#allocation3 + $0x1c8] sm:$0xff] }
 0x3da   : > { %v3110_v39 = vpop.permute.xlu0 %3109 }
 0x3db   : > { %3178 = vst.msk [vmem:[#allocation3 + $0x1b0] sm:$0xff] %vm1120_vm4, %v3110_v39 }
 0x3dc   : > { %v2728_v54 = vpop.permute.xlu1 %2727 }
 0x3dd   : > { %2795 = vst.msk [vmem:[#allocation3 + $0x1c0] sm:$0xff] %vm734_vm2, %v2728_v54 }
 0x3de   : > { %v3302_v22 = vpop.permute.xlu0 %3301 }
 0x3df   : > { %3370 = vst.msk [vmem:[#allocation3 + $0x1b0] sm:$0xff] %vm1313_vm5, %v3302_v22 }
 0x3e0   : > { %v2920_v41 = vpop.permute.xlu1 %2919  ;;  %v4067_v43 = vld [vmem:[#allocation3 + $0x1a0] sm:$0xff] }
 0x3e1   : > { %2987 = vst.msk [vmem:[#allocation3 + $0x1c0] sm:$0xff] %vm927_vm3, %v2920_v41  ;;  %4395 = vmatmul.mubr.f32.gmra.mrb[72].mxu1 %v4067_v43 }
 0x3e2   : > { %v3494_v57 = vpop.permute.xlu0 %3493  ;;  %7063 = vmatprep.mubr.msk.f32.mxu1 %vm11463_vm0, %v4070_v7 }
 0x3e3   : > { %3562 = vst.msk [vmem:[#allocation3 + $0x1b0] sm:$0xff] %vm1506_vm6, %v3494_v57 }
 0x3e4   : > { %v3112_v30 = vpop.permute.xlu1 %3111 }
 0x3e5   : > { %3179 = vst.msk [vmem:[#allocation3 + $0x1c0] sm:$0xff] %vm1120_vm4, %v3112_v30  ;;  %v4074_v30 = vld [vmem:[#allocation3 + $0x1d8] sm:$0xff] }
 0x3e6   : > { %v3686_v4 = vpop.permute.xlu0 %3685 }
 0x3e7   : > { %3754 = vst.msk [vmem:[#allocation3 + $0x1b0] sm:$0xff] %vm1699_vm7, %v3686_v4 }
 0x3e8   : > { %v10173_v9 = vpop.f32.mrb[42].mxu1  ;;  %v3304_v44 = vpop.permute.xlu1 %3303 }
 0x3e9   : > { %v4323_v36 = vpop.f32.mrb[43].mxu1  ;;  %3371 = vst.msk [vmem:[#allocation3 + $0x1c0] sm:$0xff] %vm1313_vm5, %v3304_v44 }
 0x3ea   : > { %v3878_v40 = vpop.permute.xlu0 %3877 }
 0x3eb   : > { %3946 = vst.msk [vmem:[#allocation3 + $0x1b0] sm:$0xff] %vm1892_vm8, %v3878_v40 }
 0x3ec   : > { %v3496_v21 = vpop.permute.xlu1 %3495 }
 0x3ed   : > { %3563 = vst.msk [vmem:[#allocation3 + $0x1c0] sm:$0xff] %vm1506_vm6, %v3496_v21 }
 0x3ee   : > { %v2730_v1 = vpop.permute.xlu0 %2729 }
 0x3ef   : > { %2796 = vst.msk [vmem:[#allocation3 + $0x1d0] sm:$0xff] %vm734_vm2, %v2730_v1 }
 0x3f0   : > { %v3688_v45 = vpop.permute.xlu1 %3687 }
 0x3f1   : > { %3755 = vst.msk [vmem:[#allocation3 + $0x1c0] sm:$0xff] %vm1699_vm7, %v3688_v45 }
 0x3f2   : > { %v2922_v61 = vpop.permute.xlu0 %2921  ;;  %v4069_v60 = vld [vmem:[#allocation3 + $0x1b0] sm:$0xff] }
 0x3f3   : > { %v10180_v31 = vpop.f32.mrb[44].mxu1  ;;  %2988 = vst.msk [vmem:[#allocation3 + $0x1d0] sm:$0xff] %vm927_vm3, %v2922_v61  ;;  %4400 = vmatmul.mubr.f32.gmra.mrb[74].mxu1 %v4069_v60 }
 0x3f4   : > { %v4328_v29 = vpop.f32.mrb[45].mxu1  ;;  %7064 = vmatprep.mubr.msk.f32.mxu1 %vm11463_vm0, %v4072_v33  ;;  %v3880_v39 = vpop.permute.xlu1 %3879 }
 0x3f5   : > { %3947 = vst.msk [vmem:[#allocation3 + $0x1c0] sm:$0xff] %vm1892_vm8, %v3880_v39 }
 0x3f6   : > { %v3114_v54 = vpop.permute.xlu0 %3113 }
 0x3f7   : > { %3180 = vst.msk [vmem:[#allocation3 + $0x1d0] sm:$0xff] %vm1120_vm4, %v3114_v54 }
 0x3f8   : > { %v2732_v22 = vpop.permute.xlu1 %2731 }
 0x3f9   : > { %2797 = vst.msk [vmem:[#allocation3 + $0x1e0] sm:$0xff] %vm734_vm2, %v2732_v22  ;;  %v4076_v22 = vld [vmem:[#allocation3 + $0x1e8] sm:$0xff] }
 0x3fa   : > { %v3306_v41 = vpop.permute.xlu0 %3305 }
 0x3fb   : > { %3372 = vst.msk [vmem:[#allocation3 + $0x1d0] sm:$0xff] %vm1313_vm5, %v3306_v41 }
 0x3fc   : > { %v2924_v43 = vpop.permute.xlu1 %2923  ;;  %v4071_v57 = vld [vmem:[#allocation3 + $0x1c0] sm:$0xff] }
 0x3fd   : > { %2989 = vst.msk [vmem:[#allocation3 + $0x1e0] sm:$0xff] %vm927_vm3, %v2924_v43  ;;  %4405 = vmatmul.mubr.f32.gmra.mrb[76].mxu1 %v4071_v57 }
 0x3fe   : > { %v3498_v7 = vpop.permute.xlu0 %3497  ;;  %7065 = vmatprep.mubr.msk.f32.mxu1 %vm11463_vm0, %v4074_v30 }
 0x3ff   : > { %3564 = vst.msk [vmem:[#allocation3 + $0x1d0] sm:$0xff] %vm1506_vm6, %v3498_v7 }
 0x400   : > { %v3116_v4 = vpop.permute.xlu1 %3115 }
 0x401   : > { %3181 = vst.msk [vmem:[#allocation3 + $0x1e0] sm:$0xff] %vm1120_vm4, %v3116_v4 }
 0x402   : > { %v3690_v36 = vpop.permute.xlu0 %3689 }
 0x403   : > { %3756 = vst.msk [vmem:[#allocation3 + $0x1d0] sm:$0xff] %vm1699_vm7, %v3690_v36 }
 0x404   : > { %v3308_v21 = vpop.permute.xlu1 %3307 }
 0x405   : > { %v10193_v44 = vpop.f32.mrb[46].mxu1  ;;  %3373 = vst.msk [vmem:[#allocation3 + $0x1e0] sm:$0xff] %vm1313_vm5, %v3308_v21 }
 0x406   : > { %v4333_v40 = vpop.f32.mrb[47].mxu1  ;;  %v3882_v1 = vpop.permute.xlu0 %3881 }
 0x407   : > { %3948 = vst.msk [vmem:[#allocation3 + $0x1d0] sm:$0xff] %vm1892_vm8, %v3882_v1  ;;  %v4078_v40 = vld [vmem:[#allocation3 + $0x1f8] sm:$0xff] }
 0x408   : > { %v3500_v45 = vpop.permute.xlu1 %3499 }
 0x409   : > { %3565 = vst.msk [vmem:[#allocation3 + $0x1e0] sm:$0xff] %vm1506_vm6, %v3500_v45 }
 0x40a   : > { %v2734_v61 = vpop.permute.xlu0 %2733 }
 0x40b   : > { %2798 = vst.msk [vmem:[#allocation3 + $0x1f0] sm:$0xff] %vm734_vm2, %v2734_v61  ;;  %vm5015_vm2 = vcmask 1042434  }
 0x40c   : > { %v3692_v29 = vpop.permute.xlu1 %3691 }
 0x40d   : > { %3757 = vst.msk [vmem:[#allocation3 + $0x1e0] sm:$0xff] %vm1699_vm7, %v3692_v29 }
 0x40e   : > { %v2926_v33 = vpop.permute.xlu0 %2925  ;;  %v4073_v54 = vld [vmem:[#allocation3 + $0x1d0] sm:$0xff] }
 0x40f   : > { %v10200_v60 = vpop.f32.mrb[48].mxu1  ;;  %2990 = vst.msk [vmem:[#allocation3 + $0x1f0] sm:$0xff] %vm927_vm3, %v2926_v33  ;;  %4410 = vmatmul.mubr.f32.gmra.mrb[78].mxu1 %v4073_v54  ;;  %v4496_v33 = vld [vmem:[%s11407_s5] sm:$0xff]  ;;  %vm5017_vm3 = vcmask 1043459  }
 0x410   : > { %v4338_v39 = vpop.f32.mrb[49].mxu1  ;;  %7066 = vmatprep.mubr.msk.f32.mxu1 %vm11463_vm0, %v4076_v22  ;;  %v3884_v41 = vpop.permute.xlu1 %3883 }
 0x411   : > { %3949 = vst.msk [vmem:[#allocation3 + $0x1e0] sm:$0xff] %vm1892_vm8, %v3884_v41  ;;  %v4497_v39 = vld [vmem:[%s11407_s5 + $0x8] sm:$0xff] }
 0x412   : > { %v3118_v43 = vpop.permute.xlu0 %3117  ;;  %v7430_v54 = vpack.c.bf16 %v4497_v39, %v4496_v33  ;;  %v11419_v33 = vmov 0.0   ;;  %v4573_v39 = vld [vmem:[%s11409_s7] sm:$0x1] }
 0x413   : > { %3182 = vst.msk [vmem:[#allocation3 + $0x1f0] sm:$0xff] %vm1120_vm4, %v3118_v43  ;;  %7241 = vmatprep.mubr.msk.f32.mxu0 %vm7669_vm9, %v11419_v33  ;;  %7244 = vmatprep.subr.mxu1 %v11419_v33  ;;  %vm5019_vm4 = vcmask 1044484  }
 0x414   : > { %v3502_v57 = vpop.permute.xlu1 %3501  ;;  %7431 = vmatpush3.bf16.msra.mxu0 %v7430_v54  ;;  %7245 = vmatpush3.msk.msra.mxu1 %vm4579_vm10, %v4573_v39  ;;  %v10255_v39 = vadd.f32 %v10251_v63, %v10008_v38  ;;  %vm5611_vm10 = vcmask 1044480  }
 0x416   : > { %v3310_v7 = vpop.permute.xlu0 %3309 }
 0x417   : > { %3374 = vst.msk [vmem:[#allocation3 + $0x1f0] sm:$0xff] %vm1313_vm5, %v3310_v7  ;;  %vm5021_vm5 = vcmask 1045509  }
 0x418   : > { %3566 = vst.msk [vmem:[#allocation3 + $0x1f0] sm:$0xff] %vm1506_vm6, %v3502_v57  ;;  %v3886_v30 = vpop.permute.xlu1 %3885  ;;  %v4075_v4 = vld [vmem:[#allocation3 + $0x1e0] sm:$0xff]  ;;  %vm5023_vm6 = vcmask 1046534  }
 0x419   : > { %4415 = vmatmul.mubr.f32.gmra.mrb[80].mxu1 %v4075_v4 }
 0x41a   : > { %v3694_v36 = vpop.permute.xlu0 %3693  ;;  %7067 = vmatprep.mubr.msk.f32.mxu1 %vm11463_vm0, %v4078_v40 }
 0x41b   : > { %3758 = vst.msk [vmem:[#allocation3 + $0x1f0] sm:$0xff] %vm1699_vm7, %v3694_v36  ;;  %vm5025_vm7 = vcmask 1047559  }
 0x41c   : > { %3950 = vst.msk [vmem:[#allocation3 + $0x1f0] sm:$0xff] %vm1892_vm8, %v3886_v30  ;;  %vm5036_vm8 = vcmask 154648  }
 0x41e   : > { %v10212_v21 = vpop.f32.mrb[50].mxu1 }
 0x41f   : > { %v4343_v1 = vpop.f32.mrb[51].mxu1 }
 0x423   : > { %v4077_v45 = vld [vmem:[#allocation3 + $0x1f0] sm:$0xff] }
 0x424   : > { %4420 = vmatmul.mubr.f32.gmra.mrb[82].mxu1 %v4077_v45 }
 0x425   : > { %7246 = vmatprep.mubr.msk.f32.mxu1 %vm7669_vm9, %v11419_v33  ;;  %vm5343_vm9 = vcmask 1046528  }
 0x428   : > { %v10214_v61 = vpop.f32.mrb[52].mxu1 }
 0x429   : > { %v4348_v29 = vpop.f32.mrb[53].mxu1 }
 0x43a   : > { %v10222_v22 = vpop.f32.mrb[54].mxu1 }
 0x43b   : > { %v4353_v41 = vpop.f32.mrb[55].mxu1 }
 0x444   : > { %v10224_v43 = vpop.f32.mrb[56].mxu1 }
 0x445   : > { %v4358_v57 = vpop.f32.mrb[57].mxu1 }
 0x456   : > { %v10226_v7 = vpop.f32.mrb[58].mxu1 }
 0x457   : > { %v4363_v30 = vpop.f32.mrb[59].mxu1 }
 0x460   : > { %v10228_v4 = vpop.f32.mrb[60].mxu1 }
 0x461   : > { %v4368_v36 = vpop.f32.mrb[61].mxu1 }
 0x472   : > { %v10230_v40 = vpop.f32.mrb[62].mxu1 }
 0x473   : > { %v4373_v1 = vpop.f32.mrb[63].mxu1 }
 0x47c   : > { %v10232_v45 = vpop.f32.mrb[64].mxu1 }
 0x47d   : > { %v4378_v29 = vpop.f32.mrb[65].mxu1 }
 0x48e   : > { %v10240_v54 = vpop.f32.mrb[66].mxu1 }
 0x48f   : > { %v4383_v41 = vpop.f32.mrb[67].mxu1 }
 0x490   : > { %v10259_v41 = vadd.f32 %v10251_v63, %v9973_v37  ;;  %v10277_v37 = vadd.f32 %v10251_v63, %v10071_v53  ;;  %v4434_v53 = vsel %vm11463_vm0, %v10283_v6, 0.0 }
 0x492   : > { %v4425_v33 = vsel %vm11463_vm0, %v10259_v41, 0.0  ;;  %v4432_v19 = vsel %vm11463_vm0, %v10277_v37, 0.0 }
 0x498   : > { %v10242_v57 = vpop.f32.mrb[68].mxu1 }
 0x499   : > { %v4388_v30 = vpop.f32.mrb[69].mxu1 }
 0x49a   : > { %v10263_v30 = vadd.f32 %v10251_v63, %v10026_v8 }
 0x49c   : > { %v4428_v38 = vsel %vm11463_vm0, %v10263_v30, 0.0 }
 0x4aa   : > { %v10244_v36 = vpop.f32.mrb[70].mxu1 }
 0x4ab   : > { %v4393_v1 = vpop.f32.mrb[71].mxu1 }
 0x4ac   : > { %v10269_v1 = vadd.f32 %v10251_v63, %v10054_v49 }
 0x4ae   : > { %v4430_v8 = vsel %vm11463_vm0, %v10269_v1, 0.0 }
 0x4b4   : > { %v10246_v29 = vpop.f32.mrb[72].mxu1 }
 0x4b5   : > { %v4398_v32 = vpop.f32.mrb[73].mxu1 }
 0x4b6   : > { %v4426_v32 = vsel %vm11463_vm0, %v10255_v39, 0.0 }
 0x4b7   : > { %v4427_v48 = vadd.f32 %v4426_v32, %v4425_v33  ;;  %v10295_v33 = vadd.f32 %v10251_v63, %v10133_v46 }
 0x4b9   : > { %v4429_v49 = vadd.f32 %v4428_v38, %v4427_v48  ;;  %v10301_v48 = vadd.f32 %v10251_v63, %v10140_v2 }
 0x4bb   : > { %v4431_v20 = vadd.f32 %v4430_v8, %v4429_v49  ;;  %v4438_v8 = vsel %vm11463_vm0, %v10295_v33, 0.0  ;;  %v10307_v49 = vadd.f32 %v10251_v63, %v10153_v3 }
 0x4bd   : > { %v4433_v32 = vadd.f32 %v4432_v19, %v4431_v20  ;;  %v4440_v20 = vsel %vm11463_vm0, %v10301_v48, 0.0  ;;  %v10313_v19 = vadd.f32 %v10251_v63, %v10160_v24 }
 0x4bf   : > { %v4435_v26 = vadd.f32 %v4434_v53, %v4433_v32  ;;  %v4442_v53 = vsel %vm11463_vm0, %v10307_v49, 0.0  ;;  %v10319_v32 = vadd.f32 %v10251_v63, %v10173_v9  ;;  %v4444_v3 = vsel %vm11463_vm0, %v10313_v19, 0.0 }
 0x4c1   : > { %v4437_v46 = vadd.f32 %v4436_v59, %v4435_v26  ;;  %v10325_v26 = vadd.f32 %v10251_v63, %v10180_v31  ;;  %v4446_v24 = vsel %vm11463_vm0, %v10319_v32, 0.0 }
 0x4c3   : > { %v4439_v2 = vadd.f32 %v4438_v8, %v4437_v46  ;;  %v10331_v8 = vadd.f32 %v10251_v63, %v10193_v44  ;;  %v4448_v9 = vsel %vm11463_vm0, %v10325_v26, 0.0 }
 0x4c6   : > { %v4401_v38 = vpop.f32.mrb[74].mxu1 }
 0x4c7   : > { %v4403_v27 = vpop.f32.mrb[75].mxu1 }
 0x4c8   : > { %v4441_v27 = vadd.f32 %v4440_v20, %v4439_v2  ;;  %v10337_v20 = vadd.f32 %v10251_v63, %v10200_v60 }
 0x4ca   : > { %v4443_v59 = vadd.f32 %v4442_v53, %v4441_v27  ;;  %v4450_v53 = vsel %vm11463_vm0, %v10331_v8, 0.0  ;;  %v10343_v27 = vadd.f32 %v10251_v63, %v10212_v21 }
 0x4cc   : > { %v4445_v46 = vadd.f32 %v4444_v3, %v4443_v59  ;;  %v4452_v3 = vsel %vm11463_vm0, %v10337_v20, 0.0  ;;  %v10349_v59 = vadd.f32 %v10251_v63, %v10214_v61  ;;  %v4454_v60 = vsel %vm11463_vm0, %v10343_v27, 0.0 }
 0x4ce   : > { %v4447_v31 = vadd.f32 %v4446_v24, %v4445_v46  ;;  %v10355_v24 = vadd.f32 %v10251_v63, %v10222_v22  ;;  %v4456_v21 = vsel %vm11463_vm0, %v10349_v59, 0.0 }
 0x4d0   : > { %v4406_v17 = vpop.f32.mrb[76].mxu1  ;;  %v4449_v44 = vadd.f32 %v4448_v9, %v4447_v31  ;;  %v10361_v9 = vadd.f32 %v10251_v63, %v10224_v43  ;;  %v4458_v61 = vsel %vm11463_vm0, %v10355_v24, 0.0  ;;  %v10367_v31 = vadd.f32 %v10251_v63, %v10226_v7 }
 0x4d1   : > { %v4408_v2 = vpop.f32.mrb[77].mxu1 }
 0x4d2   : > { %v4451_v23 = vadd.f32 %v4450_v53, %v4449_v44  ;;  %v4460_v22 = vsel %vm11463_vm0, %v10361_v9, 0.0  ;;  %v4462_v43 = vsel %vm11463_vm0, %v10367_v31, 0.0 }
 0x4d4   : > { %v4453_v46 = vadd.f32 %v4452_v3, %v4451_v23  ;;  %v10373_v23 = vadd.f32 %v10251_v63, %v10228_v4  ;;  %v10379_v3 = vadd.f32 %v10251_v63, %v10230_v40 }
 0x4d6   : > { %v4455_v2 = vadd.f32 %v4454_v60, %v4453_v46  ;;  %v4464_v7 = vsel %vm11463_vm0, %v10373_v23, 0.0  ;;  %v10385_v46 = vadd.f32 %v10251_v63, %v10232_v45 }
 0x4d8   : > { %v4457_v53 = vadd.f32 %v4456_v21, %v4455_v2 }
 0x4da   : > { %v4459_v44 = vadd.f32 %v4458_v61, %v4457_v53  ;;  %v4466_v61 = vsel %vm11463_vm0, %v10379_v3, 0.0  ;;  %v10391_v53 = vadd.f32 %v10251_v63, %v10240_v54 }
 0x4dc   : > { %v4461_v60 = vadd.f32 %v4460_v22, %v4459_v44  ;;  %v4468_v22 = vsel %vm11463_vm0, %v10385_v46, 0.0  ;;  %v10397_v44 = vadd.f32 %v10251_v63, %v10242_v57 }
 0x4de   : > { %v4463_v2 = vadd.f32 %v4462_v43, %v4461_v60  ;;  %v4470_v43 = vsel %vm11463_vm0, %v10391_v53, 0.0  ;;  %v10403_v60 = vadd.f32 %v10251_v63, %v10244_v36  ;;  %v4472_v54 = vsel %vm11463_vm0, %v10397_v44, 0.0 }
 0x4e0   : > { %v4465_v40 = vadd.f32 %v4464_v7, %v4463_v2  ;;  %v10409_v7 = vadd.f32 %v10251_v63, %v10246_v29  ;;  %v4474_v57 = vsel %vm11463_vm0, %v10403_v60, 0.0 }
 0x4e2   : > { %v4411_v21 = vpop.f32.mrb[78].mxu1  ;;  %v4467_v45 = vadd.f32 %v4466_v61, %v4465_v40  ;;  %v10414_v61 = vadd.f32 %v10251_v63, %v4401_v38  ;;  %v4476_v36 = vsel %vm11463_vm0, %v10409_v7, 0.0 }
 0x4e3   : > { %v4413_v4 = vpop.f32.mrb[79].mxu1 }
 0x4e4   : > { %v4469_v4 = vadd.f32 %v4468_v22, %v4467_v45  ;;  %v10419_v22 = vadd.f32 %v10251_v63, %v4406_v17  ;;  %v4478_v29 = vsel %vm11463_vm0, %v10414_v61, 0.0 }
 0x4e6   : > { %v4471_v2 = vadd.f32 %v4470_v43, %v4469_v4  ;;  %v10424_v43 = vadd.f32 %v10251_v63, %v4411_v21  ;;  %v4480_v38 = vsel %vm11463_vm0, %v10419_v22, 0.0 }
 0x4e8   : > { %v4473_v40 = vadd.f32 %v4472_v54, %v4471_v2  ;;  %v4482_v17 = vsel %vm11463_vm0, %v10424_v43, 0.0 }
 0x4ea   : > { %v4475_v18 = vadd.f32 %v4474_v57, %v4473_v40 }
 0x4ec   : > { %v4416_v15 = vpop.f32.mrb[80].mxu1  ;;  %v4477_v4 = vadd.f32 %v4476_v36, %v4475_v18 }
 0x4ed   : > { %v4418_v45 = vpop.f32.mrb[81].mxu1  ;;  %v10429_v54 = vadd.f32 %v10251_v63, %v4416_v15 }
 0x4ee   : > { %v4479_v2 = vadd.f32 %v4478_v29, %v4477_v4 }
 0x4ef   : > { %v4484_v57 = vsel %vm11463_vm0, %v10429_v54, 0.0 }
 0x4f0   : > { %v4481_v13 = vadd.f32 %v4480_v38, %v4479_v2 }
 0x4f2   : > { %v4483_v40 = vadd.f32 %v4482_v17, %v4481_v13  ;;  %v4498_v13 = vld [vmem:[#allocation5] sm:$0x1] }
 0x4f4   : > { %v4485_v36 = vadd.f32 %v4484_v57, %v4483_v40 }
 0x4f7   : > { %v4421_v45 = vpop.f32.mrb[82].mxu1 }
 0x4f8   : > { %v10436_v21 = vadd.f32 %v10251_v63, %v4421_v45  ;;  %v4423_v18 = vpop.f32.mrb[83].mxu1 }
 0x4fa   : > { %v4486_v16 = vsel %vm11463_vm0, %v10436_v21, 0.0 }
 0x4fb   : > { %v4487_v15 = vadd.f32 %v4486_v16, %v4485_v36  ;;  %v4574_v16 = vld [vmem:[%s11410_s8] sm:$0x1]  ;;  %v11437_v36 = vlaneseq }
 0x4fd   : > { %v4488_v12 = vrot.slane %v4487_v15, 4 }
 0x4ff   : > { %v4489_v29 = vadd.f32 %v4488_v12, %v4487_v15  ;;  %v10445_v15 = vshrl.u32 %v11437_v36, 7 }
 0x501   : > { %v4490_v4 = vrot.slane %v4489_v29, 2 }
 0x503   : > { %v4491_v14 = vadd.f32 %v4490_v4, %v4489_v29  ;;  %v10448_v29 = vsub.s32 0, %v10445_v15 }
 0x505   : > { %v4492_v10 = vrot.slane %v4491_v14, 1 }
 0x507   : > { %v4493_v38 = vadd.f32 %v4492_v10, %v4491_v14 }
 0x509   : > { %v4495_v2 = vmul.f32 0.00390625, %v4493_v38 }
 0x50b   : > { %7242 = vmatmul.mubr.msk.f32.vlgmr.msra.gmra.mrb[44].mxu0 %vm11463_vm0, %v4495_v2 }
 0x5de   : > { %v4568_v17 = vpop.f32.mrb[44].mxu0 }
 0x5df   : > { %v4569_v11 = vadd.f32 %v4568_v17, %v4498_v13  ;;  %v7243_v63 = vpop.f32.mrb[45].mxu0 }
 0x5e1   : > { %v4572_v45 = vmax.f32 %v4569_v11, 0.0 }
 0x5e3   : > { %7247 = vmatmul.mubr.msk.f32.vlgmr.msra.gmra.mrb[84].mxu1 %vm4575_vm11, %v4572_v45  ;;  %vm5705_vm11 = vcmask 1043456  }
 0x6b6   : > { %v4649_v57 = vpop.f32.mrb[84].mxu1 }
 0x6b7   : > { %v4650_v12 = vadd.f32 %v4649_v57, %v4574_v16  ;;  %v7248_v40 = vpop.f32.mrb[85].mxu1 }
 0x6b9   : > { %v7071_v18 = vmul.f32 -1.442695, %v4650_v12 }
 0x6bb   : > { %7583 = vpow2.f32 %v7071_v18 }
 0x6c5   : > { %v7584_v10 = vpop.eup %7583 }
 0x6c6   : > { %v4656_v14 = vadd.f32 1.0, %v7584_v10 }
 0x6c8   : > { %7585 = vrcp.f32 %v4656_v14 }
 0x6d2   : > { %v7586_v11 = vpop.eup %7585 }
 0x6d3   : > { %v10451_v4 = vrot.slane %v7586_v11, %v10448_v29 }
 0x6d5   : > { %v10455_v38 = vmul.f32 %v10451_v4, %v10259_v41  ;;  %v10459_v2 = vmul.f32 %v10451_v4, %v10255_v39  ;;  %v10463_v13 = vmul.f32 %v10451_v4, %v10263_v30  ;;  %v10467_v17 = vmul.f32 %v10451_v4, %v10349_v59 }
 0x6d6   : > { %v10475_v39 = vmul.f32 %v10451_v4, %v10269_v1  ;;  %v10479_v41 = vmul.f32 %v10451_v4, %v10361_v9  ;;  %v10487_v16 = vmul.f32 %v10451_v4, %v10277_v37  ;;  %v10491_v1 = vmul.f32 %v10451_v4, %v10355_v24 }
 0x6d7   : > { %11497 = vst [vmem:[#allocation33_spill] sm:$0xff] %v10455_v38  ;;  %11498 = vst [vmem:[#allocation34_spill] sm:$0xff] %v10459_v2  ;;  %v4706_v63 = vsel %vm11463_vm0, %v10459_v2, 0.0  ;;  %v4703_v45 = vsel %vm11463_vm0, %v10455_v38, 0.0  ;;  %v4751_v30 = vsel %vm11463_vm0, %v10467_v17, 0.0  ;;  %v4709_v59 = vsel %vm11463_vm0, %v10463_v13, 0.0 }
 0x6d8   : > { %11499 = vst [vmem:[#allocation35_spill] sm:$0xff] %v10463_v13  ;;  %4707 = vadd.xlane.f32.xlu1 %v4706_v63  ;;  %4704 = vadd.xlane.f32.xlu0 %v4703_v45  ;;  %11500 = vst [vmem:[#allocation36_spill] sm:$0xff] %v10475_v39  ;;  %v4757_v9 = vsel %vm11463_vm0, %v10479_v41, 0.0  ;;  %v4712_v57 = vsel %vm11463_vm0, %v10475_v39, 0.0  ;;  %v10499_v12 = vmul.f32 %v10451_v4, %v10367_v31  ;;  %v4715_v24 = vsel %vm11463_vm0, %v10487_v16, 0.0 }
 0x6d9   : > { %11501 = vst [vmem:[#allocation37_spill] sm:$0xff] %v10487_v16  ;;  %v10503_v37 = vmul.f32 %v10451_v4, %v10373_v23  ;;  %v4754_v40 = vsel %vm11463_vm0, %v10491_v1, 0.0  ;;  %v10511_v18 = vmul.f32 %v10451_v4, %v10283_v6  ;;  %v10515_v31 = vmul.f32 %v10451_v4, %v10289_v52 }
 0x6da   : > { %v4760_v10 = vsel %vm11463_vm0, %v10499_v12, 0.0  ;;  %v10523_v14 = vmul.f32 %v10451_v4, %v10379_v3  ;;  %v10527_v6 = vmul.f32 %v10451_v4, %v10385_v46  ;;  %v10535_v63 = vmul.f32 %v10451_v4, %v10295_v33 }
 0x6db   : > { %11502 = vst [vmem:[#allocation38_spill] sm:$0xff] %v10511_v18  ;;  %11503 = vst [vmem:[#allocation39_spill] sm:$0xff] %v10515_v31  ;;  %v4763_v23 = vsel %vm11463_vm0, %v10503_v37, 0.0  ;;  %v4721_v52 = vsel %vm11463_vm0, %v10515_v31, 0.0  ;;  %v4718_v11 = vsel %vm11463_vm0, %v10511_v18, 0.0  ;;  %v10539_v3 = vmul.f32 %v10451_v4, %v10301_v48 }
 0x6dc   : > { %4752 = vadd.xlane.f32.xlu1 %v4751_v30  ;;  %4710 = vadd.xlane.f32.xlu0 %v4709_v59  ;;  %11504 = vst [vmem:[#allocation40_spill] sm:$0xff] %v10535_v63  ;;  %v4769_v46 = vsel %vm11463_vm0, %v10527_v6, 0.0  ;;  %v4766_v45 = vsel %vm11463_vm0, %v10523_v14, 0.0  ;;  %v10547_v30 = vmul.f32 %v10451_v4, %v10391_v53  ;;  %v10551_v33 = vmul.f32 %v10451_v4, %v10397_v44 }
 0x6dd   : > { %11505 = vst [vmem:[#allocation41_spill] sm:$0xff] %v10539_v3  ;;  %v4727_v48 = vsel %vm11463_vm0, %v10539_v3, 0.0  ;;  %v4724_v59 = vsel %vm11463_vm0, %v10535_v63, 0.0  ;;  %v10563_v53 = vmul.f32 %v10451_v4, %v10313_v19 }
 0x6de   : > { %11506 = vst [vmem:[#allocation42_spill] sm:$0xff] %v10551_v33  ;;  %v4775_v44 = vsel %vm11463_vm0, %v10551_v33, 0.0 }
 0x6df   : > { %11508 = vst [vmem:[#allocation44_spill] sm:$0xff] %v10563_v53  ;;  %v4733_v19 = vsel %vm11463_vm0, %v10563_v53, 0.0 }
 0x6e0   : > { %4758 = vadd.xlane.f32.xlu1 %v4757_v9  ;;  %4713 = vadd.xlane.f32.xlu0 %v4712_v57  ;;  %v10559_v9 = vmul.f32 %v10451_v4, %v10307_v49  ;;  %v4772_v57 = vsel %vm11463_vm0, %v10547_v30, 0.0  ;;  %v10575_v49 = vmul.f32 %v10451_v4, %v10409_v7 }
 0x6e2   : > { %11507 = vst [vmem:[#allocation43_spill] sm:$0xff] %v10559_v9  ;;  %11510 = vst [vmem:[#allocation46_spill] sm:$0xff] %v10575_v49  ;;  %v4781_v7 = vsel %vm11463_vm0, %v10575_v49, 0.0 }
 0x6e4   : > { %4716 = vadd.xlane.f32.xlu1 %v4715_v24  ;;  %4755 = vadd.xlane.f32.xlu0 %v4754_v40  ;;  %v10571_v24 = vmul.f32 %v10451_v4, %v10403_v60  ;;  %v4730_v40 = vsel %vm11463_vm0, %v10559_v9, 0.0  ;;  %v10587_v60 = vmul.f32 %v10451_v4, %v10325_v26 }
 0x6e6   : > { %11509 = vst [vmem:[#allocation45_spill] sm:$0xff] %v10571_v24  ;;  %11512 = vst [vmem:[#allocation48_spill] sm:$0xff] %v10587_v60  ;;  %v4739_v26 = vsel %vm11463_vm0, %v10587_v60, 0.0 }
 0x6e8   : > { %4764 = vadd.xlane.f32.xlu1 %v4763_v23  ;;  %4761 = vadd.xlane.f32.xlu0 %v4760_v10  ;;  %v10583_v23 = vmul.f32 %v10451_v4, %v10319_v32  ;;  %v4778_v10 = vsel %vm11463_vm0, %v10571_v24, 0.0  ;;  %v10599_v32 = vmul.f32 %v10451_v4, %v10419_v22 }
 0x6ea   : > { %11511 = vst [vmem:[#allocation47_spill] sm:$0xff] %v10583_v23  ;;  %11514 = vst [vmem:[#allocation50_spill] sm:$0xff] %v10599_v32  ;;  %v4787_v22 = vsel %vm11463_vm0, %v10599_v32, 0.0 }
 0x6ec   : > { %4722 = vadd.xlane.f32.xlu1 %v4721_v52  ;;  %4719 = vadd.xlane.f32.xlu0 %v4718_v11  ;;  %v10595_v52 = vmul.f32 %v10451_v4, %v10414_v61  ;;  %v4736_v11 = vsel %vm11463_vm0, %v10583_v23, 0.0  ;;  %v10611_v61 = vmul.f32 %v10451_v4, %v10337_v20 }
 0x6ee   : > { %11513 = vst [vmem:[#allocation49_spill] sm:$0xff] %v10595_v52  ;;  %11516 = vst [vmem:[#allocation52_spill] sm:$0xff] %v10611_v61  ;;  %v4745_v20 = vsel %vm11463_vm0, %v10611_v61, 0.0 }
 0x6f0   : > { %4770 = vadd.xlane.f32.xlu1 %v4769_v46  ;;  %4767 = vadd.xlane.f32.xlu0 %v4766_v45  ;;  %v10607_v46 = vmul.f32 %v10451_v4, %v10331_v8  ;;  %v4784_v45 = vsel %vm11463_vm0, %v10595_v52, 0.0  ;;  %v10623_v8 = vmul.f32 %v10451_v4, %v10429_v54  ;;  %v10639_v54 = vmul.f32 %v10451_v4, %v10436_v21 }
 0x6f1   : > { %v5051_v21 = vsel %vm11463_vm0, %v10487_v16, -inf }
 0x6f2   : > { %11515 = vst [vmem:[#allocation51_spill] sm:$0xff] %v10607_v46  ;;  %11518 = vst [vmem:[#allocation54_spill] sm:$0xff] %v10623_v8 }
 0x6f3   : > { %11520 = vst [vmem:[#allocation56_spill] sm:$0xff] %v10639_v54 }
 0x6f4   : > { %4728 = vadd.xlane.f32.xlu1 %v4727_v48  ;;  %4725 = vadd.xlane.f32.xlu0 %v4724_v59  ;;  %v10619_v48 = vmul.f32 %v10451_v4, %v10424_v43  ;;  %v4742_v59 = vsel %vm11463_vm0, %v10607_v46, 0.0  ;;  %v4793_v43 = vsel %vm11463_vm0, %v10623_v8, 0.0 }
 0x6f6   : > { %11517 = vst [vmem:[#allocation53_spill] sm:$0xff] %v10619_v48 }
 0x6f8   : > { %4776 = vadd.xlane.f32.xlu1 %v4775_v44  ;;  %4773 = vadd.xlane.f32.xlu0 %v4772_v57  ;;  %v10631_v44 = vmul.f32 %v10451_v4, %v10343_v27  ;;  %v4790_v57 = vsel %vm11463_vm0, %v10619_v48, 0.0  ;;  %v5045_v27 = vsel %vm11463_vm0, %v10463_v13, -inf  ;;  %v5042_v4 = vsel %vm11463_vm0, %v10459_v2, -inf }
 0x6fa   : > { %11519 = vst [vmem:[#allocation55_spill] sm:$0xff] %v10631_v44 }
 0x6fc   : > { %4734 = vadd.xlane.f32.xlu1 %v4733_v19  ;;  %4731 = vadd.xlane.f32.xlu0 %v4730_v40  ;;  %v5039_v19 = vsel %vm11463_vm0, %v10455_v38, -inf  ;;  %v4748_v40 = vsel %vm11463_vm0, %v10631_v44, 0.0 }
 0x700   : > { %4782 = vadd.xlane.f32.xlu1 %v4781_v7  ;;  %4779 = vadd.xlane.f32.xlu0 %v4778_v10  ;;  %v4796_v7 = vsel %vm11463_vm0, %v10639_v54, 0.0  ;;  %v5087_v10 = vsel %vm11463_vm0, %v10467_v17, -inf }
 0x704   : > { %4740 = vadd.xlane.f32.xlu1 %v4739_v26  ;;  %4737 = vadd.xlane.f32.xlu0 %v4736_v11  ;;  %v5048_v26 = vsel %vm11463_vm0, %v10475_v39, -inf  ;;  %v5093_v11 = vsel %vm11463_vm0, %v10479_v41, -inf }
 0x708   : > { %4788 = vadd.xlane.f32.xlu1 %v4787_v22  ;;  %4785 = vadd.xlane.f32.xlu0 %v4784_v45  ;;  %v5054_v22 = vsel %vm11463_vm0, %v10511_v18, -inf  ;;  %v11521_v45 = vmov 0.0  }
 0x709   : > { %4696 = vst.msk [vmem:[#allocation4] sm:$0xff] %vm4695_vm12, %v11521_v45  ;;  %4697 = vst.msk [vmem:[#allocation4 + $0x8] sm:$0xff] %vm4695_vm12, %v11521_v45 }
 0x70a   : > { %4700 = vst.msk [vmem:[#allocation4 + $0x18] sm:$0xff] %vm4695_vm12, %v11521_v45  ;;  %4701 = vst.msk [vmem:[#allocation4 + $0x20] sm:$0xff] %vm4695_vm12, %v11521_v45 }
 0x70b   : > { %4699 = vst.msk [vmem:[#allocation4 + $0x10] sm:$0x3f] %vm4698_vm13, %v11521_v45  ;;  %4702 = vst.msk [vmem:[#allocation4 + $0x28] sm:$0x3f] %vm4698_vm13, %v11521_v45  ;;  %v5333_v45 = vld [vmem:[%s11411_s9] sm:$0xff]  ;;  %vm5799_vm13 = vcmask 1042432  }
 0x70c   : > { %4746 = vadd.xlane.f32.xlu1 %v4745_v20  ;;  %4743 = vadd.xlane.f32.xlu0 %v4742_v59  ;;  %v5057_v20 = vsel %vm11463_vm0, %v10515_v31, -inf  ;;  %v5090_v59 = vsel %vm11463_vm0, %v10491_v1, -inf }
 0x710   : > { %4794 = vadd.xlane.f32.xlu1 %v4793_v43  ;;  %4791 = vadd.xlane.f32.xlu0 %v4790_v57  ;;  %v5099_v43 = vsel %vm11463_vm0, %v10503_v37, -inf  ;;  %v5096_v57 = vsel %vm11463_vm0, %v10499_v12, -inf }
 0x714   : > { %5040 = vmax.xlane.f32.xlu1 %v5039_v19  ;;  %4749 = vadd.xlane.f32.xlu0 %v4748_v40  ;;  %v5063_v19 = vsel %vm11463_vm0, %v10539_v3, -inf  ;;  %v5060_v40 = vsel %vm11463_vm0, %v10535_v63, -inf }
 0x718   : > { %5046 = vmax.xlane.f32.xlu1 %v5045_v27  ;;  %4797 = vadd.xlane.f32.xlu0 %v4796_v7  ;;  %v5105_v27 = vsel %vm11463_vm0, %v10527_v6, -inf  ;;  %v5102_v7 = vsel %vm11463_vm0, %v10523_v14, -inf }
 0x71c   : > { %5052 = vmax.xlane.f32.xlu1 %v5051_v21  ;;  %5043 = vmax.xlane.f32.xlu0 %v5042_v4  ;;  %v7072_v21 = vld [vmem:[%s11411_s9 + $0x18] sm:$0xff]  ;;  %v7073_v4 = vld [vmem:[%s11411_s9 + $0x20] sm:$0xff] }
 0x720   : > { %5088 = vmax.xlane.f32.xlu1 %v5087_v10  ;;  %5049 = vmax.xlane.f32.xlu0 %v5048_v26  ;;  %v7432_v10 = vpack.c.bf16 %v7073_v4, %v7072_v21  ;;  %v5069_v26 = vsel %vm11463_vm0, %v10563_v53, -inf  ;;  %v5081_v21 = vsel %vm11463_vm0, %v10611_v61, -inf  ;;  %v5078_v4 = vsel %vm11463_vm0, %v10607_v46, -inf }
 0x722   : > { %7433 = vmatprep.subr.bf16.mxu0 %v7432_v10 }
 0x723   : > { %7435 = vmatpush3.bf16.msra.mxu0 %v7432_v10  ;;  %v5123_v10 = vsel %vm11463_vm0, %v10599_v32, -inf }
 0x724   : > { %5094 = vmax.xlane.f32.xlu1 %v5093_v11  ;;  %5055 = vmax.xlane.f32.xlu0 %v5054_v22  ;;  %v5066_v11 = vsel %vm11463_vm0, %v10559_v9, -inf  ;;  %v7074_v22 = vld [vmem:[%s11411_s9 + $0x28] sm:$0x3f] }
 0x725   : > { %7253 = vmatprep.subr.msk.mxu0 %vm5353_vm14, %v7074_v22 }
 0x727   : > { %7254 = vmatpush3.msk.msra.mxu0 %vm5353_vm14, %v7074_v22  ;;  %v5084_v22 = vsel %vm11463_vm0, %v10631_v44, -inf }
 0x728   : > { %5058 = vmax.xlane.f32.xlu1 %v5057_v20  ;;  %5091 = vmax.xlane.f32.xlu0 %v5090_v59  ;;  %v5334_v20 = vld [vmem:[%s11411_s9 + $0x8] sm:$0xff]  ;;  %v5111_v59 = vsel %vm11463_vm0, %v10551_v33, -inf }
 0x72c   : > { %5100 = vmax.xlane.f32.xlu1 %v5099_v43  ;;  %5097 = vmax.xlane.f32.xlu0 %v5096_v57  ;;  %v5108_v43 = vsel %vm11463_vm0, %v10547_v30, -inf  ;;  %v10711_v57 = vpack.c.bf16 %v5334_v20, %v5333_v45  ;;  %v5126_v45 = vsel %vm11463_vm0, %v10619_v48, -inf  ;;  %v5132_v20 = vsel %vm11463_vm0, %v10639_v54, -inf }
 0x72e   : > { %7437 = vmatprep.subr.bf16.mxu0 %v10711_v57 }
 0x730   : > { %5064 = vmax.xlane.f32.xlu1 %v5063_v19  ;;  %5061 = vmax.xlane.f32.xlu0 %v5060_v40  ;;  %v5075_v19 = vsel %vm11463_vm0, %v10587_v60, -inf  ;;  %v5072_v40 = vsel %vm11463_vm0, %v10583_v23, -inf }
 0x734   : > { %5106 = vmax.xlane.f32.xlu1 %v5105_v27  ;;  %5103 = vmax.xlane.f32.xlu0 %v5102_v7  ;;  %v5117_v27 = vsel %vm11463_vm0, %v10575_v49, -inf  ;;  %v5114_v7 = vsel %vm11463_vm0, %v10571_v24, -inf }
 0x738   : > { %5070 = vmax.xlane.f32.xlu1 %v5069_v26  ;;  %5067 = vmax.xlane.f32.xlu0 %v5066_v11  ;;  %v5120_v26 = vsel %vm11463_vm0, %v10595_v52, -inf  ;;  %v5129_v11 = vsel %vm11463_vm0, %v10623_v8, -inf  ;;  %vm5893_vm0 = vcmask 1041408  }
 0x73c   : > { %5112 = vmax.xlane.f32.xlu1 %v5111_v59  ;;  %5109 = vmax.xlane.f32.xlu0 %v5108_v43 }
 0x740   : > { %5076 = vmax.xlane.f32.xlu1 %v5075_v19  ;;  %5073 = vmax.xlane.f32.xlu0 %v5072_v40 }
 0x744   : > { %5118 = vmax.xlane.f32.xlu1 %v5117_v27  ;;  %5115 = vmax.xlane.f32.xlu0 %v5114_v7 }
 0x748   : > { %5082 = vmax.xlane.f32.xlu1 %v5081_v21  ;;  %5079 = vmax.xlane.f32.xlu0 %v5078_v4 }
 0x74c   : > { %5124 = vmax.xlane.f32.xlu1 %v5123_v10  ;;  %5121 = vmax.xlane.f32.xlu0 %v5120_v26 }
 0x750   : > { %5130 = vmax.xlane.f32.xlu1 %v5129_v11  ;;  %5085 = vmax.xlane.f32.xlu0 %v5084_v22 }
 0x754   : > { %5127 = vmax.xlane.f32.xlu0 %v5126_v45 }
 0x758   : > { %5133 = vmax.xlane.f32.xlu0 %v5132_v20  ;;  %v11522_v20 = vlaneseq }
 0x75a   : > { %v4865_v23 = vand.u32 127, %v11522_v20 }
 0x75c   : > { %v4871_v60 = vadd.s32 4294967285, %v4865_v23  ;;  %v4866_v63 = vadd.s32 4294967293, %v4865_v23 }
 0x75e   : > { %v10749_v39 = vsub.s32 %v4871_v60, %v10445_v15  ;;  %v10752_v13 = vsub.s32 %v4866_v63, %v10445_v15 }
 0x765   : > { %v4708_v59 = vpop.xlane.xlu1 %4707  ;;  %v4705_v43 = vpop.xlane.xlu0 %4704 }
 0x766   : > { %v4801_v31 = vmul.f32 0.0625, %v4708_v59  ;;  %v4800_v16 = vmul.f32 0.0625, %v4705_v43 }
 0x768   : > { %v4875_v51 = vrot.slane %v4801_v31, %v10749_v39 }
 0x769   : > { %v4753_v19 = vpop.xlane.xlu1 %4752  ;;  %v4711_v40 = vpop.xlane.xlu0 %4710 }
 0x76a   : > { %v4802_v38 = vmul.f32 0.0625, %v4711_v40  ;;  %v4816_v59 = vmul.f32 0.0625, %v4753_v19 }
 0x76c   : > { %v4881_v63 = vrot.slane %v4802_v38, %v10752_v13 }
 0x76d   : > { %v4759_v27 = vpop.xlane.xlu1 %4758  ;;  %v4714_v7 = vpop.xlane.xlu0 %4713 }
 0x76e   : > { %v4803_v3 = vmul.f32 0.0625, %v4714_v7  ;;  %v4818_v2 = vmul.f32 0.0625, %v4759_v27  ;;  %v4870_v7 = vrot.slane %v4800_v16, %v10752_v13 }
 0x770   : > { %v4885_v23 = vrot.slane %v4803_v3, %v10749_v39  ;;  %v4953_v40 = vrot.slane %v4818_v2, %v10752_v13  ;;  %v4877_v19 = vsel %vm4876_vm15, %v4875_v51, %v4870_v7  ;;  %v4944_v2 = vrot.slane %v4816_v59, %v10752_v13 }
 0x771   : > { %v4717_v21 = vpop.xlane.xlu1 %4716  ;;  %v4756_v4 = vpop.xlane.xlu0 %4755 }
 0x772   : > { %v4817_v48 = vmul.f32 0.0625, %v4756_v4  ;;  %v4804_v60 = vmul.f32 0.0625, %v4717_v21  ;;  %v4886_v4 = vsel %vm4876_vm15, %v4885_v23, %v4881_v63 }
 0x773   : > { %v5014_v49 = vsel %vm5013_vm1, %v4886_v4, %v4877_v19 }
 0x774   : > { %v4948_v31 = vrot.slane %v4817_v48, %v10749_v39  ;;  %v4890_v38 = vrot.slane %v4804_v60, %v10752_v13 }
 0x775   : > { %v4765_v10 = vpop.xlane.xlu1 %4764  ;;  %v4762_v26 = vpop.xlane.xlu0 %4761 }
 0x776   : > { %v4819_v20 = vmul.f32 0.0625, %v4762_v26  ;;  %v4820_v16 = vmul.f32 0.0625, %v4765_v10  ;;  %v4949_v51 = vsel %vm4876_vm15, %v4948_v31, %v4944_v2 }
 0x778   : > { %v4957_v43 = vrot.slane %v4819_v20, %v10749_v39 }
 0x779   : > { %v4723_v11 = vpop.xlane.xlu1 %4722  ;;  %v4720_v22 = vpop.xlane.xlu0 %4719 }
 0x77a   : > { %v4805_v55 = vmul.f32 0.0625, %v4720_v22  ;;  %v4958_v20 = vsel %vm4876_vm15, %v4957_v43, %v4953_v40  ;;  %v4806_v56 = vmul.f32 0.0625, %v4723_v11 }
 0x77b   : > { %v5027_v11 = vsel %vm5013_vm1, %v4958_v20, %v4949_v51 }
 0x77c   : > { %v4894_v27 = vrot.slane %v4805_v55, %v10749_v39 }
 0x77d   : > { %v4771_v36 = vpop.xlane.xlu1 %4770  ;;  %v4768_v44 = vpop.xlane.xlu0 %4767 }
 0x77e   : > { %v4821_v22 = vmul.f32 0.0625, %v4768_v44  ;;  %v4895_v23 = vsel %vm4876_vm15, %v4894_v27, %v4890_v38  ;;  %v4822_v48 = vmul.f32 0.0625, %v4771_v36  ;;  %v4962_v44 = vrot.slane %v4820_v16, %v10752_v13 }
 0x77f   : > { %v4899_v36 = vrot.slane %v4806_v56, %v10752_v13 }
 0x780   : > { %v4971_v4 = vrot.slane %v4822_v48, %v10752_v13 }
 0x781   : > { %v4729_v46 = vpop.xlane.xlu1 %4728  ;;  %v4726_v45 = vpop.xlane.xlu0 %4725 }
 0x782   : > { %v4807_v21 = vmul.f32 0.0625, %v4726_v45  ;;  %v4808_v10 = vmul.f32 0.0625, %v4729_v46  ;;  %v5016_v46 = vsel %vm5015_vm2, %v4895_v23, %v5014_v49 }
 0x784   : > { %v4903_v7 = vrot.slane %v4807_v21, %v10749_v39 }
 0x785   : > { %v10739_v8 = vpop.xlane.xlu1 %4776  ;;  %v4774_v54 = vpop.xlane.xlu0 %4773 }
 0x786   : > { %v4823_v59 = vmul.f32 0.0625, %v4774_v54  ;;  %v4904_v19 = vsel %vm4876_vm15, %v4903_v7, %v4899_v36  ;;  %v4824_v56 = vmul.f32 0.0625, %v10739_v8 }
 0x787   : > { %v5018_v48 = vsel %vm5017_vm3, %v4904_v19, %v5016_v46 }
 0x789   : > { %v10742_v61 = vpop.xlane.xlu1 %4734  ;;  %v4732_v9 = vpop.xlane.xlu0 %4731 }
 0x78a   : > { %v4809_v55 = vmul.f32 0.0625, %v4732_v9  ;;  %v4966_v9 = vrot.slane %v4821_v22, %v10749_v39  ;;  %v4810_v40 = vmul.f32 0.0625, %v10742_v61  ;;  %v4975_v22 = vrot.slane %v4823_v59, %v10749_v39 }
 0x78c   : > { %v4912_v27 = vrot.slane %v4809_v55, %v10749_v39  ;;  %v4967_v38 = vsel %vm4876_vm15, %v4966_v9, %v4962_v44  ;;  %v4980_v44 = vrot.slane %v4824_v56, %v10752_v13 }
 0x78d   : > { %v10744_v53 = vpop.xlane.xlu1 %4782  ;;  %v10746_v18 = vpop.xlane.xlu0 %4779 }
 0x78e   : > { %v4825_v31 = vmul.f32 0.0625, %v10746_v18  ;;  %v4917_v18 = vrot.slane %v4810_v40, %v10752_v13  ;;  %v4826_v55 = vmul.f32 0.0625, %v10744_v53  ;;  %v4976_v53 = vsel %vm4876_vm15, %v4975_v22, %v4971_v4 }
 0x790   : > { %v4984_v8 = vrot.slane %v4825_v31, %v10749_v39 }
 0x791   : > { %v4741_v62 = vpop.xlane.xlu1 %4740  ;;  %v4738_v32 = vpop.xlane.xlu0 %4737 }
 0x792   : > { %v4811_v60 = vmul.f32 0.0625, %v4738_v32  ;;  %v4908_v32 = vrot.slane %v4808_v10, %v10752_v13  ;;  %v4812_v16 = vmul.f32 0.0625, %v4741_v62 }
 0x794   : > { %v4921_v49 = vrot.slane %v4811_v60, %v10749_v39  ;;  %v4913_v62 = vsel %vm4876_vm15, %v4912_v27, %v4908_v32  ;;  %v5028_v27 = vsel %vm5015_vm2, %v4967_v38, %v5027_v11  ;;  %v4985_v32 = vsel %vm4876_vm15, %v4984_v8, %v4980_v44 }
 0x795   : > { %v4789_v26 = vpop.xlane.xlu1 %4788  ;;  %v4786_v3 = vpop.xlane.xlu0 %4785 }
 0x796   : > { %v4827_v61 = vmul.f32 0.0625, %v4786_v3  ;;  %v4926_v3 = vrot.slane %v4812_v16, %v10752_v13  ;;  %v4828_v10 = vmul.f32 0.0625, %v4789_v26  ;;  %v4922_v7 = vsel %vm4876_vm15, %v4921_v49, %v4917_v18 }
 0x797   : > { %v4989_v26 = vrot.slane %v4826_v55, %v10752_v13 }
 0x798   : > { %v4993_v60 = vrot.slane %v4827_v61, %v10749_v39  ;;  %v4998_v4 = vrot.slane %v4828_v10, %v10752_v13  ;;  %v5029_v61 = vsel %vm5017_vm3, %v4976_v53, %v5028_v27  ;;  %v7081_v27 = vld [vmem:[%s11411_s9 + $0x30] sm:$0xff] }
 0x799   : > { %v4747_v45 = vpop.xlane.xlu1 %4746  ;;  %v4744_v63 = vpop.xlane.xlu0 %4743  ;;  %v5030_v22 = vsel %vm5019_vm4, %v4985_v32, %v5029_v61  ;;  %v7082_v32 = vld [vmem:[%s11411_s9 + $0x38] sm:$0xff]  ;;  %v7083_v61 = vld [vmem:[%s11411_s9 + $0x40] sm:$0x3f] }
 0x79a   : > { %v4813_v43 = vmul.f32 0.0625, %v4744_v63  ;;  %v4814_v23 = vmul.f32 0.0625, %v4747_v45  ;;  %v5020_v45 = vsel %vm5019_vm4, %v4913_v62, %v5018_v48  ;;  %v4994_v19 = vsel %vm4876_vm15, %v4993_v60, %v4989_v26 }
 0x79b   : > { %v5022_v31 = vsel %vm5021_vm5, %v4922_v7, %v5020_v45  ;;  %v5031_v18 = vsel %vm5021_vm5, %v4994_v19, %v5030_v22 }
 0x79c   : > { %v4930_v2 = vrot.slane %v4813_v43, %v10749_v39  ;;  %v4935_v36 = vrot.slane %v4814_v23, %v10752_v13 }
 0x79d   : > { %v4795_v21 = vpop.xlane.xlu1 %4794  ;;  %v4792_v54 = vpop.xlane.xlu0 %4791 }
 0x79e   : > { %v4829_v20 = vmul.f32 0.0625, %v4792_v54  ;;  %v4931_v59 = vsel %vm4876_vm15, %v4930_v2, %v4926_v3  ;;  %v4830_v46 = vmul.f32 0.0625, %v4795_v21 }
 0x79f   : > { %v5024_v56 = vsel %vm5023_vm6, %v4931_v59, %v5022_v31 }
 0x7a0   : > { %v5002_v43 = vrot.slane %v4829_v20, %v10749_v39  ;;  %v5007_v2 = vrot.slane %v4830_v46, %v10752_v13 }
 0x7a1   : > { %v10793_v63 = vpop.xlane.xlu1 %5040  ;;  %v4750_v51 = vpop.xlane.xlu0 %4749 }
 0x7a2   : > { %v4815_v9 = vmul.f32 0.0625, %v4750_v51  ;;  %v5003_v11 = vsel %vm4876_vm15, %v5002_v43, %v4998_v4 }
 0x7a3   : > { %v5032_v23 = vsel %vm5023_vm6, %v5003_v11, %v5031_v18  ;;  %v7088_v11 = vld [vmem:[%s11411_s9 + $0x50] sm:$0xff] }
 0x7a4   : > { %v4939_v40 = vrot.slane %v4815_v9, %v10749_v39 }
 0x7a5   : > { %v10809_v16 = vpop.xlane.xlu1 %5046  ;;  %v4798_v54 = vpop.xlane.xlu0 %4797 }
 0x7a6   : > { %v4940_v49 = vsel %vm4876_vm15, %v4939_v40, %v4935_v36  ;;  %v4831_v21 = vmul.f32 0.0625, %v4798_v54  ;;  %v5335_v40 = vld [vmem:[%s11411_s9 + $0x10] sm:$0x3f]  ;;  %v7440_v54 = vpack.c.bf16 %v7082_v32, %v7081_v27 }
 0x7a7   : > { %v5026_v38 = vsel %vm5025_vm7, %v4940_v49, %v5024_v56 }
 0x7a8   : > { %5037 = vst.msk [vmem:[#allocation4 + $0x3] sm:$0xff] %vm5036_vm8, %v5026_v38  ;;  %v5011_v20 = vrot.slane %v4831_v21, %v10749_v39 }
 0x7a9   : > { %v10822_v62 = vpop.xlane.xlu1 %5052  ;;  %v10824_v55 = vpop.xlane.xlu0 %5043 }
 0x7aa   : > { %v5012_v48 = vsel %vm4876_vm15, %v5011_v20, %v5007_v2  ;;  %v5188_v58 = vrot.slane %v10822_v62, %v10752_v13  ;;  %v7101_v62 = vld [vmem:[%s11411_s9 + $0x88] sm:$0x3f] }
 0x7ab   : > { %v5033_v8 = vsel %vm5025_vm7, %v5012_v48, %v5032_v23 }
 0x7ac   : > { %5038 = vst.msk [vmem:[#allocation4 + $0xb] sm:$0xff] %vm5036_vm8, %v5033_v8 }
 0x7ad   : > { %v10830_v3 = vpop.xlane.xlu1 %5088  ;;  %v10832_v10 = vpop.xlane.xlu0 %5049 }
 0x7af   : > { %v10838_v7 = vld [vmem:[#allocation4] sm:$0xff] }
 0x7b0   : > { %v5344_v53 = vrot.slane %v10838_v7, 1  ;;  %v5518_v21 = vrot.slane %v10838_v7, 2  ;;  %v5800_v24 = vrot.slane %v10838_v7, 5 }
 0x7b1   : > { %v10834_v51 = vpop.xlane.xlu1 %5094  ;;  %v10836_v44 = vpop.xlane.xlu0 %5055 }
 0x7b3   : > { %v10840_v60 = vld [vmem:[#allocation4 + $0x8] sm:$0xff]  ;;  %v10842_v9 = vld [vmem:[#allocation4 + $0x10] sm:$0x3f] }
 0x7b4   : > { %v5345_v45 = vrot.slane %v10840_v60, 1  ;;  %v5347_v59 = vrot.slane %v10842_v9, 1  ;;  %v5519_v19 = vrot.slane %v10840_v60, 2  ;;  %v5521_v18 = vrot.slane %v10842_v9, 2 }
 0x7b5   : > { %v10847_v43 = vpop.xlane.xlu1 %5058  ;;  %v10849_v26 = vpop.xlane.xlu0 %5091  ;;  %v5613_v23 = vrot.slane %v10840_v60, 3 }
 0x7b6   : > { %v5346_v36 = vsel %vm5343_vm9, %v5344_v53, %v5345_v45  ;;  %v5348_v46 = vsel %vm5343_vm9, %v5345_v45, %v5347_v59  ;;  %v5520_v38 = vsel %vm5353_vm14, %v5518_v21, %v5519_v19  ;;  %v5612_v53 = vrot.slane %v10838_v7, 3  ;;  %v7089_v59 = vld [vmem:[%s11411_s9 + $0x58] sm:$0x3f] }
 0x7b7   : > { %7255 = vmatprep.mubr.msk.f32.mxu0 %vm4695_vm12, %v5346_v36  ;;  %v5522_v45 = vsel %vm5353_vm14, %v5519_v19, %v5521_v18  ;;  %v7093_v36 = vld [vmem:[%s11411_s9 + $0x60] sm:$0xff]  ;;  %v5615_v19 = vrot.slane %v10842_v9, 3  ;;  %v5707_v21 = vrot.slane %v10840_v60, 4  ;;  %v7099_v18 = vld [vmem:[%s11411_s9 + $0x78] sm:$0xff] }
 0x7b8   : > { %7256 = vmatmul.mubr.msk.f32.vlgmr.msra.gmra.mrb[46].mxu0 %vm4695_vm12, %v5348_v46  ;;  %v7094_v46 = vld [vmem:[%s11411_s9 + $0x68] sm:$0xff] }
 0x7b9   : > { %v10864_v31 = vpop.xlane.xlu1 %5100  ;;  %7264 = vmatprep.mubr.msk.f32.mxu0 %vm4695_vm12, %v10838_v7  ;;  %v10868_v4 = vpop.xlane.xlu0 %5097  ;;  %7439 = vmatpush3.bf16.msra.mxu0 %v10711_v57  ;;  %v7087_v57 = vld [vmem:[%s11411_s9 + $0x48] sm:$0xff] }
 0x7ba   : > { %7262 = vmatprep.subr.msk.mxu0 %vm5353_vm14, %v5335_v40  ;;  %v7444_v20 = vpack.c.bf16 %v7088_v11, %v7087_v57  ;;  %v5706_v11 = vrot.slane %v10838_v7, 4 }
 0x7bd   : > { %v10873_v56 = vpop.xlane.xlu1 %5064  ;;  %v10875_v49 = vpop.xlane.xlu0 %5061  ;;  %7263 = vmatpush3.msk.msra.mxu0 %vm5353_vm14, %v5335_v40  ;;  %v5614_v40 = vsel %vm5611_vm10, %v5612_v53, %v5613_v23  ;;  %v7100_v53 = vld [vmem:[%s11411_s9 + $0x80] sm:$0xff] }
 0x7be   : > { %7441 = vmatprep.subr.bf16.mxu0 %v7440_v54  ;;  %v5201_v33 = vrot.slane %v10875_v49, %v10749_v39 }
 0x7c0   : > { %7265 = vmatmul.mubr.msk.f32.vlgmr.msra.gmra.mrb[46].mxu0 %vm4695_vm12, %v10840_v60 }
 0x7c1   : > { %v10891_v22 = vpop.xlane.xlu1 %5106  ;;  %7273 = vmatprep.mubr.msk.f32.mxu0 %vm4695_vm12, %v5520_v38  ;;  %v10894_v2 = vpop.xlane.xlu0 %5103  ;;  %7443 = vmatpush3.bf16.msra.mxu0 %v7440_v54  ;;  %v7448_v54 = vpack.c.bf16 %v7094_v46, %v7093_v36  ;;  %v5616_v38 = vsel %vm5611_vm10, %v5613_v23, %v5615_v19  ;;  %v7452_v46 = vpack.c.bf16 %v7100_v53, %v7099_v18  ;;  %v7106_v19 = vld [vmem:[%s11411_s9 + $0x98] sm:$0xff]  ;;  %v7112_v18 = vld [vmem:[%s11411_s9 + $0xb0] sm:$0xff]  ;;  %v5801_v53 = vrot.slane %v10840_v60, 5 }
 0x7c2   : > { %7271 = vmatprep.subr.msk.mxu0 %vm5353_vm14, %v7083_v61 }
 0x7c5   : > { %v10899_v48 = vpop.xlane.xlu1 %5070  ;;  %v10901_v8 = vpop.xlane.xlu0 %5067  ;;  %7272 = vmatpush3.msk.msra.mxu0 %vm5353_vm14, %v7083_v61 }
 0x7c6   : > { %7445 = vmatprep.subr.bf16.mxu0 %v7444_v20 }
 0x7c8   : > { %7274 = vmatmul.mubr.msk.f32.vlgmr.msra.gmra.mrb[46].mxu0 %vm4695_vm12, %v5522_v45  ;;  %v5708_v45 = vsel %vm5705_vm11, %v5706_v11, %v5707_v21  ;;  %v5174_v11 = vrot.slane %v10824_v55, %v10749_v39  ;;  %v5192_v55 = vrot.slane %v10836_v44, %v10749_v39  ;;  %v5242_v44 = vrot.slane %v10830_v3, %v10752_v13 }
 0x7c9   : > { %v10917_v27 = vpop.xlane.xlu1 %5112  ;;  %7282 = vmatprep.mubr.msk.f32.mxu0 %vm4695_vm12, %v5614_v40  ;;  %v10920_v32 = vpop.xlane.xlu0 %5109  ;;  %7447 = vmatpush3.bf16.msra.mxu0 %v7444_v20  ;;  %v7095_v20 = vld [vmem:[%s11411_s9 + $0x70] sm:$0x3f]  ;;  %v5802_v3 = vsel %vm5799_vm13, %v5800_v24, %v5801_v53  ;;  %v5215_v24 = vrot.slane %v10899_v48, %v10752_v13  ;;  %v5260_v48 = vrot.slane %v10864_v31, %v10752_v13 }
 0x7ca   : > { %7280 = vmatprep.subr.msk.mxu0 %vm5353_vm14, %v7089_v59  ;;  %v7105_v40 = vld [vmem:[%s11411_s9 + $0x90] sm:$0xff]  ;;  %v5273_v31 = vrot.slane %v10920_v32, %v10749_v39  ;;  %v5269_v32 = vrot.slane %v10891_v22, %v10752_v13 }
 0x7cb   : > { %v10975_v47 = vpack.c.bf16 %v7106_v19, %v7105_v40 }
 0x7cd   : > { %v10925_v61 = vpop.xlane.xlu1 %5076  ;;  %v10927_v57 = vpop.xlane.xlu0 %5073  ;;  %7281 = vmatpush3.msk.msra.mxu0 %vm5353_vm14, %v7089_v59  ;;  %v5183_v59 = vrot.slane %v10832_v10, %v10749_v39  ;;  %v5179_v10 = vrot.slane %v10809_v16, %v10752_v13  ;;  %v5170_v16 = vrot.slane %v10793_v63, %v10752_v13 }
 0x7ce   : > { %7449 = vmatprep.subr.bf16.mxu0 %v7448_v54 }
 0x7d0   : > { %7283 = vmatmul.mubr.msk.f32.vlgmr.msra.gmra.mrb[46].mxu0 %vm4695_vm12, %v5616_v38  ;;  %v5709_v38 = vrot.slane %v10842_v9, 4 }
 0x7d1   : > { %v10945_v23 = vpop.xlane.xlu1 %5118  ;;  %7291 = vmatprep.mubr.msk.f32.mxu0 %vm4695_vm12, %v5708_v45  ;;  %v10948_v36 = vpop.xlane.xlu0 %5115  ;;  %7451 = vmatpush3.bf16.msra.mxu0 %v7448_v54  ;;  %v7111_v54 = vld [vmem:[%s11411_s9 + $0xa8] sm:$0xff]  ;;  %v5184_v45 = vsel %vm4876_vm15, %v5183_v59, %v5179_v10  ;;  %v5175_v59 = vsel %vm4876_vm15, %v5174_v11, %v5170_v16  ;;  %v5197_v10 = vrot.slane %v10847_v43, %v10752_v13  ;;  %v5803_v43 = vrot.slane %v10842_v9, 5 }
 0x7d2   : > { %7289 = vmatprep.subr.msk.mxu0 %vm5353_vm14, %v7095_v20  ;;  %v10982_v63 = vpack.c.bf16 %v7112_v18, %v7111_v54  ;;  %v5710_v19 = vsel %vm5705_vm11, %v5707_v21, %v5709_v38  ;;  %v5311_v49 = vsel %vm5013_vm1, %v5184_v45, %v5175_v59  ;;  %v5219_v11 = vrot.slane %v10927_v57, %v10749_v39 }
 0x7d3   : > { %v5206_v21 = vrot.slane %v10873_v56, %v10752_v13  ;;  %v5251_v57 = vrot.slane %v10834_v51, %v10752_v13  ;;  %v5202_v18 = vsel %vm4876_vm15, %v5201_v33, %v5197_v10  ;;  %v5895_v16 = vrot.slane %v10840_v60, 6  ;;  %v7107_v10 = vld [vmem:[%s11411_s9 + $0xa0] sm:$0x3f] }
 0x7d4   : > { %v5246_v33 = vrot.slane %v10849_v26, %v10749_v39  ;;  %v5804_v60 = vsel %vm5799_vm13, %v5801_v53, %v5803_v43  ;;  %v5287_v43 = vrot.slane %v10945_v23, %v10752_v13 }
 0x7d5   : > { %v5080_v52 = vpop.xlane.xlu0 %5079  ;;  %7290 = vmatpush3.msk.msra.mxu0 %vm5353_vm14, %v7095_v20  ;;  %v5210_v20 = vrot.slane %v10901_v8, %v10749_v39  ;;  %v5083_v40 = vpop.xlane.xlu1 %5082  ;;  %v5193_v8 = vsel %vm4876_vm15, %v5192_v55, %v5188_v58  ;;  %v5894_v58 = vrot.slane %v10838_v7, 6  ;;  %v5220_v7 = vsel %vm4876_vm15, %v5219_v11, %v5215_v24 }
 0x7d6   : > { %7453 = vmatprep.subr.bf16.mxu0 %v7452_v46  ;;  %v5228_v38 = vrot.slane %v5080_v52, %v10749_v39  ;;  %v5255_v52 = vrot.slane %v10868_v4, %v10749_v39  ;;  %v5312_v51 = vsel %vm5015_vm2, %v5193_v8, %v5311_v49  ;;  %v5264_v4 = vrot.slane %v10894_v2, %v10749_v39 }
 0x7d7   : > { %v5211_v56 = vsel %vm4876_vm15, %v5210_v20, %v5206_v21  ;;  %v5313_v45 = vsel %vm5017_vm3, %v5202_v18, %v5312_v51  ;;  %v5233_v20 = vrot.slane %v5083_v40, %v10752_v13  ;;  %v5896_v53 = vsel %vm5893_vm0, %v5894_v58, %v5895_v16 }
 0x7d8   : > { %7292 = vmatmul.mubr.msk.f32.vlgmr.msra.gmra.mrb[46].mxu0 %vm4695_vm12, %v5710_v19  ;;  %v5314_v26 = vsel %vm5019_vm4, %v5211_v56, %v5313_v45  ;;  %v5256_v2 = vsel %vm4876_vm15, %v5255_v52, %v5251_v57  ;;  %v5265_v8 = vsel %vm4876_vm15, %v5264_v4, %v5260_v48  ;;  %v5247_v22 = vsel %vm4876_vm15, %v5246_v33, %v5242_v44  ;;  %v7113_v45 = vld [vmem:[%s11411_s9 + $0xb8] sm:$0x3f]  ;;  %v7117_v4 = vld [vmem:[%s11411_s9 + $0xc0] sm:$0xff] }
 0x7d9   : > { %7300 = vmatprep.mubr.msk.f32.mxu0 %vm4695_vm12, %v5802_v3  ;;  %v5122_v54 = vpop.xlane.xlu0 %5121  ;;  %7455 = vmatpush3.bf16.msra.mxu0 %v7452_v46  ;;  %v5224_v46 = vrot.slane %v10925_v61, %v10752_v13  ;;  %v5125_v61 = vpop.xlane.xlu1 %5124  ;;  %v5315_v49 = vsel %vm5021_vm5, %v5220_v7, %v5314_v26  ;;  %v5897_v44 = vrot.slane %v10842_v9, 6 }
 0x7da   : > { %7298 = vmatprep.subr.msk.mxu0 %vm5353_vm14, %v7101_v62  ;;  %v5291_v11 = vrot.slane %v5122_v54, %v10749_v39  ;;  %v5274_v54 = vsel %vm4876_vm15, %v5273_v31, %v5269_v32  ;;  %v5296_v24 = vrot.slane %v5125_v61, %v10752_v13  ;;  %v7124_v31 = vld [vmem:[%s11411_s9 + $0xe0] sm:$0xff] }
 0x7db   : > { %v5229_v55 = vsel %vm4876_vm15, %v5228_v38, %v5224_v46  ;;  %v5898_v7 = vsel %vm5893_vm0, %v5895_v16, %v5897_v44 }
 0x7dc   : > { %v5316_v40 = vsel %vm5023_vm6, %v5229_v55, %v5315_v49  ;;  %v5292_v52 = vsel %vm4876_vm15, %v5291_v11, %v5287_v43  ;;  %v7125_v11 = vld [vmem:[%s11411_s9 + $0xe8] sm:$0x3f] }
 0x7dd   : > { %v5086_v59 = vpop.xlane.xlu0 %5085  ;;  %7299 = vmatpush3.msk.msra.mxu0 %vm5353_vm14, %v7101_v62  ;;  %v5282_v62 = vrot.slane %v10948_v36, %v10749_v39  ;;  %v5278_v36 = vrot.slane %v10917_v27, %v10752_v13  ;;  %v5318_v27 = vsel %vm5013_vm1, %v5256_v2, %v5247_v22 }
 0x7de   : > { %v5237_v19 = vrot.slane %v5086_v59, %v10749_v39  ;;  %7457 = vmatprep.subr.bf16.mxu0 %v10975_v47  ;;  %v5319_v58 = vsel %vm5015_vm2, %v5265_v8, %v5318_v27  ;;  %v7130_v8 = vld [vmem:[%s11411_s9 + $0xf8] sm:$0xff]  ;;  %v7135_v27 = vld [vmem:[%s11411_s9 + $0x108] sm:$0xff] }
 0x7df   : > { %v5283_v18 = vsel %vm4876_vm15, %v5282_v62, %v5278_v36  ;;  %v5320_v23 = vsel %vm5017_vm3, %v5274_v54, %v5319_v58 }
 0x7e0   : > { %v5238_v3 = vsel %vm4876_vm15, %v5237_v19, %v5233_v20  ;;  %7301 = vmatmul.mubr.msk.f32.vlgmr.msra.gmra.mrb[46].mxu0 %vm4695_vm12, %v5804_v60  ;;  %v5321_v51 = vsel %vm5019_vm4, %v5283_v18, %v5320_v23  ;;  %v7119_v60 = vld [vmem:[%s11411_s9 + $0xd0] sm:$0x3f] }
 0x7e1   : > { %v5317_v21 = vsel %vm5025_vm7, %v5238_v3, %v5316_v40  ;;  %7309 = vmatprep.mubr.msk.f32.mxu0 %vm4695_vm12, %v5896_v53  ;;  %v5128_v38 = vpop.xlane.xlu0 %5127  ;;  %7459 = vmatpush3.bf16.msra.mxu0 %v10975_v47  ;;  %v5131_v47 = vpop.xlane.xlu1 %5130  ;;  %v5322_v9 = vsel %vm5021_vm5, %v5292_v52, %v5321_v51  ;;  %v7129_v3 = vld [vmem:[%s11411_s9 + $0xf0] sm:$0xff]  ;;  %v7142_v51 = vld [vmem:[%s11411_s9 + $0x128] sm:$0xff] }
 0x7e2   : > { %5328 = vst.msk [vmem:[#allocation4 + $0x1b] sm:$0xff] %vm5036_vm8, %v5317_v21  ;;  %v5300_v57 = vrot.slane %v5128_v38, %v10749_v39  ;;  %7307 = vmatprep.subr.msk.mxu0 %vm5353_vm14, %v7107_v10  ;;  %v5305_v33 = vrot.slane %v5131_v47, %v10752_v13  ;;  %v7118_v13 = vld [vmem:[%s11411_s9 + $0xc8] sm:$0xff]  ;;  %v7472_v21 = vpack.c.bf16 %v7130_v8, %v7129_v3  ;;  %v7136_v18 = vld [vmem:[%s11411_s9 + $0x110] sm:$0xff] }
 0x7e3   : > { %v7464_v59 = vpack.c.bf16 %v7118_v13, %v7117_v4  ;;  %v7476_v47 = vpack.c.bf16 %v7136_v18, %v7135_v27  ;;  %v7143_v13 = vld [vmem:[%s11411_s9 + $0x130] sm:$0x3f]  ;;  %v6693_v27 = vsub.s32 4, %v10445_v15 }
 0x7e4   : > { %v5301_v56 = vsel %vm4876_vm15, %v5300_v57, %v5296_v24  ;;  %v7131_v57 = vld [vmem:[%s11411_s9 + $0x100] sm:$0x3f] }
 0x7e5   : > { %v5134_v46 = vpop.xlane.xlu0 %5133  ;;  %7308 = vmatpush3.msk.msra.mxu0 %vm5353_vm14, %v7107_v10 }
 0x7e6   : > { %v5309_v48 = vrot.slane %v5134_v46, %v10749_v39  ;;  %7461 = vmatprep.subr.bf16.mxu0 %v10982_v63  ;;  %v5323_v39 = vsel %vm5023_vm6, %v5301_v56, %v5322_v9  ;;  %v7137_v56 = vld [vmem:[%s11411_s9 + $0x118] sm:$0x3f]  ;;  %v7141_v46 = vld [vmem:[%s11411_s9 + $0x120] sm:$0xff] }
 0x7e8   : > { %v5310_v55 = vsel %vm4876_vm15, %v5309_v48, %v5305_v33  ;;  %7310 = vmatmul.mubr.msk.f32.vlgmr.msra.gmra.mrb[46].mxu0 %vm4695_vm12, %v5898_v7  ;;  %v7480_v48 = vpack.c.bf16 %v7142_v51, %v7141_v46 }
 0x7e9   : > { %v5324_v16 = vsel %vm5025_vm7, %v5310_v55, %v5323_v39  ;;  %7463 = vmatpush3.bf16.msra.mxu0 %v10982_v63  ;;  %v11093_v61 = vld [vmem:[#allocation4 + $0x18] sm:$0xff]  ;;  %v7123_v63 = vld [vmem:[%s11411_s9 + $0xd8] sm:$0xff]  ;;  %v7148_v55 = vld [vmem:[%s11411_s9 + $0x140] sm:$0xff] }
 0x7ea   : > { %5329 = vst.msk [vmem:[#allocation4 + $0x23] sm:$0xff] %vm5036_vm8, %v5324_v16  ;;  %7318 = vmatprep.mubr.msk.f32.mxu0 %vm4695_vm12, %v11093_v61  ;;  %7316 = vmatprep.subr.msk.mxu0 %vm5353_vm14, %v7113_v45  ;;  %v6081_v20 = vrot.slane %v11093_v61, 1  ;;  %v7468_v62 = vpack.c.bf16 %v7124_v31, %v7123_v63  ;;  %v6174_v32 = vrot.slane %v11093_v61, 2  ;;  %v6267_v54 = vrot.slane %v11093_v61, 3  ;;  %v7147_v39 = vld [vmem:[%s11411_s9 + $0x138] sm:$0xff] }
 0x7eb   : > { %v6360_v52 = vrot.slane %v11093_v61, 4  ;;  %v6546_v31 = vrot.slane %v11093_v61, 6 }
 0x7ed   : > { %7317 = vmatpush3.msk.msra.mxu0 %vm5353_vm14, %v7113_v45  ;;  %v6453_v45 = vrot.slane %v11093_v61, 5 }
 0x7ee   : > { %7465 = vmatprep.subr.bf16.mxu0 %v7464_v59 }
 0x7f1   : > { %v11103_v26 = vld [vmem:[#allocation4 + $0x20] sm:$0xff]  ;;  %v11115_v2 = vld [vmem:[#allocation4 + $0x28] sm:$0x3f] }
 0x7f2   : > { %7319 = vmatmul.mubr.msk.f32.vlgmr.msra.gmra.mrb[46].mxu0 %vm4695_vm12, %v11103_v26  ;;  %v6082_v19 = vrot.slane %v11103_v26, 1  ;;  %v6084_v53 = vrot.slane %v11115_v2, 1  ;;  %v6175_v10 = vrot.slane %v11103_v26, 2  ;;  %v6177_v38 = vrot.slane %v11115_v2, 2 }
 0x7f3   : > { %7467 = vmatpush3.bf16.msra.mxu0 %v7464_v59  ;;  %v6268_v22 = vrot.slane %v11103_v26, 3  ;;  %v6270_v44 = vrot.slane %v11115_v2, 3  ;;  %v6361_v58 = vrot.slane %v11103_v26, 4  ;;  %v6363_v9 = vrot.slane %v11115_v2, 4 }
 0x7f4   : > { %7325 = vmatprep.subr.msk.mxu0 %vm5353_vm14, %v7119_v60  ;;  %v6083_v49 = vsel %vm5343_vm9, %v6081_v20, %v6082_v19  ;;  %v6085_v40 = vsel %vm5343_vm9, %v6082_v19, %v6084_v53  ;;  %v6176_v36 = vsel %vm5353_vm14, %v6174_v32, %v6175_v10  ;;  %v6178_v43 = vsel %vm5353_vm14, %v6175_v10, %v6177_v38  ;;  %v7149_v19 = vld [vmem:[%s11411_s9 + $0x148] sm:$0x3f] }
 0x7f5   : > { %7327 = vmatprep.mubr.msk.f32.mxu0 %vm4695_vm12, %v6083_v49  ;;  %v6269_v24 = vsel %vm5611_vm10, %v6267_v54, %v6268_v22  ;;  %v6271_v23 = vsel %vm5611_vm10, %v6268_v22, %v6270_v44  ;;  %v6362_v33 = vsel %vm5705_vm11, %v6360_v52, %v6361_v58  ;;  %v6454_v7 = vrot.slane %v11103_v26, 5 }
 0x7f6   : > { %v6364_v4 = vsel %vm5705_vm11, %v6361_v58, %v6363_v9  ;;  %v7484_v59 = vpack.c.bf16 %v7148_v55, %v7147_v39  ;;  %v6547_v63 = vrot.slane %v11103_v26, 6  ;;  %v6549_v26 = vrot.slane %v11115_v2, 6 }
 0x7f7   : > { %7326 = vmatpush3.msk.msra.mxu0 %vm5353_vm14, %v7119_v60  ;;  %v6455_v16 = vsel %vm5799_vm13, %v6453_v45, %v6454_v7  ;;  %v6456_v60 = vrot.slane %v11115_v2, 5  ;;  %v6660_v2 = vsub.s32 1, %v10445_v15  ;;  %v6682_v54 = vsub.s32 3, %v10445_v15 }
 0x7f8   : > { %7469 = vmatprep.subr.bf16.mxu0 %v7468_v62  ;;  %v6548_v49 = vsel %vm5893_vm0, %v6546_v31, %v6547_v63  ;;  %v6550_v61 = vsel %vm5893_vm0, %v6547_v63, %v6549_v26  ;;  %v6715_v44 = vsub.s32 6, %v10445_v15  ;;  %vm11523_vm0 = vcmask 130048  }
 0x7f9   : > { %v6457_v20 = vsel %vm5799_vm13, %v6454_v7, %v6456_v60  ;;  %vm11526_vm15 = vmmov %vm11523_vm0 }
 0x7fa   : > { %7328 = vmatmul.mubr.msk.f32.vlgmr.msra.gmra.mrb[46].mxu0 %vm4695_vm12, %v6085_v40  ;;  %vm11527_vm1 = vmmov %vm11523_vm0 }
 0x7fb   : > { %7471 = vmatpush3.bf16.msra.mxu0 %v7468_v62  ;;  %7336 = vmatprep.mubr.msk.f32.mxu0 %vm4695_vm12, %v6176_v36  ;;  %vm11528_vm2 = vmmov %vm11523_vm0 }
 0x7fc   : > { %7334 = vmatprep.subr.msk.mxu0 %vm5353_vm14, %v7125_v11  ;;  %vm11529_vm3 = vmmov %vm11523_vm0 }
 0x7fd   : > { %vm11530_vm4 = vmmov %vm11523_vm0 }
 0x7fe   : > { %vm11535_vm5 = vmmov %vm11523_vm0 }
 0x7ff   : > { %7335 = vmatpush3.msk.msra.mxu0 %vm5353_vm14, %v7125_v11  ;;  %vm11536_vm6 = vmmov %vm11523_vm0 }
 0x800   : > { %7473 = vmatprep.subr.bf16.mxu0 %v7472_v21  ;;  %vm11541_vm7 = vmmov %vm11523_vm0 }
 0x801   : > { %vm11542_vm8 = vmmov %vm11523_vm0 }
 0x802   : > { %7337 = vmatmul.mubr.msk.f32.vlgmr.msra.gmra.mrb[46].mxu0 %vm4695_vm12, %v6178_v43  ;;  %vm11547_vm9 = vmmov %vm11523_vm0 }
 0x803   : > { %7475 = vmatpush3.bf16.msra.mxu0 %v7472_v21  ;;  %7345 = vmatprep.mubr.msk.f32.mxu0 %vm4695_vm12, %v6269_v24  ;;  %v6671_v21 = vsub.s32 2, %v10445_v15  ;;  %v6704_v24 = vsub.s32 5, %v10445_v15  ;;  %vm11548_vm10 = vmmov %vm11523_vm0 }
 0x804   : > { %7343 = vmatprep.subr.msk.mxu0 %vm5353_vm14, %v7131_v57  ;;  %vm11553_vm11 = vmmov %vm11523_vm0 }
 0x805   : > { %vm11554_vm13 = vmmov %vm11523_vm0 }
 0x807   : > { %7344 = vmatpush3.msk.msra.mxu0 %vm5353_vm14, %v7131_v57 }
 0x808   : > { %7477 = vmatprep.subr.bf16.mxu0 %v7476_v47 }
 0x80a   : > { %7346 = vmatmul.mubr.msk.f32.vlgmr.msra.gmra.mrb[46].mxu0 %vm4695_vm12, %v6271_v23 }
 0x80b   : > { %7479 = vmatpush3.bf16.msra.mxu0 %v7476_v47  ;;  %7354 = vmatprep.mubr.msk.f32.mxu0 %vm4695_vm12, %v6362_v33 }
 0x80c   : > { %7352 = vmatprep.subr.msk.mxu0 %vm5353_vm14, %v7137_v56 }
 0x80f   : > { %7353 = vmatpush3.msk.msra.mxu0 %vm5353_vm14, %v7137_v56 }
 0x810   : > { %7481 = vmatprep.subr.bf16.mxu0 %v7480_v48 }
 0x812   : > { %7355 = vmatmul.mubr.msk.f32.vlgmr.msra.gmra.mrb[46].mxu0 %vm4695_vm12, %v6364_v4 }
 0x813   : > { %7483 = vmatpush3.bf16.msra.mxu0 %v7480_v48  ;;  %7363 = vmatprep.mubr.msk.f32.mxu0 %vm4695_vm12, %v6455_v16 }
 0x814   : > { %7361 = vmatprep.subr.msk.mxu0 %vm5353_vm14, %v7143_v13 }
 0x817   : > { %7362 = vmatpush3.msk.msra.mxu0 %vm5353_vm14, %v7143_v13 }
 0x818   : > { %7485 = vmatprep.subr.bf16.mxu0 %v7484_v59 }
 0x81a   : > { %7364 = vmatmul.mubr.msk.f32.vlgmr.msra.gmra.mrb[46].mxu0 %vm4695_vm12, %v6457_v20 }
 0x81b   : > { %7487 = vmatpush3.bf16.msra.mxu0 %v7484_v59  ;;  %7372 = vmatprep.mubr.msk.f32.mxu0 %vm4695_vm12, %v6548_v49 }
 0x81c   : > { %7370 = vmatprep.subr.msk.mxu0 %vm5353_vm14, %v7149_v19 }
 0x81f   : > { %7371 = vmatpush3.msk.msra.mxu0 %vm5353_vm14, %v7149_v19  ;;  %vm11525_vm14 = vmmov %vm11523_vm0 }
 0x822   : > { %7373 = vmatmul.mubr.msk.f32.vlgmr.msra.gmra.mrb[46].mxu0 %vm4695_vm12, %v6550_v61  ;;  %vm11524_vm12 = vmmov %vm11523_vm0 }
 0x8f5   : > { %v7374_v62 = vpop.f32.mrb[46].mxu0 }
 0x8f6   : > { %v7154_v53 = vmul.f32 -1.442695, %v7374_v62  ;;  %v6624_v10 = vpop.f32.mrb[47].mxu0 }
 0x8f7   : > { %v7153_v11 = vmul.f32 -1.442695, %v6624_v10 }
 0x8f8   : > { %7587 = vpow2.f32 %v7154_v53  ;;  %v11532_v53 = vld [vmem:[#allocation42_spill] sm:$0xff] }
 0x902   : > { %v7588_v32 = vpop.eup %7587 }
 0x903   : > { %v6642_v40 = vadd.f32 1.0, %v7588_v32  ;;  %v11533_v32 = vld [vmem:[#allocation26_spill] sm:$0xff] }
 0x905   : > { %7589 = vrcp.f32 %v6642_v40  ;;  %v11534_v40 = vld [vmem:[#allocation25_spill] sm:$0xff] }
 0x906   : > { %7591 = vpow2.f32 %v7153_v11 }
 0x90f   : > { %v7590_v3 = vpop.eup %7589 }
 0x910   : > { %v6738_v8 = vrot.slane %v7590_v3, %v10448_v29  ;;  %v6749_v36 = vrot.slane %v7590_v3, %v6660_v2  ;;  %v7592_v38 = vpop.eup %7591  ;;  %v6760_v22 = vrot.slane %v7590_v3, %v6671_v21  ;;  %v6771_v57 = vrot.slane %v7590_v3, %v6682_v54 }
 0x911   : > { %v6641_v43 = vadd.f32 1.0, %v7592_v38  ;;  %v6782_v18 = vrot.slane %v7590_v3, %v6693_v27  ;;  %v6793_v47 = vrot.slane %v7590_v3, %v6704_v24  ;;  %v6804_v58 = vrot.slane %v7590_v3, %v6715_v44  ;;  %v11540_v38 = vld [vmem:[#allocation27_spill] sm:$0xff] }
 0x912   : > { %6744 = vbcast.lane.b32.xlu1 %v6738_v8, 264  ;;  %6740 = vbcast.lane.b32.xlu0 %v6738_v8, 256  ;;  %v11538_v8 = vld [vmem:[#allocation46_spill] sm:$0xff] }
 0x913   : > { %7593 = vrcp.f32 %v6641_v43 }
 0x916   : > { %6755 = vbcast.lane.b32.xlu1 %v6749_v36, 264  ;;  %6751 = vbcast.lane.b32.xlu0 %v6749_v36, 256  ;;  %v11539_v36 = vld [vmem:[#allocation28_spill] sm:$0xff] }
 0x91a   : > { %6766 = vbcast.lane.b32.xlu1 %v6760_v22, 264  ;;  %6762 = vbcast.lane.b32.xlu0 %v6760_v22, 256 }
 0x91d   : > { %v7594_v52 = vpop.eup %7593 }
 0x91e   : > { %6777 = vbcast.lane.b32.xlu1 %v6771_v57, 264  ;;  %6773 = vbcast.lane.b32.xlu0 %v6771_v57, 256  ;;  %v6650_v23 = vrot.slane %v7594_v52, %v10448_v29  ;;  %v6672_v56 = vrot.slane %v7594_v52, %v6671_v21  ;;  %v6661_v46 = vrot.slane %v7594_v52, %v6660_v2  ;;  %v6726_v29 = vsub.s32 7, %v10445_v15  ;;  %v11543_v57 = vld [vmem:[#allocation53_spill] sm:$0xff] }
 0x91f   : > { %v6683_v51 = vrot.slane %v7594_v52, %v6682_v54  ;;  %v6694_v33 = vrot.slane %v7594_v52, %v6693_v27  ;;  %v6705_v48 = vrot.slane %v7594_v52, %v6704_v24  ;;  %v6716_v9 = vrot.slane %v7594_v52, %v6715_v44 }
 0x920   : > { %v6727_v7 = vrot.slane %v7594_v52, %v6726_v29  ;;  %v6815_v45 = vrot.slane %v7590_v3, %v6726_v29 }
 0x922   : > { %6788 = vbcast.lane.b32.xlu1 %v6782_v18, 264  ;;  %6784 = vbcast.lane.b32.xlu0 %v6782_v18, 256  ;;  %v11544_v18 = vld [vmem:[#allocation50_spill] sm:$0xff] }
 0x926   : > { %6799 = vbcast.lane.b32.xlu1 %v6793_v47, 264  ;;  %6795 = vbcast.lane.b32.xlu0 %v6793_v47, 256  ;;  %v11545_v47 = vld [vmem:[#allocation30_spill] sm:$0xff] }
 0x92a   : > { %6810 = vbcast.lane.b32.xlu1 %v6804_v58, 264  ;;  %6806 = vbcast.lane.b32.xlu0 %v6804_v58, 256  ;;  %v11546_v58 = vld [vmem:[#allocation29_spill] sm:$0xff] }
 0x92e   : > { %6656 = vbcast.lane.b32.xlu0 %v6650_v23, 264  ;;  %6652 = vbcast.lane.b32.xlu1 %v6650_v23, 256 }
 0x932   : > { %6674 = vbcast.lane.b32.xlu0 %v6672_v56, 256  ;;  %6663 = vbcast.lane.b32.xlu1 %v6661_v46, 256 }
 0x936   : > { %6685 = vbcast.lane.b32.xlu0 %v6683_v51, 256  ;;  %6667 = vbcast.lane.b32.xlu1 %v6661_v46, 264  ;;  %v11549_v46 = vld [vmem:[#allocation34_spill] sm:$0xff] }
 0x93a   : > { %6696 = vbcast.lane.b32.xlu0 %v6694_v33, 256  ;;  %6678 = vbcast.lane.b32.xlu1 %v6672_v56, 264 }
 0x93e   : > { %6707 = vbcast.lane.b32.xlu0 %v6705_v48, 256  ;;  %6689 = vbcast.lane.b32.xlu1 %v6683_v51, 264 }
 0x942   : > { %6718 = vbcast.lane.b32.xlu0 %v6716_v9, 256  ;;  %6700 = vbcast.lane.b32.xlu1 %v6694_v33, 264  ;;  %v11550_v33 = vld [vmem:[#allocation33_spill] sm:$0xff] }
 0x946   : > { %6729 = vbcast.lane.b32.xlu0 %v6727_v7, 256  ;;  %6711 = vbcast.lane.b32.xlu1 %v6705_v48, 264 }
 0x94a   : > { %6817 = vbcast.lane.b32.xlu0 %v6815_v45, 256  ;;  %6722 = vbcast.lane.b32.xlu1 %v6716_v9, 264  ;;  %v11551_v9 = vld [vmem:[#allocation10_spill] sm:$0xff] }
 0x94e   : > { %6733 = vbcast.lane.b32.xlu1 %v6727_v7, 264  ;;  %v11552_v7 = vld [vmem:[#allocation9_spill] sm:$0xff] }
 0x952   : > { %6821 = vbcast.lane.b32.xlu1 %v6815_v45, 264 }
 0x984   : > { %v6745_v4 = vpop.permute.xlu1 %6744  ;;  %v6741_v13 = vpop.permute.xlu0 %6740 }
 0x985   : > { %v6840_v39 = vmul.f32 %v6745_v4, %v10491_v1  ;;  %v6839_v55 = vmul.f32 %v6741_v13, %v10467_v17 }
 0x987   : > { %v6872_v15 = vadd.f32 %v6840_v39, %v8172_v42  ;;  %v6871_v16 = vadd.f32 %v6839_v55, %v8131_v0  ;;  %v11555_v39 = vld [vmem:[#allocation37_spill] sm:$0xff] }
 0x988   : > { %v6756_v59 = vpop.permute.xlu1 %6755  ;;  %v6752_v60 = vpop.permute.xlu0 %6751 }
 0x989   : > { %6904 = vst.msk [vmem:[%s11224_s28 + $0x88] sm:$0xff] %vm11523_vm0, %v6872_v15  ;;  %v6842_v17 = vmul.f32 %v6756_v59, %v10499_v12  ;;  %v6841_v42 = vmul.f32 %v6752_v60, %v10479_v41  ;;  %v11556_v15 = vld [vmem:[#allocation35_spill] sm:$0xff]  ;;  %v11557_v59 = vld [vmem:[#allocation13_spill] sm:$0xff] }
 0x98a   : > { %6903 = vst.msk [vmem:[%s11224_s28 + $0x80] sm:$0xff] %vm11524_vm12, %v6871_v16  ;;  %vm11559_vm12 = vmmov %vm11523_vm0 }
 0x98b   : > { %v6874_v0 = vadd.f32 %v6842_v17, %v8226_v25  ;;  %v6873_v1 = vadd.f32 %v6841_v42, %v8182_v5  ;;  %v11558_v17 = vld [vmem:[#allocation11_spill] sm:$0xff] }
 0x98c   : > { %v6767_v63 = vpop.permute.xlu1 %6766  ;;  %v6763_v31 = vpop.permute.xlu0 %6762 }
 0x98d   : > { %6906 = vst.msk [vmem:[%s11224_s28 + $0x98] sm:$0xff] %vm11525_vm14, %v6874_v0  ;;  %v6844_v20 = vmul.f32 %v6767_v63, %v10523_v14  ;;  %v6843_v19 = vmul.f32 %v6763_v31, %v10503_v37  ;;  %v11560_v63 = vld [vmem:[#allocation39_spill] sm:$0xff]  ;;  %vm11564_vm14 = vmmov %vm11523_vm0 }
 0x98e   : > { %6905 = vst.msk [vmem:[%s11224_s28 + $0x90] sm:$0xff] %vm11526_vm15, %v6873_v1  ;;  %vm11565_vm15 = vmmov %vm11523_vm0 }
 0x98f   : > { %v6876_v12 = vadd.f32 %v6844_v20, %v8298_v28  ;;  %v6875_v41 = vadd.f32 %v6843_v19, %v8239_v34  ;;  %v11531_v34 = vld [vmem:[#allocation45_spill] sm:$0xff]  ;;  %v11561_v20 = vld [vmem:[#allocation36_spill] sm:$0xff] }
 0x990   : > { %v6778_v49 = vpop.permute.xlu1 %6777  ;;  %v6774_v25 = vpop.permute.xlu0 %6773 }
 0x991   : > { %6908 = vst.msk [vmem:[%s11224_s28 + $0xa8] sm:$0xff] %vm11527_vm1, %v6876_v12  ;;  %v6846_v5 = vmul.f32 %v6778_v49, %v10547_v30  ;;  %v6845_v26 = vmul.f32 %v6774_v25, %v10527_v6  ;;  %v11562_v12 = vld [vmem:[#allocation15_spill] sm:$0xff]  ;;  %v11563_v49 = vld [vmem:[#allocation12_spill] sm:$0xff]  ;;  %vm11570_vm1 = vmmov %vm11523_vm0 }
 0x992   : > { %6907 = vst.msk [vmem:[%s11224_s28 + $0xa0] sm:$0xff] %vm11528_vm2, %v6875_v41  ;;  %vm11571_vm2 = vmmov %vm11523_vm0 }
 0x993   : > { %v6878_v14 = vadd.f32 %v6846_v5, %v8384_v50  ;;  %v6877_v37 = vadd.f32 %v6845_v26, %v8301_v35  ;;  %v11537_v35 = vld [vmem:[#allocation49_spill] sm:$0xff] }
 0x994   : > { %v6789_v61 = vpop.permute.xlu1 %6788  ;;  %v6785_v28 = vpop.permute.xlu0 %6784 }
 0x995   : > { %6910 = vst.msk [vmem:[%s11224_s28 + $0xb8] sm:$0xff] %vm11529_vm3, %v6878_v14  ;;  %v6848_v62 = vmul.f32 %v6789_v61, %v11531_v34  ;;  %v6847_v10 = vmul.f32 %v6785_v28, %v11532_v53  ;;  %v11566_v14 = vld [vmem:[#allocation41_spill] sm:$0xff]  ;;  %v11567_v61 = vld [vmem:[#allocation38_spill] sm:$0xff]  ;;  %vm11576_vm3 = vmmov %vm11523_vm0 }
 0x996   : > { %6909 = vst.msk [vmem:[%s11224_s28 + $0xb0] sm:$0xff] %vm11530_vm4, %v6877_v37  ;;  %v11568_v34 = vld [vmem:[#allocation17_spill] sm:$0xff]  ;;  %v11569_v53 = vld [vmem:[#allocation14_spill] sm:$0xff]  ;;  %vm11577_vm4 = vmmov %vm11523_vm0 }
 0x997   : > { %v6880_v30 = vadd.f32 %v6848_v62, %v11533_v32  ;;  %v6879_v6 = vadd.f32 %v6847_v10, %v11534_v40  ;;  %v11572_v40 = vld [vmem:[#allocation44_spill] sm:$0xff] }
 0x998   : > { %v6800_v11 = vpop.permute.xlu1 %6799  ;;  %v6796_v50 = vpop.permute.xlu0 %6795 }
 0x999   : > { %6912 = vst.msk [vmem:[%s11224_s28 + $0xc8] sm:$0xff] %vm11535_vm5, %v6880_v30  ;;  %v6850_v3 = vmul.f32 %v6800_v11, %v11537_v35  ;;  %v6849_v2 = vmul.f32 %v6796_v50, %v11538_v8  ;;  %v11573_v11 = vld [vmem:[#allocation40_spill] sm:$0xff]  ;;  %v11574_v35 = vld [vmem:[#allocation19_spill] sm:$0xff]  ;;  %vm11582_vm5 = vmmov %vm11523_vm0 }
 0x99a   : > { %6911 = vst.msk [vmem:[%s11224_s28 + $0xc0] sm:$0xff] %vm11536_vm6, %v6879_v6  ;;  %v11575_v8 = vld [vmem:[#allocation16_spill] sm:$0xff]  ;;  %vm11583_vm6 = vmmov %vm11523_vm0 }
 0x99b   : > { %v6882_v21 = vadd.f32 %v6850_v3, %v11539_v36  ;;  %v6881_v22 = vadd.f32 %v6849_v2, %v11540_v38  ;;  %v11578_v38 = vld [vmem:[#allocation48_spill] sm:$0xff] }
 0x99c   : > { %v6811_v54 = vpop.permute.xlu1 %6810  ;;  %v6807_v43 = vpop.permute.xlu0 %6806 }
 0x99d   : > { %6914 = vst.msk [vmem:[%s11224_s28 + $0xd8] sm:$0xff] %vm11541_vm7, %v6882_v21  ;;  %v6852_v27 = vmul.f32 %v6811_v54, %v11543_v57  ;;  %v6851_v24 = vmul.f32 %v6807_v43, %v11544_v18  ;;  %v11579_v54 = vld [vmem:[#allocation43_spill] sm:$0xff]  ;;  %v11580_v57 = vld [vmem:[#allocation21_spill] sm:$0xff]  ;;  %v11581_v18 = vld [vmem:[#allocation18_spill] sm:$0xff] }
 0x99e   : > { %6913 = vst.msk [vmem:[%s11224_s28 + $0xd0] sm:$0xff] %vm11542_vm8, %v6881_v22  ;;  %vm11588_vm7 = vmmov %vm11523_vm0 }
 0x99f   : > { %v6884_v44 = vadd.f32 %v6852_v27, %v11545_v47  ;;  %v6883_v52 = vadd.f32 %v6851_v24, %v11546_v58  ;;  %v11584_v58 = vld [vmem:[#allocation52_spill] sm:$0xff]  ;;  %vm11589_vm8 = vmmov %vm11523_vm0 }
 0x9a0   : > { %v6657_v23 = vpop.permute.xlu0 %6656  ;;  %v6653_v56 = vpop.permute.xlu1 %6652 }
 0x9a1   : > { %6916 = vst.msk [vmem:[%s11224_s28 + $0xe8] sm:$0xff] %vm11547_vm9, %v6884_v44  ;;  %v6824_v51 = vmul.f32 %v6657_v23, %v11549_v46  ;;  %v6823_v48 = vmul.f32 %v6653_v56, %v11550_v33  ;;  %v11585_v23 = vld [vmem:[#allocation47_spill] sm:$0xff]  ;;  %v11587_v33 = vld [vmem:[#allocation20_spill] sm:$0xff]  ;;  %vm11594_vm9 = vmmov %vm11523_vm0 }
 0x9a2   : > { %6915 = vst.msk [vmem:[%s11224_s28 + $0xe0] sm:$0xff] %vm11548_vm10, %v6883_v52  ;;  %v11586_v46 = vld [vmem:[#allocation23_spill] sm:$0xff]  ;;  %vm11595_vm10 = vmmov %vm11523_vm0 }
 0x9a3   : > { %v6856_v29 = vadd.f32 %v6824_v51, %v11551_v9  ;;  %v6855_v45 = vadd.f32 %v6823_v48, %v11552_v7  ;;  %v11590_v7 = vld [vmem:[#allocation54_spill] sm:$0xff] }
 0x9a4   : > { %v6675_v4 = vpop.permute.xlu0 %6674  ;;  %v6664_v13 = vpop.permute.xlu1 %6663 }
 0x9a5   : > { %6888 = vst.msk [vmem:[%s11224_s28 + $0x8] sm:$0xff] %vm11553_vm11, %v6856_v29  ;;  %v6827_v55 = vmul.f32 %v6675_v4, %v11555_v39  ;;  %v6825_v16 = vmul.f32 %v6664_v13, %v11556_v15  ;;  %v11591_v4 = vld [vmem:[#allocation51_spill] sm:$0xff]  ;;  %v11593_v15 = vld [vmem:[#allocation22_spill] sm:$0xff]  ;;  %vm11598_vm11 = vmmov %vm11523_vm0 }
 0x9a6   : > { %6887 = vst.msk [vmem:[%s11224_s28] sm:$0xff] %vm11554_vm13, %v6855_v45  ;;  %v11592_v39 = vld [vmem:[#allocation31_spill] sm:$0xff]  ;;  %vm11601_vm13 = vmmov %vm11523_vm0 }
 0x9a7   : > { %v6859_v60 = vadd.f32 %v6827_v55, %v11557_v59  ;;  %v6857_v42 = vadd.f32 %v6825_v16, %v11558_v17 }
 0x9a8   : > { %v6686_v0 = vpop.permute.xlu0 %6685  ;;  %v6668_v1 = vpop.permute.xlu1 %6667 }
 0x9a9   : > { %6891 = vst.msk [vmem:[%s11224_s28 + $0x20] sm:$0xff] %vm11523_vm0, %v6859_v60  ;;  %v6829_v31 = vmul.f32 %v6686_v0, %v11560_v63  ;;  %v6826_v19 = vmul.f32 %v6668_v1, %v11561_v20  ;;  %v11596_v60 = vld [vmem:[#allocation55_spill] sm:$0xff]  ;;  %v11599_v63 = vld [vmem:[#allocation56_spill] sm:$0xff] }
 0x9aa   : > { %6889 = vst.msk [vmem:[%s11224_s28 + $0x10] sm:$0xff] %vm11559_vm12, %v6857_v42  ;;  %v11597_v42 = vld [vmem:[#allocation24_spill] sm:$0xff] }
 0x9ab   : > { %v6861_v41 = vadd.f32 %v6829_v31, %v11562_v12  ;;  %v6858_v25 = vadd.f32 %v6826_v19, %v11563_v49  ;;  %v11600_v20 = vld [vmem:[#allocation32_spill] sm:$0xff] }
 0x9ac   : > { %v6697_v5 = vpop.permute.xlu0 %6696  ;;  %v6679_v26 = vpop.permute.xlu1 %6678 }
 0x9ad   : > { %6893 = vst.msk [vmem:[%s11224_s28 + $0x30] sm:$0xff] %vm11564_vm14, %v6861_v41  ;;  %v6831_v37 = vmul.f32 %v6697_v5, %v11566_v14  ;;  %v6828_v28 = vmul.f32 %v6679_v26, %v11567_v61 }
 0x9ae   : > { %6890 = vst.msk [vmem:[%s11224_s28 + $0x18] sm:$0xff] %vm11565_vm15, %v6858_v25 }
 0x9af   : > { %v6863_v62 = vadd.f32 %v6831_v37, %v11568_v34  ;;  %v6860_v10 = vadd.f32 %v6828_v28, %v11569_v53 }
 0x9b0   : > { %v6708_v32 = vpop.permute.xlu0 %6707  ;;  %v6690_v30 = vpop.permute.xlu1 %6689 }
 0x9b1   : > { %6895 = vst.msk [vmem:[%s11224_s28 + $0x40] sm:$0xff] %vm11570_vm1, %v6863_v62  ;;  %v6833_v6 = vmul.f32 %v6708_v32, %v11572_v40  ;;  %v6830_v50 = vmul.f32 %v6690_v30, %v11573_v11 }
 0x9b2   : > { %6892 = vst.msk [vmem:[%s11224_s28 + $0x28] sm:$0xff] %vm11571_vm2, %v6860_v10 }
 0x9b3   : > { %v6865_v3 = vadd.f32 %v6833_v6, %v11574_v35  ;;  %v6862_v2 = vadd.f32 %v6830_v50, %v11575_v8 }
 0x9b4   : > { %v6719_v36 = vpop.permute.xlu0 %6718  ;;  %v6701_v21 = vpop.permute.xlu1 %6700 }
 0x9b5   : > { %6897 = vst.msk [vmem:[%s11224_s28 + $0x50] sm:$0xff] %vm11576_vm3, %v6865_v3  ;;  %v6835_v22 = vmul.f32 %v6719_v36, %v11578_v38  ;;  %v6832_v43 = vmul.f32 %v6701_v21, %v11579_v54 }
 0x9b6   : > { %6894 = vst.msk [vmem:[%s11224_s28 + $0x38] sm:$0xff] %vm11577_vm4, %v6862_v2 }
 0x9b7   : > { %v6867_v27 = vadd.f32 %v6835_v22, %v11580_v57  ;;  %v6864_v24 = vadd.f32 %v6832_v43, %v11581_v18 }
 0x9b8   : > { %v6730_v47 = vpop.permute.xlu0 %6729  ;;  %v6712_v44 = vpop.permute.xlu1 %6711 }
 0x9b9   : > { %6899 = vst.msk [vmem:[%s11224_s28 + $0x60] sm:$0xff] %vm11582_vm5, %v6867_v27  ;;  %v6837_v52 = vmul.f32 %v6730_v47, %v11584_v58  ;;  %v6834_v56 = vmul.f32 %v6712_v44, %v11585_v23 }
 0x9ba   : > { %6896 = vst.msk [vmem:[%s11224_s28 + $0x48] sm:$0xff] %vm11583_vm6, %v6864_v24 }
 0x9bb   : > { %v6869_v51 = vadd.f32 %v6837_v52, %v11586_v46  ;;  %v6866_v48 = vadd.f32 %v6834_v56, %v11587_v33 }
 0x9bc   : > { %v6818_v9 = vpop.permute.xlu0 %6817  ;;  %v6723_v29 = vpop.permute.xlu1 %6722 }
 0x9bd   : > { %6901 = vst.msk [vmem:[%s11224_s28 + $0x70] sm:$0xff] %vm11588_vm7, %v6869_v51  ;;  %v6853_v45 = vmul.f32 %v6818_v9, %v11590_v7  ;;  %v6836_v13 = vmul.f32 %v6723_v29, %v11591_v4 }
 0x9be   : > { %6898 = vst.msk [vmem:[%s11224_s28 + $0x58] sm:$0xff] %vm11589_vm8, %v6866_v48 }
 0x9bf   : > { %v6885_v55 = vadd.f32 %v6853_v45, %v11592_v39  ;;  %v6868_v16 = vadd.f32 %v6836_v13, %v11593_v15 }
 0x9c0   : > { %v6734_v59 = vpop.permute.xlu1 %6733 }
 0x9c1   : > { %6917 = vst.msk [vmem:[%s11224_s28 + $0xf0] sm:$0xff] %vm11594_vm9, %v6885_v55  ;;  %v6838_v17 = vmul.f32 %v6734_v59, %v11596_v60 }
 0x9c2   : > { %6900 = vst.msk [vmem:[%s11224_s28 + $0x68] sm:$0xff] %vm11595_vm10, %v6868_v16 }
 0x9c3   : > { %v6870_v0 = vadd.f32 %v6838_v17, %v11597_v42 }
 0x9c4   : > { %v6822_v1 = vpop.permute.xlu1 %6821 }
 0x9c5   : > { %6902 = vst.msk [vmem:[%s11224_s28 + $0x78] sm:$0xff] %vm11598_vm11, %v6870_v0  ;;  %v6854_v31 = vmul.f32 %v6822_v1, %v11599_v63 }
 0x9c7   : > { %v6886_v19 = vadd.f32 %v6854_v31, %v11600_v20 }
 0x9c9   : > { %6918 = vst.msk [vmem:[%s11224_s28 + $0xf8] sm:$0xff] %vm11601_vm13, %v6886_v19 }
 0x9ca   : > { %7610 = shalt.err (!%p7607_p3)
}
 0x9cb   : > { %s7611_s26 = scalar_lea.hbm %s11352_s14, 4096  ;;  %s7615_s29 = scalar_lea.hbm %s11412_s10, 8192 }
 0x9cc   : > { %p7612_p4 = scmp.ne.s32.totalorder %s11352_s14, %s7611_s26  ;;  %p7616_p9 = scmp.lt.u32.totalorder %s11352_s14, %s11412_s10 }
 0x9cd   : > { %p7617_p10 = scmp.lt.u32.totalorder %s7615_s29, %s7611_s26  ;;  %p7619_p12 = scmp.lt.u32.totalorder %s7611_s26, %s11352_s14 }
 0x9ce   : > { %p7613_p7 = pnand %p7612_p4, %p7770_p5 }
 0x9cf   : > { %p7618_p11 = por %p7617_p10, %p7616_p9 }
 0x9d0   : > { %p7614_p8 = pneg %p7613_p7 }
 0x9d1   : > { %p7620_p13 = por %p7619_p12, %p7618_p11 }
 0x9d3   : > { %p7621_p0 = pnand %p7620_p13, %p7614_p8 }
 0x9d5   : > { %7624 = shalt.err (!%p7621_p0)
}
 0x9d6   : > { %s7672_s27 = smov 128   ;;  %s7673_s11 = smov 8  }
 0x9d7   : > { %7532 = dma.vmem_to_hbm [thread:$0]  (%p7770_p5), %s11354_s30, 4096, %s11352_s14, %s11361_s6, %s7672_s27, %s7672_s27, %s7673_s11  }
 0x9d8 PF: > { %p7538_p1 = scmp.ge.s32.totalorder %s7659_s18, 2  ;;  %s6948_s21 = sand.u32 1, %s7647_s15  }
 0x9d9   : > { %s6949_s22 = scalar_lea.sflag [#allocation7], %s6948_s21 }
 0x9da   : > { %p7535_p2 = pnand %p7538_p1, %p7774_p6 }
 0x9dc   : > { %7642 = dma.done.wait (!%p7535_p2), %s6949_s22, 4096  }
 0x9dd   : > { %7644 = vsyncadd (!%p7535_p2), %s6949_s22, 4294963200  ;;  %p22_p3 = scmp.ge.s32.totalorder %s7757_s20, 4   ;;  %s11602_s15 = smov %s7651_s16 }
 0x9de   : > { %s11603_s16 = smov %s7655_s17  ;;  %s11604_s17 = smov %s7768_s23 }
 0x9df   : > { %s11605_s18 = smov %s7757_s20  ;;  %24 = sbr.rel (!%p22_p3) target bundleno = 6 (0x6), region = 113 }
 0x9e6   :  { %6954 = vsyncpa [#allocation7], 1 }
 0x9e7   :  { %6956 = vsyncpa [#allocation7 + $0x1], 1 }

</bundles_post_ra>
